<compile_context>
chip_gen: v5e
topology: v5e:2x2
jax: 0.10.0
libtpu: 0.0.40
codegen_flags: <defaults>
</compile_context>

<pallas_src>
import numpy as np
import jax
import jax.numpy as jnp
from jax.experimental import pallas as pl
from jax.experimental.pallas import tpu as pltpu

HID_CHANNELS = 32
KERNEL_SIZE = 4
HIDDEN_DIM = 256


def _batch_tile(batch):
    """Largest tile in {8,4,2,1} that divides the batch with a grid of >= 2
    steps (so v7x's two TensorCores both get work); otherwise the full batch."""
    for bt in (8, 4, 2, 1):
        if batch % bt == 0 and batch // bt >= 2:
            return bt
    return batch


# ---------------------------------------------------------------------------
# Fused decoder kernel: MLP (3x linear+relu) -> N x ConvT(k4,s2,p1) layers.
# Every conv layer is one 9-tap im2col matmul; activations never leave VMEM.
# ---------------------------------------------------------------------------
def _make_decoder_kernel(bt, base, couts, n_chan):
    n_convs = len(couts)

    def kernel(*refs):
        wz_ref = refs[0]
        w1_ref, b1_ref, w2_ref, b2_ref, w3_ref, b3_ref = refs[1:7]
        conv_refs = refs[7:-1]
        o_ref = refs[-1]

        i = pl.program_id(0)

        # ---------------- fused MLP: lin1 -> relu -> lin2 -> relu -> lin3 ----
        h = wz_ref[pl.ds(i * bt, bt), :]                       # (bt, latent)
        for w_ref, b_ref in ((w1_ref, b1_ref), (w2_ref, b2_ref), (w3_ref, b3_ref)):
            h = jnp.dot(h.astype(jnp.bfloat16), w_ref[...],
                        preferred_element_type=jnp.float32) + b_ref[...]
            h = jnp.maximum(h, 0.0)
        h = h.astype(jnp.bfloat16)                             # (bt, 512) NHWC-ordered

        # ------------- (bt, 512) -> (bt, 4, 4, 32) via cheap lane slices -----
        C = HID_CHANNELS
        rows = []
        for r in range(base):
            cols = [h[:, (r * base + c) * C:(r * base + c + 1) * C]
                    for c in range(base)]
            rows.append(jnp.stack(cols, axis=1))               # (bt, base, C)
        x = jnp.stack(rows, axis=1)                            # (bt, base, base, C)

        # ---------------- transposed-conv stack, fully VMEM-resident ---------
        H = W = base
        for li in range(n_convs):
            w_ref = conv_refs[2 * li]
            b_ref = conv_refs[2 * li + 1]
            cout = couts[li]
            is_last = li == n_convs - 1

            # zero halo of 1 (in-kernel; no wrapper pad / HBM round trip)
            zr = jnp.zeros((bt, 1, W, C), x.dtype)
            xt = jnp.concatenate([zr, x, zr], axis=1)          # (bt, H+2, W,   C)
            zc = jnp.zeros((bt, H + 2, 1, C), x.dtype)
            xp = jnp.concatenate([zc, xt, zc], axis=2)         # (bt, H+2, W+2, C)

            # 9-tap im2col: ONE (N, 9C) @ (9C, 4*cout) matmul per layer.
            N = bt * H * W
            taps = [xp[:, ty:ty + H, tx:tx + W, :].reshape(N, C)
                    for ty in range(3) for tx in range(3)]
            col = jnp.concatenate(taps, axis=-1)               # (N, 288)
            acc = jnp.dot(col, w_ref[...],
                          preferred_element_type=jnp.float32) + b_ref[...]

            if is_last:
                # phase-packed final slab; tiny shuffle finished in the wrapper
                o_ref[...] = jax.nn.sigmoid(acc).reshape(bt, H, W, 4 * cout)
            else:
                act = jnp.maximum(acc, 0.0).astype(jnp.bfloat16)   # (N, 4*cout)
                # in-VMEM pixel shuffle of the 4 phases back to NHWC
                ph_blk = [act[:, p * cout:(p + 1) * cout].reshape(bt, H, W, cout)
                          for p in range(4)]
                rws = []
                for ph in range(2):
                    pair = jnp.stack([ph_blk[2 * ph], ph_blk[2 * ph + 1]], axis=3)
                    rws.append(pair.reshape(bt, H, 2 * W, cout))   # (bt,H,2W,cout)
                y = jnp.stack(rws, axis=2)                         # (bt,H,2,2W,cout)
                x = y.reshape(bt, 2 * H, 2 * W, cout)
                H, W, C = 2 * H, 2 * W, cout

    return kernel


# ---------------------------------------------------------------------------
# Weight preparation (done once, outside the kernel)
# ---------------------------------------------------------------------------
def pack_convt_weight9(w_pt, b_pt):
    """(Cin, Cout, 4, 4) ConvTranspose2d weight -> ((9*Cin, 4*Cout) bf16, (1,4*Cout) f32).

    Tap t = ty*3+tx multiplies padded-input pixel (r+ty, c+tx); output column
    block p = 2*ph+pw holds output pixel (2r+ph, 2c+pw).  Unused (tap, phase)
    blocks are zero, so each layer is a single dense matmul.
    """
    w = np.asarray(w_pt, np.float32)
    cin, cout = w.shape[0], w.shape[1]
    w9 = np.zeros((9 * cin, 4 * cout), np.float32)
    for ph in range(2):
        for pw in range(2):
            p = 2 * ph + pw
            for dh in range(2):
                for dw in range(2):
                    t = (ph + dh) * 3 + (pw + dw)
                    w9[t * cin:(t + 1) * cin, p * cout:(p + 1) * cout] = \
                        w[:, :, 3 - ph - 2 * dh, 3 - pw - 2 * dw]
    b9 = np.tile(np.asarray(b_pt, np.float32), 4).reshape(1, 4 * cout)
    return jnp.asarray(w9, jnp.bfloat16), jnp.asarray(b9, jnp.float32)


def _nchw_to_nhwc_col_perm(c, h, w):
    """Column permutation so lin3's output is already NHWC-flattened."""
    j = np.arange(c * h * w)
    ch, rs = j % c, j // c
    r, s = rs // w, rs % w
    return ch * (h * w) + r * w + s


def init_params(key, img_size=(1, 32, 32), latent_dim_z=10, num_prop=2):
    latent_dim = latent_dim_z + num_prop
    n_chan = img_size[0]
    reshape_dim = HID_CHANNELS * KERNEL_SIZE * KERNEL_SIZE      # 512
    keys = jax.random.split(key, 14)

    def lin(kw_, kb_, din, dout):
        return (jax.random.normal(kw_, (din, dout), jnp.float32) * 0.1,
                jax.random.normal(kb_, (dout,), jnp.float32) * 0.01)

    def convt(kw_, kb_, cin, cout):
        return (jax.random.normal(kw_, (cin, cout, KERNEL_SIZE, KERNEL_SIZE),
                                  jnp.float32) * 0.1,
                jax.random.normal(kb_, (cout,), jnp.float32) * 0.01)

    params = {
        "lin1": lin(keys[0], keys[1], latent_dim, HIDDEN_DIM),
        "lin2": lin(keys[2], keys[3], HIDDEN_DIM, HIDDEN_DIM),
        "lin3": lin(keys[4], keys[5], HIDDEN_DIM, reshape_dim),
        "convT1": convt(keys[8], keys[9], HID_CHANNELS, HID_CHANNELS),
        "convT2": convt(keys[10], keys[11], HID_CHANNELS, HID_CHANNELS),
        "convT3": convt(keys[12], keys[13], HID_CHANNELS, n_chan),
    }
    if img_size[1] == img_size[2] == 64:
        params["convT_64"] = convt(keys[6], keys[7], HID_CHANNELS, HID_CHANNELS)
    return params


def prepare_params(params, img_size=(1, 32, 32)):
    (w1, b1), (w2, b2), (w3, b3) = params["lin1"], params["lin2"], params["lin3"]
    perm = _nchw_to_nhwc_col_perm(HID_CHANNELS, KERNEL_SIZE, KERNEL_SIZE)
    mlp = (jnp.asarray(w1, jnp.bfloat16),
           jnp.asarray(b1, jnp.float32).reshape(1, -1),
           jnp.asarray(w2, jnp.bfloat16),
           jnp.asarray(b2, jnp.float32).reshape(1, -1),
           jnp.asarray(np.asarray(w3)[:, perm], jnp.bfloat16),
           jnp.asarray(np.asarray(b3)[perm], jnp.float32).reshape(1, -1))

    names = (["convT_64"] if img_size[1] == img_size[2] == 64 else [])
    names += ["convT1", "convT2", "convT3"]
    convs, couts = [], []
    for name in names:
        wc, bc = params[name]
        convs.append(pack_convt_weight9(wc, bc))
        couts.append(int(wc.shape[1]))

    hl = KERNEL_SIZE * (2 ** (len(names) - 1))   # spatial size entering last conv
    return {"mlp": mlp, "convs": convs,
            "cfg": {"base": KERNEL_SIZE, "couts": tuple(couts),
                    "n_chan": img_size[0], "hl": hl, "wl": hl}}


# ---------------------------------------------------------------------------
# Full forward pass (matches DecoderSemivae.forward semantics)
# ---------------------------------------------------------------------------
def decoder_semivae_forward(prepared, z, w):
    B = z.shape[0]
    wz = jnp.concatenate([w, z], axis=-1)          # torch.cat([w, z], -1)
    prop = w   # cat of w[:, idx].view(-1, 1) over idx  ==  w itself

    cfg = prepared["cfg"]
    base, couts, n_chan = cfg["base"], cfg["couts"], cfg["n_chan"]
    hl, wl = cfg["hl"], cfg["wl"]
    bt = _batch_tile(B)
    grid = (B // bt,)

    args = [wz] + list(prepared["mlp"])
    for wc, bc in prepared["convs"]:
        args += [wc, bc]

    in_specs = [pl.BlockSpec(a.shape, lambda i, nd=a.ndim: (0,) * nd) for a in args]
    out_shape = jax.ShapeDtypeStruct((B, hl, wl, 4 * n_chan), jnp.float32)
    out_spec = pl.BlockSpec((bt, hl, wl, 4 * n_chan), lambda i: (i, 0, 0, 0))

    out = pl.pallas_call(
        _make_decoder_kernel(bt, base, couts, n_chan),
        grid=grid,
        out_shape=out_shape,
        in_specs=in_specs,
        out_specs=out_spec,
        compiler_params=pltpu.CompilerParams(dimension_semantics=("parallel",)),
    )(*args)

    # Tiny wrapper-side pixel shuffle of the phase-packed final layer only,
    # then NHWC -> NCHW.  (~4 KiB per sample of layout glue.)
    y = out.reshape(B, hl, wl, 2, 2, n_chan)
    y = jnp.transpose(y, (0, 1, 3, 2, 4, 5)).reshape(B, 2 * hl, 2 * wl, n_chan)
    x = jnp.transpose(y, (0, 3, 1, 2))
    return x, prop


if __name__ == "__main__":
    img_size = (1, 32, 32)
    latent_dim_z, num_prop, batch = 10, 2, 2

    key = jax.random.PRNGKey(0)
    kp, kz, kw = jax.random.split(key, 3)
    raw_params = init_params(kp, img_size, latent_dim_z, num_prop)
    prepared = prepare_params(raw_params, img_size)

    z = jax.random.normal(kz, (batch, latent_dim_z), jnp.float32)
    w = jax.random.normal(kw, (batch, num_prop), jnp.float32)

    fwd = jax.jit(lambda zz, ww: decoder_semivae_forward(prepared, zz, ww))
    x, prop = fwd(z, w)
    jax.block_until_ready((x, prop))

    assert x.shape == (batch, img_size[0], img_size[1], img_size[2]), x.shape
    assert prop.shape == (batch, num_prop), prop.shape
    assert bool(jnp.all((x >= 0.0) & (x <= 1.0)))          # sigmoid output range
    print("KERNEL_OK")
</pallas_src>

<mosaic_0001>
module attributes {stable_mosaic.version = 11 : i64} {
  func.func @kernel(%arg0: i32, %arg1: memref<2x12xf32, #tpu.memory_space<vmem>>, %arg2: memref<12x256xbf16, #tpu.memory_space<vmem>>, %arg3: memref<1x256xf32, #tpu.memory_space<vmem>>, %arg4: memref<256x256xbf16, #tpu.memory_space<vmem>>, %arg5: memref<1x256xf32, #tpu.memory_space<vmem>>, %arg6: memref<256x512xbf16, #tpu.memory_space<vmem>>, %arg7: memref<1x512xf32, #tpu.memory_space<vmem>>, %arg8: memref<288x128xbf16, #tpu.memory_space<vmem>>, %arg9: memref<1x128xf32, #tpu.memory_space<vmem>>, %arg10: memref<288x128xbf16, #tpu.memory_space<vmem>>, %arg11: memref<1x128xf32, #tpu.memory_space<vmem>>, %arg12: memref<288x4xbf16, #tpu.memory_space<vmem>>, %arg13: memref<1x4xf32, #tpu.memory_space<vmem>>, %arg14: memref<1x16x16x4xf32, #tpu.memory_space<vmem>>) attributes {dimension_semantics = [#tpu.dimension_semantics<parallel>], iteration_bounds = array<i64: 2>, scalar_prefetch = 0 : i64, scratch_operands = 0 : i64, tpu.core_type = #tpu.core_type<tc>, window_params = [{pipeline_mode = #tpu.pipeline_mode<synchronous>, transform_indices = @transform_0, window_bounds = array<i64: 2, 12>}, {pipeline_mode = #tpu.pipeline_mode<synchronous>, transform_indices = @transform_1, window_bounds = array<i64: 12, 256>}, {pipeline_mode = #tpu.pipeline_mode<synchronous>, transform_indices = @transform_2, window_bounds = array<i64: 1, 256>}, {pipeline_mode = #tpu.pipeline_mode<synchronous>, transform_indices = @transform_3, window_bounds = array<i64: 256, 256>}, {pipeline_mode = #tpu.pipeline_mode<synchronous>, transform_indices = @transform_4, window_bounds = array<i64: 1, 256>}, {pipeline_mode = #tpu.pipeline_mode<synchronous>, transform_indices = @transform_5, window_bounds = array<i64: 256, 512>}, {pipeline_mode = #tpu.pipeline_mode<synchronous>, transform_indices = @transform_6, window_bounds = array<i64: 1, 512>}, {pipeline_mode = #tpu.pipeline_mode<synchronous>, transform_indices = @transform_7, window_bounds = array<i64: 288, 128>}, {pipeline_mode = #tpu.pipeline_mode<synchronous>, transform_indices = @transform_8, window_bounds = array<i64: 1, 128>}, {pipeline_mode = #tpu.pipeline_mode<synchronous>, transform_indices = @transform_9, window_bounds = array<i64: 288, 128>}, {pipeline_mode = #tpu.pipeline_mode<synchronous>, transform_indices = @transform_10, window_bounds = array<i64: 1, 128>}, {pipeline_mode = #tpu.pipeline_mode<synchronous>, transform_indices = @transform_11, window_bounds = array<i64: 288, 4>}, {pipeline_mode = #tpu.pipeline_mode<synchronous>, transform_indices = @transform_12, window_bounds = array<i64: 1, 4>}, {transform_indices = @transform_13, window_bounds = array<i64: 1, 16, 16, 4>}]} {
    %c1_i32 = arith.constant 1 : i32
    %0 = arith.muli %arg0, %c1_i32 : i32
    %1 = arith.index_cast %0 : i32 to index
    %c0 = arith.constant 0 : index
    %2 = vector.load %arg1[%1, %c0] : memref<2x12xf32, #tpu.memory_space<vmem>>, vector<1x12xf32>
    %3 = arith.truncf %2 : vector<1x12xf32> to vector<1x12xbf16>
    %c0_0 = arith.constant 0 : index
    %c0_1 = arith.constant 0 : index
    %4 = vector.load %arg2[%c0_0, %c0_1] : memref<12x256xbf16, #tpu.memory_space<vmem>>, vector<12x256xbf16>
    %cst = arith.constant dense<0.000000e+00> : vector<1x256xf32>
    %5 = tpu.matmul %3, %4, %cst {dimension_numbers = #tpu.dot_dimension_numbers<[1], [0], [0], [1], [0, 0, 1, 1], [], []>} : vector<1x12xbf16>, vector<12x256xbf16>, vector<1x256xf32> -> vector<1x256xf32>
    %c0_2 = arith.constant 0 : index
    %c0_3 = arith.constant 0 : index
    %6 = vector.load %arg3[%c0_2, %c0_3] : memref<1x256xf32, #tpu.memory_space<vmem>>, vector<1x256xf32>
    %7 = arith.addf %5, %6 : vector<1x256xf32>
    %cst_4 = arith.constant 0.000000e+00 : f32
    %8 = vector.broadcast %cst_4 : f32 to vector<1x256xf32>
    %9 = arith.maximumf %7, %8 : vector<1x256xf32>
    %10 = arith.truncf %9 : vector<1x256xf32> to vector<1x256xbf16>
    %c0_5 = arith.constant 0 : index
    %c0_6 = arith.constant 0 : index
    %11 = vector.load %arg4[%c0_5, %c0_6] : memref<256x256xbf16, #tpu.memory_space<vmem>>, vector<256x256xbf16>
    %cst_7 = arith.constant dense<0.000000e+00> : vector<1x256xf32>
    %12 = tpu.matmul %10, %11, %cst_7 {dimension_numbers = #tpu.dot_dimension_numbers<[1], [0], [0], [1], [0, 0, 1, 1], [], []>} : vector<1x256xbf16>, vector<256x256xbf16>, vector<1x256xf32> -> vector<1x256xf32>
    %c0_8 = arith.constant 0 : index
    %c0_9 = arith.constant 0 : index
    %13 = vector.load %arg5[%c0_8, %c0_9] : memref<1x256xf32, #tpu.memory_space<vmem>>, vector<1x256xf32>
    %14 = arith.addf %12, %13 : vector<1x256xf32>
    %cst_10 = arith.constant 0.000000e+00 : f32
    %15 = vector.broadcast %cst_10 : f32 to vector<1x256xf32>
    %16 = arith.maximumf %14, %15 : vector<1x256xf32>
    %17 = arith.truncf %16 : vector<1x256xf32> to vector<1x256xbf16>
    %c0_11 = arith.constant 0 : index
    %c0_12 = arith.constant 0 : index
    %18 = vector.load %arg6[%c0_11, %c0_12] : memref<256x512xbf16, #tpu.memory_space<vmem>>, vector<256x512xbf16>
    %cst_13 = arith.constant dense<0.000000e+00> : vector<1x512xf32>
    %19 = tpu.matmul %17, %18, %cst_13 {dimension_numbers = #tpu.dot_dimension_numbers<[1], [0], [0], [1], [0, 0, 1, 1], [], []>} : vector<1x256xbf16>, vector<256x512xbf16>, vector<1x512xf32> -> vector<1x512xf32>
    %c0_14 = arith.constant 0 : index
    %c0_15 = arith.constant 0 : index
    %20 = vector.load %arg7[%c0_14, %c0_15] : memref<1x512xf32, #tpu.memory_space<vmem>>, vector<1x512xf32>
    %21 = arith.addf %19, %20 : vector<1x512xf32>
    %cst_16 = arith.constant 0.000000e+00 : f32
    %22 = vector.broadcast %cst_16 : f32 to vector<1x512xf32>
    %23 = arith.maximumf %21, %22 : vector<1x512xf32>
    %24 = arith.truncf %23 : vector<1x512xf32> to vector<1x512xbf16>
    %25 = vector.extract_strided_slice %24 {offsets = [0, 0], sizes = [1, 32], strides = [1, 1]} : vector<1x512xbf16> to vector<1x32xbf16>
    %26 = vector.extract_strided_slice %24 {offsets = [0, 32], sizes = [1, 32], strides = [1, 1]} : vector<1x512xbf16> to vector<1x32xbf16>
    %27 = vector.extract_strided_slice %24 {offsets = [0, 64], sizes = [1, 32], strides = [1, 1]} : vector<1x512xbf16> to vector<1x32xbf16>
    %28 = vector.extract_strided_slice %24 {offsets = [0, 96], sizes = [1, 32], strides = [1, 1]} : vector<1x512xbf16> to vector<1x32xbf16>
    %29 = vector.shape_cast %25 : vector<1x32xbf16> to vector<1x1x32xbf16>
    %30 = vector.shape_cast %26 : vector<1x32xbf16> to vector<1x1x32xbf16>
    %31 = vector.shape_cast %27 : vector<1x32xbf16> to vector<1x1x32xbf16>
    %32 = vector.shape_cast %28 : vector<1x32xbf16> to vector<1x1x32xbf16>
    %33 = tpu.concatenate %29, %30, %31, %32 in 1 : vector<1x1x32xbf16>, vector<1x1x32xbf16>, vector<1x1x32xbf16>, vector<1x1x32xbf16> -> vector<1x4x32xbf16>
    %34 = vector.extract_strided_slice %24 {offsets = [0, 128], sizes = [1, 32], strides = [1, 1]} : vector<1x512xbf16> to vector<1x32xbf16>
    %35 = vector.extract_strided_slice %24 {offsets = [0, 160], sizes = [1, 32], strides = [1, 1]} : vector<1x512xbf16> to vector<1x32xbf16>
    %36 = vector.extract_strided_slice %24 {offsets = [0, 192], sizes = [1, 32], strides = [1, 1]} : vector<1x512xbf16> to vector<1x32xbf16>
    %37 = vector.extract_strided_slice %24 {offsets = [0, 224], sizes = [1, 32], strides = [1, 1]} : vector<1x512xbf16> to vector<1x32xbf16>
    %38 = vector.shape_cast %34 : vector<1x32xbf16> to vector<1x1x32xbf16>
    %39 = vector.shape_cast %35 : vector<1x32xbf16> to vector<1x1x32xbf16>
    %40 = vector.shape_cast %36 : vector<1x32xbf16> to vector<1x1x32xbf16>
    %41 = vector.shape_cast %37 : vector<1x32xbf16> to vector<1x1x32xbf16>
    %42 = tpu.concatenate %38, %39, %40, %41 in 1 : vector<1x1x32xbf16>, vector<1x1x32xbf16>, vector<1x1x32xbf16>, vector<1x1x32xbf16> -> vector<1x4x32xbf16>
    %43 = vector.extract_strided_slice %24 {offsets = [0, 256], sizes = [1, 32], strides = [1, 1]} : vector<1x512xbf16> to vector<1x32xbf16>
    %44 = vector.extract_strided_slice %24 {offsets = [0, 288], sizes = [1, 32], strides = [1, 1]} : vector<1x512xbf16> to vector<1x32xbf16>
    %45 = vector.extract_strided_slice %24 {offsets = [0, 320], sizes = [1, 32], strides = [1, 1]} : vector<1x512xbf16> to vector<1x32xbf16>
    %46 = vector.extract_strided_slice %24 {offsets = [0, 352], sizes = [1, 32], strides = [1, 1]} : vector<1x512xbf16> to vector<1x32xbf16>
    %47 = vector.shape_cast %43 : vector<1x32xbf16> to vector<1x1x32xbf16>
    %48 = vector.shape_cast %44 : vector<1x32xbf16> to vector<1x1x32xbf16>
    %49 = vector.shape_cast %45 : vector<1x32xbf16> to vector<1x1x32xbf16>
    %50 = vector.shape_cast %46 : vector<1x32xbf16> to vector<1x1x32xbf16>
    %51 = tpu.concatenate %47, %48, %49, %50 in 1 : vector<1x1x32xbf16>, vector<1x1x32xbf16>, vector<1x1x32xbf16>, vector<1x1x32xbf16> -> vector<1x4x32xbf16>
    %52 = vector.extract_strided_slice %24 {offsets = [0, 384], sizes = [1, 32], strides = [1, 1]} : vector<1x512xbf16> to vector<1x32xbf16>
    %53 = vector.extract_strided_slice %24 {offsets = [0, 416], sizes = [1, 32], strides = [1, 1]} : vector<1x512xbf16> to vector<1x32xbf16>
    %54 = vector.extract_strided_slice %24 {offsets = [0, 448], sizes = [1, 32], strides = [1, 1]} : vector<1x512xbf16> to vector<1x32xbf16>
    %55 = vector.extract_strided_slice %24 {offsets = [0, 480], sizes = [1, 32], strides = [1, 1]} : vector<1x512xbf16> to vector<1x32xbf16>
    %56 = vector.shape_cast %52 : vector<1x32xbf16> to vector<1x1x32xbf16>
    %57 = vector.shape_cast %53 : vector<1x32xbf16> to vector<1x1x32xbf16>
    %58 = vector.shape_cast %54 : vector<1x32xbf16> to vector<1x1x32xbf16>
    %59 = vector.shape_cast %55 : vector<1x32xbf16> to vector<1x1x32xbf16>
    %60 = tpu.concatenate %56, %57, %58, %59 in 1 : vector<1x1x32xbf16>, vector<1x1x32xbf16>, vector<1x1x32xbf16>, vector<1x1x32xbf16> -> vector<1x4x32xbf16>
    %61 = vector.shape_cast %33 : vector<1x4x32xbf16> to vector<1x1x4x32xbf16>
    %62 = vector.shape_cast %42 : vector<1x4x32xbf16> to vector<1x1x4x32xbf16>
    %63 = vector.shape_cast %51 : vector<1x4x32xbf16> to vector<1x1x4x32xbf16>
    %64 = vector.shape_cast %60 : vector<1x4x32xbf16> to vector<1x1x4x32xbf16>
    %65 = tpu.concatenate %61, %62, %63, %64 in 1 : vector<1x1x4x32xbf16>, vector<1x1x4x32xbf16>, vector<1x1x4x32xbf16>, vector<1x1x4x32xbf16> -> vector<1x4x4x32xbf16>
    %cst_17 = arith.constant 0.000000e+00 : bf16
    %66 = vector.broadcast %cst_17 : bf16 to vector<1x1x4x32xbf16>
    %67 = tpu.concatenate %66, %65, %66 in 1 : vector<1x1x4x32xbf16>, vector<1x4x4x32xbf16>, vector<1x1x4x32xbf16> -> vector<1x6x4x32xbf16>
    %cst_18 = arith.constant 0.000000e+00 : bf16
    %68 = vector.broadcast %cst_18 : bf16 to vector<1x6x1x32xbf16>
    %69 = tpu.concatenate %68, %67, %68 in 2 : vector<1x6x1x32xbf16>, vector<1x6x4x32xbf16>, vector<1x6x1x32xbf16> -> vector<1x6x6x32xbf16>
    %70 = vector.extract_strided_slice %69 {offsets = [0, 0, 0, 0], sizes = [1, 4, 4, 32], strides = [1, 1, 1, 1]} : vector<1x6x6x32xbf16> to vector<1x4x4x32xbf16>
    %71 = vector.shape_cast %70 : vector<1x4x4x32xbf16> to vector<16x32xbf16>
    %72 = vector.extract_strided_slice %69 {offsets = [0, 0, 1, 0], sizes = [1, 4, 4, 32], strides = [1, 1, 1, 1]} : vector<1x6x6x32xbf16> to vector<1x4x4x32xbf16>
    %73 = vector.shape_cast %72 : vector<1x4x4x32xbf16> to vector<16x32xbf16>
    %74 = vector.extract_strided_slice %69 {offsets = [0, 0, 2, 0], sizes = [1, 4, 4, 32], strides = [1, 1, 1, 1]} : vector<1x6x6x32xbf16> to vector<1x4x4x32xbf16>
    %75 = vector.shape_cast %74 : vector<1x4x4x32xbf16> to vector<16x32xbf16>
    %76 = vector.extract_strided_slice %69 {offsets = [0, 1, 0, 0], sizes = [1, 4, 4, 32], strides = [1, 1, 1, 1]} : vector<1x6x6x32xbf16> to vector<1x4x4x32xbf16>
    %77 = vector.shape_cast %76 : vector<1x4x4x32xbf16> to vector<16x32xbf16>
    %78 = vector.extract_strided_slice %69 {offsets = [0, 1, 1, 0], sizes = [1, 4, 4, 32], strides = [1, 1, 1, 1]} : vector<1x6x6x32xbf16> to vector<1x4x4x32xbf16>
    %79 = vector.shape_cast %78 : vector<1x4x4x32xbf16> to vector<16x32xbf16>
    %80 = vector.extract_strided_slice %69 {offsets = [0, 1, 2, 0], sizes = [1, 4, 4, 32], strides = [1, 1, 1, 1]} : vector<1x6x6x32xbf16> to vector<1x4x4x32xbf16>
    %81 = vector.shape_cast %80 : vector<1x4x4x32xbf16> to vector<16x32xbf16>
    %82 = vector.extract_strided_slice %69 {offsets = [0, 2, 0, 0], sizes = [1, 4, 4, 32], strides = [1, 1, 1, 1]} : vector<1x6x6x32xbf16> to vector<1x4x4x32xbf16>
    %83 = vector.shape_cast %82 : vector<1x4x4x32xbf16> to vector<16x32xbf16>
    %84 = vector.extract_strided_slice %69 {offsets = [0, 2, 1, 0], sizes = [1, 4, 4, 32], strides = [1, 1, 1, 1]} : vector<1x6x6x32xbf16> to vector<1x4x4x32xbf16>
    %85 = vector.shape_cast %84 : vector<1x4x4x32xbf16> to vector<16x32xbf16>
    %86 = vector.extract_strided_slice %69 {offsets = [0, 2, 2, 0], sizes = [1, 4, 4, 32], strides = [1, 1, 1, 1]} : vector<1x6x6x32xbf16> to vector<1x4x4x32xbf16>
    %87 = vector.shape_cast %86 : vector<1x4x4x32xbf16> to vector<16x32xbf16>
    %88 = tpu.concatenate %71, %73, %75, %77, %79, %81, %83, %85, %87 in 1 : vector<16x32xbf16>, vector<16x32xbf16>, vector<16x32xbf16>, vector<16x32xbf16>, vector<16x32xbf16>, vector<16x32xbf16>, vector<16x32xbf16>, vector<16x32xbf16>, vector<16x32xbf16> -> vector<16x288xbf16>
    %c0_19 = arith.constant 0 : index
    %c0_20 = arith.constant 0 : index
    %89 = vector.load %arg8[%c0_19, %c0_20] : memref<288x128xbf16, #tpu.memory_space<vmem>>, vector<288x128xbf16>
    %cst_21 = arith.constant dense<0.000000e+00> : vector<16x128xf32>
    %90 = tpu.matmul %88, %89, %cst_21 {dimension_numbers = #tpu.dot_dimension_numbers<[1], [0], [0], [1], [0, 0, 1, 1], [], []>} : vector<16x288xbf16>, vector<288x128xbf16>, vector<16x128xf32> -> vector<16x128xf32>
    %c0_22 = arith.constant 0 : index
    %c0_23 = arith.constant 0 : index
    %91 = vector.load %arg9[%c0_22, %c0_23] : memref<1x128xf32, #tpu.memory_space<vmem>>, vector<1x128xf32>
    %92 = vector.broadcast %91 : vector<1x128xf32> to vector<16x128xf32>
    %93 = arith.addf %90, %92 : vector<16x128xf32>
    %cst_24 = arith.constant 0.000000e+00 : f32
    %94 = vector.broadcast %cst_24 : f32 to vector<16x128xf32>
    %95 = arith.maximumf %93, %94 : vector<16x128xf32>
    %96 = arith.truncf %95 : vector<16x128xf32> to vector<16x128xbf16>
    %97 = vector.extract_strided_slice %96 {offsets = [0, 0], sizes = [16, 32], strides = [1, 1]} : vector<16x128xbf16> to vector<16x32xbf16>
    %98 = vector.shape_cast %97 : vector<16x32xbf16> to vector<1x4x4x32xbf16>
    %99 = vector.extract_strided_slice %96 {offsets = [0, 32], sizes = [16, 32], strides = [1, 1]} : vector<16x128xbf16> to vector<16x32xbf16>
    %100 = vector.shape_cast %99 : vector<16x32xbf16> to vector<1x4x4x32xbf16>
    %101 = vector.extract_strided_slice %96 {offsets = [0, 64], sizes = [16, 32], strides = [1, 1]} : vector<16x128xbf16> to vector<16x32xbf16>
    %102 = vector.shape_cast %101 : vector<16x32xbf16> to vector<1x4x4x32xbf16>
    %103 = vector.extract_strided_slice %96 {offsets = [0, 96], sizes = [16, 32], strides = [1, 1]} : vector<16x128xbf16> to vector<16x32xbf16>
    %104 = vector.shape_cast %103 : vector<16x32xbf16> to vector<1x4x4x32xbf16>
    %105 = vector.shape_cast %98 : vector<1x4x4x32xbf16> to vector<1x4x4x1x32xbf16>
    %106 = vector.shape_cast %100 : vector<1x4x4x32xbf16> to vector<1x4x4x1x32xbf16>
    %107 = tpu.concatenate %105, %106 in 3 : vector<1x4x4x1x32xbf16>, vector<1x4x4x1x32xbf16> -> vector<1x4x4x2x32xbf16>
    %108 = vector.shape_cast %107 : vector<1x4x4x2x32xbf16> to vector<1x4x8x32xbf16>
    %109 = vector.shape_cast %102 : vector<1x4x4x32xbf16> to vector<1x4x4x1x32xbf16>
    %110 = vector.shape_cast %104 : vector<1x4x4x32xbf16> to vector<1x4x4x1x32xbf16>
    %111 = tpu.concatenate %109, %110 in 3 : vector<1x4x4x1x32xbf16>, vector<1x4x4x1x32xbf16> -> vector<1x4x4x2x32xbf16>
    %112 = vector.shape_cast %111 : vector<1x4x4x2x32xbf16> to vector<1x4x8x32xbf16>
    %113 = vector.shape_cast %108 : vector<1x4x8x32xbf16> to vector<1x4x1x8x32xbf16>
    %114 = vector.shape_cast %112 : vector<1x4x8x32xbf16> to vector<1x4x1x8x32xbf16>
    %115 = tpu.concatenate %113, %114 in 2 : vector<1x4x1x8x32xbf16>, vector<1x4x1x8x32xbf16> -> vector<1x4x2x8x32xbf16>
    %116 = vector.shape_cast %115 : vector<1x4x2x8x32xbf16> to vector<1x8x8x32xbf16>
    %cst_25 = arith.constant 0.000000e+00 : bf16
    %117 = vector.broadcast %cst_25 : bf16 to vector<1x1x8x32xbf16>
    %118 = tpu.concatenate %117, %116, %117 in 1 : vector<1x1x8x32xbf16>, vector<1x8x8x32xbf16>, vector<1x1x8x32xbf16> -> vector<1x10x8x32xbf16>
    %cst_26 = arith.constant 0.000000e+00 : bf16
    %119 = vector.broadcast %cst_26 : bf16 to vector<1x10x1x32xbf16>
    %120 = tpu.concatenate %119, %118, %119 in 2 : vector<1x10x1x32xbf16>, vector<1x10x8x32xbf16>, vector<1x10x1x32xbf16> -> vector<1x10x10x32xbf16>
    %121 = vector.extract_strided_slice %120 {offsets = [0, 0, 0, 0], sizes = [1, 8, 8, 32], strides = [1, 1, 1, 1]} : vector<1x10x10x32xbf16> to vector<1x8x8x32xbf16>
    %122 = vector.shape_cast %121 : vector<1x8x8x32xbf16> to vector<64x32xbf16>
    %123 = vector.extract_strided_slice %120 {offsets = [0, 0, 1, 0], sizes = [1, 8, 8, 32], strides = [1, 1, 1, 1]} : vector<1x10x10x32xbf16> to vector<1x8x8x32xbf16>
    %124 = vector.shape_cast %123 : vector<1x8x8x32xbf16> to vector<64x32xbf16>
    %125 = vector.extract_strided_slice %120 {offsets = [0, 0, 2, 0], sizes = [1, 8, 8, 32], strides = [1, 1, 1, 1]} : vector<1x10x10x32xbf16> to vector<1x8x8x32xbf16>
    %126 = vector.shape_cast %125 : vector<1x8x8x32xbf16> to vector<64x32xbf16>
    %127 = vector.extract_strided_slice %120 {offsets = [0, 1, 0, 0], sizes = [1, 8, 8, 32], strides = [1, 1, 1, 1]} : vector<1x10x10x32xbf16> to vector<1x8x8x32xbf16>
    %128 = vector.shape_cast %127 : vector<1x8x8x32xbf16> to vector<64x32xbf16>
    %129 = vector.extract_strided_slice %120 {offsets = [0, 1, 1, 0], sizes = [1, 8, 8, 32], strides = [1, 1, 1, 1]} : vector<1x10x10x32xbf16> to vector<1x8x8x32xbf16>
    %130 = vector.shape_cast %129 : vector<1x8x8x32xbf16> to vector<64x32xbf16>
    %131 = vector.extract_strided_slice %120 {offsets = [0, 1, 2, 0], sizes = [1, 8, 8, 32], strides = [1, 1, 1, 1]} : vector<1x10x10x32xbf16> to vector<1x8x8x32xbf16>
    %132 = vector.shape_cast %131 : vector<1x8x8x32xbf16> to vector<64x32xbf16>
    %133 = vector.extract_strided_slice %120 {offsets = [0, 2, 0, 0], sizes = [1, 8, 8, 32], strides = [1, 1, 1, 1]} : vector<1x10x10x32xbf16> to vector<1x8x8x32xbf16>
    %134 = vector.shape_cast %133 : vector<1x8x8x32xbf16> to vector<64x32xbf16>
    %135 = vector.extract_strided_slice %120 {offsets = [0, 2, 1, 0], sizes = [1, 8, 8, 32], strides = [1, 1, 1, 1]} : vector<1x10x10x32xbf16> to vector<1x8x8x32xbf16>
    %136 = vector.shape_cast %135 : vector<1x8x8x32xbf16> to vector<64x32xbf16>
    %137 = vector.extract_strided_slice %120 {offsets = [0, 2, 2, 0], sizes = [1, 8, 8, 32], strides = [1, 1, 1, 1]} : vector<1x10x10x32xbf16> to vector<1x8x8x32xbf16>
    %138 = vector.shape_cast %137 : vector<1x8x8x32xbf16> to vector<64x32xbf16>
    %139 = tpu.concatenate %122, %124, %126, %128, %130, %132, %134, %136, %138 in 1 : vector<64x32xbf16>, vector<64x32xbf16>, vector<64x32xbf16>, vector<64x32xbf16>, vector<64x32xbf16>, vector<64x32xbf16>, vector<64x32xbf16>, vector<64x32xbf16>, vector<64x32xbf16> -> vector<64x288xbf16>
    %c0_27 = arith.constant 0 : index
    %c0_28 = arith.constant 0 : index
    %140 = vector.load %arg10[%c0_27, %c0_28] : memref<288x128xbf16, #tpu.memory_space<vmem>>, vector<288x128xbf16>
    %cst_29 = arith.constant dense<0.000000e+00> : vector<64x128xf32>
    %141 = tpu.matmul %139, %140, %cst_29 {dimension_numbers = #tpu.dot_dimension_numbers<[1], [0], [0], [1], [0, 0, 1, 1], [], []>} : vector<64x288xbf16>, vector<288x128xbf16>, vector<64x128xf32> -> vector<64x128xf32>
    %c0_30 = arith.constant 0 : index
    %c0_31 = arith.constant 0 : index
    %142 = vector.load %arg11[%c0_30, %c0_31] : memref<1x128xf32, #tpu.memory_space<vmem>>, vector<1x128xf32>
    %143 = vector.broadcast %142 : vector<1x128xf32> to vector<64x128xf32>
    %144 = arith.addf %141, %143 : vector<64x128xf32>
    %cst_32 = arith.constant 0.000000e+00 : f32
    %145 = vector.broadcast %cst_32 : f32 to vector<64x128xf32>
    %146 = arith.maximumf %144, %145 : vector<64x128xf32>
    %147 = arith.truncf %146 : vector<64x128xf32> to vector<64x128xbf16>
    %148 = vector.extract_strided_slice %147 {offsets = [0, 0], sizes = [64, 32], strides = [1, 1]} : vector<64x128xbf16> to vector<64x32xbf16>
    %149 = vector.shape_cast %148 : vector<64x32xbf16> to vector<1x8x8x32xbf16>
    %150 = vector.extract_strided_slice %147 {offsets = [0, 32], sizes = [64, 32], strides = [1, 1]} : vector<64x128xbf16> to vector<64x32xbf16>
    %151 = vector.shape_cast %150 : vector<64x32xbf16> to vector<1x8x8x32xbf16>
    %152 = vector.extract_strided_slice %147 {offsets = [0, 64], sizes = [64, 32], strides = [1, 1]} : vector<64x128xbf16> to vector<64x32xbf16>
    %153 = vector.shape_cast %152 : vector<64x32xbf16> to vector<1x8x8x32xbf16>
    %154 = vector.extract_strided_slice %147 {offsets = [0, 96], sizes = [64, 32], strides = [1, 1]} : vector<64x128xbf16> to vector<64x32xbf16>
    %155 = vector.shape_cast %154 : vector<64x32xbf16> to vector<1x8x8x32xbf16>
    %156 = vector.shape_cast %149 : vector<1x8x8x32xbf16> to vector<1x8x8x1x32xbf16>
    %157 = vector.shape_cast %151 : vector<1x8x8x32xbf16> to vector<1x8x8x1x32xbf16>
    %158 = tpu.concatenate %156, %157 in 3 : vector<1x8x8x1x32xbf16>, vector<1x8x8x1x32xbf16> -> vector<1x8x8x2x32xbf16>
    %159 = vector.shape_cast %158 : vector<1x8x8x2x32xbf16> to vector<1x8x16x32xbf16>
    %160 = vector.shape_cast %153 : vector<1x8x8x32xbf16> to vector<1x8x8x1x32xbf16>
    %161 = vector.shape_cast %155 : vector<1x8x8x32xbf16> to vector<1x8x8x1x32xbf16>
    %162 = tpu.concatenate %160, %161 in 3 : vector<1x8x8x1x32xbf16>, vector<1x8x8x1x32xbf16> -> vector<1x8x8x2x32xbf16>
    %163 = vector.shape_cast %162 : vector<1x8x8x2x32xbf16> to vector<1x8x16x32xbf16>
    %164 = vector.shape_cast %159 : vector<1x8x16x32xbf16> to vector<1x8x1x16x32xbf16>
    %165 = vector.shape_cast %163 : vector<1x8x16x32xbf16> to vector<1x8x1x16x32xbf16>
    %166 = tpu.concatenate %164, %165 in 2 : vector<1x8x1x16x32xbf16>, vector<1x8x1x16x32xbf16> -> vector<1x8x2x16x32xbf16>
    %167 = vector.shape_cast %166 : vector<1x8x2x16x32xbf16> to vector<1x16x16x32xbf16>
    %cst_33 = arith.constant 0.000000e+00 : bf16
    %168 = vector.broadcast %cst_33 : bf16 to vector<1x1x16x32xbf16>
    %169 = tpu.concatenate %168, %167, %168 in 1 : vector<1x1x16x32xbf16>, vector<1x16x16x32xbf16>, vector<1x1x16x32xbf16> -> vector<1x18x16x32xbf16>
    %cst_34 = arith.constant 0.000000e+00 : bf16
    %170 = vector.broadcast %cst_34 : bf16 to vector<1x18x1x32xbf16>
    %171 = tpu.concatenate %170, %169, %170 in 2 : vector<1x18x1x32xbf16>, vector<1x18x16x32xbf16>, vector<1x18x1x32xbf16> -> vector<1x18x18x32xbf16>
    %172 = vector.extract_strided_slice %171 {offsets = [0, 0, 0, 0], sizes = [1, 16, 16, 32], strides = [1, 1, 1, 1]} : vector<1x18x18x32xbf16> to vector<1x16x16x32xbf16>
    %173 = vector.shape_cast %172 : vector<1x16x16x32xbf16> to vector<256x32xbf16>
    %174 = vector.extract_strided_slice %171 {offsets = [0, 0, 1, 0], sizes = [1, 16, 16, 32], strides = [1, 1, 1, 1]} : vector<1x18x18x32xbf16> to vector<1x16x16x32xbf16>
    %175 = vector.shape_cast %174 : vector<1x16x16x32xbf16> to vector<256x32xbf16>
    %176 = vector.extract_strided_slice %171 {offsets = [0, 0, 2, 0], sizes = [1, 16, 16, 32], strides = [1, 1, 1, 1]} : vector<1x18x18x32xbf16> to vector<1x16x16x32xbf16>
    %177 = vector.shape_cast %176 : vector<1x16x16x32xbf16> to vector<256x32xbf16>
    %178 = vector.extract_strided_slice %171 {offsets = [0, 1, 0, 0], sizes = [1, 16, 16, 32], strides = [1, 1, 1, 1]} : vector<1x18x18x32xbf16> to vector<1x16x16x32xbf16>
    %179 = vector.shape_cast %178 : vector<1x16x16x32xbf16> to vector<256x32xbf16>
    %180 = vector.extract_strided_slice %171 {offsets = [0, 1, 1, 0], sizes = [1, 16, 16, 32], strides = [1, 1, 1, 1]} : vector<1x18x18x32xbf16> to vector<1x16x16x32xbf16>
    %181 = vector.shape_cast %180 : vector<1x16x16x32xbf16> to vector<256x32xbf16>
    %182 = vector.extract_strided_slice %171 {offsets = [0, 1, 2, 0], sizes = [1, 16, 16, 32], strides = [1, 1, 1, 1]} : vector<1x18x18x32xbf16> to vector<1x16x16x32xbf16>
    %183 = vector.shape_cast %182 : vector<1x16x16x32xbf16> to vector<256x32xbf16>
    %184 = vector.extract_strided_slice %171 {offsets = [0, 2, 0, 0], sizes = [1, 16, 16, 32], strides = [1, 1, 1, 1]} : vector<1x18x18x32xbf16> to vector<1x16x16x32xbf16>
    %185 = vector.shape_cast %184 : vector<1x16x16x32xbf16> to vector<256x32xbf16>
    %186 = vector.extract_strided_slice %171 {offsets = [0, 2, 1, 0], sizes = [1, 16, 16, 32], strides = [1, 1, 1, 1]} : vector<1x18x18x32xbf16> to vector<1x16x16x32xbf16>
    %187 = vector.shape_cast %186 : vector<1x16x16x32xbf16> to vector<256x32xbf16>
    %188 = vector.extract_strided_slice %171 {offsets = [0, 2, 2, 0], sizes = [1, 16, 16, 32], strides = [1, 1, 1, 1]} : vector<1x18x18x32xbf16> to vector<1x16x16x32xbf16>
    %189 = vector.shape_cast %188 : vector<1x16x16x32xbf16> to vector<256x32xbf16>
    %190 = tpu.concatenate %173, %175, %177, %179, %181, %183, %185, %187, %189 in 1 : vector<256x32xbf16>, vector<256x32xbf16>, vector<256x32xbf16>, vector<256x32xbf16>, vector<256x32xbf16>, vector<256x32xbf16>, vector<256x32xbf16>, vector<256x32xbf16>, vector<256x32xbf16> -> vector<256x288xbf16>
    %c0_35 = arith.constant 0 : index
    %c0_36 = arith.constant 0 : index
    %191 = vector.load %arg12[%c0_35, %c0_36] : memref<288x4xbf16, #tpu.memory_space<vmem>>, vector<288x4xbf16>
    %cst_37 = arith.constant dense<0.000000e+00> : vector<256x4xf32>
    %192 = tpu.matmul %190, %191, %cst_37 {dimension_numbers = #tpu.dot_dimension_numbers<[1], [0], [0], [1], [0, 0, 1, 1], [], []>} : vector<256x288xbf16>, vector<288x4xbf16>, vector<256x4xf32> -> vector<256x4xf32>
    %c0_38 = arith.constant 0 : index
    %c0_39 = arith.constant 0 : index
    %193 = vector.load %arg13[%c0_38, %c0_39] : memref<1x4xf32, #tpu.memory_space<vmem>>, vector<1x4xf32>
    %194 = vector.broadcast %193 : vector<1x4xf32> to vector<256x4xf32>
    %195 = arith.addf %192, %194 : vector<256x4xf32>
    %196 = arith.negf %195 : vector<256x4xf32>
    %197 = math.exp %196 : vector<256x4xf32>
    %cst_40 = arith.constant 1.000000e+00 : f32
    %198 = vector.broadcast %cst_40 : f32 to vector<256x4xf32>
    %199 = arith.addf %198, %197 : vector<256x4xf32>
    %200 = arith.divf %198, %199 : vector<256x4xf32>
    %201 = vector.shape_cast %200 : vector<256x4xf32> to vector<1x16x16x4xf32>
    %c0_41 = arith.constant 0 : index
    %c0_42 = arith.constant 0 : index
    %c0_43 = arith.constant 0 : index
    %c0_44 = arith.constant 0 : index
    %202 = vector.load %arg14[%c0_41, %c0_42, %c0_43, %c0_44] : memref<1x16x16x4xf32, #tpu.memory_space<vmem>>, vector<1x16x16x4xf32>
    tpu.vector_store %arg14[%c0_41, %c0_42, %c0_43, %c0_44], %201 {strides = array<i32>} : memref<1x16x16x4xf32, #tpu.memory_space<vmem>>, vector<1x16x16x4xf32>,
    return
  }
  func.func @transform_0(%arg0: i32) -> (i32, i32) {
    %c0_i32 = arith.constant 0 : i32
    %c0_i32_0 = arith.constant 0 : i32
    %c0_i32_1 = arith.constant 0 : i32
    return %c0_i32, %c0_i32_0 : i32, i32
  }
  func.func @transform_1(%arg0: i32) -> (i32, i32) {
    %c0_i32 = arith.constant 0 : i32
    %c0_i32_0 = arith.constant 0 : i32
    %c0_i32_1 = arith.constant 0 : i32
    return %c0_i32, %c0_i32_0 : i32, i32
  }
  func.func @transform_2(%arg0: i32) -> (i32, i32) {
    %c0_i32 = arith.constant 0 : i32
    %c0_i32_0 = arith.constant 0 : i32
    %c0_i32_1 = arith.constant 0 : i32
    return %c0_i32, %c0_i32_0 : i32, i32
  }
  func.func @transform_3(%arg0: i32) -> (i32, i32) {
    %c0_i32 = arith.constant 0 : i32
    %c0_i32_0 = arith.constant 0 : i32
    %c0_i32_1 = arith.constant 0 : i32
    return %c0_i32, %c0_i32_0 : i32, i32
  }
  func.func @transform_4(%arg0: i32) -> (i32, i32) {
    %c0_i32 = arith.constant 0 : i32
    %c0_i32_0 = arith.constant 0 : i32
    %c0_i32_1 = arith.constant 0 : i32
    return %c0_i32, %c0_i32_0 : i32, i32
  }
  func.func @transform_5(%arg0: i32) -> (i32, i32) {
    %c0_i32 = arith.constant 0 : i32
    %c0_i32_0 = arith.constant 0 : i32
    %c0_i32_1 = arith.constant 0 : i32
    return %c0_i32, %c0_i32_0 : i32, i32
  }
  func.func @transform_6(%arg0: i32) -> (i32, i32) {
    %c0_i32 = arith.constant 0 : i32
    %c0_i32_0 = arith.constant 0 : i32
    %c0_i32_1 = arith.constant 0 : i32
    return %c0_i32, %c0_i32_0 : i32, i32
  }
  func.func @transform_7(%arg0: i32) -> (i32, i32) {
    %c0_i32 = arith.constant 0 : i32
    %c0_i32_0 = arith.constant 0 : i32
    %c0_i32_1 = arith.constant 0 : i32
    return %c0_i32, %c0_i32_0 : i32, i32
  }
  func.func @transform_8(%arg0: i32) -> (i32, i32) {
    %c0_i32 = arith.constant 0 : i32
    %c0_i32_0 = arith.constant 0 : i32
    %c0_i32_1 = arith.constant 0 : i32
    return %c0_i32, %c0_i32_0 : i32, i32
  }
  func.func @transform_9(%arg0: i32) -> (i32, i32) {
    %c0_i32 = arith.constant 0 : i32
    %c0_i32_0 = arith.constant 0 : i32
    %c0_i32_1 = arith.constant 0 : i32
    return %c0_i32, %c0_i32_0 : i32, i32
  }
  func.func @transform_10(%arg0: i32) -> (i32, i32) {
    %c0_i32 = arith.constant 0 : i32
    %c0_i32_0 = arith.constant 0 : i32
    %c0_i32_1 = arith.constant 0 : i32
    return %c0_i32, %c0_i32_0 : i32, i32
  }
  func.func @transform_11(%arg0: i32) -> (i32, i32) {
    %c0_i32 = arith.constant 0 : i32
    %c0_i32_0 = arith.constant 0 : i32
    %c0_i32_1 = arith.constant 0 : i32
    return %c0_i32, %c0_i32_0 : i32, i32
  }
  func.func @transform_12(%arg0: i32) -> (i32, i32) {
    %c0_i32 = arith.constant 0 : i32
    %c0_i32_0 = arith.constant 0 : i32
    %c0_i32_1 = arith.constant 0 : i32
    return %c0_i32, %c0_i32_0 : i32, i32
  }
  func.func @transform_13(%arg0: i32) -> (i32, i32, i32, i32) {
    %c0_i32 = arith.constant 0 : i32
    %c0_i32_0 = arith.constant 0 : i32
    %c0_i32_1 = arith.constant 0 : i32
    %c0_i32_2 = arith.constant 0 : i32
    return %arg0, %c0_i32, %c0_i32_0, %c0_i32_1 : i32, i32, i32, i32
  }
}

</mosaic_0001>

<bundles_post_ra>
// kernel: _lambda_.1
= control target key start
LH: loop header
LB: loop body
LE: loop exit
PB: predicated region body
PF: predicated region fallthrough
CT: control target
= control target key end

     0   :  { %s10541_s0 = inlined_call_operand.vmem [shape: f32[2,12], index: 0, kind: input, shape index: {}]   ;;  %s10542_s1 = inlined_call_operand.vmem [shape: bf16[12,256], index: 1, kind: input, shape index: {}]   ;;  %s10543_s2 = inlined_call_operand.vmem [shape: f32[1,256], index: 2, kind: input, shape index: {}]   ;;  %s10544_s3 = inlined_call_operand.hbm [shape: bf16[256,256], index: 3, kind: input, shape index: {}]   ;;  %s10545_s4 = inlined_call_operand.hbm [shape: f32[1,256], index: 4, kind: input, shape index: {}]   ;;  %s10546_s5 = inlined_call_operand.hbm [shape: bf16[256,512], index: 5, kind: input, shape index: {}]   ;;  %s10547_s6 = inlined_call_operand.hbm [shape: f32[1,512], index: 6, kind: input, shape index: {}]   ;;  %s10548_s7 = inlined_call_operand.hbm [shape: bf16[288,128], index: 7, kind: input, shape index: {}]   ;;  %s10549_s8 = inlined_call_operand.vmem [shape: f32[1,128], index: 8, kind: input, shape index: {}]   ;;  %s10550_s9 = inlined_call_operand.hbm [shape: bf16[288,128], index: 9, kind: input, shape index: {}]   ;;  %s10551_s10 = inlined_call_operand.hbm [shape: f32[1,128], index: 10, kind: input, shape index: {}]   ;;  %s10552_s11 = inlined_call_operand.hbm [shape: bf16[288,4], index: 11, kind: input, shape index: {}]   ;;  %s10553_s12 = inlined_call_operand.vmem [shape: f32[1,4], index: 12, kind: input, shape index: {}]   ;;  %s10554_s13 = inlined_call_operand.vmem [shape: f32[2,16,16,4], index: 13, kind: output, shape index: {}]  }
   0x1   :  { %10629 = sst [smem:[#allocation61_spill]] %s10544_s3 }
   0x2   :  { %10630 = sst [smem:[#allocation62_spill]] %s10545_s4 }
   0x3   :  { %10631 = sst [smem:[#allocation63_spill]] %s10547_s6 }
   0x4   :  { %18 = vsyncpa [#allocation3], 0 }
   0x5   :  { %19 = vsyncpa [#allocation5], 0 }
   0x6   :  { %20 = vsyncpa [#allocation8], 0 }
   0x7   :  { %21 = vsyncpa [#allocation11], 0 }
   0x8   :  { %22 = vsyncpa [#allocation14], 0  ;;  %s7660_s25 = smov 0  }
   0x9 LB: > { %s10632_s4 = sld [smem:[#allocation62_spill]]  ;;  %s7669_s29 = sadd.s32 4294967295, %s7570_s25   ;;  %s7570_s25 = sphi %s7660_s25, %s28_s25  }
   0xa   : > { %p6171_p0 = scmp.ge.s32.totalorder %s7570_s25, 1  ;;  %p332_p1 = scmp.lt.s32.totalorder %s7570_s25, 3 }
   0xb   : > { %p7120_p2 = scmp.eq.s32.totalorder %s7669_s29, 0  ;;  %s7572_s14 = smov [#allocation4]  }
   0xc   : > { %p7674_p3 = pnand %p6171_p0, %p332_p1  ;;  %s369_s15 = sshll.u32 %s7572_s14, 4  ;;  %s370_s15 = int_to_ptr.vmem [resolvable:$true] %s369_s15 }
   0xd   : > { %s10634_s6 = sld [smem:[#allocation63_spill]]  ;;  %s7573_s20 = smov [#allocation7]  }
   0xe   : > { %p7095_p4 = pneg %p7674_p3  ;;  %s395_s21 = sshll.u32 %s7573_s20, 4  ;;  %s396_s21 = int_to_ptr.vmem [resolvable:$true] %s395_s21 }
   0xf   : > { %s367_s28 = sshll.u32 %s10632_s4, 4  ;;  %s421_s24 = sshll.u32 %s10550_s9, 4  ;;  %s368_s28 = int_to_ptr.hbm [resolvable:$true] %s367_s28  ;;  %s422_s24 = int_to_ptr.hbm [resolvable:$true] %s421_s24 }
  0x10   : > { %p7685_p5 = pnand %p7120_p2, %p7095_p4  ;;  %s7574_s26 = smov [#allocation10]  }
  0x11   : > { %s423_s27 = sshll.u32 %s7574_s26, 4  ;;  %s10636_s3 = sld [smem:[#allocation61_spill]]  ;;  %s424_s27 = int_to_ptr.vmem [resolvable:$true] %s423_s27 }
  0x12   : > { %7101 = dma.hbm_to_vmem [thread:$0]  (!%p7685_p5), %s368_s28, 32, %s370_s15, [#allocation5]  }
  0x13   : > { %s393_s18 = sshll.u32 %s10634_s6, 4  ;;  %s10555_s20 = smov 64   ;;  %s394_s18 = int_to_ptr.hbm [resolvable:$true] %s393_s18 }
  0x14   : > { %7107 = dma.hbm_to_vmem [thread:$0]  (!%p7685_p5), %s394_s18, 64, %s396_s21, [#allocation8]  }
  0x15   : > { %s7576_s4 = smov 4   ;;  %s7577_s28 = smov [#allocation2]  }
  0x16   : > { %7113 = dma.hbm_to_vmem [thread:$0]  (!%p7685_p5), %s422_s24, 2304, %s424_s27, [#allocation11], %s10555_s20, %s10555_s20, %s7576_s4  }
  0x17   : > { %s352_s17 = sshll.u32 %s10636_s3, 4  ;;  %s354_s15 = sshll.u32 %s7577_s28, 4  ;;  %s353_s17 = int_to_ptr.hbm [resolvable:$true] %s352_s17  ;;  %s355_s15 = int_to_ptr.vmem [resolvable:$true] %s354_s15 }
  0x18   : > { %s378_s22 = sshll.u32 %s10546_s5, 4  ;;  %s7578_s23 = smov 128   ;;  %s379_s22 = int_to_ptr.hbm [resolvable:$true] %s378_s22 }
  0x19   : > { %s7579_s26 = smov 8   ;;  %s7580_s14 = smov [#allocation6]  }
  0x1a   : > { %7098 = dma.hbm_to_vmem [thread:$0]  (!%p7685_p5), %s353_s17, 4096, %s355_s15, [#allocation3], %s7578_s23, %s7578_s23, %s7579_s26  }
  0x1b   : > { %s380_s16 = sshll.u32 %s7580_s14, 4  ;;  %s7581_s3 = smov 256   ;;  %s381_s16 = int_to_ptr.vmem [resolvable:$true] %s380_s16 }
  0x1c   : > { %s7582_s6 = smov 16   ;;  %s404_s28 = sshll.u32 %s10548_s7, 4  ;;  %s405_s28 = int_to_ptr.hbm [resolvable:$true] %s404_s28 }
  0x1d   : > { %7104 = dma.hbm_to_vmem [thread:$0]  (!%p7685_p5), %s379_s22, 8192, %s381_s16, [#allocation5], %s7581_s3, %s7581_s3, %s7582_s6  }
  0x1e   : > { %s7583_s18 = smov [#allocation9]   ;;  %s436_s15 = sshll.u32 %s10551_s10, 4  ;;  %s437_s15 = int_to_ptr.hbm [resolvable:$true] %s436_s15 }
  0x1f   : > { %s406_s21 = sshll.u32 %s7583_s18, 4  ;;  %s10637_s23 = smov 64   ;;  %s407_s21 = int_to_ptr.vmem [resolvable:$true] %s406_s21 }
  0x20   : > { %7110 = dma.hbm_to_vmem [thread:$0]  (!%p7685_p5), %s405_s28, 2304, %s407_s21, [#allocation8], %s10637_s23, %s10637_s23, %s7576_s4  }
  0x21   : > { %s7584_s3 = smov [#allocation12]   ;;  %s447_s14 = sshll.u32 %s10552_s11, 4  ;;  %s448_s14 = int_to_ptr.hbm [resolvable:$true] %s447_s14 }
  0x22   : > { %s438_s6 = sshll.u32 %s7584_s3, 4  ;;  %s7585_s16 = smov [#allocation13]   ;;  %s439_s6 = int_to_ptr.vmem [resolvable:$true] %s438_s6 }
  0x23   : > { %7116 = dma.hbm_to_vmem [thread:$0]  (!%p7685_p5), %s437_s15, 16, %s439_s6, [#allocation11]  }
  0x24   : > { %s449_s24 = sshll.u32 %s7585_s16, 4  ;;  %468 = sbr.rel (%p7674_p3) target bundleno = 2630 (0xa46), region = 72  ;;  %s450_s24 = int_to_ptr.vmem [resolvable:$true] %s449_s24 }
  0x25   : > { %7119 = dma.hbm_to_vmem [thread:$0]  (!%p7685_p5), %s448_s14, 2304, %s450_s24, [#allocation14], %s10637_s23, %s10637_s23, %s7576_s4  }
  0x29   : > { %7549 = dma.done.wait (%p7120_p2), [#allocation3], 4096  }
  0x2a   : > { %7551 = vsyncadd (%p7120_p2), [#allocation3], 4294963200 }
  0x2b   : > { %7553 = dma.done.wait (%p7120_p2), [#allocation5], 8224  }
  0x2c   : > { %7555 = vsyncadd (%p7120_p2), [#allocation5], 4294959072 }
  0x2d   : > { %7557 = dma.done.wait (%p7120_p2), [#allocation8], 2368  }
  0x2e   : > { %7559 = vsyncadd (%p7120_p2), [#allocation8], 4294964928 }
  0x2f   : > { %7561 = dma.done.wait (%p7120_p2), [#allocation11], 2320  }
  0x30   : > { %7563 = vsyncadd (%p7120_p2), [#allocation11], 4294964976 }
  0x31   : > { %7565 = dma.done.wait (%p7120_p2), [#allocation14], 2304  }
  0x32   : > { %7567 = vsyncadd (%p7120_p2), [#allocation14], 4294964992  ;;  %s549_s19 = scalar_lea.vmem %s10541_s0, %s7669_s29  ;;  %vm572_vm0 = vcmask 1045504   ;;  %v6193_v0 = vld [vmem:[%s10542_s1] sm:$0xf]  ;;  %vm568_vm1 = vcmask 97280  }
  0x33   : > { %v6912_v1 = vld [vmem:[%s10542_s1 + $0x4] sm:$0x30]  ;;  %v6911_v2 = vld [vmem:[%s10542_s1 + $0x4] sm:$0xf]  ;;  %v6195_v4 = vld [vmem:[%s10542_s1 + $0x8] sm:$0x30] }
  0x34   : > { %v6194_v3 = vor.u32 %v6912_v1, %v6193_v0  ;;  %v550_v5 = vld [vmem:[%s549_s19] sm:$0x1]  ;;  %v6323_v6 = vld [vmem:[#allocation2 + $0xf0] sm:$0xf]  ;;  %v6198_v7 = vor.u32 %v6911_v2, %v6195_v4  ;;  %v6315_v9 = vld [vmem:[#allocation2 + $0xe0] sm:$0xf] }
  0x35   : > { %v6944_v8 = vld [vmem:[#allocation2 + $0xf4] sm:$0xf0]  ;;  %v6942_v10 = vld [vmem:[#allocation2 + $0xe4] sm:$0xf0]  ;;  %v551_v12 = vpack.c.bf16 %v550_v5, %v550_v5  ;;  %v6259_v16 = vld [vmem:[#allocation2 + $0x70] sm:$0xf] }
  0x36   : > { %v574_v11 = vsel %vm572_vm0, %v6194_v3, 0  ;;  %v6324_v13 = vor.u32 %v6944_v8, %v6323_v6  ;;  %v577_v14 = vsel %vm572_vm0, %v6198_v7, 0  ;;  %v6316_v15 = vor.u32 %v6942_v10, %v6315_v9  ;;  %v6928_v17 = vld [vmem:[#allocation2 + $0x74] sm:$0xf0]  ;;  %v6943_v18 = vld [vmem:[#allocation2 + $0xf4] sm:$0xf] }
  0x37   : > { %586 = vmatpush.bf16.msra.mxu0 %v574_v11  ;;  %599 = vmatpush.bf16.msra.mxu1 %v577_v14  ;;  %v6307_v19 = vld [vmem:[#allocation2 + $0xd0] sm:$0xf]  ;;  %v6940_v20 = vld [vmem:[#allocation2 + $0xd4] sm:$0xf0]  ;;  %v6260_v21 = vor.u32 %v6928_v17, %v6259_v16  ;;  %v6325_v22 = vld [vmem:[#allocation2 + $0xf8] sm:$0xf0] }
  0x38   : > { %v6328_v23 = vor.u32 %v6943_v18, %v6325_v22  ;;  %v6251_v24 = vld [vmem:[#allocation2 + $0x60] sm:$0xf]  ;;  %v6926_v25 = vld [vmem:[#allocation2 + $0x64] sm:$0xf0]  ;;  %v6941_v26 = vld [vmem:[#allocation2 + $0xe4] sm:$0xf]  ;;  %v6308_v29 = vor.u32 %v6940_v20, %v6307_v19 }
  0x39   : > { %807 = vmatpush.bf16.msra.mxu2 %v6260_v21  ;;  %v6252_v27 = vor.u32 %v6926_v25, %v6251_v24  ;;  %v6317_v28 = vld [vmem:[#allocation2 + $0xe8] sm:$0xf0]  ;;  %v6299_v30 = vld [vmem:[#allocation2 + $0xc0] sm:$0xf]  ;;  %v6243_v32 = vld [vmem:[#allocation2 + $0x50] sm:$0xf] }
  0x3a   : > { %6199 = vmatmul.msk.bf16.vlgmr.msra.gmra.mxu0 %vm568_vm1, %v551_v12  ;;  %6200 = vmatmul.msk.bf16.vlgmr.msra.gmra.mxu1 %vm568_vm1, %v551_v12  ;;  %v6320_v31 = vor.u32 %v6941_v26, %v6317_v28  ;;  %v6924_v33 = vld [vmem:[#allocation2 + $0x54] sm:$0xf0]  ;;  %v6938_v34 = vld [vmem:[#allocation2 + $0xc4] sm:$0xf0]  ;;  %v6939_v35 = vld [vmem:[#allocation2 + $0xd4] sm:$0xf] }
  0x3b   : > { %820 = vmatpush.bf16.msrb.mxu0 %v6324_v13  ;;  %846 = vmatpush.bf16.msrb.mxu1 %v6328_v23  ;;  %v6309_v36 = vld [vmem:[#allocation2 + $0xd8] sm:$0xf0]  ;;  %v6244_v37 = vor.u32 %v6924_v33, %v6243_v32  ;;  %v6300_v38 = vor.u32 %v6938_v34, %v6299_v30  ;;  %v6291_v39 = vld [vmem:[#allocation2 + $0xb0] sm:$0xf]  ;;  %v6235_v41 = vld [vmem:[#allocation2 + $0x40] sm:$0xf] }
  0x3c   : > { %v6312_v40 = vor.u32 %v6939_v35, %v6309_v36  ;;  %v6922_v42 = vld [vmem:[#allocation2 + $0x44] sm:$0xf0]  ;;  %v6936_v43 = vld [vmem:[#allocation2 + $0xb4] sm:$0xf0]  ;;  %v6937_v44 = vld [vmem:[#allocation2 + $0xc4] sm:$0xf] }
  0x3d   : > { %808 = vmatpush.bf16.msra.mxu2 %v6252_v27  ;;  %v6301_v45 = vld [vmem:[#allocation2 + $0xc8] sm:$0xf0]  ;;  %v6283_v46 = vld [vmem:[#allocation2 + $0xa0] sm:$0xf]  ;;  %v6934_v47 = vld [vmem:[#allocation2 + $0xa4] sm:$0xf0]  ;;  %v6236_v48 = vor.u32 %v6922_v42, %v6235_v41  ;;  %v6292_v50 = vor.u32 %v6936_v43, %v6291_v39 }
  0x3e   : > { %v6227_v49 = vld [vmem:[#allocation2 + $0x30] sm:$0xf]  ;;  %v6304_v51 = vor.u32 %v6937_v44, %v6301_v45  ;;  %v6920_v52 = vld [vmem:[#allocation2 + $0x34] sm:$0xf0]  ;;  %v6935_v53 = vld [vmem:[#allocation2 + $0xb4] sm:$0xf]  ;;  %v6284_v56 = vor.u32 %v6934_v47, %v6283_v46 }
  0x3f   : > { %821 = vmatpush.bf16.msrb.mxu0 %v6316_v15  ;;  %847 = vmatpush.bf16.msrb.mxu1 %v6320_v31  ;;  %v6293_v54 = vld [vmem:[#allocation2 + $0xb8] sm:$0xf0]  ;;  %v6228_v55 = vor.u32 %v6920_v52, %v6227_v49  ;;  %v6275_v57 = vld [vmem:[#allocation2 + $0x90] sm:$0xf]  ;;  %v6219_v59 = vld [vmem:[#allocation2 + $0x20] sm:$0xf] }
  0x40   : > { %v6296_v58 = vor.u32 %v6935_v53, %v6293_v54  ;;  %v6918_v60 = vld [vmem:[#allocation2 + $0x24] sm:$0xf0]  ;;  %v6932_v61 = vld [vmem:[#allocation2 + $0x94] sm:$0xf0]  ;;  %v6933_v62 = vld [vmem:[#allocation2 + $0xa4] sm:$0xf] }
  0x41   : > { %809 = vmatpush.bf16.msra.mxu2 %v6244_v37  ;;  %v6285_v63 = vld [vmem:[#allocation2 + $0xa8] sm:$0xf0]  ;;  %v6220_v0 = vor.u32 %v6918_v60, %v6219_v59  ;;  %v6276_v1 = vor.u32 %v6932_v61, %v6275_v57  ;;  %v6267_v3 = vld [vmem:[#allocation2 + $0x80] sm:$0xf]  ;;  %v6930_v4 = vld [vmem:[#allocation2 + $0x84] sm:$0xf0] }
  0x42   : > { %v6288_v2 = vor.u32 %v6933_v62, %v6285_v63  ;;  %v6927_v5 = vld [vmem:[#allocation2 + $0x74] sm:$0xf]  ;;  %v6261_v6 = vld [vmem:[#allocation2 + $0x78] sm:$0xf0]  ;;  %v6268_v7 = vor.u32 %v6930_v4, %v6267_v3  ;;  %v6925_v9 = vld [vmem:[#allocation2 + $0x64] sm:$0xf] }
  0x43   : > { %822 = vmatpush.bf16.msrb.mxu0 %v6308_v29  ;;  %848 = vmatpush.bf16.msrb.mxu1 %v6312_v40  ;;  %v6264_v8 = vor.u32 %v6927_v5, %v6261_v6  ;;  %v6253_v10 = vld [vmem:[#allocation2 + $0x68] sm:$0xf0]  ;;  %v6211_v12 = vld [vmem:[#allocation2 + $0x10] sm:$0xf]  ;;  %v6916_v13 = vld [vmem:[#allocation2 + $0x14] sm:$0xf0] }
  0x44   : > { %v6256_v11 = vor.u32 %v6925_v9, %v6253_v10  ;;  %v6923_v14 = vld [vmem:[#allocation2 + $0x54] sm:$0xf]  ;;  %v6212_v15 = vor.u32 %v6916_v13, %v6211_v12  ;;  %v6245_v16 = vld [vmem:[#allocation2 + $0x58] sm:$0xf0]  ;;  %v6203_v21 = vld [vmem:[#allocation2] sm:$0xf] }
  0x45   : > { %810 = vmatpush.bf16.msra.mxu2 %v6236_v48  ;;  %v6931_v17 = vld [vmem:[#allocation2 + $0x94] sm:$0xf]  ;;  %v6277_v18 = vld [vmem:[#allocation2 + $0x98] sm:$0xf0]  ;;  %v6248_v19 = vor.u32 %v6923_v14, %v6245_v16  ;;  %v6914_v22 = vld [vmem:[#allocation2 + $0x4] sm:$0xf0] }
  0x46   : > { %v6280_v20 = vor.u32 %v6931_v17, %v6277_v18  ;;  %v6921_v23 = vld [vmem:[#allocation2 + $0x44] sm:$0xf]  ;;  %v6204_v24 = vor.u32 %v6914_v22, %v6203_v21  ;;  %v6237_v25 = vld [vmem:[#allocation2 + $0x48] sm:$0xf0]  ;;  %v6919_v30 = vld [vmem:[#allocation2 + $0x34] sm:$0xf] }
  0x47   : > { %823 = vmatpush.bf16.msrb.mxu0 %v6300_v38  ;;  %849 = vmatpush.bf16.msrb.mxu1 %v6304_v51  ;;  %v6929_v26 = vld [vmem:[#allocation2 + $0x84] sm:$0xf]  ;;  %v6269_v27 = vld [vmem:[#allocation2 + $0x88] sm:$0xf0]  ;;  %v6240_v28 = vor.u32 %v6921_v23, %v6237_v25  ;;  %v6229_v31 = vld [vmem:[#allocation2 + $0x38] sm:$0xf0] }
  0x48   : > { %v6272_v29 = vor.u32 %v6929_v26, %v6269_v27  ;;  %v6232_v32 = vor.u32 %v6919_v30, %v6229_v31  ;;  %v6917_v33 = vld [vmem:[#allocation2 + $0x24] sm:$0xf]  ;;  %v6221_v34 = vld [vmem:[#allocation2 + $0x28] sm:$0xf0]  ;;  %v6915_v36 = vld [vmem:[#allocation2 + $0x14] sm:$0xf] }
  0x49   : > { %811 = vmatpush.bf16.msra.mxu2 %v6228_v55  ;;  %v6224_v35 = vor.u32 %v6917_v33, %v6221_v34  ;;  %v6213_v37 = vld [vmem:[#allocation2 + $0x18] sm:$0xf0]  ;;  %v6913_v39 = vld [vmem:[#allocation2 + $0x4] sm:$0xf]  ;;  %v6205_v40 = vld [vmem:[#allocation2 + $0x8] sm:$0xf0] }
  0x4a   : > { %v6216_v38 = vor.u32 %v6915_v36, %v6213_v37  ;;  %v6208_v41 = vor.u32 %v6913_v39, %v6205_v40  ;;  %v6443_v42 = vld [vmem:[#allocation6 + $0xe0] sm:$0xf]  ;;  %v6975_v43 = vld [vmem:[#allocation6 + $0xec] sm:$0xf0]  ;;  %v554_v47 = vld [vmem:[%s10543_s2] sm:$0x3] }
  0x4b   : > { %824 = vmatpush.bf16.msrb.mxu0 %v6292_v50  ;;  %850 = vmatpush.bf16.msrb.mxu1 %v6296_v58  ;;  %v6444_v44 = vor.u32 %v6975_v43, %v6443_v42  ;;  %v6427_v45 = vld [vmem:[#allocation6 + $0xc0] sm:$0xf]  ;;  %v6971_v46 = vld [vmem:[#allocation6 + $0xcc] sm:$0xf0]  ;;  %v7005_v53 = vld [vmem:[#allocation6 + $0x1e4] sm:$0xf] }
  0x4c   : > { %v6428_v48 = vor.u32 %v6971_v46, %v6427_v45  ;;  %v6411_v49 = vld [vmem:[#allocation6 + $0xa0] sm:$0xf]  ;;  %v6967_v50 = vld [vmem:[#allocation6 + $0xac] sm:$0xf0]  ;;  %v564_v54 = vperm.slane %v554_v47, 0  ;;  %v565_v57 = vperm.slane %v554_v47, 1 }
  0x4d   : > { %812 = vmatpush.bf16.msra.mxu2 %v6220_v0  ;;  %v6571_v51 = vld [vmem:[#allocation6 + $0x1e0] sm:$0xf]  ;;  %v7007_v52 = vld [vmem:[#allocation6 + $0x1ec] sm:$0xf0]  ;;  %v6412_v60 = vor.u32 %v6967_v50, %v6411_v49  ;;  %v7001_v62 = vld [vmem:[#allocation6 + $0x1c4] sm:$0xf] }
  0x4e   : > { %v6572_v55 = vor.u32 %v7007_v52, %v6571_v51  ;;  %v6555_v59 = vld [vmem:[#allocation6 + $0x1c0] sm:$0xf]  ;;  %v7003_v61 = vld [vmem:[#allocation6 + $0x1cc] sm:$0xf0]  ;;  %v6557_v63 = vld [vmem:[#allocation6 + $0x1d0] sm:$0xf0] }
  0x4f   : > { %825 = vmatpush.bf16.msrb.mxu0 %v6284_v56  ;;  %851 = vmatpush.bf16.msrb.mxu1 %v6288_v2  ;;  %v6573_v56 = vld [vmem:[#allocation6 + $0x1f0] sm:$0xf0]  ;;  %v6560_v2 = vor.u32 %v7001_v62, %v6557_v63  ;;  %v6973_v5 = vld [vmem:[#allocation6 + $0xe4] sm:$0xf]  ;;  %v6539_v6 = vld [vmem:[#allocation6 + $0x1a0] sm:$0xf] }
  0x50   : > { %v6576_v58 = vor.u32 %v7005_v53, %v6573_v56  ;;  %1270 = vmatpush.bf16.msra.mxu3 %v6572_v55  ;;  %v6445_v9 = vld [vmem:[#allocation6 + $0xf0] sm:$0xf0]  ;;  %v6395_v10 = vld [vmem:[#allocation6 + $0x80] sm:$0xf]  ;;  %v6997_v14 = vld [vmem:[#allocation6 + $0x1a4] sm:$0xf] }
  0x51   : > { %813 = vmatpush.bf16.msra.mxu2 %v6212_v15  ;;  %v6541_v15 = vld [vmem:[#allocation6 + $0x1b0] sm:$0xf0]  ;;  %v6523_v17 = vld [vmem:[#allocation6 + $0x180] sm:$0xf]  ;;  %v6995_v22 = vld [vmem:[#allocation6 + $0x18c] sm:$0xf0] }
  0x52   : > { %v6379_v25 = vld [vmem:[#allocation6 + $0x60] sm:$0xf]  ;;  %v6959_v26 = vld [vmem:[#allocation6 + $0x6c] sm:$0xf0]  ;;  %v6544_v27 = vor.u32 %v6997_v14, %v6541_v15  ;;  %v6525_v30 = vld [vmem:[#allocation6 + $0x190] sm:$0xf0] }
  0x53   : > { %826 = vmatpush.bf16.msrb.mxu0 %v6276_v1  ;;  %852 = vmatpush.bf16.msrb.mxu1 %v6280_v20  ;;  %v6556_v1 = vor.u32 %v7003_v61, %v6555_v59  ;;  %v6969_v20 = vld [vmem:[#allocation6 + $0xc4] sm:$0xf]  ;;  %v6991_v33 = vld [vmem:[#allocation6 + $0x16c] sm:$0xf0]  ;;  %v6380_v37 = vor.u32 %v6959_v26, %v6379_v25  ;;  %v6363_v39 = vld [vmem:[#allocation6 + $0x40] sm:$0xf] }
  0x54   : > { %v6965_v36 = vld [vmem:[#allocation6 + $0xa4] sm:$0xf]  ;;  %v6955_v40 = vld [vmem:[#allocation6 + $0x4c] sm:$0xf0]  ;;  %v6347_v49 = vld [vmem:[#allocation6 + $0x20] sm:$0xf] }
  0x55   : > { %814 = vmatpush.bf16.msra.mxu2 %v6204_v24  ;;  %1271 = vmatpush.bf16.msra.mxu3 %v6556_v1  ;;  %v6429_v24 = vld [vmem:[#allocation6 + $0xd0] sm:$0xf0]  ;;  %v6989_v43 = vld [vmem:[#allocation6 + $0x164] sm:$0xf]  ;;  %v6364_v47 = vor.u32 %v6955_v40, %v6363_v39  ;;  %v6951_v50 = vld [vmem:[#allocation6 + $0x2c] sm:$0xf0] }
  0x56   : > { %v6961_v46 = vld [vmem:[#allocation6 + $0x84] sm:$0xf]  ;;  %v6381_v55 = vld [vmem:[#allocation6 + $0x70] sm:$0xf0]  ;;  %v6331_v56 = vld [vmem:[#allocation6] sm:$0xf] }
  0x57   : > { %827 = vmatpush.bf16.msrb.mxu0 %v6268_v7  ;;  %853 = vmatpush.bf16.msrb.mxu1 %v6272_v29  ;;  %v6999_v7 = vld [vmem:[#allocation6 + $0x1ac] sm:$0xf0]  ;;  %v6993_v29 = vld [vmem:[#allocation6 + $0x184] sm:$0xf]  ;;  %v6365_v61 = vld [vmem:[#allocation6 + $0x50] sm:$0xf0] }
  0x58   : > { %v6540_v13 = vor.u32 %v6999_v7, %v6539_v6  ;;  %v6957_v53 = vld [vmem:[#allocation6 + $0x64] sm:$0xf]  ;;  %v6976_v6 = vld [vmem:[#allocation6 + $0xf4] sm:$0xf0]  ;;  %v6974_v7 = vld [vmem:[#allocation6 + $0xec] sm:$0xf] }
  0x59   : > { %1257 = vmatpush.bf16.msrb.mxu2 %v6444_v44  ;;  %v6509_v44 = vld [vmem:[#allocation6 + $0x170] sm:$0xf0]  ;;  %v6949_v63 = vld [vmem:[#allocation6 + $0x24] sm:$0xf]  ;;  %v6579_v40 = vld [vmem:[#allocation6 + $0x1e8] sm:$0xf] }
  0x5a   : > { %1272 = vmatpush.bf16.msra.mxu3 %v6540_v13  ;;  %v6512_v51 = vor.u32 %v6989_v43, %v6509_v44  ;;  %v6985_v14 = vld [vmem:[#allocation6 + $0x144] sm:$0xf]  ;;  %v6493_v15 = vld [vmem:[#allocation6 + $0x150] sm:$0xf0]  ;;  %v7006_v43 = vld [vmem:[#allocation6 + $0x1ec] sm:$0xf] }
  0x5b   : > { %833 = vmatpush.bf16.msra.mxu0 %v6264_v8  ;;  %1296 = vmatpush.bf16.msra.mxu1 %v6576_v58  ;;  %v6384_v58 = vor.u32 %v6957_v53, %v6381_v55  ;;  %v6981_v26 = vld [vmem:[#allocation6 + $0x124] sm:$0xf]  ;;  %v6461_v39 = vld [vmem:[#allocation6 + $0x110] sm:$0xf0]  ;;  %v6581_v44 = vld [vmem:[#allocation6 + $0x1f8] sm:$0xf0] }
  0x5c   : > { %v6563_v53 = vld [vmem:[#allocation6 + $0x1c8] sm:$0xf]  ;;  %v7002_v55 = vld [vmem:[#allocation6 + $0x1cc] sm:$0xf]  ;;  %s7586_s22 = smov 64   ;;  %s7587_s26 = smov 96  }
  0x5d   : > { %1258 = vmatpush.bf16.msrb.mxu2 %v6428_v48  ;;  %v6397_v48 = vld [vmem:[#allocation6 + $0x90] sm:$0xf0]  ;;  %s7588_s14 = smov 32   ;;  %vm1383_vm2 = vcmask 1040384   ;;  %vm1384_vm3 = vsmask.f32 256 }
  0x5e   : > { %v6400_v52 = vor.u32 %v6961_v46, %v6397_v48  ;;  %v6584_v46 = vor.u32 %v7006_v43, %v6581_v44  ;;  %v6964_v48 = vld [vmem:[#allocation6 + $0x94] sm:$0xf0]  ;;  %v6483_v43 = vld [vmem:[#allocation6 + $0x128] sm:$0xf]  ;;  %vm1529_vm4 = vcmask 1042432   ;;  %vm7802_vm6 = vmand %vm1383_vm2, %vm1384_vm3  ;;  %vm1392_vm8 = vcmask 1041408  }
  0x5f   : > { %834 = vmatpush.bf16.msra.mxu0 %v6256_v11  ;;  %v6963_v11 = vld [vmem:[#allocation6 + $0x8c] sm:$0xf0]  ;;  %1297 = vmatpush.bf16.msra.mxu1 %v6560_v2  ;;  %v6945_v2 = vld [vmem:[#allocation6 + $0x4] sm:$0xf]  ;;  %v6984_v44 = vld [vmem:[#allocation6 + $0x134] sm:$0xf0] }
  0x60   : > { %v6396_v21 = vor.u32 %v6963_v11, %v6395_v10  ;;  %v6491_v10 = vld [vmem:[#allocation6 + $0x140] sm:$0xf]  ;;  %v6987_v11 = vld [vmem:[#allocation6 + $0x14c] sm:$0xf0]  ;;  %vm1530_vm5 = vsmask.f32 2304 }
  0x61   : > { %1259 = vmatpush.bf16.msrb.mxu2 %v6412_v60  ;;  %v6953_v60 = vld [vmem:[#allocation6 + $0x44] sm:$0xf]  ;;  %v6492_v13 = vor.u32 %v6987_v11, %v6491_v10  ;;  %v6373_v11 = vld [vmem:[#allocation6 + $0x58] sm:$0xf0]  ;;  %vm7812_vm7 = vmand %vm1529_vm4, %vm1530_vm5  ;;  %vm1393_vm9 = vsmask.f32 1280 }
  0x62   : > { %v6368_v62 = vor.u32 %v6953_v60, %v6365_v61  ;;  %v6960_v60 = vld [vmem:[#allocation6 + $0x74] sm:$0xf0]  ;;  %v6958_v61 = vld [vmem:[#allocation6 + $0x6c] sm:$0xf]  ;;  %vm7826_vm10 = vmand %vm1392_vm8, %vm1393_vm9  ;;  %vm1545_vm11 = vsmask.f32 3336 }
  0x63   : > { %835 = vmatpush.bf16.msra.mxu0 %v6248_v19  ;;  %v6448_v19 = vor.u32 %v6973_v5, %v6445_v9  ;;  %1298 = vmatpush.bf16.msra.mxu1 %v6544_v27  ;;  %v6451_v5 = vld [vmem:[#allocation6 + $0xe8] sm:$0xf]  ;;  %v6453_v9 = vld [vmem:[#allocation6 + $0xf8] sm:$0xf0]  ;;  %v6477_v27 = vld [vmem:[#allocation6 + $0x130] sm:$0xf0] }
  0x64   : > { %vm1547_vm12 = vsmask.f32 5392  ;;  %vm1549_vm13 = vsmask.f32 7448  ;;  %vm7870_vm14 = vmor %vm1393_vm9, %vm1545_vm11  ;;  %vm1607_vm1 = vcmask 1042434   ;;  %vm1609_vm5 = vcmask 1044484  }
  0x65   : > { %1260 = vmatpush.bf16.msrb.mxu2 %v6396_v21  ;;  %v6437_v21 = vld [vmem:[#allocation6 + $0xd8] sm:$0xf0]  ;;  %vm1548_vm15 = vmor %vm7870_vm14, %vm1547_vm12  ;;  %vm1611_vm9 = vcmask 1046534   ;;  %vm1752_vm11 = vcmask 523264   ;;  %vm1755_vm12 = vcmask 785408   ;;  %vm1978_vm14 = vcmask 1043459  }
  0x66   : > { %vm7894_vm0 = vmor %vm1548_vm15, %vm1549_vm13  ;;  %vm1970_vm13 = vcmask 1041409   ;;  %vm2310_vm15 = vcmask 1044480   ;;  %p543_p6 = scmp.lt.s32.totalorder %s7669_s29, 1 }
  0x67   : > { %836 = vmatpush.bf16.msra.mxu0 %v6240_v28  ;;  %v6524_v28 = vor.u32 %v6995_v22, %v6523_v17  ;;  %v6435_v17 = vld [vmem:[#allocation6 + $0xc8] sm:$0xf]  ;;  %v6475_v22 = vld [vmem:[#allocation6 + $0x120] sm:$0xf]  ;;  %vm1608_vm3 = vmor %vm1383_vm2, %vm1607_vm1 }
  0x68   : > { %vm1610_vm8 = vmor %vm1608_vm3, %vm1609_vm5  ;;  %vm2477_vm5 = vcmask 1046532   ;;  %s10785_s29 = smov (!%p543_p6, %s7669_s29), 1 }
  0x69   : > { %1273 = vmatpush.bf16.msra.mxu3 %v6524_v28  ;;  %1261 = vmatpush.bf16.msrb.mxu2 %v6380_v37  ;;  %v6480_v28 = vor.u32 %v6981_v26, %v6477_v27  ;;  %v6992_v26 = vld [vmem:[#allocation6 + $0x174] sm:$0xf0]  ;;  %v6990_v27 = vld [vmem:[#allocation6 + $0x16c] sm:$0xf]  ;;  %s6910_s19 = sshll.u32 %s10785_s29, 8 }
  0x6a   : > { %s10247_s28 = scalar_lea.vmem %s10554_s13, %s6910_s19 }
  0x6b   : > { %837 = vmatpush.bf16.msra.mxu0 %v6232_v32  ;;  %v6507_v32 = vld [vmem:[#allocation6 + $0x160] sm:$0xf] }
  0x6c   : > { %v6508_v42 = vor.u32 %v6991_v33, %v6507_v32  ;;  %v6421_v33 = vld [vmem:[#allocation6 + $0xb8] sm:$0xf0] }
  0x6d   : > { %1262 = vmatpush.bf16.msrb.mxu2 %v6364_v47  ;;  %v6403_v47 = vld [vmem:[#allocation6 + $0x88] sm:$0xf] }
  0x6e   : > { %1274 = vmatpush.bf16.msra.mxu3 %v6508_v42  ;;  %v7008_v42 = vld [vmem:[#allocation6 + $0x1f4] sm:$0xf0] }
  0x6f   : > { %838 = vmatpush.bf16.msra.mxu0 %v6224_v35  ;;  %v6432_v35 = vor.u32 %v6969_v20, %v6429_v24 }
  0x72   : > { %1275 = vmatpush.bf16.msra.mxu3 %v6492_v13  ;;  %v6531_v13 = vld [vmem:[#allocation6 + $0x188] sm:$0xf] }
  0x73   : > { %839 = vmatpush.bf16.msra.mxu0 %v6216_v38  ;;  %v6413_v38 = vld [vmem:[#allocation6 + $0xb0] sm:$0xf0] }
  0x74   : > { %v6416_v45 = vor.u32 %v6965_v36, %v6413_v38  ;;  %v6977_v38 = vld [vmem:[#allocation6 + $0x104] sm:$0xf] }
  0x77   : > { %840 = vmatpush.bf16.msra.mxu0 %v6208_v41  ;;  %v6528_v41 = vor.u32 %v6993_v29, %v6525_v30  ;;  %v6419_v29 = vld [vmem:[#allocation6 + $0xa8] sm:$0xf]  ;;  %v6968_v30 = vld [vmem:[#allocation6 + $0xb4] sm:$0xf0] }
  0x78   : > { %v6420_v32 = vor.u32 %v6968_v30, %v6419_v29  ;;  %v6517_v29 = vld [vmem:[#allocation6 + $0x178] sm:$0xf0] }
  0x79   : > { %1299 = vmatpush.bf16.msra.mxu1 %v6528_v41  ;;  %v6464_v41 = vor.u32 %v6977_v38, %v6461_v39  ;;  %v6520_v30 = vor.u32 %v6990_v27, %v6517_v29 }
  0x7d   : > { %1300 = vmatpush.bf16.msra.mxu1 %v6512_v51  ;;  %v6405_v51 = vld [vmem:[#allocation6 + $0x98] sm:$0xf0] }
  0xb7   : > { %v588_v0 = vpop.f32.mrf.mxu0  ;;  %v601_v4 = vpop.f32.mrf.mxu1 }
  0xb8   : > { %v589_v3 = vadd.f32 %v588_v0, %v564_v54  ;;  %v602_v8 = vadd.f32 %v601_v4, %v565_v57  ;;  %v6348_v54 = vor.u32 %v6951_v50, %v6347_v49  ;;  %v6947_v57 = vld [vmem:[#allocation6 + $0xc] sm:$0xf0]  ;;  %v6349_v0 = vld [vmem:[#allocation6 + $0x30] sm:$0xf0]  ;;  %v6962_v49 = vld [vmem:[#allocation6 + $0x8c] sm:$0xf]  ;;  %v6404_v50 = vor.u32 %v6964_v48, %v6403_v47 }
  0xb9   : > { %v6332_v59 = vor.u32 %v6947_v57, %v6331_v56  ;;  %v6352_v1 = vor.u32 %v6949_v63, %v6349_v0  ;;  %v6565_v57 = vld [vmem:[#allocation6 + $0x1d8] sm:$0xf0]  ;;  %v6484_v47 = vor.u32 %v6984_v44, %v6483_v43 }
  0xba   : > { %v605_v12 = vmax.f32 %v589_v3, 0.0  ;;  %v606_v16 = vmax.f32 %v602_v8, 0.0  ;;  %1263 = vmatpush.bf16.msrb.mxu2 %v6348_v54  ;;  %v6333_v3 = vld [vmem:[#allocation6 + $0x10] sm:$0xf0]  ;;  %v6452_v8 = vor.u32 %v6976_v6, %v6451_v5  ;;  %v7004_v54 = vld [vmem:[#allocation6 + $0x1d4] sm:$0xf0] }
  0xbb   : > { %v6336_v4 = vor.u32 %v6945_v2, %v6333_v3  ;;  %v6564_v56 = vor.u32 %v7004_v54, %v6563_v53  ;;  %v6389_v63 = vld [vmem:[#allocation6 + $0x78] sm:$0xf0]  ;;  %v7000_v2 = vld [vmem:[#allocation6 + $0x1b4] sm:$0xf0]  ;;  %v6998_v3 = vld [vmem:[#allocation6 + $0x1ac] sm:$0xf] }
  0xbc   : > { %v607_v18 = vpack.c.bf16 %v605_v12, %v605_v12  ;;  %v608_v23 = vpack.c.bf16 %v606_v16, %v606_v16  ;;  %v6456_v12 = vor.u32 %v6974_v7, %v6453_v9  ;;  %v6496_v16 = vor.u32 %v6985_v14, %v6493_v15  ;;  %v6549_v5 = vld [vmem:[#allocation6 + $0x1b8] sm:$0xf0]  ;;  %v6371_v7 = vld [vmem:[#allocation6 + $0x48] sm:$0xf]  ;;  %v6954_v9 = vld [vmem:[#allocation6 + $0x4c] sm:$0xf] }
  0xbd   : > { %v6392_v0 = vor.u32 %v6958_v61, %v6389_v63  ;;  %v6552_v6 = vor.u32 %v6998_v3, %v6549_v5  ;;  %v6996_v14 = vld [vmem:[#allocation6 + $0x194] sm:$0xf0]  ;;  %v6994_v15 = vld [vmem:[#allocation6 + $0x18c] sm:$0xf]  ;;  %v6485_v48 = vld [vmem:[#allocation6 + $0x138] sm:$0xf0] }
  0xbe   : > { %815 = vmatmul.bf16.vlgmr.msra.gmra.mxu2 %v607_v18  ;;  %828 = vmatmul.bf16.vlgmr.msrb.gmra.mxu0 %v608_v23  ;;  %v6980_v53 = vld [vmem:[#allocation6 + $0x114] sm:$0xf0]  ;;  %v6978_v54 = vld [vmem:[#allocation6 + $0x10c] sm:$0xf] }
  0xbf   : > { %854 = vmatmul.bf16.vlgmr.msrb.gmra.mxu1 %v608_v23  ;;  %v590_v31 = vpop.f32.mrf.mxu0  ;;  %v603_v34 = vpop.f32.mrf.mxu1  ;;  %1283 = vmatpush.bf16.msrb.mxu0 %v6448_v19  ;;  %v6970_v19 = vld [vmem:[#allocation6 + $0xcc] sm:$0xf]  ;;  %v6983_v23 = vld [vmem:[#allocation6 + $0x12c] sm:$0xf0] }
  0xc0   : > { %1264 = vmatpush.bf16.msrb.mxu2 %v6332_v59  ;;  %1301 = vmatpush.bf16.msra.mxu1 %v6496_v16  ;;  %v6440_v24 = vor.u32 %v6970_v19, %v6437_v21  ;;  %v6476_v25 = vor.u32 %v6983_v23, %v6475_v22  ;;  %v6966_v31 = vld [vmem:[#allocation6 + $0xac] sm:$0xf]  ;;  %v6459_v34 = vld [vmem:[#allocation6 + $0x100] sm:$0xf]  ;;  %v6387_v59 = vld [vmem:[#allocation6 + $0x68] sm:$0xf]  ;;  %v6532_v16 = vor.u32 %v6996_v14, %v6531_v13 }
  0xc1   : > { %v6424_v36 = vor.u32 %v6966_v31, %v6421_v33  ;;  %v6355_v19 = vld [vmem:[#allocation6 + $0x28] sm:$0xf]  ;;  %v6950_v21 = vld [vmem:[#allocation6 + $0x2c] sm:$0xf]  ;;  %v6357_v23 = vld [vmem:[#allocation6 + $0x38] sm:$0xf0] }
  0xc2   : > { %1276 = vmatpush.bf16.msra.mxu3 %v6476_v25  ;;  %v6515_v25 = vld [vmem:[#allocation6 + $0x168] sm:$0xf]  ;;  %v6946_v33 = vld [vmem:[#allocation6 + $0xc] sm:$0xf] }
  0xc3   : > { %1284 = vmatpush.bf16.msrb.mxu0 %v6432_v35  ;;  %v6979_v35 = vld [vmem:[#allocation6 + $0x10c] sm:$0xf0]  ;;  %v6339_v31 = vld [vmem:[#allocation6 + $0x8] sm:$0xf] }
  0xc4   : > { %1309 = vmatpush.bf16.msra.mxu2 %v6452_v8  ;;  %1302 = vmatpush.bf16.msra.mxu1 %v6480_v28  ;;  %v6460_v37 = vor.u32 %v6979_v35, %v6459_v34  ;;  %v6956_v8 = vld [vmem:[#allocation6 + $0x54] sm:$0xf0]  ;;  %v6516_v28 = vor.u32 %v6992_v26, %v6515_v25  ;;  %v6341_v35 = vld [vmem:[#allocation6 + $0x18] sm:$0xf0] }
  0xc5   : > { %v6372_v10 = vor.u32 %v6956_v8, %v6371_v7  ;;  %v6344_v38 = vor.u32 %v6946_v33, %v6341_v35 }
  0xc6   : > { %1277 = vmatpush.bf16.msra.mxu3 %v6460_v37  ;;  %v6988_v37 = vld [vmem:[#allocation6 + $0x154] sm:$0xf0] }
  0xc7   : > { %1285 = vmatpush.bf16.msrb.mxu0 %v6416_v45  ;;  %v6580_v45 = vor.u32 %v7008_v42, %v6579_v40  ;;  %v6986_v40 = vld [vmem:[#allocation6 + $0x14c] sm:$0xf] }
  0xc8   : > { %1303 = vmatpush.bf16.msra.mxu1 %v6464_v41  ;;  %v6501_v41 = vld [vmem:[#allocation6 + $0x158] sm:$0xf0] }
  0xc9   : > { %v6504_v42 = vor.u32 %v6986_v40, %v6501_v41 }
  0xca   : > { %1322 = vmatpush.bf16.msrb.mxu3 %v6580_v45  ;;  %v6982_v45 = vld [vmem:[#allocation6 + $0x12c] sm:$0xf] }
  0xcb   : > { %1286 = vmatpush.bf16.msrb.mxu0 %v6400_v52  ;;  %v6408_v52 = vor.u32 %v6962_v49, %v6405_v51  ;;  %v6467_v49 = vld [vmem:[#allocation6 + $0x108] sm:$0xf] }
  0xcc   : > { %1348 = vmatpush.bf16.msrb.mxu1 %v6584_v46  ;;  %v641_v46 = vld [vmem:[#allocation4] sm:$0x3] }
  0xcd   : > { %v804_v3 = vperm.slane %v641_v46, 1 }
  0xce   : > { %841 = vmatmul.bf16.vlgmr.msra.gmra.mxu0 %v607_v18  ;;  %v6972_v18 = vld [vmem:[#allocation6 + $0xd4] sm:$0xf0]  ;;  %1323 = vmatpush.bf16.msrb.mxu3 %v6564_v56  ;;  %v803_v56 = vperm.slane %v641_v46, 0 }
  0xcf   : > { %1287 = vmatpush.bf16.msrb.mxu0 %v6384_v58  ;;  %v6436_v20 = vor.u32 %v6972_v18, %v6435_v17  ;;  %v6568_v58 = vor.u32 %v7002_v55, %v6565_v57  ;;  %v6533_v17 = vld [vmem:[#allocation6 + $0x198] sm:$0xf0]  ;;  %v6468_v57 = vor.u32 %v6980_v53, %v6467_v49 }
  0xd0   : > { %v6536_v18 = vor.u32 %v6994_v15, %v6533_v17  ;;  %v6469_v55 = vld [vmem:[#allocation6 + $0x118] sm:$0xf0] }
  0xd1   : > { %1310 = vmatpush.bf16.msra.mxu2 %v6436_v20  ;;  %1349 = vmatpush.bf16.msrb.mxu1 %v6568_v58  ;;  %v6952_v20 = vld [vmem:[#allocation6 + $0x34] sm:$0xf0]  ;;  %v6472_v58 = vor.u32 %v6978_v54, %v6469_v55 }
  0xd2   : > { %v6356_v22 = vor.u32 %v6952_v20, %v6355_v19 }
  0xd3   : > { %1288 = vmatpush.bf16.msrb.mxu0 %v6368_v62  ;;  %v6388_v62 = vor.u32 %v6960_v60, %v6387_v59 }
  0xd5   : > { %1311 = vmatpush.bf16.msra.mxu2 %v6420_v32  ;;  %1350 = vmatpush.bf16.msrb.mxu1 %v6552_v6  ;;  %v6948_v32 = vld [vmem:[#allocation6 + $0x14] sm:$0xf0] }
  0xd6   : > { %v6340_v34 = vor.u32 %v6948_v32, %v6339_v31 }
  0xd7   : > { %1289 = vmatpush.bf16.msrb.mxu0 %v6352_v1  ;;  %v6547_v1 = vld [vmem:[#allocation6 + $0x1a8] sm:$0xf] }
  0xd9   : > { %1312 = vmatpush.bf16.msra.mxu2 %v6404_v50  ;;  %1351 = vmatpush.bf16.msrb.mxu1 %v6536_v18 }
  0xdb   : > { %1290 = vmatpush.bf16.msrb.mxu0 %v6336_v4  ;;  %v6548_v4 = vor.u32 %v7000_v2, %v6547_v1 }
  0xdd   : > { %1313 = vmatpush.bf16.msra.mxu2 %v6388_v62  ;;  %1324 = vmatpush.bf16.msrb.mxu3 %v6548_v4 }
  0xde   : > { %1352 = vmatpush.bf16.msrb.mxu1 %v6520_v30 }
  0xdf   : > { %1335 = vmatpush.bf16.msra.mxu0 %v6456_v12  ;;  %v6376_v12 = vor.u32 %v6954_v9, %v6373_v11 }
  0xe1   : > { %1314 = vmatpush.bf16.msra.mxu2 %v6372_v10  ;;  %1325 = vmatpush.bf16.msrb.mxu3 %v6532_v16 }
  0xe2   : > { %1353 = vmatpush.bf16.msrb.mxu1 %v6504_v42 }
  0xe3   : > { %1336 = vmatpush.bf16.msra.mxu0 %v6440_v24  ;;  %v6360_v24 = vor.u32 %v6950_v21, %v6357_v23 }
  0xe5   : > { %1315 = vmatpush.bf16.msra.mxu2 %v6356_v22  ;;  %1326 = vmatpush.bf16.msrb.mxu3 %v6516_v28 }
  0xe7   : > { %1337 = vmatpush.bf16.msra.mxu0 %v6424_v36  ;;  %v6499_v36 = vld [vmem:[#allocation6 + $0x148] sm:$0xf] }
  0xe8   : > { %v6500_v39 = vor.u32 %v6988_v37, %v6499_v36 }
  0xe9   : > { %1316 = vmatpush.bf16.msra.mxu2 %v6340_v34 }
  0xea   : > { %1327 = vmatpush.bf16.msrb.mxu3 %v6500_v39 }
  0xeb   : > { %1338 = vmatpush.bf16.msra.mxu0 %v6408_v52  ;;  %v6488_v52 = vor.u32 %v6982_v45, %v6485_v48 }
  0xed   : > { %1354 = vmatpush.bf16.msrb.mxu1 %v6488_v52 }
  0xee   : > { %1328 = vmatpush.bf16.msrb.mxu3 %v6484_v47 }
  0xef   : > { %1339 = vmatpush.bf16.msra.mxu0 %v6392_v0 }
  0xf1   : > { %1355 = vmatpush.bf16.msrb.mxu1 %v6472_v58 }
  0xf2   : > { %1329 = vmatpush.bf16.msrb.mxu3 %v6468_v57  ;;  %v7589_v57 = vmov 0  }
  0xf3   : > { %1340 = vmatpush.bf16.msra.mxu0 %v6376_v12  ;;  %v927_v12 = vld [vmem:[#allocation7] sm:$0xf]  ;;  %v7799_v58 = vrot.slane %v7589_v57, 7 }
  0xf4   : > { %v1250_v14 = vperm.slane %v927_v12, 1  ;;  %v1249_v16 = vperm.slane %v927_v12, 0  ;;  %v1252_v32 = vperm.slane %v927_v12, 3  ;;  %v1251_v35 = vperm.slane %v927_v12, 2 }
  0xf7   : > { %1341 = vmatpush.bf16.msra.mxu0 %v6360_v24 }
  0xfb   : > { %1342 = vmatpush.bf16.msra.mxu0 %v6344_v38 }
 0x13b   : > { %v829_v50 = vpop.f32.mrf.mxu0 }
 0x13c   : > { %v855_v51 = vpop.f32.mrf.mxu1 }
 0x141   : > { %v816_v59 = vpop.f32.mrf.mxu2 }
 0x142   : > { %v817_v60 = vadd.f32 %v816_v59, %v803_v56 }
 0x143   : > { %v831_v62 = vpop.f32.mrf.mxu0 }
 0x144   : > { %v830_v61 = vadd.f32 %v829_v50, %v817_v60  ;;  %v857_v63 = vpop.f32.mrf.mxu1  ;;  %v7809_v60 = vsel %vm7802_vm6, 0, %v7799_v58 }
 0x145   : > { %10640 = vst [vmem:[#allocation20_spill] sm:$0xff] %v7809_v60  ;;  %v7819_v62 = vsel %vm7812_vm7, %v7809_v60, 0 }
 0x146   : > { %v859_v0 = vmax.f32 %v830_v61, 0.0  ;;  %1649 = vst [vmem:[#allocation1] ss:$4 sm:$0xff] %v7819_v62 }
 0x148   : > { %v861_v1 = vpack.c.bf16 %v859_v0, %v859_v0 }
 0x149   : > { %v818_v2 = vpop.f32.mrf.mxu2 }
 0x14a   : > { %1265 = vmatmul.bf16.vlgmr.msrb.gmra.mxu2 %v861_v1  ;;  %1291 = vmatmul.bf16.vlgmr.msrb.gmra.mxu0 %v861_v1 }
 0x14b   : > { %v842_v4 = vpop.f32.mrf.mxu0 }
 0x14c   : > { %v843_v5 = vadd.f32 %v842_v4, %v804_v3 }
 0x14e   : > { %v856_v6 = vadd.f32 %v855_v51, %v843_v5 }
 0x150   : > { %v860_v7 = vmax.f32 %v856_v6, 0.0 }
 0x152   : > { %v862_v8 = vpack.c.bf16 %v860_v7, %v860_v7 }
 0x153   : > { %v844_v9 = vpop.f32.mrf.mxu0 }
 0x154   : > { %1278 = vmatmul.bf16.vlgmr.msra.gmra.mxu3 %v862_v8  ;;  %1304 = vmatmul.bf16.vlgmr.msra.gmra.mxu1 %v862_v8 }
 0x15a   : > { %1317 = vmatmul.bf16.vlgmr.msra.gmra.mxu2 %v861_v1  ;;  %1343 = vmatmul.bf16.vlgmr.msra.gmra.mxu0 %v861_v1 }
 0x164   : > { %1330 = vmatmul.bf16.vlgmr.msrb.gmra.mxu3 %v862_v8  ;;  %1356 = vmatmul.bf16.vlgmr.msrb.gmra.mxu1 %v862_v8 }
 0x1c7   : > { %v1292_v10 = vpop.f32.mrf.mxu0 }
 0x1c8   : > { %v1293_v17 = vadd.f32 %v1292_v10, %v1250_v14 }
 0x1cd   : > { %v1266_v11 = vpop.f32.mrf.mxu2 }
 0x1ce   : > { %v1267_v19 = vadd.f32 %v1266_v11, %v1249_v16 }
 0x1cf   : > { %v1294_v13 = vpop.f32.mrf.mxu0 }
 0x1d1   : > { %v1305_v15 = vpop.f32.mrf.mxu1 }
 0x1d2   : > { %v1306_v20 = vadd.f32 %v1305_v15, %v1293_v17 }
 0x1d4   : > { %v1362_v25 = vmax.f32 %v1306_v20, 0.0 }
 0x1d5   : > { %v1268_v18 = vpop.f32.mrf.mxu2 }
 0x1d7   : > { %v1344_v21 = vpop.f32.mrf.mxu0  ;;  %v1279_v22 = vpop.f32.mrf.mxu3 }
 0x1d8   : > { %v1280_v23 = vadd.f32 %v1279_v22, %v1267_v19  ;;  %v1345_v37 = vadd.f32 %v1344_v21, %v1252_v32 }
 0x1d9   : > { %v1307_v24 = vpop.f32.mrf.mxu1 }
 0x1da   : > { %v1361_v26 = vmax.f32 %v1280_v23, 0.0 }
 0x1dc   : > { %v7777_v27 = vpack.c.bf16 %v1362_v25, %v1361_v26 }
 0x1dd   : > { %v1318_v28 = vpop.f32.mrf.mxu2 }
 0x1de   : > { %1401 = vrot.lane.b32.xlu1 %v7777_v27, %s7586_s22  ;;  %1398 = vrot.lane.b32.xlu0 %v7777_v27, %s7587_s26  ;;  %v1368_v30 = vunpack.c.l.b16 %v7777_v27  ;;  %v1319_v39 = vadd.f32 %v1318_v28, %v1251_v35  ;;  %v1396_v12 = vrot.slane %v7777_v27, 4 }
 0x1df   : > { %v1346_v29 = vpop.f32.mrf.mxu0  ;;  %v1281_v31 = vpop.f32.mrf.mxu3 }
 0x1e0   : > { %v1369_v33 = vpack.c.b16 %v1368_v30, %v1368_v30 }
 0x1e1   : > { %v1357_v34 = vpop.f32.mrf.mxu1 }
 0x1e2   : > { %v1376_v36 = vrot.slane %v1369_v33, 7  ;;  %v1358_v40 = vadd.f32 %v1357_v34, %v1345_v37  ;;  %v1371_v49 = vshll.u32 %v1369_v33, 16  ;;  %v1552_v37 = vshrl.u32 %v7819_v62, 16 }
 0x1e4   : > { %1377 = vrot.lane.b32.xlu2 %v1376_v36, %s7586_s22  ;;  %v1364_v44 = vmax.f32 %v1358_v40, 0.0  ;;  %v1379_v54 = vrot.slane %v1371_v49, 7 }
 0x1e5   : > { %v1320_v38 = vpop.f32.mrf.mxu2 }
 0x1e6   : > { %1404 = vrot.lane.b32.xlu0 %v7777_v27, %s7588_s14  ;;  %v1555_v38 = vshll.u32 %v7819_v62, 16 }
 0x1e7   : > { %v1331_v41 = vpop.f32.mrf.mxu3 }
 0x1e8   : > { %v1332_v42 = vadd.f32 %v1331_v41, %v1319_v39 }
 0x1e9   : > { %v1359_v43 = vpop.f32.mrf.mxu1 }
 0x1ea   : > { %v1363_v45 = vmax.f32 %v1332_v42, 0.0 }
 0x1ec   : > { %v7787_v46 = vpack.c.bf16 %v1364_v44, %v1363_v45  ;;  %v1541_v45 = vrot.slane %v7819_v62, 2 }
 0x1ee   : > { %v1430_v47 = vunpack.c.l.b16 %v7787_v46 }
 0x1ef   : > { %v1333_v48 = vpop.f32.mrf.mxu3 }
 0x1f0   : > { %v1431_v50 = vpack.c.b16 %v1430_v47, %v1430_v47  ;;  %v1554_v47 = vrot.slane %v1552_v37, 6 }
 0x1f2   : > { %v1438_v51 = vrot.slane %v1431_v50, 7  ;;  %v1433_v52 = vshll.u32 %v1431_v50, 16 }
 0x1f4   : > { %1439 = vrot.lane.b32.xlu2 %v1438_v51, %s7586_s22  ;;  %v7162_v53 = vpack.i.bf16 %v1433_v52, %v1371_v49  ;;  %v1441_v55 = vrot.slane %v1433_v52, 7  ;;  %v1557_v51 = vrot.slane %v1555_v38, 7 }
 0x1f6   : > { %7163 = vrot.lane.b32.xlu1 %v7162_v53, %s7587_s26  ;;  %v7167_v56 = vpack.i.bf16 %v1441_v55, %v1379_v54 }
 0x1f8   : > { %7168 = vrot.lane.b32.xlu0 %v7167_v56, %s7588_s14 }
 0x1fc   : > { %1459 = vrot.lane.b32.xlu2 %v7787_v46, %s7588_s14 }
 0x1fe   : > { %1453 = vrot.lane.b32.xlu1 %v7787_v46, %s7587_s26 }
 0x200   : > { %1456 = vrot.lane.b32.xlu0 %v7787_v46, %s7586_s22 }
 0x23e   : > { %v1378_v6 = vpop.permute.xlu2 %1377 }
 0x24e   : > { %v1440_v17 = vpop.permute.xlu2 %1439 }
 0x250   : > { %v1402_v63 = vpop.permute.xlu1 %1401  ;;  %v1399_v0 = vpop.permute.xlu0 %1398 }
 0x251   : > { %v1400_v1 = vrot.slane %v1399_v0, 4  ;;  %v1403_v2 = vrot.slane %v1402_v63, 4 }
 0x253   : > { %v1407_v3 = vunpack.c.l.b16 %v1400_v1  ;;  %v1413_v4 = vunpack.c.l.b16 %v1403_v2 }
 0x255   : > { %v1408_v5 = vpack.c.b16 %v1407_v3, %v1407_v3  ;;  %v1414_v9 = vpack.c.b16 %v1413_v4, %v1413_v4  ;;  %v1561_v3 = vshll.u32 %v1541_v45, 16 }
 0x256   : > { %v1460_v30 = vpop.permute.xlu2 %1459 }
 0x257   : > { %v1410_v10 = vshll.u32 %v1408_v5, 16  ;;  %v1415_v14 = vrot.slane %v1414_v9, 7  ;;  %v1461_v39 = vrot.slane %v1460_v30, 4  ;;  %v1558_v9 = vor.u32 %v1557_v51, %v1554_v47 }
 0x258   : > { %v1405_v7 = vpop.permute.xlu0 %1404 }
 0x259   : > { %v1406_v8 = vrot.slane %v1405_v7, 4  ;;  %v1423_v15 = vsel %vm7802_vm6, %v1396_v12, %v1410_v10  ;;  %v1471_v50 = vunpack.c.l.b16 %v1461_v39 }
 0x25a   : > { %v1426_v20 = vsel %vm1383_vm2, %v1423_v15, %v1415_v14 }
 0x25b   : > { %v1416_v11 = vunpack.c.l.b16 %v1406_v8  ;;  %v1472_v5 = vpack.c.b16 %v1471_v50, %v1471_v50 }
 0x25d   : > { %v1417_v13 = vpack.c.b16 %v1416_v11, %v1416_v11 }
 0x25f   : > { %v1419_v16 = vshll.u32 %v1417_v13, 16 }
 0x261   : > { %v1421_v19 = vrot.slane %v1419_v16, 7 }
 0x263   : > { %v1428_v21 = vsel %vm7826_vm10, %v1426_v20, %v1421_v19 }
 0x264   : > { %v1499_v22 = vshrl.u32 %v1428_v21, 16  ;;  %v1502_v24 = vshll.u32 %v1428_v21, 16 }
 0x266   : > { %v1501_v23 = vrot.slane %v1499_v22, 7 }
 0x268   : > { %v1504_v25 = vor.u32 %v1502_v24, %v1501_v23  ;;  %v7164_v26 = vpop.permute.xlu1 %7163  ;;  %v1474_v23 = vshll.u32 %v1472_v5, 16  ;;  %v1563_v24 = vrot.slane %v1561_v3, 7 }
 0x269   : > { %v7166_v28 = vunpack.i.h.bf16 %v7164_v26  ;;  %v7165_v29 = vunpack.i.l.bf16 %v7164_v26 }
 0x26a   : > { %v1526_v31 = vsel %vm7802_vm6, 0, %v1504_v25  ;;  %v7169_v32 = vpop.permute.xlu0 %7168 }
 0x26b   : > { %v7837_v33 = vsel %vm7812_vm7, %v1526_v31, 0  ;;  %v1445_v34 = vsel %vm7802_vm6, %v7787_v46, %v7166_v28  ;;  %v1386_v35 = vsel %vm7802_vm6, %v7777_v27, %v7165_v29  ;;  %v7171_v36 = vunpack.i.h.bf16 %v7169_v32 }
 0x26c   : > { %1653 = vst [vmem:[#allocation1 + $0x2] ss:$4 sm:$0xff] %v7837_v33  ;;  %v1390_v40 = vsel %vm1383_vm2, %v1386_v35, %v1378_v6  ;;  %v1448_v41 = vsel %vm1383_vm2, %v1445_v34, %v1440_v17  ;;  %v7170_v42 = vunpack.i.l.bf16 %v7169_v32  ;;  %v1451_v27 = vrot.slane %v7787_v46, 4 }
 0x26d   : > { %v1450_v43 = vsel %vm7826_vm10, %v1448_v41, %v7171_v36  ;;  %v1580_v54 = vshrl.u32 %v7837_v33, 16  ;;  %v1583_v55 = vshll.u32 %v7837_v33, 16  ;;  %v1543_v19 = vrot.slane %v7837_v33, 2 }
 0x26e   : > { %v1395_v44 = vsel %vm7826_vm10, %v1390_v40, %v7170_v42  ;;  %v1506_v48 = vshrl.u32 %v1450_v43, 16  ;;  %v1509_v57 = vshll.u32 %v1450_v43, 16  ;;  %v1559_v32 = vrot.slane %v1558_v9, 2 }
 0x26f   : > { %v1492_v52 = vshrl.u32 %v1395_v44, 16  ;;  %v1495_v1 = vshll.u32 %v1395_v44, 16  ;;  %v1582_v10 = vrot.slane %v1580_v54, 6  ;;  %v1585_v11 = vrot.slane %v1583_v55, 7 }
 0x270   : > { %v1454_v49 = vpop.permute.xlu1 %1453  ;;  %v1508_v56 = vrot.slane %v1506_v48, 7  ;;  %v1589_v37 = vshll.u32 %v1543_v19, 16  ;;  %v1476_v44 = vrot.slane %v1474_v23, 7 }
 0x271   : > { %v1455_v53 = vrot.slane %v1454_v49, 4  ;;  %v1494_v0 = vrot.slane %v1492_v52, 7  ;;  %v1586_v28 = vor.u32 %v1585_v11, %v1582_v10  ;;  %v7900_v49 = vsel %vm7894_vm0, %v1559_v32, %v1563_v24 }
 0x272   : > { %v1457_v63 = vpop.permute.xlu0 %1456  ;;  %v1511_v4 = vor.u32 %v1509_v57, %v1508_v56  ;;  %v1591_v51 = vrot.slane %v1589_v37, 7  ;;  %v6587_v11 = vrot.slane %v7837_v33, 9  ;;  %v7026_v37 = vld [vmem:[#allocation9 + $0x88] sm:$0xff] }
 0x273   : > { %v1462_v46 = vunpack.c.l.b16 %v1455_v53  ;;  %v1458_v2 = vrot.slane %v1457_v63, 4  ;;  %v1497_v6 = vor.u32 %v1495_v1, %v1494_v0  ;;  %v1587_v47 = vrot.slane %v1586_v28, 2  ;;  %1950 = vmatpush.bf16.msrb.mxu0 %v7026_v37 }
 0x274   : > { %v1527_v12 = vsel %vm7802_vm6, 0, %v1511_v4  ;;  %v6585_v1 = vrot.slane %v7819_v62, 9 }
 0x275   : > { %v1463_v7 = vpack.c.b16 %v1462_v46, %v1462_v46  ;;  %v1468_v8 = vunpack.c.l.b16 %v1458_v2  ;;  %v7864_v13 = vsel %vm7812_vm7, %v1527_v12, 0  ;;  %v1525_v14 = vsel %vm7802_vm6, 0, %v1497_v6 }
 0x276   : > { %v1544_v20 = vrot.slane %v7864_v13, 2  ;;  %v1594_v21 = vshrl.u32 %v7864_v13, 16  ;;  %v1597_v22 = vshll.u32 %v7864_v13, 16  ;;  %1655 = vst [vmem:[#allocation1 + $0x3] ss:$4 sm:$0xff] %v7864_v13  ;;  %v7881_v25 = vsel %vm7812_vm7, %v1525_v14, 0 }
 0x277   : > { %v1465_v15 = vshll.u32 %v1463_v7, 16  ;;  %v1469_v16 = vpack.c.b16 %v1468_v8, %v1468_v8  ;;  %1651 = vst [vmem:[#allocation1 + $0x1] ss:$4 sm:$0xff] %v7881_v25  ;;  %v1542_v34 = vrot.slane %v7881_v25, 2  ;;  %v1566_v35 = vshrl.u32 %v7881_v25, 16 }
 0x278   : > { %v1596_v29 = vrot.slane %v1594_v21, 6  ;;  %v1599_v30 = vrot.slane %v1597_v22, 7  ;;  %v1569_v36 = vshll.u32 %v7881_v25, 16  ;;  %v1603_v39 = vshll.u32 %v1544_v20, 16 }
 0x279   : > { %v1470_v26 = vrot.slane %v1469_v16, 7  ;;  %v1478_v31 = vsel %vm7802_vm6, %v1451_v27, %v1465_v15  ;;  %v1568_v40 = vrot.slane %v1566_v35, 6  ;;  %v1575_v42 = vshll.u32 %v1542_v34, 16  ;;  %v7011_v27 = vld [vmem:[#allocation9 + $0x10] sm:$0xff] }
 0x27a   : > { %v1600_v38 = vor.u32 %v1599_v30, %v1596_v29  ;;  %v1571_v41 = vrot.slane %v1569_v36, 7  ;;  %v1605_v52 = vrot.slane %v1603_v39, 7  ;;  %v7908_v57 = vsel %vm7894_vm0, %v1587_v47, %v1591_v51  ;;  %v7010_v47 = vld [vmem:[#allocation9 + $0x8] sm:$0xff] }
 0x27b   : > { %v1481_v43 = vsel %vm1383_vm2, %v1478_v31, %v1470_v26  ;;  %v1577_v55 = vrot.slane %v1575_v42, 7  ;;  %v1615_v46 = vrot.slane %v1541_v45, 7  ;;  %v1619_v4 = vrot.slane %v1542_v34, 7  ;;  %v7022_v51 = vld [vmem:[#allocation9 + $0x68] sm:$0xff] }
 0x27c   : > { %v1601_v48 = vrot.slane %v1600_v38, 2  ;;  %v1572_v50 = vor.u32 %v1571_v41, %v1568_v40  ;;  %v1483_v53 = vsel %vm7826_vm10, %v1481_v43, %v1476_v44  ;;  %vm7924_vm10 = vmor %vm1610_vm8, %vm1611_vm9  ;;  %v1623_v7 = vrot.slane %v1543_v19, 7  ;;  %v7025_v38 = vld [vmem:[#allocation9 + $0x80] sm:$0xff]  ;;  %v7012_v44 = vld [vmem:[#allocation9 + $0x18] sm:$0xff] }
 0x27d   : > { %v1513_v0 = vshrl.u32 %v1483_v53, 16  ;;  %v1516_v5 = vshll.u32 %v1483_v53, 16  ;;  %v7930_v6 = vsel %vm7924_vm10, %v6585_v1, %v1615_v46  ;;  %v1627_v8 = vrot.slane %v1544_v20, 7  ;;  %1951 = vmatpush.bf16.msrb.mxu0 %v7025_v38  ;;  %v7013_v43 = vld [vmem:[#allocation9 + $0x20] sm:$0xff]  ;;  %v7020_v53 = vld [vmem:[#allocation9 + $0x58] sm:$0xff]  ;;  %vm8084_vm8 = vmor %vm1529_vm4, %vm2477_vm5 }
 0x27e   : > { %v1573_v54 = vrot.slane %v1572_v50, 2  ;;  %v7904_v56 = vld.sshfl [vmem:[#allocation1] sm:$0xff pattern:$0x73625140]  ;;  %v7912_v63 = vsel %vm7894_vm0, %v1601_v48, %v1605_v52  ;;  %v6586_v9 = vrot.slane %v7881_v25, 9  ;;  %v6588_v45 = vrot.slane %v7864_v13, 9 }
 0x27f   : > { %1658 = vst [vmem:[#allocation1] ss:$4 sm:$0xff] %v7900_v49  ;;  %v1515_v2 = vrot.slane %v1513_v0, 7  ;;  %v1624_v15 = vsel %vm7924_vm10, %v6587_v11, %v1623_v7  ;;  %v7009_v48 = vld [vmem:[#allocation9] sm:$0xff]  ;;  %v7023_v50 = vld [vmem:[#allocation9 + $0x70] sm:$0xff] }
 0x280   : > { %v1578_v18 = vsel %vm7894_vm0, %v1573_v54, %v1577_v55  ;;  %1664 = vst [vmem:[#allocation1 + $0x2] ss:$4 sm:$0xff] %v7908_v57  ;;  %v1620_v14 = vsel %vm7924_vm10, %v6586_v9, %v1619_v4  ;;  %v1628_v16 = vsel %vm7924_vm10, %v6588_v45, %v1627_v8  ;;  %v7021_v52 = vld [vmem:[#allocation9 + $0x60] sm:$0xff]  ;;  %v7019_v55 = vld [vmem:[#allocation9 + $0x50] sm:$0xff]  ;;  %vm2362_vm4 = vsmask.f32 3328 }
 0x281   : > { %1661 = vst [vmem:[#allocation1 + $0x1] ss:$4 sm:$0xff] %v1578_v18  ;;  %v1518_v10 = vor.u32 %v1516_v5, %v1515_v2  ;;  %v7017_v2 = vld [vmem:[#allocation9 + $0x40] sm:$0xff]  ;;  %v7172_v9 = vld [vmem:[%s10549_s8] ss:$0 sm:$0xff] }
 0x282   : > { %1667 = vst [vmem:[#allocation1 + $0x3] ss:$4 sm:$0xff] %v7912_v63  ;;  %vm2363_vm9 = vsmask.f32 7440 }
 0x283   : > { %v1528_v17 = vsel %vm7802_vm6, 0, %v1518_v10 }
 0x284   : > { %v1536_v19 = vsel %vm7812_vm7, %v1528_v17, 0  ;;  %vm1749_vm7 = vcmask 261120  }
 0x285   : > { %v1632_v20 = vshrl.u32 %v1536_v19, 16  ;;  %v1635_v21 = vshll.u32 %v1536_v19, 16  ;;  %v1630_v26 = vrot.slane %v1536_v19, 2  ;;  %v6589_v35 = vrot.slane %v1536_v19, 9 }
 0x287   : > { %v1634_v23 = vrot.slane %v1632_v20, 6  ;;  %v1637_v24 = vrot.slane %v1635_v21, 7  ;;  %v1641_v29 = vshll.u32 %v1630_v26, 16  ;;  %v1647_v32 = vrot.slane %v1630_v26, 7 }
 0x289   : > { %v1668_v12 = vld.sshfl [vmem:[#allocation1] sm:$0xff pattern:$0x73625140]  ;;  %v1638_v28 = vor.u32 %v1637_v24, %v1634_v23  ;;  %v1643_v31 = vrot.slane %v1641_v29, 7  ;;  %v1648_v36 = vsel %vm7924_vm10, %v6589_v35, %v1647_v32  ;;  %vm8151_vm10 = vmor %vm2362_vm4, %vm2363_vm9 }
 0x28a   : > { %1673 = vst [vmem:[#allocation1] ss:$4 sm:$0xff] %v7930_v6  ;;  %1670 = vrot.lane.b32.xlu1 %v1668_v12, %s7588_s14 }
 0x28b   : > { %1676 = vst [vmem:[#allocation1 + $0x1] ss:$4 sm:$0xff] %v1620_v14  ;;  %v1639_v30 = vrot.slane %v1638_v28, 2 }
 0x28c   : > { %1679 = vst [vmem:[#allocation1 + $0x2] ss:$4 sm:$0xff] %v1624_v15 }
 0x28d   : > { %1682 = vst [vmem:[#allocation1 + $0x3] ss:$4 sm:$0xff] %v1628_v16 }
 0x294   : > { %v1683_v22 = vld.sshfl [vmem:[#allocation1] sm:$0xff pattern:$0x73625140] }
 0x295   : > { %1687 = vst [vmem:[#allocation1] ss:$4 sm:$0xff] %v7881_v25  ;;  %1685 = vrot.lane.b32.xlu2 %v1683_v22, %s7586_s22  ;;  %v1644_v25 = vsel %vm7894_vm0, %v1639_v30, %v1643_v31  ;;  %vm2311_vm0 = vsmask.f32 4352 }
 0x296   : > { %1689 = vst [vmem:[#allocation1 + $0x1] ss:$4 sm:$0xff] %v7837_v33  ;;  %vm8064_vm3 = vmand %vm2310_vm15, %vm2311_vm0  ;;  %vm4444_vm15 = vcmask 1046528   ;;  %vm4219_vm0 = vsmask.f32 7424 }
 0x297   : > { %1691 = vst [vmem:[#allocation1 + $0x2] ss:$4 sm:$0xff] %v7864_v13 }
 0x298   : > { %1693 = vst [vmem:[#allocation1 + $0x3] ss:$4 sm:$0xff] %v1536_v19 }
 0x29f   : > { %v1694_v61 = vld.sshfl [vmem:[#allocation1] sm:$0xff pattern:$0x73625140] }
 0x2a0   : > { %1698 = vst [vmem:[#allocation1] ss:$4 sm:$0xff] %v1578_v18  ;;  %1696 = vrot.lane.b32.xlu0 %v1694_v61, %s7587_s26  ;;  %v7018_v18 = vld [vmem:[#allocation9 + $0x48] sm:$0xff] }
 0x2a1   : > { %1700 = vst [vmem:[#allocation1 + $0x1] ss:$4 sm:$0xff] %v7908_v57 }
 0x2a2   : > { %1702 = vst [vmem:[#allocation1 + $0x2] ss:$4 sm:$0xff] %v7912_v63 }
 0x2a3   : > { %1705 = vst [vmem:[#allocation1 + $0x3] ss:$4 sm:$0xff] %v1644_v25 }
 0x2aa   : > { %v7956_v34 = vld.sshfl [vmem:[#allocation1] sm:$0xff pattern:$0x73625140] }
 0x2ab   : > { %1707 = vst [vmem:[#allocation1] ss:$4 sm:$0xff] %v1620_v14 }
 0x2ac   : > { %1709 = vst [vmem:[#allocation1 + $0x1] ss:$4 sm:$0xff] %v1624_v15 }
 0x2ad   : > { %1711 = vst [vmem:[#allocation1 + $0x2] ss:$4 sm:$0xff] %v1628_v16 }
 0x2ae   : > { %1714 = vst [vmem:[#allocation1 + $0x3] ss:$4 sm:$0xff] %v1648_v36 }
 0x2b5   : > { %v1715_v39 = vld.sshfl [vmem:[#allocation1] sm:$0xff pattern:$0x73625140] }
 0x2b6   : > { %1719 = vst [vmem:[#allocation1] ss:$4 sm:$0xff] %v7837_v33  ;;  %1717 = vrot.lane.b32.xlu1 %v1715_v39, %s7588_s14  ;;  %v7016_v33 = vld [vmem:[#allocation9 + $0x38] sm:$0xff] }
 0x2b7   : > { %1721 = vst [vmem:[#allocation1 + $0x1] ss:$4 sm:$0xff] %v7864_v13  ;;  %1916 = vmatpush.bf16.msrb.mxu2 %v7016_v33  ;;  %v7014_v13 = vld [vmem:[#allocation9 + $0x28] sm:$0xff] }
 0x2b8   : > { %1723 = vst [vmem:[#allocation1 + $0x2] ss:$4 sm:$0xff] %v1536_v19 }
 0x2b9   : > { %1725 = vst [vmem:[#allocation1 + $0x3] ss:$4 sm:$0xff] %v7819_v62  ;;  %v7015_v62 = vld [vmem:[#allocation9 + $0x30] sm:$0xff] }
 0x2bb   : > { %1917 = vmatpush.bf16.msrb.mxu2 %v7015_v62 }
 0x2bf   : > { %1918 = vmatpush.bf16.msrb.mxu2 %v7014_v13 }
 0x2c0   : > { %v1726_v40 = vld.sshfl [vmem:[#allocation1] sm:$0xff pattern:$0x73625140] }
 0x2c1   : > { %1730 = vst [vmem:[#allocation1] ss:$4 sm:$0xff] %v7908_v57  ;;  %1728 = vrot.lane.b32.xlu2 %v1726_v40, %s7586_s22 }
 0x2c2   : > { %1732 = vst [vmem:[#allocation1 + $0x1] ss:$4 sm:$0xff] %v7912_v63 }
 0x2c3   : > { %1734 = vst [vmem:[#allocation1 + $0x2] ss:$4 sm:$0xff] %v1644_v25  ;;  %1919 = vmatpush.bf16.msrb.mxu2 %v7013_v43 }
 0x2c4   : > { %1736 = vst [vmem:[#allocation1 + $0x3] ss:$4 sm:$0xff] %v7900_v49  ;;  %v7024_v49 = vld [vmem:[#allocation9 + $0x78] sm:$0xff] }
 0x2c5   : > { %1930 = vmatpush.bf16.msra.mxu3 %v7024_v49 }
 0x2c7   : > { %1920 = vmatpush.bf16.msrb.mxu2 %v7012_v44 }
 0x2c9   : > { %1931 = vmatpush.bf16.msra.mxu3 %v7023_v50 }
 0x2cb   : > { %v1737_v41 = vld.sshfl [vmem:[#allocation1] sm:$0xff pattern:$0x73625140]  ;;  %1921 = vmatpush.bf16.msrb.mxu2 %v7011_v27 }
 0x2cc   : > { %1741 = vst [vmem:[#allocation1] ss:$4 sm:$0xff] %v1624_v15  ;;  %1739 = vrot.lane.b32.xlu0 %v1737_v41, %s7587_s26 }
 0x2cd   : > { %1743 = vst [vmem:[#allocation1 + $0x1] ss:$4 sm:$0xff] %v1628_v16  ;;  %1932 = vmatpush.bf16.msra.mxu3 %v7022_v51 }
 0x2ce   : > { %1745 = vst [vmem:[#allocation1 + $0x2] ss:$4 sm:$0xff] %v1648_v36 }
 0x2cf   : > { %1747 = vst [vmem:[#allocation1 + $0x3] ss:$4 sm:$0xff] %v7930_v6  ;;  %1922 = vmatpush.bf16.msrb.mxu2 %v7010_v47 }
 0x2d1   : > { %1933 = vmatpush.bf16.msra.mxu3 %v7021_v52 }
 0x2d3   : > { %1923 = vmatpush.bf16.msrb.mxu2 %v7009_v48 }
 0x2d5   : > { %1934 = vmatpush.bf16.msra.mxu3 %v7020_v53 }
 0x2d6   : > { %v1748_v42 = vld.sshfl [vmem:[#allocation1] sm:$0xff pattern:$0x73625140] }
 0x2d7   : > { %6662 = vmatmul.msk.bf16.vlgmr.msrb.gmra.mxu0 %vm1749_vm7, %v1748_v42 }
 0x2d9   : > { %1935 = vmatpush.bf16.msra.mxu3 %v7019_v55 }
 0x2dd   : > { %1936 = vmatpush.bf16.msra.mxu3 %v7018_v18 }
 0x2e1   : > { %1937 = vmatpush.bf16.msra.mxu3 %v7017_v2 }
 0x2ef   : > { %v1686_v63 = vpop.permute.xlu2 %1685 }
 0x2fc   : > { %v1671_v54 = vpop.permute.xlu1 %1670 }
 0x2fd   : > { %v1751_v57 = vsel %vm1749_vm7, %v7904_v56, %v1671_v54 }
 0x2fe   : > { %v1754_v0 = vsel %vm1752_vm11, %v1751_v57, %v1686_v63 }
 0x312   : > { %v1697_v1 = vpop.permute.xlu0 %1696 }
 0x313   : > { %v1757_v46 = vsel %vm1755_vm12, %v1754_v0, %v1697_v1 }
 0x314   : > { %1924 = vmatmul.bf16.vlgmr.msrb.gmra.mxu2 %v1757_v46 }
 0x31b   : > { %v1729_v5 = vpop.permute.xlu2 %1728 }
 0x328   : > { %v1718_v3 = vpop.permute.xlu1 %1717 }
 0x329   : > { %v1760_v4 = vsel %vm1749_vm7, %v7956_v34, %v1718_v3 }
 0x32a   : > { %v1762_v56 = vsel %vm1752_vm11, %v1760_v4, %v1729_v5 }
 0x33e   : > { %v1740_v6 = vpop.permute.xlu0 %1739 }
 0x33f   : > { %v1764_v7 = vsel %vm1755_vm12, %v1762_v56, %v1740_v6 }
 0x340   : > { %1938 = vmatmul.bf16.vlgmr.msra.gmra.mxu3 %v1764_v7 }
 0x354   : > { %v1953_v11 = vpop.f32.mrf.mxu0 }
 0x35c   : > { %v1955_v23 = vpop.f32.mrf.mxu0 }
 0x397   : > { %v1925_v8 = vpop.f32.mrf.mxu2 }
 0x398   : > { %v1926_v10 = vadd.f32 %v7172_v9, %v1925_v8 }
 0x39f   : > { %v1927_v15 = vpop.f32.mrf.mxu2 }
 0x3a0   : > { %v1928_v17 = vadd.f32 %v7172_v9, %v1927_v15 }
 0x3c3   : > { %v1939_v12 = vpop.f32.mrf.mxu3 }
 0x3c4   : > { %v1940_v45 = vadd.f32 %v1939_v12, %v1926_v10 }
 0x3c6   : > { %v1954_v14 = vadd.f32 %v1953_v11, %v1940_v45 }
 0x3c8   : > { %v1958_v16 = vmax.f32 %v1954_v14, 0.0 }
 0x3ca   : > { %v1960_v19 = vpack.c.bf16 %v1958_v16, %v1958_v16 }
 0x3cb   : > { %v1941_v20 = vpop.f32.mrf.mxu3 }
 0x3cc   : > { %v1942_v21 = vadd.f32 %v1941_v20, %v1928_v17  ;;  %v1964_v22 = vrot.slane %v1960_v19, 3 }
 0x3ce   : > { %v1956_v24 = vadd.f32 %v1955_v23, %v1942_v21  ;;  %v1968_v26 = vsel %vm1383_vm2, %v1960_v19, %v1964_v22  ;;  %v1971_v28 = vsel %vm1970_vm13, %v1960_v19, %v1964_v22  ;;  %v1975_v29 = vsel %vm1607_vm1, %v1960_v19, %v1964_v22 }
 0x3cf   : > { %v6663_v30 = vpack.i.b16 %v1968_v26, %v1968_v26  ;;  %v1973_v61 = vrot.slane %v1971_v28, 1  ;;  %v1996_v31 = vunpack.i.h.s16 %v1968_v26  ;;  %v1977_v25 = vrot.slane %v1975_v29, 2 }
 0x3d0   : > { %v1959_v32 = vmax.f32 %v1956_v24, 0.0  ;;  %v1979_v33 = vsel %vm1978_vm14, %v1960_v19, %v1964_v22  ;;  %v2313_v22 = vsel %vm8064_vm3, %v7809_v60, 0 }
 0x3d1   : > { %v7985_v34 = vperm.slane %v6663_v30, 0  ;;  %v6664_v35 = vpack.i.b16 %v1973_v61, %v1973_v61  ;;  %v2012_v36 = vpack.i.b16 %v1996_v31, %v1996_v31  ;;  %v1998_v37 = vunpack.i.h.s16 %v1973_v61 }
 0x3d2   : > { %v1961_v38 = vpack.c.bf16 %v1959_v32, %v1959_v32  ;;  %v2000_v41 = vunpack.i.h.s16 %v1977_v25  ;;  %v6665_v43 = vpack.i.b16 %v1977_v25, %v1977_v25  ;;  %v1981_v44 = vrot.slane %v1979_v33, 3 }
 0x3d3   : > { %2059 = vrot.lane.b32.xlu1 %v7985_v34, %s7587_s26  ;;  %v7989_v39 = vperm.slane %v6664_v35, 0  ;;  %v2028_v40 = vperm.slane %v2012_v36, 0  ;;  %v7995_v13 = vpack.i.b16 %v1998_v37, %v1998_v37  ;;  %v8071_v23 = vunpack.c.l.b16 %v2313_v22 }
 0x3d4   : > { %v1965_v62 = vrot.slane %v1961_v38, 3  ;;  %v7997_v42 = vpack.i.b16 %v2000_v41, %v2000_v41  ;;  %v8005_v49 = vperm.slane %v6665_v43, 0  ;;  %v2002_v50 = vunpack.i.h.s16 %v1981_v44 }
 0x3d5   : > { %2063 = vrot.lane.b32.xlu0 %v7989_v39, %s7587_s26  ;;  %2061 = vrot.lane.b32.xlu2 %v2028_v40, %s7587_s26  ;;  %v2030_v47 = vperm.slane %v7995_v13, 0  ;;  %v6666_v53 = vpack.i.b16 %v1981_v44, %v1981_v44  ;;  %v2331_v24 = vunpack.c.h.b16 %v2313_v22  ;;  %v2346_v31 = vpack.c.b16 %v8071_v23, %v8071_v23 }
 0x3d6   : > { %v1992_v27 = vsel %vm1978_vm14, %v1961_v38, %v1965_v62  ;;  %v2032_v48 = vperm.slane %v7997_v42, 0  ;;  %v1984_v51 = vsel %vm1383_vm2, %v1961_v38, %v1965_v62  ;;  %v1986_v52 = vsel %vm1970_vm13, %v1961_v38, %v1965_v62 }
 0x3d7   : > { %v6667_v54 = vpack.i.b16 %v1984_v51, %v1984_v51  ;;  %v8014_v55 = vpack.i.b16 %v2002_v50, %v2002_v50  ;;  %v1988_v57 = vrot.slane %v1986_v52, 1  ;;  %v8016_v63 = vperm.slane %v6666_v53, 0 }
 0x3d8   : > { %v2004_v18 = vunpack.i.h.s16 %v1984_v51  ;;  %v1989_v2 = vsel %vm1607_vm1, %v1961_v38, %v1965_v62  ;;  %v1994_v14 = vrot.slane %v1992_v27, 3  ;;  %v2347_v25 = vpack.c.b16 %v2331_v24, %v2331_v24 }
 0x3d9   : > { %v8020_v0 = vperm.slane %v6667_v54, 0  ;;  %v2034_v1 = vperm.slane %v8014_v55, 0  ;;  %v2006_v46 = vunpack.i.h.s16 %v1988_v57  ;;  %v6668_v5 = vpack.i.b16 %v1988_v57, %v1988_v57 }
 0x3da   : > { %v8029_v3 = vpack.i.b16 %v2004_v18, %v2004_v18  ;;  %v1991_v56 = vrot.slane %v1989_v2, 2  ;;  %v2010_v16 = vunpack.i.h.s16 %v1994_v14  ;;  %v2481_v35 = vrot.slane %v2347_v25, 5 }
 0x3db   : > { %2065 = vrot.lane.b32.xlu1 %v2030_v47, %s7587_s26  ;;  %v8031_v4 = vpack.i.b16 %v2006_v46, %v2006_v46  ;;  %v8038_v8 = vperm.slane %v6668_v5, 0  ;;  %v6670_v33 = vpack.i.b16 %v1994_v14, %v1994_v14  ;;  %v2366_v27 = vshrl.u32 %v2346_v31, 16 }
 0x3dc   : > { %v2036_v6 = vperm.slane %v8029_v3, 0  ;;  %v2008_v9 = vunpack.i.h.s16 %v1991_v56  ;;  %v6669_v11 = vpack.i.b16 %v1991_v56, %v1991_v56  ;;  %v8058_v19 = vpack.i.b16 %v2010_v16, %v2010_v16 }
 0x3dd   : > { %2069 = vrot.lane.b32.xlu0 %v2032_v48, %s7587_s26  ;;  %2067 = vrot.lane.b32.xlu2 %v8005_v49, %s7587_s26  ;;  %v2038_v7 = vperm.slane %v8031_v4, 0  ;;  %v8104_v13 = vperm.slane %v6670_v33, 0  ;;  %v2368_v57 = vrot.slane %v2366_v27, 4 }
 0x3de   : > { %v8045_v10 = vpack.i.b16 %v2008_v9, %v2008_v9  ;;  %v8048_v45 = vperm.slane %v6669_v11, 0  ;;  %v2042_v20 = vperm.slane %v8058_v19, 0 }
 0x3e0   : > { %v2040_v12 = vperm.slane %v8045_v10, 0 }
 0x3e3   : > { %2071 = vrot.lane.b32.xlu1 %v8016_v63, %s7587_s26 }
 0x3e5   : > { %2075 = vrot.lane.b32.xlu0 %v8020_v0, %s7587_s26  ;;  %2073 = vrot.lane.b32.xlu2 %v2034_v1, %s7587_s26 }
 0x3eb   : > { %2077 = vrot.lane.b32.xlu1 %v2036_v6, %s7587_s26 }
 0x3ed   : > { %2081 = vrot.lane.b32.xlu0 %v2038_v7, %s7587_s26  ;;  %2079 = vrot.lane.b32.xlu2 %v8038_v8, %s7587_s26 }
 0x3f5   : > { %2085 = vrot.lane.b32.xlu0 %v2040_v12, %s7587_s26  ;;  %2083 = vrot.lane.b32.xlu2 %v8048_v45, %s7587_s26 }
 0x42f   : > { %v2062_v15 = vpop.permute.xlu2 %2061 }
 0x430   : > { %v2108_v17 = vsel %vm7802_vm6, %v2028_v40, %v2062_v15 }
 0x431   : > { %2141 = vrot.lane.b32.xlu2 %v2108_v17, %s7586_s22  ;;  %2175 = vst [vmem:[#allocation1 + $0x1] ss:$9 sm:$0xff] %v2108_v17 }
 0x437   : > { %v2068_v26 = vpop.permute.xlu2 %2067 }
 0x438   : > { %v8100_v41 = vsel %vm7802_vm6, %v8005_v49, %v2068_v26 }
 0x439   : > { %2089 = vrot.lane.b32.xlu2 %v2042_v20, %s7587_s26 }
 0x445   : > { %v2060_v28 = vpop.permute.xlu1 %2059 }
 0x446   : > { %v2107_v29 = vsel %vm7802_vm6, %v7985_v34, %v2060_v28  ;;  %v6671_v34 = vrot.slane %v2346_v31, 9  ;;  %v7041_v28 = vld [vmem:[#allocation10 + $0x70] sm:$0xff] }
 0x447   : > { %v2064_v30 = vpop.permute.xlu0 %2063  ;;  %2139 = vrot.lane.b32.xlu1 %v2107_v29, %s7586_s22  ;;  %2172 = vst [vmem:[#allocation1] ss:$9 sm:$0xff] %v2107_v29 }
 0x448   : > { %v2109_v61 = vsel %vm7802_vm6, %v7989_v39, %v2064_v30  ;;  %v8094_v38 = vsel %vm8084_vm8, %v6671_v34, %v2481_v35  ;;  %v2074_v39 = vpop.permute.xlu2 %2073 }
 0x449   : > { %2143 = vrot.lane.b32.xlu0 %v2109_v61, %s7586_s22  ;;  %2178 = vst [vmem:[#allocation1 + $0x2] ss:$9 sm:$0xff] %v2109_v61  ;;  %v8119_v51 = vsel %vm7802_vm6, %v2034_v1, %v2074_v39 }
 0x44d   : > { %v2066_v36 = vpop.permute.xlu1 %2065 }
 0x44e   : > { %v2110_v37 = vsel %vm7802_vm6, %v2030_v47, %v2066_v36  ;;  %v2369_v47 = vshll.u32 %v2346_v31, 16 }
 0x44f   : > { %v2070_v40 = vpop.permute.xlu0 %2069  ;;  %2145 = vrot.lane.b32.xlu1 %v2110_v37, %s7586_s22  ;;  %2181 = vst [vmem:[#allocation1 + $0x3] ss:$9 sm:$0xff] %v2110_v37 }
 0x450   : > { %v2080_v52 = vpop.permute.xlu2 %2079  ;;  %v2112_v55 = vsel %vm7802_vm6, %v2032_v48, %v2070_v40  ;;  %v2375_v48 = vshll.u32 %v2347_v25, 16 }
 0x451   : > { %2147 = vrot.lane.b32.xlu0 %v8100_v41, %s7586_s22  ;;  %v8145_v3 = vsel %vm7802_vm6, %v8038_v8, %v2080_v52 }
 0x452   : > { %v2377_v17 = vrot.slane %v2375_v48, 5 }
 0x455   : > { %v2072_v62 = vpop.permute.xlu1 %2071 }
 0x456   : > { %v2182_v43 = vld [vmem:[#allocation1] sm:$0xff]  ;;  %v8109_v44 = vsel %vm7802_vm6, %v8016_v63, %v2072_v62  ;;  %v2371_v63 = vrot.slane %v2369_v47, 5 }
 0x457   : > { %v2076_v50 = vpop.permute.xlu0 %2075  ;;  %2087 = vrot.lane.b32.xlu1 %v8104_v13, %s7587_s26  ;;  %2151 = vrot.lane.b32.xlu2 %v8109_v44, %s7586_s22  ;;  %v2246_v49 = vshrl.u32 %v2182_v43, 16  ;;  %v2249_v54 = vshll.u32 %v2182_v43, 16 }
 0x458   : > { %v2372_v56 = vor.u32 %v2371_v63, %v2368_v57  ;;  %v2084_v16 = vpop.permute.xlu2 %2083  ;;  %v8158_v31 = vsel %vm7802_vm6, %v8020_v0, %v2076_v50  ;;  %v2558_v63 = vunpack.c.l.b16 %v8094_v38 }
 0x459   : > { %2153 = vrot.lane.b32.xlu0 %v8119_v51, %s7586_s22  ;;  %v2248_v53 = vrot.slane %v2246_v49, 7  ;;  %v8163_v25 = vsel %vm7802_vm6, %v8048_v45, %v2084_v16 }
 0x45a   : > { %v2373_v15 = vrot.slane %v2372_v56, 4 }
 0x45b   : > { %v2251_v18 = vor.u32 %v2249_v54, %v2248_v53 }
 0x45c   : > { %v2378_v0 = vsel %vm8151_vm10, %v2373_v15, %v2377_v17 }
 0x45d   : > { %v2078_v46 = vpop.permute.xlu1 %2077  ;;  %v2302_v2 = vsel %vm7802_vm6, 0, %v2251_v18  ;;  %v8183_v40 = vunpack.c.l.b16 %v2378_v0 }
 0x45e   : > { %v8133_v1 = vsel %vm7802_vm6, %v2036_v6, %v2078_v46  ;;  %v2314_v5 = vsel %vm8064_vm3, %v2302_v2, 0 }
 0x45f   : > { %v2082_v9 = vpop.permute.xlu0 %2081  ;;  %2149 = vrot.lane.b32.xlu1 %v2112_v55, %s7586_s22  ;;  %2157 = vrot.lane.b32.xlu2 %v8133_v1, %s7586_s22  ;;  %v8140_v42 = vunpack.c.l.b16 %v2314_v5  ;;  %v2333_v11 = vunpack.c.h.b16 %v2314_v5 }
 0x460   : > { %v8193_v10 = vsel %vm7802_vm6, %v2038_v7, %v2082_v9 }
 0x461   : > { %2159 = vrot.lane.b32.xlu0 %v8145_v3, %s7586_s22  ;;  %v2348_v6 = vpack.c.b16 %v8140_v42, %v8140_v42  ;;  %v2349_v14 = vpack.c.b16 %v2333_v11, %v2333_v11 }
 0x463   : > { %v2380_v22 = vshrl.u32 %v2348_v6, 16  ;;  %v2383_v24 = vshll.u32 %v2348_v6, 16  ;;  %v6672_v26 = vrot.slane %v2348_v6, 9  ;;  %v2485_v8 = vrot.slane %v2349_v14, 5 }
 0x464   : > { %v2389_v61 = vshll.u32 %v2349_v14, 16 }
 0x465   : > { %v2382_v29 = vrot.slane %v2380_v22, 4  ;;  %v2385_v30 = vrot.slane %v2383_v24, 5  ;;  %v8167_v34 = vsel %vm8084_vm8, %v6672_v26, %v2485_v8 }
 0x466   : > { %v2391_v39 = vrot.slane %v2389_v61, 5 }
 0x467   : > { %v2086_v35 = vpop.permute.xlu0 %2085  ;;  %2155 = vrot.lane.b32.xlu1 %v8158_v31, %s7586_s22  ;;  %2163 = vrot.lane.b32.xlu2 %v8163_v25, %s7586_s22  ;;  %v2386_v36 = vor.u32 %v2385_v30, %v2382_v29 }
 0x468   : > { %v8179_v45 = vsel %vm7802_vm6, %v2040_v12, %v2086_v35 }
 0x469   : > { %2165 = vrot.lane.b32.xlu0 %v8179_v45, %s7586_s22  ;;  %v2387_v37 = vrot.slane %v2386_v36, 4 }
 0x46b   : > { %v2392_v33 = vsel %vm8151_vm10, %v2387_v37, %v2391_v39 }
 0x46c   : > { %v8187_v62 = vunpack.c.l.b16 %v2392_v33 }
 0x46e   : > { %v2546_v12 = vpack.c.b16 %v8187_v62, %v8183_v40 }
 0x46f   : > { %2161 = vrot.lane.b32.xlu1 %v8193_v10, %s7586_s22 }
 0x471   : > { %2550 = vrot.lane.b32.xlu0 %v2546_v12, %s7588_s14 }
 0x48b   : > { %v2142_v43 = vpop.permute.xlu2 %2141 }
 0x48c   : > { %2186 = vst [vmem:[#allocation1 + $0x1] ss:$9 sm:$0xff] %v2142_v43 }
 0x493   : > { %v2090_v27 = vpop.permute.xlu2 %2089 }
 0x494   : > { %v8204_v4 = vsel %vm7802_vm6, %v2042_v20, %v2090_v27 }
 0x495   : > { %2169 = vrot.lane.b32.xlu2 %v8204_v4, %s7586_s22 }
 0x4b1   : > { %v2152_v5 = vpop.permute.xlu2 %2151 }
 0x4b9   : > { %v2140_v7 = vpop.permute.xlu1 %2139 }
 0x4ba   : > { %2184 = vst [vmem:[#allocation1] ss:$9 sm:$0xff] %v2140_v7 }
 0x4bb   : > { %v2144_v47 = vpop.permute.xlu0 %2143 }
 0x4bc   : > { %2188 = vst [vmem:[#allocation1 + $0x2] ss:$9 sm:$0xff] %v2144_v47 }
 0x4c1   : > { %v2146_v50 = vpop.permute.xlu1 %2145 }
 0x4c2   : > { %2190 = vst [vmem:[#allocation1 + $0x3] ss:$9 sm:$0xff] %v2146_v50 }
 0x4c3   : > { %v2148_v53 = vpop.permute.xlu0 %2147 }
 0x4c9   : > { %v2191_v49 = vld [vmem:[#allocation1] sm:$0xff]  ;;  %v2088_v52 = vpop.permute.xlu1 %2087 }
 0x4ca   : > { %2193 = vst [vmem:[#allocation1] ss:$9 sm:$0xff] %v8100_v41  ;;  %v8212_v19 = vsel %vm7802_vm6, %v8104_v13, %v2088_v52  ;;  %v2252_v20 = vshrl.u32 %v2191_v49, 16  ;;  %v2255_v57 = vshll.u32 %v2191_v49, 16  ;;  %v2559_v41 = vunpack.c.l.b16 %v8167_v34 }
 0x4cb   : > { %2195 = vst [vmem:[#allocation1 + $0x1] ss:$9 sm:$0xff] %v2112_v55  ;;  %2167 = vrot.lane.b32.xlu1 %v8212_v19, %s7586_s22  ;;  %v2154_v14 = vpop.permute.xlu0 %2153 }
 0x4cc   : > { %2197 = vst [vmem:[#allocation1 + $0x2] ss:$9 sm:$0xff] %v8109_v44  ;;  %v2254_v54 = vrot.slane %v2252_v20, 7  ;;  %v2566_v46 = vpack.c.b16 %v2559_v41, %v2558_v63 }
 0x4cd   : > { %2199 = vst [vmem:[#allocation1 + $0x3] ss:$9 sm:$0xff] %v8119_v51 }
 0x4ce   : > { %v2257_v18 = vor.u32 %v2255_v57, %v2254_v54 }
 0x4d0   : > { %v2303_v13 = vsel %vm7802_vm6, 0, %v2257_v18 }
 0x4d1   : > { %v2315_v2 = vsel %vm8064_vm3, %v2303_v13, 0  ;;  %v2150_v48 = vpop.permute.xlu1 %2149 }
 0x4d2   : > { %v2334_v44 = vunpack.c.l.b16 %v2315_v2  ;;  %v2335_v55 = vunpack.c.h.b16 %v2315_v2 }
 0x4d3   : > { %2570 = vrot.lane.b32.xlu1 %v2566_v46, %s7586_s22 }
 0x4d4   : > { %v2200_v51 = vld [vmem:[#allocation1] sm:$0xff]  ;;  %v2350_v56 = vpack.c.b16 %v2334_v44, %v2334_v44  ;;  %v2351_v9 = vpack.c.b16 %v2335_v55, %v2335_v55  ;;  %v2578_v11 = vpack.c.b16 %v2334_v44, %v8140_v42 }
 0x4d5   : > { %2206 = vst [vmem:[#allocation1 + $0x2] ss:$9 sm:$0xff] %v2152_v5  ;;  %v2258_v6 = vshrl.u32 %v2200_v51, 16  ;;  %v2261_v26 = vshll.u32 %v2200_v51, 16 }
 0x4d6   : > { %2202 = vst [vmem:[#allocation1] ss:$9 sm:$0xff] %v2148_v53  ;;  %2582 = vrot.lane.b32.xlu2 %v2578_v11, %s7587_s26  ;;  %v6673_v15 = vrot.slane %v2350_v56, 9  ;;  %v2489_v16 = vrot.slane %v2351_v9, 5  ;;  %v2394_v17 = vshrl.u32 %v2350_v56, 16  ;;  %v2397_v22 = vshll.u32 %v2350_v56, 16 }
 0x4d7   : > { %2208 = vst [vmem:[#allocation1 + $0x3] ss:$9 sm:$0xff] %v2154_v14  ;;  %v2260_v24 = vrot.slane %v2258_v6, 7  ;;  %v2403_v50 = vshll.u32 %v2351_v9, 16 }
 0x4d8   : > { %2204 = vst [vmem:[#allocation1 + $0x1] ss:$9 sm:$0xff] %v2150_v48  ;;  %v2490_v8 = vsel %vm8084_vm8, %v6673_v15, %v2489_v16  ;;  %v2396_v61 = vrot.slane %v2394_v17, 4  ;;  %v2399_v34 = vrot.slane %v2397_v22, 5  ;;  %v2158_v16 = vpop.permute.xlu2 %2157 }
 0x4d9   : > { %v2560_v29 = vunpack.c.l.b16 %v2490_v8  ;;  %v2263_v30 = vor.u32 %v2261_v26, %v2260_v24  ;;  %v2156_v49 = vpop.permute.xlu1 %2155  ;;  %v2405_v55 = vrot.slane %v2403_v50, 5 }
 0x4da   : > { %v2400_v33 = vor.u32 %v2399_v34, %v2396_v61 }
 0x4db   : > { %v2596_v35 = vpack.c.b16 %v2560_v29, %v2559_v41  ;;  %v2304_v0 = vsel %vm7802_vm6, 0, %v2263_v30 }
 0x4dc   : > { %v2316_v36 = vsel %vm8064_vm3, %v2304_v0, 0  ;;  %v2401_v18 = vrot.slane %v2400_v33, 4 }
 0x4dd   : > { %2600 = vrot.lane.b32.xlu0 %v2596_v35, %s7588_s14  ;;  %v2336_v37 = vunpack.c.l.b16 %v2316_v36  ;;  %v2337_v39 = vunpack.c.h.b16 %v2316_v36 }
 0x4de   : > { %v2406_v56 = vsel %vm8151_vm10, %v2401_v18, %v2405_v55 }
 0x4df   : > { %v2209_v12 = vld [vmem:[#allocation1] sm:$0xff]  ;;  %v2353_v43 = vpack.c.b16 %v2337_v39, %v2337_v39  ;;  %v8236_v27 = vpack.c.b16 %v2336_v37, %v2334_v44  ;;  %v2352_v7 = vpack.c.b16 %v2336_v37, %v2336_v37  ;;  %v8258_v15 = vunpack.c.l.b16 %v2406_v56 }
 0x4e0   : > { %2211 = vst [vmem:[#allocation1] ss:$9 sm:$0xff] %v8158_v31  ;;  %v2264_v47 = vshrl.u32 %v2209_v12, 16  ;;  %v2267_v41 = vshll.u32 %v2209_v12, 16 }
 0x4e1   : > { %2213 = vst [vmem:[#allocation1 + $0x1] ss:$9 sm:$0xff] %v8133_v1  ;;  %2609 = vrot.lane.b32.xlu1 %v8236_v27, %s7586_s22  ;;  %v6674_v52 = vrot.slane %v2352_v7, 9  ;;  %v2493_v20 = vrot.slane %v2353_v43, 5  ;;  %v2408_v53 = vshrl.u32 %v2352_v7, 16  ;;  %v2411_v54 = vshll.u32 %v2352_v7, 16  ;;  %v2162_v30 = vpop.permute.xlu1 %2161 }
 0x4e2   : > { %2215 = vst [vmem:[#allocation1 + $0x2] ss:$9 sm:$0xff] %v8145_v3  ;;  %v2266_v57 = vrot.slane %v2264_v47, 7  ;;  %v2417_v46 = vshll.u32 %v2353_v43, 16 }
 0x4e3   : > { %2217 = vst [vmem:[#allocation1 + $0x3] ss:$9 sm:$0xff] %v8193_v10  ;;  %v2494_v31 = vsel %vm8084_vm8, %v6674_v52, %v2493_v20  ;;  %v2410_v13 = vrot.slane %v2408_v53, 4  ;;  %v2413_v1 = vrot.slane %v2411_v54, 5 }
 0x4e4   : > { %v2561_v2 = vunpack.c.l.b16 %v2494_v31  ;;  %v2269_v44 = vor.u32 %v2267_v41, %v2266_v57  ;;  %v2419_v11 = vrot.slane %v2417_v46, 5 }
 0x4e5   : > { %v2414_v5 = vor.u32 %v2413_v1, %v2410_v13 }
 0x4e6   : > { %v8246_v51 = vpack.c.b16 %v2561_v2, %v2560_v29  ;;  %v2305_v3 = vsel %vm7802_vm6, 0, %v2269_v44  ;;  %v2160_v29 = vpop.permute.xlu0 %2159 }
 0x4e7   : > { %v2317_v10 = vsel %vm8064_vm3, %v2305_v3, 0  ;;  %v2415_v9 = vrot.slane %v2414_v5, 4 }
 0x4e8   : > { %v2338_v48 = vunpack.c.l.b16 %v2317_v10  ;;  %v2339_v6 = vunpack.c.h.b16 %v2317_v10 }
 0x4e9   : > { %2572 = vrot.lane.b32.xlu1 %v8246_v51, %s7586_s22  ;;  %v2420_v14 = vsel %vm8151_vm10, %v2415_v9, %v2419_v11 }
 0x4ea   : > { %v2218_v17 = vld [vmem:[#allocation1] sm:$0xff]  ;;  %v2355_v22 = vpack.c.b16 %v2339_v6, %v2339_v6  ;;  %v2579_v24 = vpack.c.b16 %v2338_v48, %v2336_v37  ;;  %v2354_v26 = vpack.c.b16 %v2338_v48, %v2338_v48  ;;  %v8260_v8 = vunpack.c.l.b16 %v2420_v14 }
 0x4eb   : > { %2222 = vst [vmem:[#allocation1 + $0x1] ss:$9 sm:$0xff] %v2158_v16  ;;  %v2270_v61 = vshrl.u32 %v2218_v17, 16  ;;  %v2273_v33 = vshll.u32 %v2218_v17, 16  ;;  %v2164_v17 = vpop.permute.xlu2 %2163 }
 0x4ec   : > { %2224 = vst [vmem:[#allocation1 + $0x2] ss:$9 sm:$0xff] %v2160_v29  ;;  %2584 = vrot.lane.b32.xlu2 %v2579_v24, %s7587_s26  ;;  %v2547_v34 = vpack.c.b16 %v8260_v8, %v8258_v15  ;;  %v6675_v35 = vrot.slane %v2354_v26, 9  ;;  %v2497_v0 = vrot.slane %v2355_v22, 5  ;;  %v2422_v36 = vshrl.u32 %v2354_v26, 16 }
 0x4ed   : > { %2220 = vst [vmem:[#allocation1] ss:$9 sm:$0xff] %v2156_v49  ;;  %v2272_v39 = vrot.slane %v2270_v61, 7  ;;  %v2425_v37 = vshll.u32 %v2354_v26, 16  ;;  %v2431_v50 = vshll.u32 %v2355_v22, 16  ;;  %v7034_v26 = vld [vmem:[#allocation10 + $0x38] sm:$0xff] }
 0x4ee   : > { %2226 = vst [vmem:[#allocation1 + $0x3] ss:$9 sm:$0xff] %v2162_v30  ;;  %2552 = vrot.lane.b32.xlu0 %v2547_v34, %s7588_s14  ;;  %v2498_v12 = vsel %vm8084_vm8, %v6675_v35, %v2497_v0  ;;  %v2424_v43 = vrot.slane %v2422_v36, 4  ;;  %2851 = vmatpush.bf16.msra.mxu0 %v7034_v26  ;;  %v7033_v61 = vld [vmem:[#allocation10 + $0x30] sm:$0xff] }
 0x4ef   : > { %v2275_v7 = vor.u32 %v2273_v33, %v2272_v39  ;;  %v2427_v47 = vrot.slane %v2425_v37, 5  ;;  %v2562_v52 = vunpack.c.l.b16 %v2498_v12  ;;  %v2433_v18 = vrot.slane %v2431_v50, 5 }
 0x4f1   : > { %v2306_v20 = vsel %vm7802_vm6, 0, %v2275_v7  ;;  %v2428_v53 = vor.u32 %v2427_v47, %v2424_v43  ;;  %v2597_v31 = vpack.c.b16 %v2562_v52, %v2561_v2  ;;  %v2166_v47 = vpop.permute.xlu0 %2165 }
 0x4f2   : > { %v2318_v49 = vsel %vm8064_vm3, %v2306_v20, 0  ;;  %2852 = vmatpush.bf16.msra.mxu0 %v7033_v61 }
 0x4f3   : > { %v2340_v54 = vunpack.c.l.b16 %v2318_v49  ;;  %v2341_v57 = vunpack.c.h.b16 %v2318_v49  ;;  %v2429_v41 = vrot.slane %v2428_v53, 4 }
 0x4f4   : > { %2618 = vrot.lane.b32.xlu2 %v2547_v34, %s7587_s26 }
 0x4f5   : > { %v2227_v13 = vld [vmem:[#allocation1] sm:$0xff]  ;;  %v2357_v1 = vpack.c.b16 %v2341_v57, %v2341_v57  ;;  %v8273_v46 = vpack.c.b16 %v2340_v54, %v2338_v48  ;;  %v2356_v44 = vpack.c.b16 %v2340_v54, %v2340_v54  ;;  %v2434_v55 = vsel %vm8151_vm10, %v2429_v41, %v2433_v18 }
 0x4f6   : > { %2229 = vst [vmem:[#allocation1] ss:$9 sm:$0xff] %v8163_v25  ;;  %2602 = vrot.lane.b32.xlu0 %v2597_v31, %s7588_s14  ;;  %v2276_v5 = vshrl.u32 %v2227_v13, 16  ;;  %v8279_v3 = vunpack.c.l.b16 %v2434_v55  ;;  %v2279_v48 = vshll.u32 %v2227_v13, 16 }
 0x4f7   : > { %2231 = vst [vmem:[#allocation1 + $0x1] ss:$9 sm:$0xff] %v8179_v45  ;;  %2611 = vrot.lane.b32.xlu1 %v8273_v46, %s7586_s22  ;;  %v6676_v2 = vrot.slane %v2356_v44, 9  ;;  %v2501_v56 = vrot.slane %v2357_v1, 5  ;;  %v2436_v10 = vshrl.u32 %v2356_v44, 16  ;;  %v2439_v9 = vshll.u32 %v2356_v44, 16 }
 0x4f8   : > { %2233 = vst [vmem:[#allocation1 + $0x2] ss:$9 sm:$0xff] %v8212_v19  ;;  %v2278_v11 = vrot.slane %v2276_v5, 7  ;;  %v2592_v25 = vpack.c.b16 %v8279_v3, %v8260_v8  ;;  %v2445_v16 = vshll.u32 %v2357_v1, 16 }
 0x4f9   : > { %2235 = vst [vmem:[#allocation1 + $0x3] ss:$9 sm:$0xff] %v8204_v4  ;;  %v2502_v6 = vsel %vm8084_vm8, %v6676_v2, %v2501_v56  ;;  %v2438_v45 = vrot.slane %v2436_v10, 4  ;;  %v2441_v14 = vrot.slane %v2439_v9, 5 }
 0x4fa   : > { %v2563_v22 = vunpack.c.l.b16 %v2502_v6  ;;  %v2281_v24 = vor.u32 %v2279_v48, %v2278_v11  ;;  %v2447_v35 = vrot.slane %v2445_v16, 5 }
 0x4fb   : > { %v2442_v29 = vor.u32 %v2441_v14, %v2438_v45 }
 0x4fc   : > { %v8290_v30 = vpack.c.b16 %v2563_v22, %v2562_v52  ;;  %v2307_v19 = vsel %vm7802_vm6, 0, %v2281_v24  ;;  %v2170_v52 = vpop.permute.xlu2 %2169 }
 0x4fd   : > { %v2319_v4 = vsel %vm8064_vm3, %v2307_v19, 0  ;;  %v2443_v34 = vrot.slane %v2442_v29, 4 }
 0x4fe   : > { %v2342_v0 = vunpack.c.l.b16 %v2319_v4  ;;  %v2343_v36 = vunpack.c.h.b16 %v2319_v4 }
 0x4ff   : > { %2574 = vrot.lane.b32.xlu1 %v8290_v30, %s7586_s22  ;;  %v2448_v39 = vsel %vm8151_vm10, %v2443_v34, %v2447_v35 }
 0x500   : > { %v2236_v33 = vld [vmem:[#allocation1] sm:$0xff]  ;;  %v2359_v37 = vpack.c.b16 %v2343_v36, %v2343_v36  ;;  %v2580_v12 = vpack.c.b16 %v2342_v0, %v2340_v54  ;;  %v2358_v43 = vpack.c.b16 %v2342_v0, %v2342_v0  ;;  %v8300_v7 = vunpack.c.l.b16 %v2448_v39 }
 0x501   : > { %2238 = vst [vmem:[#allocation1] ss:$9 sm:$0xff] %v2164_v17  ;;  %v2282_v50 = vshrl.u32 %v2236_v33, 16  ;;  %v2285_v54 = vshll.u32 %v2236_v33, 16  ;;  %v7032_v33 = vld [vmem:[#allocation10 + $0x28] sm:$0xff] }
 0x502   : > { %2240 = vst [vmem:[#allocation1 + $0x1] ss:$9 sm:$0xff] %v2166_v47  ;;  %2586 = vrot.lane.b32.xlu2 %v2580_v12, %s7587_s26  ;;  %v2548_v20 = vpack.c.b16 %v8300_v7, %v8279_v3  ;;  %v6677_v53 = vrot.slane %v2358_v43, 9  ;;  %v2505_v49 = vrot.slane %v2359_v37, 5  ;;  %v2450_v57 = vshrl.u32 %v2358_v43, 16  ;;  %2853 = vmatpush.bf16.msra.mxu0 %v7032_v33 }
 0x503   : > { %2244 = vst [vmem:[#allocation1 + $0x3] ss:$9 sm:$0xff] %v2170_v52  ;;  %v2284_v41 = vrot.slane %v2282_v50, 7  ;;  %v2453_v18 = vshll.u32 %v2358_v43, 16  ;;  %v2459_v55 = vshll.u32 %v2359_v37, 16  ;;  %v7031_v43 = vld [vmem:[#allocation10 + $0x20] sm:$0xff] }
 0x504   : > { %2554 = vrot.lane.b32.xlu0 %v2548_v20, %s7588_s14  ;;  %v2506_v31 = vsel %vm8084_vm8, %v6677_v53, %v2505_v49  ;;  %v2452_v13 = vrot.slane %v2450_v57, 4  ;;  %v7030_v53 = vld [vmem:[#allocation10 + $0x18] sm:$0xff]  ;;  %v7029_v57 = vld [vmem:[#allocation10 + $0x10] sm:$0xff] }
 0x505   : > { %v2287_v1 = vor.u32 %v2285_v54, %v2284_v41  ;;  %v2455_v44 = vrot.slane %v2453_v18, 5  ;;  %v2564_v5 = vunpack.c.l.b16 %v2506_v31  ;;  %v2461_v6 = vrot.slane %v2459_v55, 5  ;;  %v7028_v41 = vld [vmem:[#allocation10 + $0x8] sm:$0xff]  ;;  %v7027_v54 = vld [vmem:[#allocation10] sm:$0xff]  ;;  %v2551_v55 = vpop.permute.xlu0 %2550 }
 0x506   : > { %2854 = vmatpush.bf16.msra.mxu0 %v7031_v43  ;;  %v4202_v18 = vsel %vm7802_vm6, %v7799_v58, 0  ;;  %v4445_v31 = vrot.slane %v7809_v60, 1 }
 0x507   : > { %v2308_v2 = vsel %vm7802_vm6, 0, %v2287_v1  ;;  %v2456_v56 = vor.u32 %v2455_v44, %v2452_v13  ;;  %v2598_v45 = vpack.c.b16 %v2564_v5, %v2563_v22  ;;  %v4446_v1 = vrot.slane %v4202_v18, 1 }
 0x508   : > { %v2320_v10 = vsel %vm8064_vm3, %v2308_v2, 0 }
 0x509   : > { %v8312_v9 = vunpack.c.l.b16 %v2320_v10  ;;  %v2345_v11 = vunpack.c.h.b16 %v2320_v10  ;;  %v2457_v48 = vrot.slane %v2456_v56, 4  ;;  %v8355_v44 = vsel %vm4444_vm15, %v4445_v31, %v4446_v1 }
 0x50a   : > { %2620 = vrot.lane.b32.xlu2 %v2548_v20, %s7587_s26  ;;  %2855 = vmatpush.bf16.msra.mxu0 %v7030_v53  ;;  %10657 = vst [vmem:[#allocation21_spill] sm:$0xff] %v8355_v44 }
 0x50b   : > { %v2361_v14 = vpack.c.b16 %v2345_v11, %v2345_v11  ;;  %v8316_v16 = vpack.c.b16 %v8312_v9, %v2342_v0  ;;  %v2360_v17 = vpack.c.b16 %v8312_v9, %v8312_v9  ;;  %v2462_v24 = vsel %vm8151_vm10, %v2457_v48, %v2461_v6 }
 0x50c   : > { %2604 = vrot.lane.b32.xlu0 %v2598_v45, %s7588_s14  ;;  %v8323_v26 = vunpack.c.l.b16 %v2462_v24 }
 0x50d   : > { %2613 = vrot.lane.b32.xlu1 %v8316_v16, %s7586_s22  ;;  %v6678_v29 = vrot.slane %v2360_v17, 9  ;;  %v2509_v19 = vrot.slane %v2361_v14, 5  ;;  %v2464_v22 = vshrl.u32 %v2360_v17, 16  ;;  %v2467_v61 = vshll.u32 %v2360_v17, 16 }
 0x50e   : > { %v2593_v4 = vpack.c.b16 %v8323_v26, %v8300_v7  ;;  %v2473_v36 = vshll.u32 %v2361_v14, 16  ;;  %2856 = vmatpush.bf16.msra.mxu0 %v7029_v57 }
 0x50f   : > { %v8331_v34 = vsel %vm8084_vm8, %v6678_v29, %v2509_v19  ;;  %v2466_v35 = vrot.slane %v2464_v22, 4  ;;  %v2469_v0 = vrot.slane %v2467_v61, 5  ;;  %v4223_v29 = vshll.u32 %v7809_v60, 16 }
 0x510   : > { %v2565_v39 = vunpack.c.l.b16 %v8331_v34  ;;  %v2475_v50 = vrot.slane %v2473_v36, 5  ;;  %v4221_v61 = vshrl.u32 %v7809_v60, 16 }
 0x511   : > { %v2470_v37 = vor.u32 %v2469_v0, %v2466_v35  ;;  %v4228_v35 = vshll.u32 %v4202_v18, 16 }
 0x512   : > { %v8336_v12 = vpack.c.b16 %v2565_v39, %v2564_v5  ;;  %2857 = vmatpush.bf16.msra.mxu0 %v7028_v41  ;;  %v2534_v5 = vpack.c.b16 %v8140_v42, %v8071_v23 }
 0x513   : > { %v2471_v47 = vrot.slane %v2470_v37, 4  ;;  %v4225_v37 = vrot.slane %v4223_v29, 1  ;;  %v4230_v41 = vrot.slane %v4228_v35, 1  ;;  %v7040_v29 = vld [vmem:[#allocation10 + $0x68] sm:$0xff] }
 0x514   : > { %v2629_v2 = vsel %vm1749_vm7, %v2534_v5, %v2551_v55 }
 0x515   : > { %2576 = vrot.lane.b32.xlu1 %v8336_v12, %s7586_s22  ;;  %v2476_v52 = vsel %vm8151_vm10, %v2471_v47, %v2475_v50  ;;  %v4226_v57 = vor.u32 %v4225_v37, %v4221_v61  ;;  %v7035_v37 = vld [vmem:[#allocation10 + $0x40] sm:$0xff] }
 0x516   : > { %v8342_v20 = vunpack.c.l.b16 %v2476_v52  ;;  %2858 = vmatpush.bf16.msra.mxu0 %v7027_v54 }
 0x517   : > { %v8386_v1 = vsel %vm4219_vm0, %v4226_v57, %v4230_v41 }
 0x518   : > { %v8346_v49 = vpack.c.b16 %v8342_v20, %v8323_v26  ;;  %10658 = vst [vmem:[#allocation22_spill] sm:$0xff] %v8386_v1 }
 0x51a   : > { %2556 = vrot.lane.b32.xlu0 %v8346_v49, %s7588_s14 }
 0x522   : > { %4542 = vrot.lane.b32.xlu0 %v8355_v44, %s7586_s22 }
 0x530   : > { %v2583_v10 = vpop.permute.xlu2 %2582 }
 0x53d   : > { %v2168_v13 = vpop.permute.xlu1 %2167 }
 0x53e   : > { %2242 = vst [vmem:[#allocation1 + $0x2] ss:$9 sm:$0xff] %v2168_v13 }
 0x545   : > { %v2245_v56 = vld [vmem:[#allocation1] sm:$0xff]  ;;  %v2571_v58 = vpop.permute.xlu1 %2570 }
 0x546   : > { %v2640_v11 = vsel %vm1752_vm11, %v2629_v2, %v2571_v58  ;;  %v2288_v48 = vshrl.u32 %v2245_v56, 16  ;;  %v2291_v14 = vshll.u32 %v2245_v56, 16 }
 0x547   : > { %v2648_v6 = vsel %vm1755_vm12, %v2640_v11, %v2583_v10  ;;  %v2585_v10 = vpop.permute.xlu2 %2584 }
 0x548   : > { %2859 = vmatmul.bf16.vlgmr.msra.gmra.mxu0 %v2648_v6  ;;  %v2290_v45 = vrot.slane %v2288_v48, 7 }
 0x54a   : > { %v2293_v17 = vor.u32 %v2291_v14, %v2290_v45 }
 0x54c   : > { %v2309_v24 = vsel %vm7802_vm6, 0, %v2293_v17  ;;  %v7042_v17 = vld [vmem:[#allocation10 + $0x78] sm:$0xff] }
 0x54d   : > { %v2321_v42 = vsel %vm8064_vm3, %v2309_v24, 0  ;;  %2880 = vmatpush.bf16.msrb.mxu0 %v7042_v17 }
 0x54e   : > { %v2512_v19 = vunpack.c.l.b16 %v2321_v42  ;;  %v2513_v22 = vunpack.c.h.b16 %v2321_v42 }
 0x54f   : > { %v2601_v13 = vpop.permute.xlu0 %2600  ;;  %v2619_v24 = vpop.permute.xlu2 %2618 }
 0x550   : > { %v2515_v0 = vpack.c.b16 %v2513_v22, %v2513_v22  ;;  %v2608_v36 = vpack.c.b16 %v8071_v23, %v2512_v19  ;;  %v2514_v33 = vpack.c.b16 %v2512_v19, %v2512_v19  ;;  %v2581_v43 = vpack.c.b16 %v2512_v19, %v8312_v9  ;;  %v7039_v22 = vld [vmem:[#allocation10 + $0x60] sm:$0xff] }
 0x551   : > { %2881 = vmatpush.bf16.msrb.mxu0 %v7041_v28  ;;  %v7173_v28 = vld [vmem:[#allocation12] ss:$0 sm:$0xff] }
 0x552   : > { %2615 = vrot.lane.b32.xlu1 %v2608_v36, %s7586_s22  ;;  %v6679_v47 = vrot.slane %v2514_v33, 9  ;;  %v2532_v50 = vrot.slane %v2515_v0, 5  ;;  %v2517_v52 = vshrl.u32 %v2514_v33, 16  ;;  %v2520_v53 = vshll.u32 %v2514_v33, 16  ;;  %2588 = vrot.lane.b32.xlu2 %v2581_v43, %s7587_s26  ;;  %v7037_v36 = vld [vmem:[#allocation10 + $0x50] sm:$0xff]  ;;  %v7036_v33 = vld [vmem:[#allocation10 + $0x48] sm:$0xff] }
 0x553   : > { %v8379_v9 = vpop.permute.xlu1 %2609  ;;  %v2526_v55 = vshll.u32 %v2515_v0, 16  ;;  %v7038_v0 = vld [vmem:[#allocation10 + $0x58] sm:$0xff] }
 0x554   : > { %v8376_v21 = vsel %vm8084_vm8, %v6679_v47, %v2532_v50  ;;  %v2519_v54 = vrot.slane %v2517_v52, 4  ;;  %v2522_v18 = vrot.slane %v2520_v53, 5  ;;  %v7044_v47 = vld [vmem:[#allocation10 + $0x88] sm:$0xff] }
 0x555   : > { %v2595_v23 = vunpack.c.l.b16 %v8376_v21  ;;  %v2528_v56 = vrot.slane %v2526_v55, 5  ;;  %2882 = vmatpush.bf16.msrb.mxu0 %v7040_v29 }
 0x556   : > { %v2523_v32 = vor.u32 %v2522_v18, %v2519_v54 }
 0x557   : > { %v2599_v31 = vpack.c.b16 %v2595_v23, %v2565_v39  ;;  %v2626_v17 = vpack.c.b16 %v2558_v63, %v2595_v23 }
 0x558   : > { %v2524_v5 = vrot.slane %v2523_v32, 4 }
 0x559   : > { %2606 = vrot.lane.b32.xlu0 %v2599_v31, %s7588_s14  ;;  %2883 = vmatpush.bf16.msrb.mxu0 %v7039_v22  ;;  %v2591_v31 = vpack.c.b16 %v8258_v15, %v8187_v62 }
 0x55a   : > { %4510 = vrot.lane.b32.xlu2 %v8386_v1, %s7588_s14  ;;  %v2529_v11 = vsel %vm8151_vm10, %v2524_v5, %v2528_v56 }
 0x55b   : > { %v2573_v58 = vpop.permute.xlu1 %2572  ;;  %v8399_v6 = vunpack.c.l.b16 %v2529_v11  ;;  %v2661_v32 = vsel %vm1749_vm7, %v2591_v31, %v2601_v13 }
 0x55c   : > { %v2587_v61 = vpop.permute.xlu2 %2586  ;;  %v2672_v55 = vsel %vm1752_vm11, %v2661_v32, %v8379_v9 }
 0x55d   : > { %v2617_v45 = vpack.c.b16 %v8183_v40, %v8399_v6  ;;  %2884 = vmatpush.bf16.msrb.mxu0 %v7038_v0  ;;  %v2680_v5 = vsel %vm1755_vm12, %v2672_v55, %v2619_v24 }
 0x560   : > { %v2553_v2 = vpop.permute.xlu0 %2552 }
 0x561   : > { %v2632_v34 = vsel %vm1749_vm7, %v8236_v27, %v2553_v2  ;;  %2885 = vmatpush.bf16.msrb.mxu0 %v7037_v36  ;;  %v7043_v2 = vld [vmem:[#allocation10 + $0x80] sm:$0xff] }
 0x562   : > { %v2642_v39 = vsel %vm1752_vm11, %v2632_v34, %v2573_v58  ;;  %2622 = vrot.lane.b32.xlu2 %v8346_v49, %s7587_s26 }
 0x563   : > { %v2651_v48 = vsel %vm1755_vm12, %v2642_v39, %v2585_v10 }
 0x564   : > { %2864 = vmatmul.bf16.gmra.mxu0 %v2651_v48  ;;  %v2621_v50 = vpop.permute.xlu2 %2620 }
 0x565   : > { %2886 = vmatpush.bf16.msrb.mxu0 %v7036_v33 }
 0x568   : > { %v2603_v27 = vpop.permute.xlu0 %2602 }
 0x569   : > { %v2612_v14 = vpop.permute.xlu1 %2611  ;;  %2887 = vmatpush.bf16.msrb.mxu0 %v7035_v37 }
 0x56a   : > { %2624 = vrot.lane.b32.xlu2 %v2617_v45, %s7587_s26 }
 0x56d   : > { %2915 = vmatpush.bf16.msra.mxu0 %v7044_v47 }
 0x571   : > { %v2575_v19 = vpop.permute.xlu1 %2574  ;;  %2916 = vmatpush.bf16.msra.mxu0 %v7043_v2 }
 0x576   : > { %v2555_v42 = vpop.permute.xlu0 %2554 }
 0x577   : > { %v2635_v49 = vsel %vm1749_vm7, %v8273_v46, %v2555_v42 }
 0x578   : > { %v2644_v40 = vsel %vm1752_vm11, %v2635_v49, %v2575_v19 }
 0x579   : > { %v2654_v35 = vsel %vm1755_vm12, %v2644_v40, %v2587_v61 }
 0x57a   : > { %2869 = vmatmul.bf16.gmra.mxu0 %v2654_v35 }
 0x57e   : > { %v2605_v43 = vpop.permute.xlu0 %2604 }
 0x57f   : > { %v2614_v46 = vpop.permute.xlu1 %2613  ;;  %v2667_v15 = vsel %vm1749_vm7, %v2593_v4, %v2605_v43 }
 0x580   : > { %v2676_v34 = vsel %vm1752_vm11, %v2667_v15, %v2614_v46 }
 0x587   : > { %v2577_v57 = vpop.permute.xlu1 %2576 }
 0x58c   : > { %v2557_v52 = vpop.permute.xlu0 %2556 }
 0x58d   : > { %v2638_v53 = vsel %vm1749_vm7, %v8316_v16, %v2557_v52  ;;  %v2664_v16 = vsel %vm1749_vm7, %v2592_v25, %v2603_v27  ;;  %v2594_v25 = vpack.c.b16 %v8399_v6, %v8342_v20 }
 0x58e   : > { %v2646_v54 = vsel %vm1752_vm11, %v2638_v53, %v2577_v57  ;;  %v2674_v56 = vsel %vm1752_vm11, %v2664_v16, %v2612_v14 }
 0x58f   : > { %v2683_v58 = vsel %vm1755_vm12, %v2674_v56, %v2621_v50 }
 0x594   : > { %v8430_v13 = vpop.permute.xlu0 %4542 }
 0x595   : > { %10660 = vst [vmem:[#allocation24_spill] sm:$0xff] %v8430_v13 }
 0x5ac   : > { %v2589_v41 = vpop.permute.xlu2 %2588 }
 0x5ad   : > { %v2657_v18 = vsel %vm1755_vm12, %v2646_v54, %v2589_v41 }
 0x5ae   : > { %2874 = vmatmul.bf16.gmra.mxu0 %v2657_v18 }
 0x5b4   : > { %v8424_v62 = vpop.permute.xlu2 %4510 }
 0x5b5   : > { %10659 = vst [vmem:[#allocation23_spill] sm:$0xff] %v8424_v62 }
 0x5bc   : > { %v2623_v9 = vpop.permute.xlu2 %2622 }
 0x5bd   : > { %v2686_v8 = vsel %vm1755_vm12, %v2676_v34, %v2623_v9 }
 0x5be   : > { %2888 = vmatmul.bf16.vlgmr.msrb.gmra.mxu0 %v2680_v5 }
 0x5c4   : > { %v2616_v39 = vpop.permute.xlu1 %2615  ;;  %v2625_v7 = vpop.permute.xlu2 %2624 }
 0x5c5   : > { %v2860_v4 = vpop.f32.mrf.mxu0 }
 0x5c6   : > { %v2861_v50 = vadd.f32 %v7173_v28, %v2860_v4 }
 0x5cb   : > { %v2607_v3 = vpop.permute.xlu0 %2606 }
 0x5cc   : > { %v2670_v10 = vsel %vm1749_vm7, %v2594_v25, %v2607_v3 }
 0x5cd   : > { %v2678_v11 = vsel %vm1752_vm11, %v2670_v10, %v2616_v39  ;;  %v2862_v48 = vpop.f32.mrf.mxu0 }
 0x5ce   : > { %2893 = vmatmul.bf16.gmra.mxu0 %v2683_v58  ;;  %v2689_v26 = vsel %vm1755_vm12, %v2678_v11, %v2625_v7  ;;  %v2863_v29 = vadd.f32 %v7173_v28, %v2862_v48 }
 0x5de   : > { %2898 = vmatmul.bf16.gmra.mxu0 %v2686_v8 }
 0x5e1   : > { %v2865_v45 = vpop.f32.mrf.mxu0 }
 0x5e2   : > { %v2866_v19 = vadd.f32 %v7173_v28, %v2865_v45 }
 0x5e9   : > { %v2867_v27 = vpop.f32.mrf.mxu0 }
 0x5ea   : > { %v2868_v61 = vadd.f32 %v7173_v28, %v2867_v27 }
 0x5ee   : > { %2903 = vmatmul.bf16.gmra.mxu0 %v2689_v26 }
 0x5f7   : > { %v2870_v20 = vpop.f32.mrf.mxu0 }
 0x5f8   : > { %v2871_v35 = vadd.f32 %v7173_v28, %v2870_v20 }
 0x5fe   : > { %6752 = vmatmul.msk.bf16.vlgmr.msra.gmra.mxu0 %vm1749_vm7, %v8246_v51 }
 0x5ff   : > { %v2872_v6 = vpop.f32.mrf.mxu0 }
 0x600   : > { %v2873_v38 = vadd.f32 %v7173_v28, %v2872_v6 }
 0x60e   : > { %6753 = vmatmul.msk.bf16.gmra.mxu0 %vm1749_vm7, %v8290_v30 }
 0x61e   : > { %6754 = vmatmul.msk.bf16.gmra.mxu0 %vm1749_vm7, %v8336_v12 }
 0x62b   : > { %v2875_v14 = vpop.f32.mrf.mxu0 }
 0x62c   : > { %v2876_v36 = vadd.f32 %v7173_v28, %v2875_v14 }
 0x62e   : > { %6755 = vmatmul.msk.bf16.gmra.mxu0 %vm1749_vm7, %v2626_v17 }
 0x633   : > { %v2877_v24 = vpop.f32.mrf.mxu0 }
 0x634   : > { %v2878_v43 = vadd.f32 %v7173_v28, %v2877_v24 }
 0x63b   : > { %v2889_v51 = vpop.f32.mrf.mxu0 }
 0x63c   : > { %v2890_v52 = vadd.f32 %v2889_v51, %v2861_v50 }
 0x643   : > { %v2891_v42 = vpop.f32.mrf.mxu0 }
 0x644   : > { %v2892_v30 = vadd.f32 %v2891_v42, %v2863_v29 }
 0x64b   : > { %v2894_v49 = vpop.f32.mrf.mxu0 }
 0x64c   : > { %v2895_v22 = vadd.f32 %v2894_v49, %v2866_v19 }
 0x653   : > { %v2896_v12 = vpop.f32.mrf.mxu0 }
 0x654   : > { %v8450_v40 = vadd.f32 %v2896_v12, %v2868_v61 }
 0x65b   : > { %v2899_v21 = vpop.f32.mrf.mxu0 }
 0x65c   : > { %v8452_v0 = vadd.f32 %v2899_v21, %v2871_v35 }
 0x663   : > { %v2901_v63 = vpop.f32.mrf.mxu0 }
 0x664   : > { %v8454_v23 = vadd.f32 %v2901_v63, %v2873_v38 }
 0x66b   : > { %v2904_v33 = vpop.f32.mrf.mxu0 }
 0x66c   : > { %v8456_v37 = vadd.f32 %v2904_v33, %v2876_v36 }
 0x673   : > { %v2906_v47 = vpop.f32.mrf.mxu0 }
 0x674   : > { %v8458_v46 = vadd.f32 %v2906_v47, %v2878_v43 }
 0x67b   : > { %v2918_v53 = vpop.f32.mrf.mxu0 }
 0x67c   : > { %v2919_v57 = vadd.f32 %v2918_v53, %v2890_v52 }
 0x67e   : > { %v2938_v41 = vmax.f32 %v2919_v57, 0.0 }
 0x680   : > { %v2946_v54 = vpack.c.bf16 %v2938_v41, %v2938_v41 }
 0x682   : > { %v2962_v18 = vrot.slane %v2946_v54, 3 }
 0x683   : > { %v2920_v31 = vpop.f32.mrf.mxu0 }
 0x684   : > { %v2921_v32 = vadd.f32 %v2920_v31, %v2892_v30  ;;  %v2972_v55 = vsel %vm1383_vm2, %v2946_v54, %v2962_v18  ;;  %v2974_v5 = vsel %vm1970_vm13, %v2946_v54, %v2962_v18  ;;  %v2980_v2 = vsel %vm1978_vm14, %v2946_v54, %v2962_v18 }
 0x685   : > { %v6756_v16 = vpack.i.b16 %v2972_v55, %v2972_v55  ;;  %v2976_v56 = vrot.slane %v2974_v5, 1  ;;  %v3075_v58 = vunpack.i.h.s16 %v2972_v55  ;;  %v2977_v9 = vsel %vm1607_vm1, %v2946_v54, %v2962_v18 }
 0x686   : > { %v2939_v15 = vmax.f32 %v2921_v32, 0.0  ;;  %v2982_v25 = vrot.slane %v2980_v2, 3  ;;  %v2979_v10 = vrot.slane %v2977_v9, 2 }
 0x687   : > { %v8464_v34 = vperm.slane %v6756_v16, 0  ;;  %v6757_v8 = vpack.i.b16 %v2976_v56, %v2976_v56  ;;  %v8466_v3 = vpack.i.b16 %v3075_v58, %v3075_v58  ;;  %v3077_v6 = vunpack.i.h.s16 %v2976_v56 }
 0x688   : > { %v2947_v7 = vpack.c.bf16 %v2939_v15, %v2939_v15  ;;  %v3079_v26 = vunpack.i.h.s16 %v2979_v10  ;;  %v6759_v4 = vpack.i.b16 %v2982_v25, %v2982_v25  ;;  %v6758_v45 = vpack.i.b16 %v2979_v10, %v2979_v10 }
 0x689   : > { %3330 = vrot.lane.b32.xlu0 %v8464_v34, %s7587_s26  ;;  %v8470_v39 = vperm.slane %v6757_v8, 0  ;;  %v10572_v11 = vperm.slane %v8466_v3, 0  ;;  %v3081_v24 = vunpack.i.h.s16 %v2982_v25  ;;  %v8493_v29 = vpack.i.b16 %v3077_v6, %v3077_v6 }
 0x68a   : > { %v8478_v48 = vpack.i.b16 %v3079_v26, %v3079_v26  ;;  %v2963_v27 = vrot.slane %v2947_v7, 3  ;;  %v8480_v20 = vperm.slane %v6759_v4, 0  ;;  %v8485_v17 = vperm.slane %v6758_v45, 0 }
 0x68b   : > { %3334 = vrot.lane.b32.xlu2 %v8470_v39, %s7587_s26  ;;  %3332 = vrot.lane.b32.xlu1 %v10572_v11, %s7587_s26  ;;  %v2923_v28 = vpop.f32.mrf.mxu0  ;;  %v8495_v30 = vpack.i.b16 %v3081_v24, %v3081_v24  ;;  %v10571_v12 = vperm.slane %v8493_v29, 0  ;;  %v10672_v62 = vperm.slane %v8466_v3, 0 }
 0x68c   : > { %v3207_v14 = vperm.slane %v8478_v48, 0  ;;  %v2985_v51 = vsel %vm1383_vm2, %v2947_v7, %v2963_v27  ;;  %v2924_v19 = vadd.f32 %v2923_v28, %v2895_v22  ;;  %v2993_v49 = vsel %vm1978_vm14, %v2947_v7, %v2963_v27 }
 0x68d   : > { %v6760_v42 = vpack.i.b16 %v2985_v51, %v2985_v51  ;;  %v2987_v61 = vsel %vm1970_vm13, %v2947_v7, %v2963_v27  ;;  %v3083_v35 = vunpack.i.h.s16 %v2985_v51  ;;  %v10570_v38 = vperm.slane %v8495_v30, 0 }
 0x68e   : > { %v2995_v63 = vrot.slane %v2993_v49, 3  ;;  %v2989_v36 = vrot.slane %v2987_v61, 1  ;;  %v2940_v33 = vmax.f32 %v2924_v19, 0.0  ;;  %v2990_v22 = vsel %vm1607_vm1, %v2947_v7, %v2963_v27 }
 0x68f   : > { %v8503_v21 = vperm.slane %v6760_v42, 0  ;;  %v8512_v43 = vpack.i.b16 %v3083_v35, %v3083_v35  ;;  %v2992_v52 = vrot.slane %v2990_v22, 2 }
 0x690   : > { %v6763_v47 = vpack.i.b16 %v2995_v63, %v2995_v63  ;;  %v6761_v50 = vpack.i.b16 %v2989_v36, %v2989_v36  ;;  %v2948_v53 = vpack.c.bf16 %v2940_v33, %v2940_v33  ;;  %v3085_v18 = vunpack.i.h.s16 %v2989_v36 }
 0x691   : > { %3342 = vrot.lane.b32.xlu0 %v8480_v20, %s7587_s26  ;;  %v10569_v57 = vperm.slane %v8512_v43, 0  ;;  %v3087_v31 = vunpack.i.h.s16 %v2992_v52  ;;  %v6762_v55 = vpack.i.b16 %v2992_v52, %v2992_v52  ;;  %v3089_v58 = vunpack.i.h.s16 %v2995_v63 }
 0x692   : > { %v8518_v41 = vperm.slane %v6763_v47, 0  ;;  %v8520_v54 = vperm.slane %v6761_v50, 0  ;;  %v2964_v32 = vrot.slane %v2948_v53, 3  ;;  %v8526_v5 = vpack.i.b16 %v3085_v18, %v3085_v18 }
 0x693   : > { %3340 = vrot.lane.b32.xlu2 %v3207_v14, %s7587_s26  ;;  %3338 = vrot.lane.b32.xlu1 %v8485_v17, %s7587_s26  ;;  %v8528_v2 = vpack.i.b16 %v3087_v31, %v3087_v31  ;;  %v8531_v56 = vperm.slane %v6762_v55, 0  ;;  %v2925_v25 = vpop.f32.mrf.mxu0  ;;  %v8543_v10 = vpack.i.b16 %v3089_v58, %v3089_v58 }
 0x694   : > { %v2998_v16 = vsel %vm1383_vm2, %v2948_v53, %v2964_v32  ;;  %v10565_v15 = vperm.slane %v8526_v5, 0  ;;  %v3000_v7 = vsel %vm1970_vm13, %v2948_v53, %v2964_v32  ;;  %v2926_v45 = vadd.f32 %v2925_v25, %v8450_v40 }
 0x695   : > { %v10568_v9 = vperm.slane %v8528_v2, 0  ;;  %v3091_v8 = vunpack.i.h.s16 %v2998_v16  ;;  %v6764_v4 = vpack.i.b16 %v2998_v16, %v2998_v16  ;;  %v3003_v27 = vsel %vm1607_vm1, %v2948_v53, %v2964_v32 }
 0x696   : > { %v3006_v6 = vsel %vm1978_vm14, %v2948_v53, %v2964_v32  ;;  %v10564_v24 = vperm.slane %v8543_v10, 0  ;;  %v3002_v51 = vrot.slane %v3000_v7, 1  ;;  %v3005_v19 = vrot.slane %v3003_v27, 2 }
 0x697   : > { %v8546_v26 = vpack.i.b16 %v3091_v8, %v3091_v8  ;;  %v8556_v42 = vperm.slane %v6764_v4, 0  ;;  %v3008_v49 = vrot.slane %v3006_v6, 3  ;;  %v2941_v61 = vmax.f32 %v2926_v45, 0.0 }
 0x698   : > { %v6765_v40 = vpack.i.b16 %v3002_v51, %v3002_v51  ;;  %v6766_v35 = vpack.i.b16 %v3005_v19, %v3005_v19  ;;  %v3095_v22 = vunpack.i.h.s16 %v3005_v19  ;;  %v3093_v53 = vunpack.i.h.s16 %v3002_v51 }
 0x699   : > { %3336 = vrot.lane.b32.xlu0 %v10571_v12, %s7587_s26  ;;  %v10562_v28 = vperm.slane %v8546_v26, 0  ;;  %v6767_v63 = vpack.i.b16 %v3008_v49, %v3008_v49  ;;  %v2949_v36 = vpack.c.bf16 %v2941_v61, %v2941_v61  ;;  %v3097_v52 = vunpack.i.h.s16 %v3008_v49 }
 0x69a   : > { %v8563_v33 = vperm.slane %v6765_v40, 0  ;;  %v8567_v47 = vperm.slane %v6766_v35, 0  ;;  %v8575_v31 = vpack.i.b16 %v3095_v22, %v3095_v22  ;;  %v8579_v55 = vpack.i.b16 %v3093_v53, %v3093_v53 }
 0x69b   : > { %3346 = vrot.lane.b32.xlu2 %v8503_v21, %s7587_s26  ;;  %3344 = vrot.lane.b32.xlu1 %v10570_v38, %s7587_s26  ;;  %v8569_v50 = vperm.slane %v6767_v63, 0  ;;  %v2965_v18 = vrot.slane %v2949_v36, 3  ;;  %v8577_v32 = vpack.i.b16 %v3097_v52, %v3097_v52  ;;  %v2928_v8 = vpop.f32.mrf.mxu0 }
 0x69c   : > { %v10557_v25 = vperm.slane %v8575_v31, 0  ;;  %v10561_v4 = vperm.slane %v8579_v55, 0  ;;  %v2929_v6 = vadd.f32 %v2928_v8, %v8452_v0 }
 0x69d   : > { %v3011_v16 = vsel %vm1383_vm2, %v2949_v36, %v2965_v18  ;;  %v3013_v58 = vsel %vm1970_vm13, %v2949_v36, %v2965_v18  ;;  %v10559_v7 = vperm.slane %v8577_v32, 0  ;;  %v3016_v51 = vsel %vm1607_vm1, %v2949_v36, %v2965_v18 }
 0x69e   : > { %v3015_v45 = vrot.slane %v3013_v58, 1  ;;  %v3099_v27 = vunpack.i.h.s16 %v3011_v16  ;;  %v6768_v19 = vpack.i.b16 %v3011_v16, %v3011_v16  ;;  %v3019_v49 = vsel %vm1978_vm14, %v2949_v36, %v2965_v18 }
 0x69f   : > { %v3018_v35 = vrot.slane %v3016_v51, 2  ;;  %v2942_v63 = vmax.f32 %v2929_v6, 0.0  ;;  %v3021_v0 = vrot.slane %v3019_v49, 3 }
 0x6a0   : > { %v6769_v61 = vpack.i.b16 %v3015_v45, %v3015_v45  ;;  %v8598_v40 = vpack.i.b16 %v3099_v27, %v3099_v27  ;;  %v8600_v22 = vperm.slane %v6768_v19, 0  ;;  %v3101_v51 = vunpack.i.h.s16 %v3015_v45 }
 0x6a1   : > { %3348 = vrot.lane.b32.xlu0 %v10569_v57, %s7587_s26  ;;  %v3103_v58 = vunpack.i.h.s16 %v3018_v35  ;;  %v2950_v8 = vpack.c.bf16 %v2942_v63, %v2942_v63  ;;  %v6771_v36 = vpack.i.b16 %v3021_v0, %v3021_v0  ;;  %v6770_v16 = vpack.i.b16 %v3018_v35, %v3018_v35 }
 0x6a2   : > { %v8604_v52 = vperm.slane %v6769_v61, 0  ;;  %v10558_v53 = vperm.slane %v8598_v40, 0  ;;  %v3105_v61 = vunpack.i.h.s16 %v3021_v0  ;;  %v8627_v35 = vpack.i.b16 %v3101_v51, %v3101_v51 }
 0x6a3   : > { %3358 = vrot.lane.b32.xlu2 %v8518_v41, %s7587_s26  ;;  %3350 = vrot.lane.b32.xlu1 %v8520_v54, %s7587_s26  ;;  %v8612_v18 = vpack.i.b16 %v3103_v58, %v3103_v58  ;;  %v2966_v27 = vrot.slane %v2950_v8, 3  ;;  %v8614_v6 = vperm.slane %v6771_v36, 0  ;;  %v8619_v49 = vperm.slane %v6770_v16, 0 }
 0x6a4   : > { %v8629_v58 = vpack.i.b16 %v3105_v61, %v3105_v61 }
 0x6a5   : > { %v10560_v19 = vperm.slane %v8612_v18, 0  ;;  %v3024_v63 = vsel %vm1383_vm2, %v2950_v8, %v2966_v27  ;;  %v3032_v16 = vsel %vm1978_vm14, %v2950_v8, %v2966_v27  ;;  %v3026_v0 = vsel %vm1970_vm13, %v2950_v8, %v2966_v27 }
 0x6a6   : > { %v6772_v45 = vpack.i.b16 %v3024_v63, %v3024_v63  ;;  %v10566_v51 = vperm.slane %v8629_v58, 0  ;;  %v3028_v61 = vrot.slane %v3026_v0, 1 }
 0x6a9   : > { %3354 = vrot.lane.b32.xlu0 %v8531_v56, %s7587_s26 }
 0x6ab   : > { %3352 = vrot.lane.b32.xlu2 %v10565_v15, %s7587_s26  ;;  %3356 = vrot.lane.b32.xlu1 %v10568_v9, %s7587_s26 }
 0x6b1   : > { %3360 = vrot.lane.b32.xlu0 %v10564_v24, %s7587_s26 }
 0x6b3   : > { %3364 = vrot.lane.b32.xlu2 %v10562_v28, %s7587_s26  ;;  %3362 = vrot.lane.b32.xlu1 %v8556_v42, %s7587_s26 }
 0x6b9   : > { %3366 = vrot.lane.b32.xlu0 %v8563_v33, %s7587_s26 }
 0x6bb   : > { %3370 = vrot.lane.b32.xlu2 %v8567_v47, %s7587_s26  ;;  %3374 = vrot.lane.b32.xlu1 %v8569_v50, %s7587_s26 }
 0x6c1   : > { %3372 = vrot.lane.b32.xlu0 %v10557_v25, %s7587_s26  ;;  %v2930_v25 = vpop.f32.mrf.mxu0 }
 0x6c2   : > { %v2931_v36 = vadd.f32 %v2930_v25, %v8454_v23  ;;  %v3029_v23 = vsel %vm1607_vm1, %v2950_v8, %v2966_v27 }
 0x6c3   : > { %3376 = vrot.lane.b32.xlu2 %v10559_v7, %s7587_s26  ;;  %3368 = vrot.lane.b32.xlu1 %v10561_v4, %s7587_s26  ;;  %v3107_v7 = vunpack.i.h.s16 %v3024_v63  ;;  %v3034_v4 = vrot.slane %v3032_v16, 3 }
 0x6c4   : > { %v2943_v28 = vmax.f32 %v2931_v36, 0.0  ;;  %v3109_v36 = vunpack.i.h.s16 %v3028_v61 }
 0x6c5   : > { %v8647_v25 = vpack.i.b16 %v3107_v7, %v3107_v7  ;;  %v6775_v63 = vpack.i.b16 %v3034_v4, %v3034_v4 }
 0x6c6   : > { %v2951_v24 = vpack.c.bf16 %v2943_v28, %v2943_v28 }
 0x6c7   : > { %v10567_v15 = vperm.slane %v8647_v25, 0  ;;  %v8653_v8 = vperm.slane %v6775_v63, 0 }
 0x6c8   : > { %v2967_v0 = vrot.slane %v2951_v24, 3 }
 0x6c9   : > { %3378 = vrot.lane.b32.xlu0 %v8600_v22, %s7587_s26  ;;  %v2933_v9 = vpop.f32.mrf.mxu0 }
 0x6ca   : > { %v3037_v63 = vsel %vm1383_vm2, %v2951_v24, %v2967_v0  ;;  %v2934_v38 = vadd.f32 %v2933_v9, %v8456_v37  ;;  %v3042_v12 = vsel %vm1607_vm1, %v2951_v24, %v2967_v0  ;;  %v3045_v11 = vsel %vm1978_vm14, %v2951_v24, %v2967_v0 }
 0x6cb   : > { %3382 = vrot.lane.b32.xlu2 %v8604_v52, %s7587_s26  ;;  %3380 = vrot.lane.b32.xlu1 %v10558_v53, %s7587_s26  ;;  %v10563_v53 = vperm.slane %v8627_v35, 0  ;;  %v6776_v57 = vpack.i.b16 %v3037_v63, %v3037_v63 }
 0x6cc   : > { %v2944_v48 = vmax.f32 %v2934_v38, 0.0 }
 0x6cd   : > { %v8704_v9 = vperm.slane %v6776_v57, 0 }
 0x6cf   : > { %10665 = vst [vmem:[#allocation29_spill] sm:$0xff] %v8704_v9 }
 0x6d1   : > { %3390 = vrot.lane.b32.xlu0 %v8614_v6, %s7587_s26  ;;  %v2935_v44 = vpop.f32.mrf.mxu0 }
 0x6d3   : > { %3388 = vrot.lane.b32.xlu2 %v10560_v19, %s7587_s26  ;;  %3386 = vrot.lane.b32.xlu1 %v8619_v49, %s7587_s26  ;;  %v8638_v19 = vperm.slane %v6772_v45, 0  ;;  %v3031_v45 = vrot.slane %v3029_v23, 2  ;;  %v8661_v23 = vpack.i.b16 %v3109_v36, %v3109_v36 }
 0x6d5   : > { %v3111_v16 = vunpack.i.h.s16 %v3031_v45  ;;  %v6774_v28 = vpack.i.b16 %v3031_v45, %v3031_v45  ;;  %v10573_v45 = vperm.slane %v8661_v23, 0 }
 0x6d9   : > { %3384 = vrot.lane.b32.xlu0 %v10563_v53, %s7587_s26  ;;  %v6773_v53 = vpack.i.b16 %v3028_v61, %v3028_v61  ;;  %v8671_v61 = vperm.slane %v6774_v28, 0 }
 0x6db   : > { %3394 = vrot.lane.b32.xlu2 %v8638_v19, %s7587_s26  ;;  %3392 = vrot.lane.b32.xlu1 %v10566_v51, %s7587_s26  ;;  %v8655_v27 = vperm.slane %v6773_v53, 0  ;;  %v8663_v51 = vpack.i.b16 %v3111_v16, %v3111_v16  ;;  %10662 = vst [vmem:[#allocation26_spill] sm:$0xff] %v8671_v61  ;;  %v3115_v16 = vunpack.i.h.s16 %v3037_v63 }
 0x6dd   : > { %10661 = vst [vmem:[#allocation25_spill] sm:$0xff] %v8663_v51  ;;  %v10574_v36 = vperm.slane %v8663_v51, 0 }
 0x6e1   : > { %3396 = vrot.lane.b32.xlu0 %v10567_v15, %s7587_s26  ;;  %v3113_v15 = vunpack.i.h.s16 %v3034_v4  ;;  %v3039_v4 = vsel %vm1970_vm13, %v2951_v24, %v2967_v0  ;;  %v3044_v24 = vrot.slane %v3042_v12, 2  ;;  %v3047_v0 = vrot.slane %v3045_v11, 3 }
 0x6e3   : > { %3406 = vrot.lane.b32.xlu2 %v8653_v8, %s7587_s26  ;;  %3398 = vrot.lane.b32.xlu1 %v8655_v27, %s7587_s26  ;;  %v3119_v57 = vunpack.i.h.s16 %v3044_v24  ;;  %v3121_v38 = vunpack.i.h.s16 %v3047_v0 }
 0x6e5   : > { %v3335_v7 = vpop.permute.xlu2 %3334 }
 0x6e6   : > { %v8669_v53 = vsel %vm7802_vm6, %v8470_v39, %v3335_v7  ;;  %v8684_v39 = vpack.i.b16 %v3113_v15, %v3113_v15  ;;  %v8687_v7 = vpack.i.b16 %v3115_v16, %v3115_v16  ;;  %v6778_v16 = vpack.i.b16 %v3044_v24, %v3044_v24 }
 0x6e7   : > { %3785 = vst [vmem:[#allocation1 + $0x2] ss:$9 sm:$0xff] %v8669_v53 }
 0x6e8   : > { %10663 = vst [vmem:[#allocation27_spill] sm:$0xff] %v8684_v39  ;;  %v10575_v15 = vperm.slane %v8684_v39, 0  ;;  %v10576_v37 = vperm.slane %v8687_v7, 0  ;;  %v8717_v11 = vperm.slane %v6778_v16, 0 }
 0x6e9   : > { %3402 = vrot.lane.b32.xlu0 %v8671_v61, %s7587_s26  ;;  %10664 = vst [vmem:[#allocation28_spill] sm:$0xff] %v8687_v7 }
 0x6ea   : > { %10667 = vst [vmem:[#allocation31_spill] sm:$0xff] %v8717_v11 }
 0x6eb   : > { %3400 = vrot.lane.b32.xlu2 %v10573_v45, %s7587_s26  ;;  %3404 = vrot.lane.b32.xlu1 %v10574_v36, %s7587_s26  ;;  %v3041_v36 = vrot.slane %v3039_v4, 1  ;;  %v6779_v4 = vpack.i.b16 %v3047_v0, %v3047_v0 }
 0x6ed   : > { %v3341_v28 = vpop.permute.xlu2 %3340  ;;  %v8719_v12 = vperm.slane %v6779_v4, 0  ;;  %v2936_v4 = vadd.f32 %v2935_v44, %v8458_v46 }
 0x6ee   : > { %v8696_v45 = vsel %vm7802_vm6, %v3207_v14, %v3341_v28  ;;  %v6777_v14 = vpack.i.b16 %v3041_v36, %v3041_v36  ;;  %v2952_v28 = vpack.c.bf16 %v2944_v48, %v2944_v48  ;;  %v8725_v48 = vpack.i.b16 %v3119_v57, %v3119_v57 }
 0x6ef   : > { %3794 = vst [vmem:[#allocation1 + $0x5] ss:$9 sm:$0xff] %v8696_v45 }
 0x6f0   : > { %10668 = vst [vmem:[#allocation32_spill] sm:$0xff] %v8719_v12  ;;  %v2968_v1 = vrot.slane %v2952_v28, 3 }
 0x6f1   : > { %3408 = vrot.lane.b32.xlu0 %v10575_v15, %s7587_s26  ;;  %v8713_v15 = vperm.slane %v6777_v14, 0  ;;  %10669 = vst [vmem:[#allocation33_spill] sm:$0xff] %v8725_v48 }
 0x6f2   : > { %v3050_v60 = vsel %vm1383_vm2, %v2952_v28, %v2968_v1  ;;  %v3052_v57 = vsel %vm1970_vm13, %v2952_v28, %v2968_v1  ;;  %v3055_v3 = vsel %vm1607_vm1, %v2952_v28, %v2968_v1 }
 0x6f3   : > { %3412 = vrot.lane.b32.xlu2 %v10576_v37, %s7587_s26  ;;  %3410 = vrot.lane.b32.xlu1 %v8704_v9, %s7587_s26  ;;  %10666 = vst [vmem:[#allocation30_spill] sm:$0xff] %v8713_v15  ;;  %v3117_v37 = vunpack.i.h.s16 %v3041_v36  ;;  %v8734_v36 = vpack.i.b16 %v3121_v38, %v3121_v38  ;;  %v3123_v38 = vunpack.i.h.s16 %v3050_v60 }
 0x6f5   : > { %v8711_v63 = vpop.permute.xlu2 %3346  ;;  %10670 = vst [vmem:[#allocation34_spill] sm:$0xff] %v8734_v36  ;;  %v8736_v16 = vpack.i.b16 %v3117_v37, %v3117_v37  ;;  %v10586_v44 = vperm.slane %v8734_v36, 0  ;;  %v3054_v37 = vrot.slane %v3052_v57, 1  ;;  %v8770_v9 = vpack.i.b16 %v3123_v38, %v3123_v38 }
 0x6f7   : > { %10671 = vst [vmem:[#allocation35_spill] sm:$0xff] %v8736_v16  ;;  %v10588_v46 = vperm.slane %v8736_v16, 0  ;;  %v10592_v38 = vperm.slane %v8770_v9, 0 }
 0x6f8   : > { %10673 = vst [vmem:[#allocation36_spill] sm:$0xff] %v8770_v9  ;;  %v10678_v9 = vperm.slane %v8495_v30, 0 }
 0x6f9   : > { %3414 = vrot.lane.b32.xlu0 %v8713_v15, %s7587_s26  ;;  %v6781_v15 = vpack.i.b16 %v3054_v37, %v3054_v37 }
 0x6fb   : > { %3418 = vrot.lane.b32.xlu2 %v8717_v11, %s7587_s26  ;;  %v3331_v13 = vpop.permute.xlu0 %3330  ;;  %3422 = vrot.lane.b32.xlu1 %v8719_v12, %s7587_s26  ;;  %v2945_v12 = vmax.f32 %v2936_v4, 0.0 }
 0x6fc   : > { %v8730_v24 = vsel %vm7802_vm6, %v8464_v34, %v3331_v13  ;;  %v10582_v34 = vperm.slane %v8725_v48, 0 }
 0x6fd   : > { %v8732_v14 = vpop.permute.xlu2 %3358  ;;  %v3333_v0 = vpop.permute.xlu1 %3332  ;;  %3779 = vst [vmem:[#allocation1] ss:$9 sm:$0xff] %v8730_v24  ;;  %v2953_v36 = vpack.c.bf16 %v2945_v12, %v2945_v12 }
 0x6fe   : > { %v8746_v13 = vsel %vm7802_vm6, %v10672_v62, %v3333_v0  ;;  %v6780_v0 = vpack.i.b16 %v3050_v60, %v3050_v60 }
 0x6ff   : > { %3782 = vst [vmem:[#allocation1 + $0x1] ss:$9 sm:$0xff] %v8746_v13 }
 0x701   : > { %3420 = vrot.lane.b32.xlu0 %v10582_v34, %s7587_s26  ;;  %v3058_v34 = vsel %vm1978_vm14, %v2952_v28, %v2968_v1  ;;  %v8778_v1 = vperm.slane %v6780_v0, 0 }
 0x702   : > { %v3060_v28 = vrot.slane %v3058_v34, 3 }
 0x703   : > { %3424 = vrot.lane.b32.xlu2 %v10586_v44, %s7587_s26  ;;  %v3343_v62 = vpop.permute.xlu0 %3342  ;;  %3416 = vrot.lane.b32.xlu1 %v10588_v46, %s7587_s26  ;;  %v3057_v44 = vrot.slane %v3055_v3, 2  ;;  %10674 = vst [vmem:[#allocation37_spill] sm:$0xff] %v8778_v1 }
 0x704   : > { %v8766_v57 = vsel %vm7802_vm6, %v8480_v20, %v3343_v62  ;;  %v8783_v20 = vperm.slane %v6781_v15, 0  ;;  %v2969_v62 = vrot.slane %v2953_v36, 3 }
 0x705   : > { %v8768_v4 = vpop.permute.xlu2 %3352  ;;  %v3339_v48 = vpop.permute.xlu1 %3338  ;;  %3797 = vst [vmem:[#allocation1 + $0x6] ss:$9 sm:$0xff] %v8766_v57  ;;  %v3127_v3 = vunpack.i.h.s16 %v3057_v44 }
 0x706   : > { %v8776_v60 = vsel %vm7802_vm6, %v8485_v17, %v3339_v48  ;;  %10675 = vst [vmem:[#allocation38_spill] sm:$0xff] %v8783_v20  ;;  %v6783_v17 = vpack.i.b16 %v3060_v28, %v3060_v28  ;;  %v10676_v48 = vperm.slane %v8493_v29, 0  ;;  %v3063_v16 = vsel %vm1383_vm2, %v2953_v36, %v2969_v62 }
 0x707   : > { %3791 = vst [vmem:[#allocation1 + $0x4] ss:$9 sm:$0xff] %v8776_v60  ;;  %v8799_v46 = vpack.i.b16 %v3127_v3, %v3127_v3 }
 0x708   : > { %v8809_v29 = vperm.slane %v6783_v17, 0 }
 0x709   : > { %3426 = vrot.lane.b32.xlu0 %v8778_v1, %s7587_s26  ;;  %10677 = vst [vmem:[#allocation39_spill] sm:$0xff] %v8799_v46  ;;  %v6782_v1 = vpack.i.b16 %v3057_v44, %v3057_v44  ;;  %v10597_v44 = vperm.slane %v8799_v46, 0  ;;  %v3129_v46 = vunpack.i.h.s16 %v3060_v28 }
 0x70a   : > { %10679 = vst [vmem:[#allocation40_spill] sm:$0xff] %v8809_v29 }
 0x70b   : > { %v3337_v12 = vpop.permute.xlu0 %3336  ;;  %3430 = vrot.lane.b32.xlu2 %v8783_v20, %s7587_s26  ;;  %3428 = vrot.lane.b32.xlu1 %v10592_v38, %s7587_s26  ;;  %v8815_v3 = vperm.slane %v6782_v1, 0  ;;  %v6784_v1 = vpack.i.b16 %v3063_v16, %v3063_v16  ;;  %v8849_v28 = vpack.i.b16 %v3129_v46, %v3129_v46 }
 0x70c   : > { %v8795_v34 = vsel %vm7802_vm6, %v10676_v48, %v3337_v12  ;;  %v3125_v12 = vunpack.i.h.s16 %v3054_v37  ;;  %v3131_v48 = vunpack.i.h.s16 %v3063_v16 }
 0x70d   : > { %v8797_v15 = vpop.permute.xlu2 %3364  ;;  %v3345_v0 = vpop.permute.xlu1 %3344  ;;  %3788 = vst [vmem:[#allocation1 + $0x3] ss:$9 sm:$0xff] %v8795_v34 }
 0x70e   : > { %v8807_v38 = vsel %vm7802_vm6, %v10678_v9, %v3345_v0  ;;  %10680 = vst [vmem:[#allocation41_spill] sm:$0xff] %v8815_v3  ;;  %v8824_v30 = vpack.i.b16 %v3125_v12, %v3125_v12  ;;  %v8830_v17 = vpack.i.b16 %v3131_v48, %v3131_v48  ;;  %v3071_v0 = vsel %vm1978_vm14, %v2953_v36, %v2969_v62 }
 0x70f   : > { %3800 = vst [vmem:[#allocation1 + $0x7] ss:$9 sm:$0xff] %v8807_v38  ;;  %v3068_v48 = vsel %vm1607_vm1, %v2953_v36, %v2969_v62 }
 0x710   : > { %10681 = vst [vmem:[#allocation42_spill] sm:$0xff] %v8824_v30  ;;  %v10600_v39 = vperm.slane %v8824_v30, 0  ;;  %v10603_v12 = vperm.slane %v8830_v17, 0 }
 0x711   : > { %3438 = vrot.lane.b32.xlu0 %v8809_v29, %s7587_s26  ;;  %10682 = vst [vmem:[#allocation43_spill] sm:$0xff] %v8830_v17  ;;  %v3065_v29 = vsel %vm1970_vm13, %v2953_v36, %v2969_v62  ;;  %vm6013_vm13 = vcmask 31744  }
 0x712   : > { %v3067_v11 = vrot.slane %v3065_v29, 1  ;;  %10684 = vst [vmem:[#allocation45_spill] sm:$0xff] %v8849_v28  ;;  %v10608_v29 = vperm.slane %v8849_v28, 0 }
 0x713   : > { %v8817_v20 = vpop.permute.xlu0 %3348  ;;  %3436 = vrot.lane.b32.xlu2 %v10597_v44, %s7587_s26  ;;  %3434 = vrot.lane.b32.xlu1 %v8815_v3, %s7587_s26  ;;  %v8839_v44 = vperm.slane %v6784_v1, 0  ;;  %v3073_v3 = vrot.slane %v3071_v0, 3  ;;  %v3070_v0 = vrot.slane %v3068_v48, 2 }
 0x714   : > { %v6785_v51 = vpack.i.b16 %v3067_v11, %v3067_v11 }
 0x715   : > { %v8826_v9 = vpop.permute.xlu2 %3370  ;;  %v8828_v37 = vpop.permute.xlu1 %3350  ;;  %10683 = vst [vmem:[#allocation44_spill] sm:$0xff] %v8839_v44  ;;  %v6787_v1 = vpack.i.b16 %v3073_v3, %v3073_v3  ;;  %v3135_v17 = vunpack.i.h.s16 %v3070_v0  ;;  %v6786_v48 = vpack.i.b16 %v3070_v0, %v3070_v0 }
 0x716   : > { %v8859_v62 = vperm.slane %v6785_v51, 0  ;;  %v3137_v51 = vunpack.i.h.s16 %v3073_v3 }
 0x717   : > { %v8857_v36 = vperm.slane %v6787_v1, 0  ;;  %v8871_v1 = vperm.slane %v6786_v48, 0 }
 0x718   : > { %10686 = vst [vmem:[#allocation47_spill] sm:$0xff] %v8859_v62 }
 0x719   : > { %3432 = vrot.lane.b32.xlu0 %v10600_v39, %s7587_s26  ;;  %10685 = vst [vmem:[#allocation46_spill] sm:$0xff] %v8857_v36 }
 0x71a   : > { %10689 = vst [vmem:[#allocation50_spill] sm:$0xff] %v8871_v1 }
 0x71b   : > { %v8842_v16 = vpop.permute.xlu0 %3354  ;;  %3444 = vrot.lane.b32.xlu2 %v10603_v12, %s7587_s26  ;;  %3442 = vrot.lane.b32.xlu1 %v8839_v44, %s7587_s26  ;;  %v3133_v12 = vunpack.i.h.s16 %v3067_v11 }
 0x71d   : > { %v8851_v39 = vpop.permute.xlu2 %3376  ;;  %v3357_v30 = vpop.permute.xlu1 %3356  ;;  %v8867_v7 = vpack.i.b16 %v3133_v12, %v3133_v12 }
 0x71f   : > { %10687 = vst [vmem:[#allocation48_spill] sm:$0xff] %v8867_v7  ;;  %v10612_v11 = vperm.slane %v8867_v7, 0 }
 0x721   : > { %3440 = vrot.lane.b32.xlu0 %v10608_v29, %s7587_s26  ;;  %v8869_v29 = vpack.i.b16 %v3135_v17, %v3135_v17  ;;  %v8883_v17 = vpack.i.b16 %v3137_v51, %v3137_v51 }
 0x723   : > { %v3361_v46 = vpop.permute.xlu0 %3360  ;;  %3454 = vrot.lane.b32.xlu2 %v8857_v36, %s7587_s26  ;;  %3446 = vrot.lane.b32.xlu1 %v8859_v62, %s7587_s26  ;;  %10688 = vst [vmem:[#allocation49_spill] sm:$0xff] %v8869_v29  ;;  %v10611_v36 = vperm.slane %v8869_v29, 0  ;;  %v10613_v0 = vperm.slane %v8883_v17, 0  ;;  %v10701_v62 = vperm.slane %v8575_v31, 0 }
 0x724   : > { %10690 = vst [vmem:[#allocation51_spill] sm:$0xff] %v8883_v17 }
 0x725   : > { %v8865_v44 = vpop.permute.xlu2 %3382  ;;  %v3363_v61 = vpop.permute.xlu1 %3362 }
 0x726   : > { %v9105_v31 = vsel %vm7802_vm6, %v8604_v52, %v8865_v44 }
 0x727   : > { %10702 = vst [vmem:[#allocation55_spill] sm:$0xff] %v9105_v31 }
 0x729   : > { %3450 = vrot.lane.b32.xlu0 %v8871_v1, %s7587_s26  ;;  %v3801_v1 = vld [vmem:[#allocation1] sm:$0xff] }
 0x72b   : > { %v3367_v28 = vpop.permute.xlu0 %3366  ;;  %3448 = vrot.lane.b32.xlu2 %v10612_v11, %s7587_s26  ;;  %3452 = vrot.lane.b32.xlu1 %v10611_v36, %s7587_s26 }
 0x72d   : > { %v8885_v12 = vpop.permute.xlu2 %3388  ;;  %v3375_v3 = vpop.permute.xlu1 %3374 }
 0x731   : > { %3456 = vrot.lane.b32.xlu0 %v10613_v0, %s7587_s26 }
 0x733   : > { %v8891_v48 = vpop.permute.xlu0 %3372  ;;  %3652 = vrot.lane.b32.xlu2 %v8746_v13, %s7586_s22  ;;  %3650 = vrot.lane.b32.xlu1 %v8730_v24, %s7586_s22 }
 0x735   : > { %v8897_v36 = vpop.permute.xlu2 %3394  ;;  %v3369_v51 = vpop.permute.xlu1 %3368 }
 0x739   : > { %3654 = vrot.lane.b32.xlu0 %v8669_v53, %s7586_s22 }
 0x73b   : > { %v8901_v11 = vpop.permute.xlu0 %3378  ;;  %3658 = vrot.lane.b32.xlu2 %v8776_v60, %s7586_s22  ;;  %3662 = vrot.lane.b32.xlu1 %v8766_v57, %s7586_s22  ;;  %v8927_v57 = vsel %vm7802_vm6, %v8503_v21, %v8711_v63 }
 0x73d   : > { %v8907_v0 = vpop.permute.xlu2 %3406  ;;  %v8909_v13 = vpop.permute.xlu1 %3380 }
 0x741   : > { %3660 = vrot.lane.b32.xlu0 %v8696_v45, %s7586_s22  ;;  %v8935_v45 = vsel %vm7802_vm6, %v8520_v54, %v8828_v37  ;;  %v8966_v54 = vsel %vm7802_vm6, %v8531_v56, %v8842_v16  ;;  %v10693_v56 = vperm.slane %v8526_v5, 0 }
 0x743   : > { %v8913_v24 = vpop.permute.xlu0 %3390  ;;  %3664 = vrot.lane.b32.xlu2 %v8807_v38, %s7586_s22  ;;  %3656 = vrot.lane.b32.xlu1 %v8795_v34, %s7586_s22  ;;  %v10691_v38 = vperm.slane %v8512_v43, 0  ;;  %v8958_v43 = vsel %vm7802_vm6, %v8518_v41, %v8732_v14 }
 0x745   : > { %v8919_v53 = vpop.permute.xlu2 %3400  ;;  %v8921_v60 = vpop.permute.xlu1 %3386  ;;  %v8942_v34 = vsel %vm7802_vm6, %v10691_v38, %v8817_v20  ;;  %v10692_v20 = vperm.slane %v8528_v2, 0  ;;  %v8989_v2 = vsel %vm7802_vm6, %v10693_v56, %v8768_v4  ;;  %v10695_v56 = vperm.slane %v8546_v26, 0 }
 0x746   : > { %v4060_v26 = vshll.u32 %v3801_v1, 16 }
 0x747   : > { %v8972_v37 = vsel %vm7802_vm6, %v10692_v20, %v3357_v30  ;;  %v10694_v30 = vperm.slane %v8543_v10, 0  ;;  %v9002_v20 = vsel %vm7802_vm6, %v8556_v42, %v3363_v61  ;;  %v9019_v42 = vsel %vm7802_vm6, %v10695_v56, %v8797_v15 }
 0x748   : > { %v9026_v61 = vsel %vm7802_vm6, %v8563_v33, %v3367_v28  ;;  %v10698_v28 = vperm.slane %v8579_v55, 0 }
 0x749   : > { %3666 = vrot.lane.b32.xlu0 %v8927_v57, %s7586_s22  ;;  %v8997_v16 = vsel %vm7802_vm6, %v10694_v30, %v3361_v46  ;;  %v4057_v46 = vshrl.u32 %v3801_v1, 16  ;;  %v9031_v30 = vsel %vm7802_vm6, %v8569_v50, %v3375_v3  ;;  %v9047_v50 = vsel %vm7802_vm6, %v8567_v47, %v8826_v9 }
 0x74a   : > { %10696 = vst [vmem:[#allocation52_spill] sm:$0xff] %v9031_v30  ;;  %v9055_v3 = vsel %vm7802_vm6, %v10698_v28, %v3369_v51 }
 0x74b   : > { %v8944_v17 = vpop.permute.xlu0 %3384  ;;  %3670 = vrot.lane.b32.xlu2 %v8935_v45, %s7586_s22  ;;  %3668 = vrot.lane.b32.xlu1 %v8942_v34, %s7586_s22  ;;  %v4059_v29 = vrot.slane %v4057_v46, 7  ;;  %10697 = vst [vmem:[#allocation53_spill] sm:$0xff] %v9047_v50 }
 0x74d   : > { %v8950_v21 = vpop.permute.xlu2 %3412  ;;  %v8952_v63 = vpop.permute.xlu1 %3392  ;;  %v4062_v33 = vor.u32 %v4060_v26, %v4059_v29  ;;  %v4203_v55 = vsel %vm7802_vm6, %v4059_v29, 0  ;;  %v10699_v26 = vperm.slane %v8577_v32, 0 }
 0x74e   : > { %v4449_v28 = vrot.slane %v4203_v55, 1  ;;  %v4240_v44 = vshll.u32 %v4203_v55, 16 }
 0x74f   : > { %v9059_v1 = vsel %vm7802_vm6, 0, %v4062_v33  ;;  %v9079_v33 = vsel %vm7802_vm6, %v10699_v26, %v8851_v39 }
 0x750   : > { %v4448_v51 = vrot.slane %v9059_v1, 1  ;;  %10700 = vst [vmem:[#allocation54_spill] sm:$0xff] %v9079_v33  ;;  %v4235_v26 = vshll.u32 %v9059_v1, 16  ;;  %v4233_v52 = vshrl.u32 %v9059_v1, 16 }
 0x751   : > { %3678 = vrot.lane.b32.xlu0 %v8958_v43, %s7586_s22 }
 0x752   : > { %v4450_v29 = vsel %vm4444_vm15, %v4448_v51, %v4449_v28 }
 0x753   : > { %v8974_v38 = vpop.permute.xlu0 %3396  ;;  %3676 = vrot.lane.b32.xlu2 %v8972_v37, %s7586_s22  ;;  %3674 = vrot.lane.b32.xlu1 %v8966_v54, %s7586_s22 }
 0x755   : > { %v8980_v41 = vpop.permute.xlu2 %3418  ;;  %v8982_v14 = vpop.permute.xlu1 %3398 }
 0x759   : > { %3672 = vrot.lane.b32.xlu0 %v8989_v2, %s7586_s22 }
 0x75b   : > { %v9004_v5 = vpop.permute.xlu0 %3402  ;;  %3682 = vrot.lane.b32.xlu2 %v9002_v20, %s7586_s22  ;;  %3680 = vrot.lane.b32.xlu1 %v8997_v16, %s7586_s22 }
 0x75d   : > { %v9010_v4 = vpop.permute.xlu2 %3424  ;;  %v9012_v10 = vpop.permute.xlu1 %3404 }
 0x761   : > { %3684 = vrot.lane.b32.xlu0 %v9019_v42, %s7586_s22 }
 0x763   : > { %v9033_v7 = vpop.permute.xlu0 %3408  ;;  %3694 = vrot.lane.b32.xlu2 %v9031_v30, %s7586_s22  ;;  %3686 = vrot.lane.b32.xlu1 %v9026_v61, %s7586_s22  ;;  %v9088_v30 = vsel %vm7802_vm6, %v10701_v62, %v8891_v48  ;;  %v9113_v62 = vsel %vm7802_vm6, %v8600_v22, %v8901_v11  ;;  %v4237_v48 = vrot.slane %v4235_v26, 1  ;;  %v10704_v22 = vperm.slane %v8612_v18, 0 }
 0x764   : > { %v10705_v26 = vperm.slane %v8598_v40, 0  ;;  %v9158_v40 = vsel %vm7802_vm6, %v8638_v19, %v8897_v36 }
 0x765   : > { %v9039_v15 = vpop.permute.xlu1 %3410  ;;  %v9041_v56 = vpop.permute.xlu2 %3430  ;;  %v9130_v11 = vsel %vm7802_vm6, %v10704_v22, %v8885_v12 }
 0x766   : > { %v9139_v55 = vsel %vm7802_vm6, %v10705_v26, %v8909_v13  ;;  %v9166_v13 = vsel %vm7802_vm6, %v8614_v6, %v8913_v24  ;;  %v9186_v6 = vsel %vm7802_vm6, %v8653_v8, %v8907_v0  ;;  %v9232_v26 = vsel %vm7802_vm6, %v8655_v27, %v8982_v14  ;;  %v10716_v27 = vld [vmem:[#allocation26_spill] sm:$0xff] }
 0x767   : > { %v9255_v14 = vsel %vm7802_vm6, %v10716_v27, %v9004_v5  ;;  %v10720_v5 = vld [vmem:[#allocation31_spill] sm:$0xff] }
 0x769   : > { %3690 = vrot.lane.b32.xlu0 %v9047_v50, %s7586_s22 }
 0x76b   : > { %v9061_v46 = vpop.permute.xlu0 %3414  ;;  %3688 = vrot.lane.b32.xlu2 %v9055_v3, %s7586_s22  ;;  %4574 = vrot.lane.b32.xlu1 %v9059_v1, %s7587_s26 }
 0x76d   : > { %v9067_v47 = vpop.permute.xlu1 %3422  ;;  %v9069_v9 = vpop.permute.xlu2 %3436 }
 0x771   : > { %3696 = vrot.lane.b32.xlu0 %v9079_v33, %s7586_s22  ;;  %v4238_v33 = vor.u32 %v4237_v48, %v4233_v52 }
 0x773   : > { %v9091_v50 = vpop.permute.xlu0 %3420  ;;  %4606 = vrot.lane.b32.xlu2 %v4450_v29, %s7588_s14  ;;  %3692 = vrot.lane.b32.xlu1 %v9088_v30, %s7586_s22 }
 0x775   : > { %v9096_v32 = vpop.permute.xlu1 %3416  ;;  %v9098_v39 = vpop.permute.xlu2 %3444 }
 0x779   : > { %3702 = vrot.lane.b32.xlu0 %v9105_v31, %s7586_s22 }
 0x77b   : > { %4544 = vrot.lane.b32.xlu2 %v4450_v29, %s7586_s22  ;;  %v9116_v51 = vpop.permute.xlu0 %3426  ;;  %3698 = vrot.lane.b32.xlu1 %v9113_v62, %s7586_s22  ;;  %v4242_v29 = vrot.slane %v4240_v44, 1 }
 0x77d   : > { %v9121_v28 = vpop.permute.xlu2 %3454  ;;  %v9123_v31 = vpop.permute.xlu1 %3428  ;;  %v9142_v48 = vsel %vm4219_vm0, %v4238_v33, %v4242_v29  ;;  %v9172_v33 = vsel %vm7802_vm6, %v8619_v49, %v8921_v60  ;;  %v10708_v49 = vperm.slane %v8627_v35, 0  ;;  %v10709_v60 = vperm.slane %v8629_v58, 0 }
 0x77e   : > { %10703 = vst [vmem:[#allocation56_spill] sm:$0xff] %v9121_v28  ;;  %v10726_v28 = vld [vmem:[#allocation30_spill] sm:$0xff] }
 0x77f   : > { %10706 = vst [vmem:[#allocation57_spill] sm:$0xff] %v9142_v48  ;;  %v9195_v24 = vsel %vm7802_vm6, %v10708_v49, %v8944_v17  ;;  %v9202_v22 = vsel %vm7802_vm6, %v10709_v60, %v8952_v63  ;;  %v10710_v17 = vperm.slane %v8661_v23, 0  ;;  %v10711_v63 = vperm.slane %v8647_v25, 0  ;;  %v10717_v60 = vld [vmem:[#allocation25_spill] sm:$0xff] }
 0x781   : > { %3708 = vrot.lane.b32.xlu0 %v9130_v11, %s7586_s22  ;;  %v9217_v58 = vsel %vm7802_vm6, %v10710_v17, %v8919_v53  ;;  %v9226_v29 = vsel %vm7802_vm6, %v10711_v63, %v8974_v38  ;;  %v10714_v38 = vld [vmem:[#allocation28_spill] sm:$0xff] }
 0x783   : > { %3700 = vrot.lane.b32.xlu2 %v9139_v55, %s7586_s22  ;;  %v9146_v18 = vpop.permute.xlu0 %3438  ;;  %4512 = vrot.lane.b32.xlu1 %v9142_v48, %s7588_s14  ;;  %v10745_v48 = vld [vmem:[#allocation45_spill] sm:$0xff] }
 0x785   : > { %v9150_v12 = vpop.permute.xlu2 %3448  ;;  %v9152_v52 = vpop.permute.xlu1 %3434 }
 0x786   : > { %10707 = vst [vmem:[#allocation58_spill] sm:$0xff] %v9150_v12 }
 0x789   : > { %3714 = vrot.lane.b32.xlu0 %v9158_v40, %s7586_s22 }
 0x78b   : > { %3706 = vrot.lane.b32.xlu2 %v9172_v33, %s7586_s22  ;;  %v9176_v19 = vpop.permute.xlu0 %3432  ;;  %3710 = vrot.lane.b32.xlu1 %v9166_v13, %s7586_s22 }
 0x78d   : > { %v3653_v36 = vpop.permute.xlu2 %3652  ;;  %v9180_v44 = vpop.permute.xlu1 %3442 }
 0x78e   : > { %3805 = vst [vmem:[#allocation1 + $0x1] ss:$9 sm:$0xff] %v3653_v36  ;;  %v10715_v36 = vperm.slane %v10714_v38, 0  ;;  %v9276_v38 = vsel %vm7802_vm6, %v10720_v5, %v8980_v41 }
 0x790   : > { %v9247_v49 = vsel %vm7802_vm6, %v10715_v36, %v8950_v21 }
 0x791   : > { %3726 = vrot.lane.b32.xlu0 %v9186_v6, %s7586_s22 }
 0x793   : > { %3712 = vrot.lane.b32.xlu2 %v9202_v22, %s7586_s22  ;;  %v9206_v8 = vpop.permute.xlu0 %3440  ;;  %3704 = vrot.lane.b32.xlu1 %v9195_v24, %s7586_s22 }
 0x795   : > { %v3659_v35 = vpop.permute.xlu2 %3658  ;;  %v9210_v0 = vpop.permute.xlu1 %3446 }
 0x796   : > { %3811 = vst [vmem:[#allocation1 + $0x4] ss:$9 sm:$0xff] %v3659_v35  ;;  %v10718_v35 = vperm.slane %v10717_v60, 0  ;;  %v10723_v60 = vld [vmem:[#allocation29_spill] sm:$0xff] }
 0x798   : > { %v9262_v17 = vsel %vm7802_vm6, %v10718_v35, %v9012_v10  ;;  %v10721_v10 = vld [vmem:[#allocation27_spill] sm:$0xff]  ;;  %v9291_v35 = vsel %vm7802_vm6, %v10723_v60, %v9039_v15  ;;  %v7051_v60 = vld [vmem:[#allocation13 + $0x30] sm:$0xff] }
 0x799   : > { %3720 = vrot.lane.b32.xlu0 %v9217_v58, %s7586_s22  ;;  %v10722_v36 = vperm.slane %v10721_v10, 0  ;;  %v7062_v10 = vld [vmem:[#allocation13 + $0x88] sm:$0xff] }
 0x79a   : > { %5322 = vmatpush.bf16.msra.mxu2 %v7062_v10  ;;  %v10729_v10 = vld [vmem:[#allocation33_spill] sm:$0xff] }
 0x79b   : > { %3718 = vrot.lane.b32.xlu2 %v9232_v26, %s7586_s22  ;;  %v9236_v23 = vpop.permute.xlu0 %3450  ;;  %3716 = vrot.lane.b32.xlu1 %v9226_v29, %s7586_s22  ;;  %v9285_v27 = vsel %vm7802_vm6, %v10722_v36, %v9033_v7  ;;  %v7052_v7 = vld [vmem:[#allocation13 + $0x38] sm:$0xff]  ;;  %v10724_v36 = vld [vmem:[#allocation34_spill] sm:$0xff] }
 0x79c   : > { %10712 = vst [vmem:[#allocation59_spill] sm:$0xff] %v9236_v23  ;;  %5138 = vmatpush.bf16.msrb.mxu3 %v7052_v7  ;;  %v10727_v23 = vld [vmem:[#allocation32_spill] sm:$0xff] }
 0x79d   : > { %v3665_v53 = vpop.permute.xlu2 %3664  ;;  %v9240_v25 = vpop.permute.xlu1 %3452 }
 0x79e   : > { %10713 = vst [vmem:[#allocation60_spill] sm:$0xff] %v9240_v25 }
 0x79f   : > { %3817 = vst [vmem:[#allocation1 + $0x7] ss:$9 sm:$0xff] %v3665_v53 }
 0x7a0   : > { %5139 = vmatpush.bf16.msrb.mxu3 %v7051_v60  ;;  %v10730_v60 = vperm.slane %v10729_v10, 0 }
 0x7a1   : > { %3732 = vrot.lane.b32.xlu0 %v9247_v49, %s7586_s22 }
 0x7a3   : > { %3724 = vrot.lane.b32.xlu2 %v9262_v17, %s7586_s22  ;;  %v9266_v21 = vpop.permute.xlu0 %3456  ;;  %3722 = vrot.lane.b32.xlu1 %v9255_v14, %s7586_s22 }
 0x7a4   : > { %10719 = vst [vmem:[#allocation28_spill] sm:$0xff] %v9266_v21  ;;  %v10725_v21 = vperm.slane %v10724_v36, 0  ;;  %v9318_v36 = vsel %vm7802_vm6, %v10727_v23, %v9067_v47  ;;  %v7049_v23 = vld [vmem:[#allocation13 + $0x20] sm:$0xff] }
 0x7a5   : > { %v9270_v63 = vpop.permute.xlu2 %3670  ;;  %v3651_v53 = vpop.permute.xlu1 %3650 }
 0x7a6   : > { %3803 = vst [vmem:[#allocation1] ss:$9 sm:$0xff] %v3651_v53  ;;  %v9304_v15 = vsel %vm7802_vm6, %v10725_v21, %v9010_v4  ;;  %v7050_v21 = vld [vmem:[#allocation13 + $0x28] sm:$0xff] }
 0x7a7   : > { %5140 = vmatpush.bf16.msrb.mxu3 %v7050_v21 }
 0x7a9   : > { %3738 = vrot.lane.b32.xlu0 %v9276_v38, %s7586_s22 }
 0x7ab   : > { %3730 = vrot.lane.b32.xlu2 %v9291_v35, %s7586_s22  ;;  %v3655_v41 = vpop.permute.xlu0 %3654  ;;  %3728 = vrot.lane.b32.xlu1 %v9285_v27, %s7586_s22 }
 0x7ac   : > { %3807 = vst [vmem:[#allocation1 + $0x2] ss:$9 sm:$0xff] %v3655_v41  ;;  %v7061_v41 = vld [vmem:[#allocation13 + $0x80] sm:$0xff]  ;;  %5141 = vmatpush.bf16.msrb.mxu3 %v7049_v23 }
 0x7ad   : > { %v9297_v53 = vpop.permute.xlu2 %3676  ;;  %v3663_v5 = vpop.permute.xlu1 %3662  ;;  %5323 = vmatpush.bf16.msra.mxu2 %v7061_v41  ;;  %v10731_v41 = vld [vmem:[#allocation35_spill] sm:$0xff] }
 0x7ae   : > { %3815 = vst [vmem:[#allocation1 + $0x6] ss:$9 sm:$0xff] %v3663_v5  ;;  %v9312_v5 = vsel %vm7802_vm6, %v10726_v28, %v9061_v46  ;;  %v10728_v28 = vld [vmem:[#allocation38_spill] sm:$0xff] }
 0x7af   : > { %v9330_v47 = vsel %vm7802_vm6, %v10728_v28, %v9041_v56 }
 0x7b1   : > { %3744 = vrot.lane.b32.xlu0 %v9304_v15, %s7586_s22 }
 0x7b3   : > { %3742 = vrot.lane.b32.xlu2 %v9318_v36, %s7586_s22  ;;  %v3661_v4 = vpop.permute.xlu0 %3660  ;;  %3734 = vrot.lane.b32.xlu1 %v9312_v5, %s7586_s22 }
 0x7b4   : > { %3813 = vst [vmem:[#allocation1 + $0x5] ss:$9 sm:$0xff] %v3661_v4  ;;  %v9339_v4 = vsel %vm7802_vm6, %v10730_v60, %v9091_v50  ;;  %v7048_v60 = vld [vmem:[#allocation13 + $0x18] sm:$0xff] }
 0x7b5   : > { %v9324_v7 = vpop.permute.xlu2 %3682  ;;  %v3657_v46 = vpop.permute.xlu1 %3656  ;;  %5142 = vmatpush.bf16.msrb.mxu3 %v7048_v60 }
 0x7b6   : > { %3809 = vst [vmem:[#allocation1 + $0x3] ss:$9 sm:$0xff] %v3657_v46  ;;  %v10732_v46 = vperm.slane %v10731_v41, 0 }
 0x7b8   : > { %v9346_v25 = vsel %vm7802_vm6, %v10732_v46, %v9096_v32  ;;  %v10733_v32 = vld [vmem:[#allocation39_spill] sm:$0xff] }
 0x7b9   : > { %3750 = vrot.lane.b32.xlu0 %v9330_v47, %s7586_s22  ;;  %v10734_v41 = vperm.slane %v10733_v32, 0  ;;  %v10736_v32 = vld [vmem:[#allocation36_spill] sm:$0xff] }
 0x7bb   : > { %3736 = vrot.lane.b32.xlu2 %v9346_v25, %s7586_s22  ;;  %v3667_v56 = vpop.permute.xlu0 %3666  ;;  %3740 = vrot.lane.b32.xlu1 %v9339_v4, %s7586_s22  ;;  %v9361_v46 = vsel %vm7802_vm6, %v10734_v41, %v9069_v9  ;;  %v10737_v9 = vperm.slane %v10736_v32, 0 }
 0x7bd   : > { %v3818_v21 = vld [vmem:[#allocation1] sm:$0xff]  ;;  %v9352_v28 = vpop.permute.xlu2 %3694  ;;  %v3669_v50 = vpop.permute.xlu1 %3668 }
 0x7be   : > { %3820 = vst [vmem:[#allocation1] ss:$9 sm:$0xff] %v8927_v57  ;;  %v4063_v10 = vshrl.u32 %v3818_v21, 16  ;;  %v4066_v12 = vshll.u32 %v3818_v21, 16  ;;  %v10735_v57 = vld [vmem:[#allocation37_spill] sm:$0xff] }
 0x7bf   : > { %3822 = vst [vmem:[#allocation1 + $0x1] ss:$9 sm:$0xff] %v8942_v34  ;;  %v9371_v34 = vsel %vm7802_vm6, %v10735_v57, %v9116_v51 }
 0x7c0   : > { %3824 = vst [vmem:[#allocation1 + $0x2] ss:$9 sm:$0xff] %v8935_v45  ;;  %v4065_v23 = vrot.slane %v4063_v10, 7  ;;  %v9378_v45 = vsel %vm7802_vm6, %v10737_v9, %v9123_v31  ;;  %v7047_v10 = vld [vmem:[#allocation13 + $0x10] sm:$0xff]  ;;  %v10741_v9 = vld [vmem:[#allocation41_spill] sm:$0xff] }
 0x7c1   : > { %3826 = vst [vmem:[#allocation1 + $0x3] ss:$9 sm:$0xff] %v8989_v2  ;;  %3756 = vrot.lane.b32.xlu0 %v9361_v46, %s7586_s22  ;;  %5143 = vmatpush.bf16.msrb.mxu3 %v7047_v10 }
 0x7c2   : > { %3828 = vst [vmem:[#allocation1 + $0x4] ss:$9 sm:$0xff] %v8966_v54  ;;  %v4068_v21 = vor.u32 %v4066_v12, %v4065_v23  ;;  %v9383_v2 = vsel %vm7802_vm6, %v4065_v23, 0  ;;  %v7046_v23 = vld [vmem:[#allocation13 + $0x8] sm:$0xff] }
 0x7c3   : > { %3830 = vst [vmem:[#allocation1 + $0x5] ss:$9 sm:$0xff] %v8972_v37  ;;  %v3679_v60 = vpop.permute.xlu0 %3678  ;;  %3746 = vrot.lane.b32.xlu1 %v9371_v34, %s7586_s22  ;;  %3748 = vrot.lane.b32.xlu2 %v9378_v45, %s7586_s22  ;;  %v4452_v12 = vrot.slane %v9383_v2, 1 }
 0x7c4   : > { %3832 = vst [vmem:[#allocation1 + $0x6] ss:$9 sm:$0xff] %v8958_v43  ;;  %v9393_v54 = vsel %vm7802_vm6, 0, %v4068_v21  ;;  %v10738_v43 = vld [vmem:[#allocation44_spill] sm:$0xff]  ;;  %v9423_v21 = vsel %vm7802_vm6, %v10741_v9, %v9152_v52  ;;  %v10743_v9 = vld [vmem:[#allocation42_spill] sm:$0xff] }
 0x7c5   : > { %3834 = vst [vmem:[#allocation1 + $0x7] ss:$9 sm:$0xff] %v8997_v16  ;;  %v9396_v31 = vpop.permute.xlu2 %3688  ;;  %v3675_v51 = vpop.permute.xlu1 %3674  ;;  %v4451_v37 = vrot.slane %v9393_v54, 1  ;;  %v9407_v57 = vsel %vm7802_vm6, %v10738_v43, %v9180_v44  ;;  %5144 = vmatpush.bf16.msrb.mxu3 %v7046_v23  ;;  %v10740_v16 = vld [vmem:[#allocation40_spill] sm:$0xff] }
 0x7c6   : > { %10739 = vst [vmem:[#allocation26_spill] sm:$0xff] %v9407_v57  ;;  %v9417_v32 = vsel %vm7802_vm6, %v10740_v16, %v9146_v18 }
 0x7c7   : > { %v9401_v41 = vsel %vm4444_vm15, %v4451_v37, %v4452_v12  ;;  %v7045_v37 = vld [vmem:[#allocation13] sm:$0xff] }
 0x7c8   : > { %6860 = vmatmul.msk.bf16.vlgmr.msra.gmra.mxu2 %vm1749_vm7, %v9401_v41 }
 0x7c9   : > { %3762 = vrot.lane.b32.xlu0 %v9407_v57, %s7586_s22  ;;  %5145 = vmatpush.bf16.msrb.mxu3 %v7045_v37  ;;  %v10744_v57 = vperm.slane %v10743_v9, 0  ;;  %v10749_v37 = vld [vmem:[#allocation20_spill] sm:$0xff] }
 0x7cb   : > { %v3673_v44 = vpop.permute.xlu0 %3672  ;;  %3758 = vrot.lane.b32.xlu1 %v9417_v32, %s7586_s22  ;;  %3754 = vrot.lane.b32.xlu2 %v9423_v21, %s7586_s22 }
 0x7cc   : > { %v3835_v10 = vld [vmem:[#allocation1] sm:$0xff] }
 0x7cd   : > { %3841 = vst [vmem:[#allocation1 + $0x2] ss:$9 sm:$0xff] %v9270_v63  ;;  %v9430_v12 = vpop.permute.xlu2 %4606  ;;  %v3681_v18 = vpop.permute.xlu1 %3680  ;;  %v4069_v23 = vshrl.u32 %v3835_v10, 16  ;;  %v4072_v43 = vshll.u32 %v3835_v10, 16  ;;  %v9440_v63 = vsel %vm7802_vm6, %v10744_v57, %v9176_v19  ;;  %v10748_v10 = vld [vmem:[#allocation23_spill] sm:$0xff] }
 0x7ce   : > { %10742 = vst [vmem:[#allocation25_spill] sm:$0xff] %v9430_v12 }
 0x7cf   : > { %3847 = vst [vmem:[#allocation1 + $0x5] ss:$9 sm:$0xff] %v9297_v53  ;;  %v4071_v52 = vrot.slane %v4069_v23, 7  ;;  %v10746_v53 = vperm.slane %v10745_v48, 0  ;;  %v10750_v23 = vld [vmem:[#allocation43_spill] sm:$0xff] }
 0x7d0   : > { %3837 = vst [vmem:[#allocation1] ss:$9 sm:$0xff] %v3667_v56 }
 0x7d1   : > { %3839 = vst [vmem:[#allocation1 + $0x1] ss:$9 sm:$0xff] %v3669_v50  ;;  %4638 = vrot.lane.b32.xlu0 %v9393_v54, %s7586_s22  ;;  %v4074_v16 = vor.u32 %v4072_v43, %v4071_v52  ;;  %v9447_v56 = vsel %vm7802_vm6, %v10746_v53, %v9206_v8  ;;  %v4205_v50 = vsel %vm7802_vm6, %v4071_v52, 0  ;;  %v10751_v52 = vperm.slane %v10750_v23, 0 }
 0x7d2   : > { %3849 = vst [vmem:[#allocation1 + $0x6] ss:$9 sm:$0xff] %v3679_v60  ;;  %v4455_v57 = vrot.slane %v4205_v50, 1 }
 0x7d3   : > { %10747 = vst [vmem:[#allocation31_spill] sm:$0xff] %v9447_v56  ;;  %v9451_v60 = vpop.permute.xlu0 %3684  ;;  %3752 = vrot.lane.b32.xlu1 %v9440_v63, %s7586_s22  ;;  %3760 = vrot.lane.b32.xlu2 %v9447_v56, %s7586_s22  ;;  %v9459_v48 = vsel %vm7802_vm6, 0, %v4074_v16  ;;  %v9481_v43 = vsel %vm7802_vm6, %v10751_v52, %v9098_v39  ;;  %v4247_v52 = vshll.u32 %v9393_v54, 16 }
 0x7d4   : > { %3845 = vst [vmem:[#allocation1 + $0x4] ss:$9 sm:$0xff] %v3675_v51  ;;  %v4454_v19 = vrot.slane %v9459_v48, 1 }
 0x7d5   : > { %3843 = vst [vmem:[#allocation1 + $0x3] ss:$9 sm:$0xff] %v3673_v44  ;;  %v9462_v8 = vpop.permute.xlu2 %4544  ;;  %v9464_v51 = vpop.permute.xlu1 %3686 }
 0x7d6   : > { %3851 = vst [vmem:[#allocation1 + $0x7] ss:$9 sm:$0xff] %v3681_v18  ;;  %v9467_v44 = vsel %vm4444_vm15, %v4454_v19, %v4455_v57  ;;  %v4703_v18 = vsel %vm1749_vm7, %v10749_v37, %v10748_v10  ;;  %v4259_v19 = vshll.u32 %v9459_v48, 16  ;;  %v10753_v57 = vld [vmem:[#allocation24_spill] sm:$0xff] }
 0x7d7   : > { %10752 = vst [vmem:[#allocation27_spill] sm:$0xff] %v9481_v43  ;;  %v4735_v10 = vsel %vm1752_vm11, %v4703_v18, %v10753_v57  ;;  %v10755_v57 = vld [vmem:[#allocation52_spill] sm:$0xff] }
 0x7d8   : > { %6861 = vmatmul.msk.bf16.gmra.mxu2 %vm1749_vm7, %v9467_v44  ;;  %v4261_v18 = vrot.slane %v4259_v19, 1  ;;  %v4252_v19 = vshll.u32 %v9383_v2, 16 }
 0x7d9   : > { %4576 = vrot.lane.b32.xlu0 %v9393_v54, %s7587_s26 }
 0x7db   : > { %v3691_v9 = vpop.permute.xlu0 %3690  ;;  %3764 = vrot.lane.b32.xlu1 %v9481_v43, %s7586_s22  ;;  %4546 = vrot.lane.b32.xlu2 %v9401_v41, %s7586_s22 }
 0x7dd   : > { %v3852_v16 = vld [vmem:[#allocation1] sm:$0xff]  ;;  %v9492_v39 = vpop.permute.xlu2 %3700  ;;  %v4575_v23 = vpop.permute.xlu1 %4574 }
 0x7de   : > { %3854 = vst [vmem:[#allocation1] ss:$9 sm:$0xff] %v9002_v20  ;;  %v4075_v53 = vshrl.u32 %v3852_v16, 16  ;;  %v4767_v37 = vsel %vm1755_vm12, %v4735_v10, %v4575_v23  ;;  %v4078_v12 = vshll.u32 %v3852_v16, 16  ;;  %v10754_v20 = vld [vmem:[#allocation53_spill] sm:$0xff] }
 0x7df   : > { %3856 = vst [vmem:[#allocation1 + $0x1] ss:$9 sm:$0xff] %v9019_v42  ;;  %5146 = vmatmul.bf16.vlgmr.msrb.gmra.mxu3 %v4767_v37  ;;  %v4249_v42 = vrot.slane %v4247_v52, 1  ;;  %v10757_v37 = vld [vmem:[#allocation54_spill] sm:$0xff] }
 0x7e0   : > { %3858 = vst [vmem:[#allocation1 + $0x2] ss:$9 sm:$0xff] %v9026_v61  ;;  %v4077_v43 = vrot.slane %v4075_v53, 7  ;;  %v4264_v61 = vshll.u32 %v4205_v50, 16 }
 0x7e1   : > { %3860 = vst [vmem:[#allocation1 + $0x3] ss:$9 sm:$0xff] %v9055_v3  ;;  %4578 = vrot.lane.b32.xlu0 %v9459_v48, %s7587_s26 }
 0x7e2   : > { %3862 = vst [vmem:[#allocation1 + $0x4] ss:$9 sm:$0xff] %v10754_v20  ;;  %v4080_v56 = vor.u32 %v4078_v12, %v4077_v43  ;;  %v9509_v3 = vsel %vm7802_vm6, %v4077_v43, 0  ;;  %v4257_v12 = vshrl.u32 %v9459_v48, 16  ;;  %v4266_v52 = vrot.slane %v4264_v61, 1 }
 0x7e3   : > { %3864 = vst [vmem:[#allocation1 + $0x5] ss:$9 sm:$0xff] %v9088_v30  ;;  %v3697_v30 = vpop.permute.xlu0 %3696  ;;  %4608 = vrot.lane.b32.xlu1 %v9401_v41, %s7588_s14  ;;  %4640 = vrot.lane.b32.xlu2 %v9459_v48, %s7586_s22  ;;  %v4458_v23 = vrot.slane %v9509_v3, 1 }
 0x7e4   : > { %3866 = vst [vmem:[#allocation1 + $0x6] ss:$9 sm:$0xff] %v10755_v57  ;;  %v9505_v53 = vsel %vm7802_vm6, 0, %v4080_v56  ;;  %v4262_v16 = vor.u32 %v4261_v18, %v4257_v12  ;;  %v4245_v56 = vshrl.u32 %v9393_v54, 16  ;;  %v4254_v18 = vrot.slane %v4252_v19, 1 }
 0x7e5   : > { %10756 = vst [vmem:[#allocation29_spill] sm:$0xff] %v9505_v53  ;;  %v4457_v50 = vrot.slane %v9505_v53, 1  ;;  %v9520_v43 = vpop.permute.xlu2 %3706  ;;  %v3693_v10 = vpop.permute.xlu1 %3692 }
 0x7e6   : > { %3868 = vst [vmem:[#allocation1 + $0x7] ss:$9 sm:$0xff] %v10757_v37  ;;  %v4250_v20 = vor.u32 %v4249_v42, %v4245_v56  ;;  %v9529_v41 = vsel %vm4219_vm0, %v4262_v16, %v4266_v52 }
 0x7e7   : > { %v9524_v57 = vsel %vm4444_vm15, %v4457_v50, %v4458_v23  ;;  %10758 = vst [vmem:[#allocation34_spill] sm:$0xff] %v9529_v41 }
 0x7e8   : > { %6862 = vmatmul.msk.bf16.gmra.mxu2 %vm1749_vm7, %v9524_v57  ;;  %v9534_v12 = vsel %vm4219_vm0, %v4250_v20, %v4254_v18 }
 0x7e9   : > { %4672 = vrot.lane.b32.xlu0 %v9529_v41, %s7587_s26 }
 0x7eb   : > { %v9537_v42 = vpop.permute.xlu0 %3702  ;;  %4670 = vrot.lane.b32.xlu1 %v9534_v12, %s7587_s26  ;;  %4642 = vrot.lane.b32.xlu2 %v9505_v53, %s7586_s22 }
 0x7ed   : > { %v3869_v2 = vld [vmem:[#allocation1] sm:$0xff]  ;;  %v9545_v37 = vpop.permute.xlu2 %3712  ;;  %v9547_v50 = vpop.permute.xlu1 %3698 }
 0x7ee   : > { %3871 = vst [vmem:[#allocation1] ss:$9 sm:$0xff] %v9324_v7  ;;  %v4081_v61 = vshrl.u32 %v3869_v2, 16  ;;  %v4084_v56 = vshll.u32 %v3869_v2, 16 }
 0x7ef   : > { %3877 = vst [vmem:[#allocation1 + $0x3] ss:$9 sm:$0xff] %v9396_v31 }
 0x7f0   : > { %3883 = vst [vmem:[#allocation1 + $0x6] ss:$9 sm:$0xff] %v9352_v28  ;;  %v4083_v16 = vrot.slane %v4081_v61, 7  ;;  %v4269_v61 = vshrl.u32 %v9505_v53, 16 }
 0x7f1   : > { %3873 = vst [vmem:[#allocation1 + $0x1] ss:$9 sm:$0xff] %v9451_v60  ;;  %4516 = vrot.lane.b32.xlu0 %v9529_v41, %s7588_s14 }
 0x7f2   : > { %3875 = vst [vmem:[#allocation1 + $0x2] ss:$9 sm:$0xff] %v9464_v51  ;;  %v4086_v7 = vor.u32 %v4084_v56, %v4083_v16  ;;  %v4207_v28 = vsel %vm7802_vm6, %v4083_v16, 0  ;;  %v4271_v51 = vshll.u32 %v9505_v53, 16  ;;  %v4276_v16 = vshll.u32 %v9509_v3, 16 }
 0x7f3   : > { %3879 = vst [vmem:[#allocation1 + $0x4] ss:$9 sm:$0xff] %v3691_v9  ;;  %v9559_v19 = vpop.permute.xlu0 %3708  ;;  %4514 = vrot.lane.b32.xlu1 %v9534_v12, %s7588_s14  ;;  %4580 = vrot.lane.b32.xlu2 %v9505_v53, %s7587_s26  ;;  %v4461_v23 = vrot.slane %v4207_v28, 1 }
 0x7f4   : > { %3885 = vst [vmem:[#allocation1 + $0x7] ss:$9 sm:$0xff] %v3697_v30  ;;  %v9555_v31 = vsel %vm7802_vm6, 0, %v4086_v7  ;;  %v4273_v20 = vrot.slane %v4271_v51, 1  ;;  %v4278_v53 = vrot.slane %v4276_v16, 1 }
 0x7f5   : > { %3881 = vst [vmem:[#allocation1 + $0x5] ss:$9 sm:$0xff] %v3693_v10  ;;  %v4460_v60 = vrot.slane %v9555_v31, 1  ;;  %v9567_v9 = vpop.permute.xlu2 %3718  ;;  %v4513_v30 = vpop.permute.xlu1 %4512  ;;  %v4283_v10 = vshll.u32 %v9555_v31, 16 }
 0x7f6   : > { %v4705_v2 = vsel %vm1749_vm7, %v9059_v1, %v4513_v30  ;;  %v4274_v1 = vor.u32 %v4273_v20, %v4269_v61  ;;  %v10759_v30 = vld [vmem:[#allocation55_spill] sm:$0xff] }
 0x7f7   : > { %v9571_v52 = vsel %vm4444_vm15, %v4460_v60, %v4461_v23  ;;  %v4285_v56 = vrot.slane %v4283_v10, 1  ;;  %v4288_v60 = vshll.u32 %v4207_v28, 16  ;;  %v9593_v10 = vsel %vm1752_vm11, %v4705_v2, %v9462_v8 }
 0x7f8   : > { %6863 = vmatmul.msk.bf16.gmra.mxu2 %vm1749_vm7, %v9571_v52 }
 0x7f9   : > { %4612 = vrot.lane.b32.xlu0 %v9524_v57, %s7588_s14  ;;  %v4290_v61 = vrot.slane %v4288_v60, 1 }
 0x7fb   : > { %v9583_v51 = vpop.permute.xlu0 %3714  ;;  %4610 = vrot.lane.b32.xlu1 %v9467_v44, %s7588_s14  ;;  %4582 = vrot.lane.b32.xlu2 %v9555_v31, %s7587_s26 }
 0x7fc   : > { %v3886_v18 = vld [vmem:[#allocation1] sm:$0xff] }
 0x7fd   : > { %3888 = vst [vmem:[#allocation1] ss:$9 sm:$0xff] %v9113_v62  ;;  %v4087_v7 = vshrl.u32 %v3886_v18, 16  ;;  %v4281_v62 = vshrl.u32 %v9555_v31, 16  ;;  %v4090_v3 = vshll.u32 %v3886_v18, 16  ;;  %v3711_v28 = vpop.permute.xlu1 %3710  ;;  %v9602_v18 = vsel %vm4219_vm0, %v4274_v1, %v4278_v53 }
 0x7fe   : > { %3890 = vst [vmem:[#allocation1 + $0x1] ss:$9 sm:$0xff] %v9139_v55  ;;  %v9596_v55 = vpop.permute.xlu2 %3724 }
 0x7ff   : > { %3892 = vst [vmem:[#allocation1 + $0x2] ss:$9 sm:$0xff] %v10759_v30  ;;  %v4089_v23 = vrot.slane %v4087_v7, 7  ;;  %v4286_v41 = vor.u32 %v4285_v56, %v4281_v62 }
 0x800   : > { %3894 = vst [vmem:[#allocation1 + $0x3] ss:$9 sm:$0xff] %v9195_v24 }
 0x801   : > { %3896 = vst [vmem:[#allocation1 + $0x4] ss:$9 sm:$0xff] %v9172_v33  ;;  %v4092_v20 = vor.u32 %v4090_v3, %v4089_v23  ;;  %4674 = vrot.lane.b32.xlu0 %v9602_v18, %s7587_s26  ;;  %v9612_v33 = vsel %vm4219_vm0, %v4286_v41, %v4290_v61 }
 0x802   : > { %3898 = vst [vmem:[#allocation1 + $0x5] ss:$9 sm:$0xff] %v9130_v11  ;;  %v4208_v11 = vsel %vm7802_vm6, %v4089_v23, 0 }
 0x803   : > { %3900 = vst [vmem:[#allocation1 + $0x6] ss:$9 sm:$0xff] %v9166_v13  ;;  %v9606_v8 = vsel %vm7802_vm6, 0, %v4092_v20  ;;  %v9616_v13 = vpop.permute.xlu0 %3726  ;;  %4548 = vrot.lane.b32.xlu1 %v9467_v44, %s7586_s22  ;;  %4676 = vrot.lane.b32.xlu2 %v9612_v33, %s7587_s26  ;;  %v4464_v2 = vrot.slane %v4208_v11, 1  ;;  %v4300_v62 = vshll.u32 %v4208_v11, 16 }
 0x804   : > { %3902 = vst [vmem:[#allocation1 + $0x7] ss:$9 sm:$0xff] %v9202_v22  ;;  %v4463_v24 = vrot.slane %v9606_v8, 1  ;;  %v4293_v23 = vshrl.u32 %v9606_v8, 16 }
 0x805   : > { %v3705_v53 = vpop.permute.xlu1 %3704 }
 0x806   : > { %v9623_v22 = vpop.permute.xlu2 %3730  ;;  %v4465_v41 = vsel %vm4444_vm15, %v4463_v24, %v4464_v2  ;;  %v4302_v2 = vrot.slane %v4300_v62, 1 }
 0x808   : > { %6864 = vmatmul.msk.bf16.gmra.mxu2 %vm1749_vm7, %v4465_v41 }
 0x809   : > { %4518 = vrot.lane.b32.xlu0 %v9602_v18, %s7588_s14 }
 0x80b   : > { %v3903_v16 = vld [vmem:[#allocation1] sm:$0xff]  ;;  %v9632_v56 = vpop.permute.xlu0 %3720  ;;  %4550 = vrot.lane.b32.xlu1 %v9524_v57, %s7586_s22  ;;  %4520 = vrot.lane.b32.xlu2 %v9612_v33, %s7588_s14 }
 0x80c   : > { %3907 = vst [vmem:[#allocation1 + $0x1] ss:$9 sm:$0xff] %v9492_v39  ;;  %v4093_v44 = vshrl.u32 %v3903_v16, 16  ;;  %v4096_v60 = vshll.u32 %v3903_v16, 16 }
 0x80d   : > { %3913 = vst [vmem:[#allocation1 + $0x4] ss:$9 sm:$0xff] %v9520_v43  ;;  %v9642_v1 = vpop.permute.xlu1 %3716 }
 0x80e   : > { %3909 = vst [vmem:[#allocation1 + $0x2] ss:$9 sm:$0xff] %v9537_v42  ;;  %v4095_v7 = vrot.slane %v4093_v44, 7  ;;  %v9640_v39 = vpop.permute.xlu2 %3742  ;;  %v4295_v42 = vshll.u32 %v9606_v8, 16 }
 0x80f   : > { %3919 = vst [vmem:[#allocation1 + $0x7] ss:$9 sm:$0xff] %v9545_v37 }
 0x810   : > { %3905 = vst [vmem:[#allocation1] ss:$9 sm:$0xff] %v9547_v50  ;;  %v4098_v43 = vor.u32 %v4096_v60, %v4095_v7  ;;  %v9654_v37 = vsel %vm7802_vm6, %v4095_v7, 0  ;;  %v4297_v50 = vrot.slane %v4295_v42, 1  ;;  %v10760_v60 = vld [vmem:[#allocation47_spill] sm:$0xff] }
 0x811   : > { %3915 = vst [vmem:[#allocation1 + $0x5] ss:$9 sm:$0xff] %v9559_v19  ;;  %4614 = vrot.lane.b32.xlu0 %v9571_v52, %s7588_s14  ;;  %v4467_v20 = vrot.slane %v9654_v37, 1 }
 0x812   : > { %3917 = vst [vmem:[#allocation1 + $0x6] ss:$9 sm:$0xff] %v3711_v28  ;;  %v9648_v57 = vsel %vm7802_vm6, 0, %v4098_v43  ;;  %v4298_v61 = vor.u32 %v4297_v50, %v4293_v23 }
 0x813   : > { %3911 = vst [vmem:[#allocation1 + $0x3] ss:$9 sm:$0xff] %v3705_v53  ;;  %v9656_v30 = vpop.permute.xlu0 %3732  ;;  %4644 = vrot.lane.b32.xlu1 %v9555_v31, %s7586_s22  ;;  %4616 = vrot.lane.b32.xlu2 %v4465_v41, %s7588_s14  ;;  %v4466_v19 = vrot.slane %v9648_v57, 1  ;;  %v4307_v50 = vshll.u32 %v9648_v57, 16 }
 0x814   : > { %v9677_v11 = vsel %vm4219_vm0, %v4298_v61, %v4302_v2 }
 0x815   : > { %v3723_v28 = vpop.permute.xlu1 %3722  ;;  %v9667_v53 = vsel %vm4444_vm15, %v4466_v19, %v4467_v20  ;;  %v4309_v20 = vrot.slane %v4307_v50, 1 }
 0x816   : > { %v9663_v3 = vpop.permute.xlu2 %3736 }
 0x818   : > { %6865 = vmatmul.msk.bf16.gmra.mxu2 %vm1749_vm7, %v9667_v53 }
 0x819   : > { %4552 = vrot.lane.b32.xlu0 %v9571_v52, %s7586_s22 }
 0x81a   : > { %v3920_v24 = vld [vmem:[#allocation1] sm:$0xff] }
 0x81b   : > { %3922 = vst [vmem:[#allocation1] ss:$9 sm:$0xff] %v9158_v40  ;;  %v4099_v16 = vshrl.u32 %v3920_v24, 16  ;;  %v4102_v7 = vshll.u32 %v3920_v24, 16  ;;  %v9680_v40 = vpop.permute.xlu0 %3738  ;;  %4646 = vrot.lane.b32.xlu1 %v9606_v8, %s7586_s22  ;;  %4678 = vrot.lane.b32.xlu2 %v9677_v11, %s7587_s26 }
 0x81c   : > { %3924 = vst [vmem:[#allocation1 + $0x1] ss:$9 sm:$0xff] %v9226_v29 }
 0x81d   : > { %3926 = vst [vmem:[#allocation1 + $0x2] ss:$9 sm:$0xff] %v9232_v26  ;;  %v4101_v44 = vrot.slane %v4099_v16, 7  ;;  %v3729_v52 = vpop.permute.xlu1 %3728 }
 0x81e   : > { %3928 = vst [vmem:[#allocation1 + $0x3] ss:$9 sm:$0xff] %v9217_v58  ;;  %v9688_v26 = vpop.permute.xlu2 %3748 }
 0x81f   : > { %3930 = vst [vmem:[#allocation1 + $0x4] ss:$9 sm:$0xff] %v9255_v14  ;;  %v4104_v29 = vor.u32 %v4102_v7, %v4101_v44  ;;  %v9701_v14 = vsel %vm7802_vm6, %v10760_v60, %v9210_v0 }
 0x820   : > { %3932 = vst [vmem:[#allocation1 + $0x5] ss:$9 sm:$0xff] %v9262_v17  ;;  %v9705_v17 = vsel %vm7802_vm6, %v4101_v44, 0 }
 0x821   : > { %3934 = vst [vmem:[#allocation1 + $0x6] ss:$9 sm:$0xff] %v9186_v6  ;;  %v9694_v58 = vsel %vm7802_vm6, 0, %v4104_v29  ;;  %4554 = vrot.lane.b32.xlu0 %v4465_v41, %s7586_s22  ;;  %v4470_v41 = vrot.slane %v9705_v17, 1 }
 0x822   : > { %3936 = vst [vmem:[#allocation1 + $0x7] ss:$9 sm:$0xff] %v9285_v27  ;;  %v4469_v6 = vrot.slane %v9694_v58, 1 }
 0x823   : > { %4584 = vrot.lane.b32.xlu1 %v9606_v8, %s7587_s26  ;;  %3766 = vrot.lane.b32.xlu2 %v9701_v14, %s7586_s22  ;;  %v9712_v27 = vpop.permute.xlu0 %3744 }
 0x824   : > { %v9722_v19 = vsel %vm4444_vm15, %v4469_v6, %v4470_v41 }
 0x825   : > { %v9717_v0 = vpop.permute.xlu1 %3734 }
 0x826   : > { %v9715_v42 = vpop.permute.xlu2 %3754 }
 0x828   : > { %6866 = vmatmul.msk.bf16.gmra.mxu2 %vm1749_vm7, %v9722_v19 }
 0x829   : > { %v3937_v43 = vld [vmem:[#allocation1] sm:$0xff]  ;;  %4648 = vrot.lane.b32.xlu0 %v9648_v57, %s7586_s22 }
 0x82a   : > { %3939 = vst [vmem:[#allocation1] ss:$9 sm:$0xff] %v9583_v51  ;;  %v4105_v62 = vshrl.u32 %v3937_v43, 16  ;;  %v4108_v61 = vshll.u32 %v3937_v43, 16  ;;  %v4305_v51 = vshrl.u32 %v9648_v57, 16 }
 0x82b   : > { %3943 = vst [vmem:[#allocation1 + $0x2] ss:$9 sm:$0xff] %v9567_v9  ;;  %4522 = vrot.lane.b32.xlu2 %v9677_v11, %s7588_s14  ;;  %4586 = vrot.lane.b32.xlu1 %v9648_v57, %s7587_s26  ;;  %v4312_v9 = vshll.u32 %v9654_v37, 16 }
 0x82c   : > { %3949 = vst [vmem:[#allocation1 + $0x5] ss:$9 sm:$0xff] %v9596_v55  ;;  %v4107_v23 = vrot.slane %v4105_v62, 7  ;;  %v4310_v24 = vor.u32 %v4309_v20, %v4305_v51  ;;  %v4319_v62 = vshll.u32 %v9694_v58, 16 }
 0x82d   : > { %3951 = vst [vmem:[#allocation1 + $0x6] ss:$9 sm:$0xff] %v9616_v13  ;;  %v9739_v13 = vpop.permute.xlu0 %3750  ;;  %v4314_v16 = vrot.slane %v4312_v9, 1 }
 0x82e   : > { %3945 = vst [vmem:[#allocation1 + $0x3] ss:$9 sm:$0xff] %v9632_v56  ;;  %v4110_v55 = vor.u32 %v4108_v61, %v4107_v23  ;;  %v9741_v2 = vpop.permute.xlu2 %3760  ;;  %v9743_v56 = vpop.permute.xlu1 %3740  ;;  %v4211_v37 = vsel %vm7802_vm6, %v4107_v23, 0 }
 0x82f   : > { %3941 = vst [vmem:[#allocation1 + $0x1] ss:$9 sm:$0xff] %v9642_v1  ;;  %v9752_v1 = vsel %vm4219_vm0, %v4310_v24, %v4314_v16  ;;  %v4473_v29 = vrot.slane %v4211_v37, 1  ;;  %v4336_v20 = vshll.u32 %v4211_v37, 16  ;;  %v4324_v37 = vshll.u32 %v9705_v17, 16 }
 0x830   : > { %3947 = vst [vmem:[#allocation1 + $0x4] ss:$9 sm:$0xff] %v3723_v28  ;;  %v9747_v44 = vsel %vm7802_vm6, 0, %v4110_v55  ;;  %v4321_v55 = vrot.slane %v4319_v62, 1 }
 0x831   : > { %3953 = vst [vmem:[#allocation1 + $0x7] ss:$9 sm:$0xff] %v3729_v52  ;;  %4650 = vrot.lane.b32.xlu0 %v9694_v58, %s7586_s22  ;;  %v4472_v28 = vrot.slane %v9747_v44, 1  ;;  %v4331_v50 = vshll.u32 %v9747_v44, 16  ;;  %v4329_v51 = vshrl.u32 %v9747_v44, 16 }
 0x833   : > { %4618 = vrot.lane.b32.xlu2 %v9667_v53, %s7588_s14  ;;  %4680 = vrot.lane.b32.xlu1 %v9752_v1, %s7587_s26  ;;  %v9764_v60 = vsel %vm4444_vm15, %v4472_v28, %v4473_v29 }
 0x835   : > { %v9767_v6 = vpop.permute.xlu0 %3756 }
 0x838   : > { %v3954_v7 = vld [vmem:[#allocation1] sm:$0xff]  ;;  %6867 = vmatmul.msk.bf16.gmra.mxu2 %vm1749_vm7, %v9764_v60 }
 0x839   : > { %3956 = vst [vmem:[#allocation1] ss:$9 sm:$0xff] %v9291_v35  ;;  %v4111_v52 = vshrl.u32 %v3954_v7, 16  ;;  %4588 = vrot.lane.b32.xlu0 %v9694_v58, %s7587_s26  ;;  %v9775_v35 = vpop.permute.xlu2 %4546  ;;  %v4114_v43 = vshll.u32 %v3954_v7, 16  ;;  %v4317_v7 = vshrl.u32 %v9694_v58, 16 }
 0x83a   : > { %3958 = vst [vmem:[#allocation1 + $0x1] ss:$9 sm:$0xff] %v9247_v49  ;;  %v9777_v49 = vpop.permute.xlu1 %3746 }
 0x83b   : > { %3960 = vst [vmem:[#allocation1 + $0x2] ss:$9 sm:$0xff] %v9312_v5  ;;  %v4113_v41 = vrot.slane %v4111_v52, 7  ;;  %4556 = vrot.lane.b32.xlu2 %v9667_v53, %s7586_s22  ;;  %4524 = vrot.lane.b32.xlu1 %v9752_v1, %s7588_s14  ;;  %v7060_v5 = vld [vmem:[#allocation13 + $0x78] sm:$0xff]  ;;  %v4333_v53 = vrot.slane %v4331_v50, 1  ;;  %v7057_v52 = vld [vmem:[#allocation13 + $0x60] sm:$0xff] }
 0x83c   : > { %3962 = vst [vmem:[#allocation1 + $0x3] ss:$9 sm:$0xff] %v9346_v25  ;;  %5227 = vmatpush.bf16.msra.mxu1 %v7060_v5  ;;  %v4322_v5 = vor.u32 %v4321_v55, %v4317_v7  ;;  %v7053_v7 = vld [vmem:[#allocation13 + $0x40] sm:$0xff] }
 0x83d   : > { %3964 = vst [vmem:[#allocation1 + $0x4] ss:$9 sm:$0xff] %v9276_v38  ;;  %v4116_v25 = vor.u32 %v4114_v43, %v4113_v41  ;;  %v7059_v38 = vld [vmem:[#allocation13 + $0x70] sm:$0xff]  ;;  %v9788_v23 = vpop.permute.xlu0 %3762  ;;  %v9802_v9 = vsel %vm7802_vm6, %v4113_v41, 0  ;;  %v4334_v28 = vor.u32 %v4333_v53, %v4329_v51  ;;  %v4338_v43 = vrot.slane %v4336_v20, 1 }
 0x83e   : > { %3966 = vst [vmem:[#allocation1 + $0x5] ss:$9 sm:$0xff] %v9339_v4  ;;  %v4476_v29 = vrot.slane %v9802_v9, 1 }
 0x83f   : > { %3968 = vst [vmem:[#allocation1 + $0x6] ss:$9 sm:$0xff] %v9318_v36  ;;  %v9792_v4 = vsel %vm7802_vm6, 0, %v4116_v25  ;;  %v7058_v36 = vld [vmem:[#allocation13 + $0x68] sm:$0xff]  ;;  %v4326_v25 = vrot.slane %v4324_v37, 1 }
 0x840   : > { %3970 = vst [vmem:[#allocation1 + $0x7] ss:$9 sm:$0xff] %v9304_v15  ;;  %5228 = vmatpush.bf16.msra.mxu1 %v7059_v38  ;;  %v4475_v24 = vrot.slane %v9792_v4, 1 }
 0x841   : > { %4590 = vrot.lane.b32.xlu0 %v9747_v44, %s7587_s26  ;;  %v9796_v61 = vpop.permute.xlu2 %4640  ;;  %v9836_v38 = vsel %vm4219_vm0, %v4322_v5, %v4326_v25  ;;  %v10761_v5 = vld [vmem:[#allocation31_spill] sm:$0xff] }
 0x842   : > { %v9798_v15 = vpop.permute.xlu1 %3758 }
 0x843   : > { %4558 = vrot.lane.b32.xlu2 %v9722_v19, %s7586_s22  ;;  %4620 = vrot.lane.b32.xlu1 %v9722_v19, %s7588_s14  ;;  %v9817_v19 = vsel %vm4444_vm15, %v4475_v24, %v4476_v29 }
 0x844   : > { %5229 = vmatpush.bf16.msra.mxu1 %v7058_v36 }
 0x845   : > { %v9820_v17 = vpop.permute.xlu0 %4638 }
 0x847   : > { %v3971_v16 = vld [vmem:[#allocation1] sm:$0xff] }
 0x848   : > { %3973 = vst [vmem:[#allocation1] ss:$9 sm:$0xff] %v9623_v22  ;;  %v4117_v41 = vshrl.u32 %v3971_v16, 16  ;;  %6868 = vmatmul.msk.bf16.gmra.mxu2 %vm1749_vm7, %v9817_v19  ;;  %v9825_v22 = vsel %vm4219_vm0, %v4334_v28, %v4338_v43  ;;  %5230 = vmatpush.bf16.msra.mxu1 %v7057_v52  ;;  %v4120_v62 = vshll.u32 %v3971_v16, 16  ;;  %v4343_v16 = vshll.u32 %v9792_v4, 16 }
 0x849   : > { %3975 = vst [vmem:[#allocation1 + $0x1] ss:$9 sm:$0xff] %v9656_v30  ;;  %4684 = vrot.lane.b32.xlu0 %v9825_v22, %s7587_s26  ;;  %v7056_v30 = vld [vmem:[#allocation13 + $0x58] sm:$0xff] }
 0x84a   : > { %3979 = vst [vmem:[#allocation1 + $0x3] ss:$9 sm:$0xff] %v9663_v3  ;;  %v4119_v50 = vrot.slane %v4117_v41, 7  ;;  %v9831_v3 = vpop.permute.xlu2 %4642  ;;  %v4348_v41 = vshll.u32 %v9802_v9, 16 }
 0x84b   : > { %3981 = vst [vmem:[#allocation1 + $0x4] ss:$9 sm:$0xff] %v9680_v40  ;;  %v9833_v40 = vpop.permute.xlu1 %3752  ;;  %4682 = vrot.lane.b32.xlu1 %v9836_v38, %s7587_s26  ;;  %4652 = vrot.lane.b32.xlu2 %v9747_v44, %s7586_s22 }
 0x84c   : > { %3985 = vst [vmem:[#allocation1 + $0x6] ss:$9 sm:$0xff] %v9640_v39  ;;  %v4122_v39 = vor.u32 %v4120_v62, %v4119_v50  ;;  %5231 = vmatpush.bf16.msra.mxu1 %v7056_v30  ;;  %v9858_v55 = vsel %vm7802_vm6, %v4119_v50, 0  ;;  %v4350_v50 = vrot.slane %v4348_v41, 1 }
 0x84d   : > { %3987 = vst [vmem:[#allocation1 + $0x7] ss:$9 sm:$0xff] %v9712_v27  ;;  %v7055_v27 = vld [vmem:[#allocation13 + $0x50] sm:$0xff]  ;;  %v4577_v53 = vpop.permute.xlu0 %4576  ;;  %v4479_v28 = vrot.slane %v9858_v55, 1 }
 0x84e   : > { %3977 = vst [vmem:[#allocation1 + $0x2] ss:$9 sm:$0xff] %v9717_v0  ;;  %v9846_v36 = vsel %vm7802_vm6, 0, %v4122_v39  ;;  %v4770_v20 = vsel %vm1755_vm12, %v9593_v10, %v4577_v53  ;;  %v7054_v0 = vld [vmem:[#allocation13 + $0x48] sm:$0xff]  ;;  %v10762_v39 = vld [vmem:[#allocation25_spill] sm:$0xff] }
 0x84f   : > { %3983 = vst [vmem:[#allocation1 + $0x5] ss:$9 sm:$0xff] %v9743_v56  ;;  %5151 = vmatmul.bf16.gmra.mxu3 %v4770_v20  ;;  %v4478_v10 = vrot.slane %v9846_v36, 1 }
 0x850   : > { %5232 = vmatpush.bf16.msra.mxu1 %v7055_v27  ;;  %v10763_v27 = vld [vmem:[#allocation57_spill] sm:$0xff] }
 0x851   : > { %4528 = vrot.lane.b32.xlu0 %v9825_v22, %s7588_s14  ;;  %v9872_v29 = vsel %vm4444_vm15, %v4478_v10, %v4479_v28  ;;  %v4816_v53 = vsel %vm1749_vm7, %v10763_v27, %v10762_v39 }
 0x852   : > { %v9852_v51 = vpop.permute.xlu2 %4580  ;;  %v4863_v20 = vsel %vm1752_vm11, %v4816_v53, %v9820_v17  ;;  %v4353_v17 = vshrl.u32 %v9846_v36, 16  ;;  %v10767_v53 = vld [vmem:[#allocation60_spill] sm:$0xff] }
 0x853   : > { %v9854_v56 = vpop.permute.xlu1 %3764  ;;  %4526 = vrot.lane.b32.xlu1 %v9836_v38, %s7588_s14  ;;  %4654 = vrot.lane.b32.xlu2 %v9792_v4, %s7586_s22 }
 0x854   : > { %5233 = vmatpush.bf16.msra.mxu1 %v7054_v0 }
 0x855   : > { %v9875_v52 = vpop.permute.xlu0 %4578 }
 0x856   : > { %v3988_v24 = vld [vmem:[#allocation1] sm:$0xff] }
 0x857   : > { %3990 = vst [vmem:[#allocation1] ss:$9 sm:$0xff] %v9371_v34  ;;  %v4123_v37 = vshrl.u32 %v3988_v24, 16  ;;  %v4345_v34 = vrot.slane %v4343_v16, 1  ;;  %v4126_v43 = vshll.u32 %v3988_v24, 16 }
 0x858   : > { %3992 = vst [vmem:[#allocation1 + $0x1] ss:$9 sm:$0xff] %v9378_v45  ;;  %6869 = vmatmul.msk.bf16.gmra.mxu2 %vm1749_vm7, %v9872_v29  ;;  %5234 = vmatpush.bf16.msra.mxu1 %v7053_v7 }
 0x859   : > { %3994 = vst [vmem:[#allocation1 + $0x2] ss:$9 sm:$0xff] %v9330_v47  ;;  %v4125_v45 = vrot.slane %v4123_v37, 7  ;;  %4624 = vrot.lane.b32.xlu0 %v9817_v19, %s7588_s14 }
 0x85a   : > { %3996 = vst [vmem:[#allocation1 + $0x3] ss:$9 sm:$0xff] %v9440_v63  ;;  %v9883_v47 = vpop.permute.xlu2 %4582 }
 0x85b   : > { %3998 = vst [vmem:[#allocation1 + $0x4] ss:$9 sm:$0xff] %v9423_v21  ;;  %v4609_v63 = vpop.permute.xlu1 %4608  ;;  %v4341_v21 = vshrl.u32 %v9792_v4, 16  ;;  %4622 = vrot.lane.b32.xlu1 %v9764_v60, %s7588_s14  ;;  %4592 = vrot.lane.b32.xlu2 %v9792_v4, %s7587_s26  ;;  %v4128_v25 = vor.u32 %v4126_v43, %v4125_v45  ;;  %v9911_v10 = vsel %vm7802_vm6, %v4125_v45, 0  ;;  %v10765_v43 = vld [vmem:[#allocation48_spill] sm:$0xff] }
 0x85c   : > { %4000 = vst [vmem:[#allocation1 + $0x5] ss:$9 sm:$0xff] %v9361_v46 }
 0x85d   : > { %4002 = vst [vmem:[#allocation1 + $0x6] ss:$9 sm:$0xff] %v9417_v32  ;;  %v4346_v46 = vor.u32 %v4345_v34, %v4341_v21  ;;  %v4355_v32 = vshll.u32 %v9846_v36, 16  ;;  %v4673_v30 = vpop.permute.xlu0 %4672  ;;  %v9898_v9 = vsel %vm7802_vm6, 0, %v4128_v25  ;;  %v4360_v34 = vshll.u32 %v9858_v55, 16 }
 0x85e   : > { %4004 = vst [vmem:[#allocation1 + $0x7] ss:$9 sm:$0xff] %v10761_v5  ;;  %v4481_v7 = vrot.slane %v9898_v9, 1  ;;  %v4482_v21 = vrot.slane %v9911_v10, 1  ;;  %v10766_v5 = vperm.slane %v10765_v43, 0  ;;  %v4367_v27 = vshll.u32 %v9898_v9, 16 }
 0x85f   : > { %v9894_v62 = vsel %vm4219_vm0, %v4346_v46, %v4350_v50  ;;  %v4357_v16 = vrot.slane %v4355_v32, 1  ;;  %v10773_v43 = vld [vmem:[#allocation50_spill] sm:$0xff] }
 0x860   : > { %v9927_v41 = vsel %vm4444_vm15, %v4481_v7, %v4482_v21  ;;  %v10770_v7 = vld [vmem:[#allocation26_spill] sm:$0xff]  ;;  %v4372_v21 = vshll.u32 %v9911_v10, 16 }
 0x861   : > { %4686 = vrot.lane.b32.xlu0 %v9894_v62, %s7587_s26 }
 0x862   : > { %v9907_v0 = vpop.permute.xlu2 %4676 }
 0x863   : > { %v4671_v24 = vpop.permute.xlu1 %4670  ;;  %4560 = vrot.lane.b32.xlu1 %v9764_v60, %s7586_s22  ;;  %4594 = vrot.lane.b32.xlu2 %v9846_v36, %s7587_s26  ;;  %v4358_v60 = vor.u32 %v4357_v16, %v4353_v17 }
 0x864   : > { %v4895_v28 = vsel %vm1755_vm12, %v4863_v20, %v4671_v24  ;;  %v10768_v20 = vld [vmem:[#allocation49_spill] sm:$0xff] }
 0x865   : > { %v4005_v37 = vld [vmem:[#allocation1] sm:$0xff]  ;;  %5235 = vmatmul.bf16.vlgmr.msra.gmra.mxu1 %v4895_v28  ;;  %v4517_v46 = vpop.permute.xlu0 %4516  ;;  %v10769_v24 = vperm.slane %v10768_v20, 0  ;;  %v4369_v28 = vrot.slane %v4367_v27, 1 }
 0x866   : > { %4007 = vst [vmem:[#allocation1] ss:$9 sm:$0xff] %v9777_v49  ;;  %v4129_v45 = vshrl.u32 %v4005_v37, 16  ;;  %v10764_v49 = vld [vmem:[#allocation58_spill] sm:$0xff]  ;;  %v4132_v50 = vshll.u32 %v4005_v37, 16 }
 0x867   : > { %4009 = vst [vmem:[#allocation1 + $0x1] ss:$9 sm:$0xff] %v9688_v26  ;;  %v3581_v55 = vsel %vm7802_vm6, %v10766_v5, %v10764_v49  ;;  %v4362_v26 = vrot.slane %v4360_v34, 1  ;;  %v10772_v49 = vld [vmem:[#allocation59_spill] sm:$0xff] }
 0x868   : > { %4011 = vst [vmem:[#allocation1 + $0x2] ss:$9 sm:$0xff] %v9739_v13  ;;  %6870 = vmatmul.msk.bf16.gmra.mxu2 %vm1749_vm7, %v9927_v41  ;;  %v4131_v13 = vrot.slane %v4129_v45, 7  ;;  %v10771_v45 = vld [vmem:[#allocation27_spill] sm:$0xff] }
 0x869   : > { %4013 = vst [vmem:[#allocation1 + $0x3] ss:$9 sm:$0xff] %v9833_v40  ;;  %3768 = vrot.lane.b32.xlu0 %v3581_v55, %s7586_s22  ;;  %v9943_v25 = vsel %vm4219_vm0, %v4358_v60, %v4362_v26 }
 0x86a   : > { %4015 = vst [vmem:[#allocation1 + $0x4] ss:$9 sm:$0xff] %v9715_v42  ;;  %v9940_v40 = vpop.permute.xlu2 %4520 }
 0x86b   : > { %4017 = vst [vmem:[#allocation1 + $0x5] ss:$9 sm:$0xff] %v9767_v6  ;;  %v4515_v42 = vpop.permute.xlu1 %4514  ;;  %4562 = vrot.lane.b32.xlu1 %v9817_v19, %s7586_s22  ;;  %4688 = vrot.lane.b32.xlu2 %v9943_v25, %s7587_s26 }
 0x86c   : > { %4019 = vst [vmem:[#allocation1 + $0x6] ss:$9 sm:$0xff] %v9798_v15  ;;  %v4707_v32 = vsel %vm1749_vm7, %v9393_v54, %v4515_v42  ;;  %v4134_v15 = vor.u32 %v4132_v50, %v4131_v13  ;;  %v10775_v42 = vld [vmem:[#allocation46_spill] sm:$0xff] }
 0x86d   : > { %4021 = vst [vmem:[#allocation1 + $0x7] ss:$9 sm:$0xff] %v9741_v2  ;;  %v4739_v6 = vsel %vm1752_vm11, %v4707_v32, %v9775_v35  ;;  %v4819_v2 = vsel %vm1749_vm7, %v9534_v12, %v4609_v63  ;;  %v9959_v54 = vpop.permute.xlu0 %4612  ;;  %v9978_v63 = vsel %vm7802_vm6, %v4131_v13, 0  ;;  %v10774_v13 = vld [vmem:[#allocation56_spill] sm:$0xff]  ;;  %v10777_v32 = vld [vmem:[#allocation51_spill] sm:$0xff] }
 0x86e   : > { %v4773_v39 = vsel %vm1755_vm12, %v4739_v6, %v9875_v52  ;;  %v9963_v19 = vsel %vm7802_vm6, 0, %v4134_v15  ;;  %v3583_v52 = vsel %vm7802_vm6, %v10769_v24, %v10767_v53  ;;  %v4865_v12 = vsel %vm1752_vm11, %v4819_v2, %v9796_v61  ;;  %v10009_v2 = vpop.f32.mrf.mxu2 }
 0x86f   : > { %5156 = vmatmul.bf16.gmra.mxu3 %v4773_v39  ;;  %v4898_v17 = vsel %vm1755_vm12, %v4865_v12, %v4673_v30  ;;  %v4484_v34 = vrot.slane %v9963_v19, 1  ;;  %v4365_v61 = vshrl.u32 %v9898_v9, 16  ;;  %v3582_v30 = vsel %vm7802_vm6, %v10773_v43, %v10772_v49 }
 0x870   : > { %v4485_v5 = vrot.slane %v9978_v63, 1  ;;  %v3584_v50 = vsel %vm7802_vm6, %v10775_v42, %v10774_v13  ;;  %v10778_v6 = vperm.slane %v10777_v32, 0  ;;  %v4709_v53 = vsel %vm1749_vm7, %v9459_v48, %v4517_v46  ;;  %v10779_v48 = vld [vmem:[#allocation34_spill] sm:$0xff] }
 0x871   : > { %4530 = vrot.lane.b32.xlu0 %v9894_v62, %s7588_s14  ;;  %v4370_v26 = vor.u32 %v4369_v28, %v4365_v61 }
 0x872   : > { %v9972_v16 = vpop.permute.xlu2 %4616  ;;  %v10000_v10 = vsel %vm4444_vm15, %v4484_v34, %v4485_v5 }
 0x873   : > { %v4611_v37 = vpop.permute.xlu1 %4610  ;;  %4656 = vrot.lane.b32.xlu1 %v9846_v36, %s7586_s22  ;;  %3772 = vrot.lane.b32.xlu2 %v3583_v52, %s7586_s22 }
 0x874   : > { %v4022_v35 = vld [vmem:[#allocation1] sm:$0xff]  ;;  %v4822_v46 = vsel %vm1749_vm7, %v10779_v48, %v4611_v37  ;;  %v4384_v48 = vshll.u32 %v9978_v63, 16 }
 0x875   : > { %4024 = vst [vmem:[#allocation1] ss:$9 sm:$0xff] %v10770_v7  ;;  %5240 = vmatmul.bf16.gmra.mxu1 %v4898_v17  ;;  %v4135_v60 = vshrl.u32 %v4022_v35, 16  ;;  %v4675_v39 = vpop.permute.xlu0 %4674  ;;  %v4138_v12 = vshll.u32 %v4022_v35, 16 }
 0x876   : > { %4026 = vst [vmem:[#allocation1 + $0x1] ss:$9 sm:$0xff] %v10771_v45  ;;  %v10047_v49 = vpop.f32.mrf.mxu2 }
 0x877   : > { %4028 = vst [vmem:[#allocation1 + $0x2] ss:$9 sm:$0xff] %v9701_v14  ;;  %v10776_v14 = vld [vmem:[#allocation28_spill] sm:$0xff]  ;;  %v4137_v27 = vrot.slane %v4135_v60, 7 }
 0x878   : > { %4030 = vst [vmem:[#allocation1 + $0x3] ss:$9 sm:$0xff] %v3581_v55  ;;  %v3585_v15 = vsel %vm7802_vm6, %v10778_v6, %v10776_v14  ;;  %6871 = vmatmul.msk.bf16.gmra.mxu2 %vm1749_vm7, %v10000_v10  ;;  %v4374_v55 = vrot.slane %v4372_v21, 1 }
 0x879   : > { %4032 = vst [vmem:[#allocation1 + $0x4] ss:$9 sm:$0xff] %v3582_v30  ;;  %4626 = vrot.lane.b32.xlu0 %v9872_v29, %s7588_s14  ;;  %v4140_v17 = vor.u32 %v4138_v12, %v4137_v27  ;;  %v10038_v60 = vsel %vm7802_vm6, %v4137_v27, 0  ;;  %v4825_v27 = vsel %vm1749_vm7, %v9602_v18, %v9959_v54 }
 0x87a   : > { %4034 = vst [vmem:[#allocation1 + $0x5] ss:$9 sm:$0xff] %v3583_v52  ;;  %v10015_v20 = vpop.permute.xlu2 %4678  ;;  %v10018_v52 = vsel %vm4219_vm0, %v4370_v26, %v4374_v55  ;;  %v4488_v43 = vrot.slane %v10038_v60, 1 }
 0x87b   : > { %4036 = vst [vmem:[#allocation1 + $0x6] ss:$9 sm:$0xff] %v3584_v50  ;;  %v4549_v24 = vpop.permute.xlu1 %4548  ;;  %3770 = vrot.lane.b32.xlu1 %v3582_v30, %s7586_s22  ;;  %4690 = vrot.lane.b32.xlu2 %v10018_v52, %s7587_s26  ;;  %v10030_v45 = vsel %vm7802_vm6, 0, %v4140_v17  ;;  %v10780_v30 = vld [vmem:[#allocation29_spill] sm:$0xff]  ;;  %v4377_v17 = vshrl.u32 %v9963_v19, 16 }
 0x87c   : > { %4038 = vst [vmem:[#allocation1 + $0x7] ss:$9 sm:$0xff] %v3585_v15  ;;  %v4741_v28 = vsel %vm1752_vm11, %v4709_v53, %v4549_v24 }
 0x87d   : > { %v4776_v7 = vsel %vm1755_vm12, %v4741_v28, %v9852_v51  ;;  %v4519_v34 = vpop.permute.xlu0 %4518  ;;  %v4867_v51 = vsel %vm1752_vm11, %v4822_v46, %v9831_v3 }
 0x87e   : > { %v4901_v37 = vsel %vm1755_vm12, %v4867_v51, %v4675_v39  ;;  %v10067_v55 = vpop.f32.mrf.mxu2 }
 0x87f   : > { %5161 = vmatmul.bf16.gmra.mxu3 %v4776_v7 }
 0x881   : > { %3774 = vrot.lane.b32.xlu0 %v3584_v50, %s7586_s22 }
 0x882   : > { %v3767_v61 = vpop.permute.xlu2 %3766 }
 0x883   : > { %v4039_v35 = vld [vmem:[#allocation1] sm:$0xff]  ;;  %v4551_v21 = vpop.permute.xlu1 %4550  ;;  %4658 = vrot.lane.b32.xlu1 %v9898_v9, %s7586_s22  ;;  %4532 = vrot.lane.b32.xlu2 %v9943_v25, %s7588_s14 }
 0x884   : > { %4041 = vst [vmem:[#allocation1] ss:$9 sm:$0xff] %v9788_v23  ;;  %v4487_v23 = vrot.slane %v10030_v45, 1  ;;  %v4141_v3 = vshrl.u32 %v4039_v35, 16  ;;  %v4144_v32 = vshll.u32 %v4039_v35, 16 }
 0x885   : > { %4043 = vst [vmem:[#allocation1 + $0x1] ss:$9 sm:$0xff] %v9854_v56  ;;  %5245 = vmatmul.bf16.gmra.mxu1 %v4901_v37  ;;  %v4711_v56 = vsel %vm1749_vm7, %v10780_v30, %v4519_v34  ;;  %v4615_v26 = vpop.permute.xlu0 %4614 }
 0x886   : > { %4045 = vst [vmem:[#allocation1 + $0x2] ss:$9 sm:$0xff] %v3767_v61  ;;  %v10053_v5 = vsel %vm4444_vm15, %v4487_v23, %v4488_v43  ;;  %v4143_v13 = vrot.slane %v4141_v3, 7  ;;  %v4743_v42 = vsel %vm1752_vm11, %v4711_v56, %v4551_v21  ;;  %v4386_v21 = vrot.slane %v4384_v48, 1 }
 0x887   : > { %v4779_v39 = vsel %vm1755_vm12, %v4743_v42, %v9883_v47  ;;  %v4713_v23 = vsel %vm1749_vm7, %v9555_v31, %v9940_v40  ;;  %v4828_v30 = vsel %vm1749_vm7, %v9612_v33, %v4615_v26  ;;  %v4389_v33 = vshrl.u32 %v10030_v45, 16 }
 0x888   : > { %6872 = vmatmul.msk.bf16.gmra.mxu2 %vm1749_vm7, %v10053_v5  ;;  %v4146_v6 = vor.u32 %v4144_v32, %v4143_v13  ;;  %v10084_v28 = vsel %vm7802_vm6, %v4143_v13, 0  ;;  %v4396_v26 = vshll.u32 %v10038_v60, 16 }
 0x889   : > { %4564 = vrot.lane.b32.xlu0 %v9872_v29, %s7586_s22  ;;  %v4379_v29 = vshll.u32 %v9963_v19, 16  ;;  %v4491_v46 = vrot.slane %v10084_v28, 1 }
 0x88a   : > { %v10060_v50 = vpop.permute.xlu2 %4522 }
 0x88b   : > { %v4645_v14 = vpop.permute.xlu1 %4644  ;;  %3776 = vrot.lane.b32.xlu1 %v3585_v15, %s7586_s22  ;;  %4628 = vrot.lane.b32.xlu2 %v9927_v41, %s7588_s14  ;;  %v10076_v15 = vsel %vm7802_vm6, 0, %v4146_v6  ;;  %v4381_v7 = vrot.slane %v4379_v29, 1 }
 0x88c   : > { %v4869_v53 = vsel %vm1752_vm11, %v4825_v27, %v4645_v14  ;;  %v4490_v54 = vrot.slane %v10076_v15, 1 }
 0x88d   : > { %v4553_v24 = vpop.permute.xlu0 %4552  ;;  %v4904_v18 = vsel %vm1755_vm12, %v4869_v53, %v9907_v0  ;;  %v4382_v34 = vor.u32 %v4381_v7, %v4377_v17  ;;  %v10099_v0 = vpop.f32.mrf.mxu2  ;;  %v4715_v53 = vsel %vm1749_vm7, %v9606_v8, %v10060_v50  ;;  %v4831_v7 = vsel %vm1749_vm7, %v9677_v11, %v9972_v16 }
 0x88e   : > { %v10097_v35 = vsel %vm4444_vm15, %v4490_v54, %v4491_v46  ;;  %v4745_v3 = vsel %vm1752_vm11, %v4713_v23, %v4553_v24  ;;  %v4401_v11 = vshrl.u32 %v10076_v15, 16  ;;  %v4408_v16 = vshll.u32 %v10084_v28, 16 }
 0x88f   : > { %5166 = vmatmul.bf16.gmra.mxu3 %v4779_v39  ;;  %v10106_v63 = vsel %vm4219_vm0, %v4382_v34, %v4386_v21  ;;  %v4398_v39 = vrot.slane %v4396_v26, 1 }
 0x891   : > { %4660 = vrot.lane.b32.xlu0 %v9963_v19, %s7586_s22 }
 0x892   : > { %v10080_v47 = vpop.permute.xlu2 %4618 }
 0x893   : > { %v4647_v12 = vpop.permute.xlu1 %4646  ;;  %4596 = vrot.lane.b32.xlu1 %v9898_v9, %s7587_s26  ;;  %4534 = vrot.lane.b32.xlu2 %v10018_v52, %s7588_s14 }
 0x894   : > { %v4871_v56 = vsel %vm1752_vm11, %v4828_v30, %v4647_v12 }
 0x895   : > { %5250 = vmatmul.bf16.gmra.mxu1 %v4904_v18  ;;  %v4555_v61 = vpop.permute.xlu0 %4554  ;;  %v4907_v14 = vsel %vm1755_vm12, %v4871_v56, %v10015_v20 }
 0x896   : > { %v4747_v60 = vsel %vm1752_vm11, %v4715_v53, %v4555_v61  ;;  %v4410_v61 = vrot.slane %v4408_v16, 1  ;;  %v10196_v53 = vpop.f32.mrf.mxu2 }
 0x898   : > { %6873 = vmatmul.msk.bf16.gmra.mxu2 %vm1749_vm7, %v10097_v35 }
 0x899   : > { %4566 = vrot.lane.b32.xlu0 %v9927_v41, %s7586_s22  ;;  %v4391_v41 = vshll.u32 %v10030_v45, 16 }
 0x89a   : > { %v4557_v51 = vpop.permute.xlu2 %4556 }
 0x89b   : > { %v4585_v37 = vpop.permute.xlu1 %4584  ;;  %4630 = vrot.lane.b32.xlu2 %v10000_v10, %s7588_s14  ;;  %4692 = vrot.lane.b32.xlu1 %v10106_v63, %s7587_s26  ;;  %v4393_v42 = vrot.slane %v4391_v41, 1 }
 0x89c   : > { %v4782_v43 = vsel %vm1755_vm12, %v4745_v3, %v4585_v37 }
 0x89d   : > { %v4649_v13 = vpop.permute.xlu0 %4648  ;;  %v4394_v32 = vor.u32 %v4393_v42, %v4389_v33  ;;  %v5147_v42 = vpop.f32.mrf.mxu3 }
 0x89e   : > { %v4873_v8 = vsel %vm1752_vm11, %v4831_v7, %v4649_v13 }
 0x89f   : > { %5171 = vmatmul.bf16.gmra.mxu3 %v4782_v43  ;;  %v10136_v20 = vsel %vm4219_vm0, %v4394_v32, %v4398_v39 }
 0x8a1   : > { %4662 = vrot.lane.b32.xlu0 %v10030_v45, %s7586_s22 }
 0x8a2   : > { %v10123_v31 = vpop.permute.xlu2 %4558 }
 0x8a3   : > { %v4587_v40 = vpop.permute.xlu1 %4586  ;;  %4536 = vrot.lane.b32.xlu2 %v10106_v63, %s7588_s14  ;;  %4598 = vrot.lane.b32.xlu1 %v9963_v19, %s7587_s26 }
 0x8a4   : > { %v4785_v24 = vsel %vm1755_vm12, %v4747_v60, %v4587_v40 }
 0x8a5   : > { %5255 = vmatmul.bf16.gmra.mxu1 %v4907_v14  ;;  %v4651_v6 = vpop.permute.xlu0 %4650 }
 0x8a9   : > { %4568 = vrot.lane.b32.xlu0 %v10000_v10, %s7586_s22  ;;  %v4403_v10 = vshll.u32 %v10076_v15, 16 }
 0x8aa   : > { %v4653_v29 = vpop.permute.xlu2 %4652 }
 0x8ab   : > { %v4681_v27 = vpop.permute.xlu1 %4680  ;;  %4632 = vrot.lane.b32.xlu2 %v10053_v5, %s7588_s14  ;;  %4694 = vrot.lane.b32.xlu1 %v10136_v20, %s7587_s26  ;;  %v4405_v54 = vrot.slane %v4403_v10, 1 }
 0x8ac   : > { %v4910_v17 = vsel %vm1755_vm12, %v4873_v8, %v4681_v27 }
 0x8ad   : > { %v4589_v12 = vpop.permute.xlu0 %4588  ;;  %v4406_v48 = vor.u32 %v4405_v54, %v4401_v11  ;;  %v10210_v54 = vpop.f32.mrf.mxu2 }
 0x8af   : > { %5176 = vmatmul.bf16.gmra.mxu3 %v4785_v24  ;;  %v10169_v3 = vsel %vm4219_vm0, %v4406_v48, %v4410_v61 }
 0x8b1   : > { %4664 = vrot.lane.b32.xlu0 %v10076_v15, %s7586_s22 }
 0x8b2   : > { %v10154_v50 = vpop.permute.xlu2 %4654 }
 0x8b3   : > { %v4525_v18 = vpop.permute.xlu1 %4524  ;;  %4538 = vrot.lane.b32.xlu2 %v10136_v20, %s7588_s14  ;;  %4600 = vrot.lane.b32.xlu1 %v10030_v45, %s7587_s26 }
 0x8b4   : > { %v4717_v46 = vsel %vm1749_vm7, %v9648_v57, %v4525_v18 }
 0x8b5   : > { %5260 = vmatmul.bf16.gmra.mxu1 %v4910_v17  ;;  %v4591_v34 = vpop.permute.xlu0 %4590  ;;  %v4749_v23 = vsel %vm1752_vm11, %v4717_v46, %v4557_v51 }
 0x8b6   : > { %v4788_v57 = vsel %vm1755_vm12, %v4749_v23, %v4589_v12 }
 0x8b9   : > { %4570 = vrot.lane.b32.xlu0 %v10053_v5, %s7586_s22  ;;  %v4834_v5 = vsel %vm1749_vm7, %v9752_v1, %v10080_v47 }
 0x8ba   : > { %v4593_v21 = vpop.permute.xlu2 %4592  ;;  %v4875_v43 = vsel %vm1752_vm11, %v4834_v5, %v4651_v6 }
 0x8bb   : > { %v4621_v37 = vpop.permute.xlu1 %4620  ;;  %4634 = vrot.lane.b32.xlu2 %v10097_v35, %s7588_s14  ;;  %4696 = vrot.lane.b32.xlu1 %v10169_v3, %s7587_s26 }
 0x8bc   : > { %v4837_v33 = vsel %vm1749_vm7, %v9836_v38, %v4621_v37  ;;  %v10204_v38 = vld [vmem:[%s10553_s12] ss:$0 sm:$0xff] }
 0x8bd   : > { %v4685_v28 = vpop.permute.xlu0 %4684  ;;  %v4877_v39 = vsel %vm1752_vm11, %v4837_v33, %v4653_v29  ;;  %v5148_v8 = vadd.f32 %v10204_v38, %v5147_v42 }
 0x8be   : > { %v4916_v27 = vsel %vm1755_vm12, %v4877_v39, %v4685_v28 }
 0x8bf   : > { %5181 = vmatmul.bf16.gmra.mxu3 %v4788_v57 }
 0x8c2   : > { %v4595_v51 = vpop.permute.xlu2 %4594 }
 0x8c3   : > { %v4683_v41 = vpop.permute.xlu1 %4682  ;;  %4540 = vrot.lane.b32.xlu2 %v10169_v3, %s7588_s14  ;;  %4602 = vrot.lane.b32.xlu1 %v10076_v15, %s7587_s26 }
 0x8c4   : > { %v4913_v30 = vsel %vm1755_vm12, %v4875_v43, %v4683_v41 }
 0x8c5   : > { %5265 = vmatmul.bf16.gmra.mxu1 %v4913_v30  ;;  %v4529_v56 = vpop.permute.xlu0 %4528 }
 0x8c6   : > { %v4721_v60 = vsel %vm1749_vm7, %v9747_v44, %v4529_v56 }
 0x8ca   : > { %v10185_v13 = vpop.permute.xlu2 %4688 }
 0x8cb   : > { %v4527_v40 = vpop.permute.xlu1 %4526 }
 0x8cc   : > { %v4719_v1 = vsel %vm1749_vm7, %v9694_v58, %v4527_v40  ;;  %v5149_v58 = vpop.f32.mrf.mxu3 }
 0x8cd   : > { %v4751_v47 = vsel %vm1752_vm11, %v4719_v1, %v10123_v31  ;;  %v4625_v26 = vpop.permute.xlu0 %4624 }
 0x8ce   : > { %v4791_v14 = vsel %vm1755_vm12, %v4751_v47, %v4591_v34  ;;  %v4843_v56 = vsel %vm1749_vm7, %v9894_v62, %v4625_v26 }
 0x8cf   : > { %5186 = vmatmul.bf16.gmra.mxu3 %v4791_v14 }
 0x8d2   : > { %v3773_v32 = vpop.permute.xlu2 %3772 }
 0x8d3   : > { %v4623_v6 = vpop.permute.xlu1 %4622  ;;  %4051 = vst [vmem:[#allocation1 + $0x5] ss:$9 sm:$0xff] %v3773_v32 }
 0x8d4   : > { %v4840_v12 = vsel %vm1749_vm7, %v9825_v22, %v4623_v6  ;;  %v5152_v7 = vpop.f32.mrf.mxu3  ;;  %v5150_v22 = vadd.f32 %v10204_v38, %v5149_v58 }
 0x8d5   : > { %5270 = vmatmul.bf16.gmra.mxu1 %v4916_v27  ;;  %v4687_v31 = vpop.permute.xlu0 %4686  ;;  %v4879_v16 = vsel %vm1752_vm11, %v4840_v12, %v10154_v50  ;;  %v10220_v50 = vpop.f32.mrf.mxu2 }
 0x8d6   : > { %v4919_v48 = vsel %vm1755_vm12, %v4879_v16, %v4687_v31 }
 0x8da   : > { %v10227_v1 = vpop.permute.xlu2 %4690 }
 0x8db   : > { %v4561_v24 = vpop.permute.xlu1 %4560 }
 0x8dc   : > { %v4753_v10 = vsel %vm1752_vm11, %v4721_v60, %v4561_v24 }
 0x8dd   : > { %v4794_v29 = vsel %vm1755_vm12, %v4753_v10, %v4593_v21  ;;  %v3769_v18 = vpop.permute.xlu0 %3768  ;;  %v5154_v21 = vpop.f32.mrf.mxu3 }
 0x8de   : > { %4047 = vst [vmem:[#allocation1 + $0x3] ss:$9 sm:$0xff] %v3769_v18  ;;  %v10234_v6 = vpop.f32.mrf.mxu2  ;;  %v5155_v31 = vadd.f32 %v10204_v38, %v5154_v21 }
 0x8df   : > { %5191 = vmatmul.bf16.gmra.mxu3 %v4794_v29 }
 0x8e2   : > { %v5236_v44 = vpop.f32.mrf.mxu1  ;;  %v10241_v29 = vpop.permute.xlu2 %4532 }
 0x8e3   : > { %v5237_v17 = vadd.f32 %v5236_v44, %v5148_v8  ;;  %v4563_v11 = vpop.permute.xlu1 %4562 }
 0x8e5   : > { %v5326_v46 = vadd.f32 %v10009_v2, %v5237_v17  ;;  %5275 = vmatmul.bf16.gmra.mxu1 %v4919_v48  ;;  %v4531_v61 = vpop.permute.xlu0 %4530 }
 0x8e6   : > { %v4723_v37 = vsel %vm1749_vm7, %v9792_v4, %v4531_v61  ;;  %v5153_v4 = vadd.f32 %v10204_v38, %v5152_v7 }
 0x8e7   : > { %v6876_v34 = vmul.f32 -1.442695, %v5326_v46  ;;  %v4755_v5 = vsel %vm1752_vm11, %v4723_v37, %v4563_v11 }
 0x8e8   : > { %v4797_v2 = vsel %vm1755_vm12, %v4755_v5, %v4595_v51 }
 0x8e9   : > { %7175 = vpow2.f32 %v6876_v34 }
 0x8ea   : > { %v5238_v23 = vpop.f32.mrf.mxu1 }
 0x8eb   : > { %v5239_v57 = vadd.f32 %v5238_v23, %v5150_v22  ;;  %v4657_v28 = vpop.permute.xlu1 %4656 }
 0x8ec   : > { %v4881_v47 = vsel %vm1752_vm11, %v4843_v56, %v4657_v28 }
 0x8ed   : > { %v5328_v43 = vadd.f32 %v10047_v49, %v5239_v57  ;;  %v4627_v42 = vpop.permute.xlu0 %4626  ;;  %v4922_v32 = vsel %vm1755_vm12, %v4881_v47, %v10185_v13  ;;  %v4629_v47 = vpop.permute.xlu2 %4628 }
 0x8ee   : > { %v4846_v22 = vsel %vm1749_vm7, %v9943_v25, %v4627_v42 }
 0x8ef   : > { %v7176_v41 = vpop.eup %7175  ;;  %v6877_v30 = vmul.f32 -1.442695, %v5328_v43  ;;  %5196 = vmatmul.bf16.gmra.mxu3 %v4797_v2 }
 0x8f0   : > { %v5501_v40 = vadd.f32 1.0, %v7176_v41 }
 0x8f1   : > { %7177 = vpow2.f32 %v6877_v30 }
 0x8f2   : > { %7179 = vrcp.f32 %v5501_v40  ;;  %v5157_v49 = vpop.f32.mrf.mxu3  ;;  %v5241_v51 = vpop.f32.mrf.mxu1  ;;  %v5542_v8 = vand.u32 2147483647, %v5501_v40  ;;  %v5544_v18 = vand.u32 2147483648, %v5501_v40  ;;  %vm5538_vm1 = vweird.f32 %v5501_v40 }
 0x8f3   : > { %v5242_v14 = vadd.f32 %v5241_v51, %v5153_v4  ;;  %v3771_v33 = vpop.permute.xlu1 %3770  ;;  %v5158_v5 = vadd.f32 %v10204_v38, %v5157_v49 }
 0x8f4   : > { %4049 = vst [vmem:[#allocation1 + $0x4] ss:$9 sm:$0xff] %v3771_v33  ;;  %vm5543_vm3 = vcmp.eq.f32.partialorder %v5542_v8, 8.507059e+37  ;;  %v5545_v34 = vor.u32 1.1754944e-38, %v5544_v18 }
 0x8f5   : > { %v5331_v62 = vadd.f32 %v10067_v55, %v5242_v14  ;;  %5280 = vmatmul.bf16.gmra.mxu1 %v4922_v32  ;;  %v3775_v24 = vpop.permute.xlu0 %3774 }
 0x8f6   : > { %4053 = vst [vmem:[#allocation1 + $0x6] ss:$9 sm:$0xff] %v3775_v24 }
 0x8f7   : > { %v7178_v26 = vpop.eup %7177  ;;  %v6878_v39 = vmul.f32 -1.442695, %v5331_v62 }
 0x8f8   : > { %v7180_v27 = vpop.eup %7179  ;;  %v10236_v58 = vadd.f32 1.0, %v7178_v26 }
 0x8f9   : > { %v5534_v60 = vmul.f32 %v7180_v27, %v5501_v40  ;;  %7181 = vpow2.f32 %v6878_v39  ;;  %vm5539_vm2 = vweird.f32 %v7180_v27 }
 0x8fa   : > { %7183 = vrcp.f32 %v10236_v58  ;;  %v5159_v13 = vpop.f32.mrf.mxu3  ;;  %v5243_v10 = vpop.f32.mrf.mxu1  ;;  %vm5540_vm14 = vmor %vm5538_vm1, %vm5539_vm2  ;;  %v5559_v41 = vand.u32 2147483648, %v10236_v58  ;;  %v5557_v4 = vand.u32 2147483647, %v10236_v58  ;;  %vm5553_vm8 = vweird.f32 %v10236_v58 }
 0x8fb   : > { %v5535_v55 = vsub.f32 1.0, %v5534_v60  ;;  %v5244_v12 = vadd.f32 %v5243_v10, %v5155_v31  ;;  %v4659_v7 = vpop.permute.xlu1 %4658 }
 0x8fc   : > { %v4883_v23 = vsel %vm1752_vm11, %v4846_v22, %v4659_v7  ;;  %v5560_v32 = vor.u32 1.1754944e-38, %v5559_v41  ;;  %vm5558_vm9 = vcmp.eq.f32.partialorder %v5557_v4, 8.507059e+37 }
 0x8fd   : > { %v5536_v44 = vmul.f32 %v7180_v27, %v5535_v55  ;;  %v5333_v17 = vadd.f32 %v10099_v0, %v5244_v12  ;;  %v10253_v0 = vpop.f32.mrf.mxu2  ;;  %v4565_v57 = vpop.permute.xlu0 %4564  ;;  %v4925_v56 = vsel %vm1755_vm12, %v4883_v23, %v10227_v1  ;;  %v4725_v55 = vsel %vm1749_vm7, %v9846_v36, %v10241_v29 }
 0x8fe   : > { %v4757_v18 = vsel %vm1752_vm11, %v4725_v55, %v4565_v57  ;;  %v4849_v23 = vsel %vm1749_vm7, %v10018_v52, %v4629_v47 }
 0x8ff   : > { %v7182_v11 = vpop.eup %7181  ;;  %v5537_v16 = vadd.f32 %v7180_v27, %v5536_v44  ;;  %v6879_v48 = vmul.f32 -1.442695, %v5333_v17 }
 0x900   : > { %v7184_v46 = vpop.eup %7183  ;;  %v10251_v61 = vadd.f32 1.0, %v7182_v11 }
 0x901   : > { %v5541_v21 = vsel %vm5540_vm14, %v7180_v27, %v5537_v16  ;;  %v5549_v37 = vmul.f32 %v7184_v46, %v10236_v58  ;;  %7185 = vpow2.f32 %v6879_v48  ;;  %vm5554_vm5 = vweird.f32 %v7184_v46  ;;  %v4535_v48 = vpop.permute.xlu2 %4534 }
 0x902   : > { %v5546_v28 = vsel %vm5543_vm3, %v5545_v34, %v5541_v21  ;;  %7187 = vrcp.f32 %v10251_v61  ;;  %v5162_v43 = vpop.f32.mrf.mxu3  ;;  %v5246_v2 = vpop.f32.mrf.mxu1  ;;  %vm5555_vm4 = vmor %vm5553_vm8, %vm5554_vm5  ;;  %v5574_v12 = vand.u32 2147483648, %v10251_v61  ;;  %vm5568_vm2 = vweird.f32 %v10251_v61 }
 0x903   : > { %6014 = vst.msk [vmem:[%s10247_s28] sm:$0xff] %vm6013_vm13, %v5546_v28  ;;  %v5550_v25 = vsub.f32 1.0, %v5549_v37  ;;  %v5247_v30 = vadd.f32 %v5246_v2, %v5158_v5  ;;  %v3777_v42 = vpop.permute.xlu1 %3776  ;;  %v5163_v37 = vadd.f32 %v10204_v38, %v5162_v43 }
 0x904   : > { %4055 = vst [vmem:[#allocation1 + $0x7] ss:$9 sm:$0xff] %v3777_v42  ;;  %v5575_v29 = vor.u32 1.1754944e-38, %v5574_v12 }
 0x905   : > { %v5551_v40 = vmul.f32 %v7184_v46, %v5550_v25  ;;  %5285 = vmatmul.bf16.gmra.mxu1 %v4925_v56  ;;  %v5336_v49 = vadd.f32 %v10196_v53, %v5247_v30  ;;  %v4661_v27 = vpop.permute.xlu0 %4660  ;;  %v5160_v53 = vadd.f32 %v10204_v38, %v5159_v13  ;;  %v10274_v24 = vpop.f32.mrf.mxu2  ;;  %v5572_v13 = vand.u32 2147483647, %v10251_v61 }
 0x906   : > { %v4885_v52 = vsel %vm1752_vm11, %v4849_v23, %v4661_v27 }
 0x907   : > { %v7186_v51 = vpop.eup %7185  ;;  %v5552_v14 = vadd.f32 %v7184_v46, %v5551_v40  ;;  %v6880_v1 = vmul.f32 -1.442695, %v5336_v49  ;;  %vm5573_vm14 = vcmp.eq.f32.partialorder %v5572_v13, 8.507059e+37  ;;  %v4727_v13 = vsel %vm1749_vm7, %v9898_v9, %v4535_v48 }
 0x908   : > { %v7188_v33 = vpop.eup %7187  ;;  %v10267_v62 = vadd.f32 1.0, %v7186_v51 }
 0x909   : > { %v5556_v26 = vsel %vm5555_vm4, %v7184_v46, %v5552_v14  ;;  %v5564_v39 = vmul.f32 %v7188_v33, %v10251_v61  ;;  %vm5569_vm10 = vweird.f32 %v7188_v33 }
 0x90a   : > { %v5561_v31 = vsel %vm5558_vm9, %v5560_v32, %v5556_v26  ;;  %7189 = vrcp.f32 %v10267_v62  ;;  %v10272_v60 = vpop.f32.mrf.mxu3  ;;  %v5248_v58 = vpop.f32.mrf.mxu1  ;;  %vm5570_vm1 = vmor %vm5568_vm2, %vm5569_vm10  ;;  %v5587_v41 = vand.u32 2147483647, %v10267_v62  ;;  %v5589_v43 = vand.u32 2147483648, %v10267_v62 }
 0x90b   : > { %6015 = vst.msk [vmem:[%s10247_s28 + $0x8] sm:$0xff] %vm6013_vm13, %v5561_v31  ;;  %v5565_v10 = vsub.f32 1.0, %v5564_v39  ;;  %7191 = vpow2.f32 %v6880_v1  ;;  %v5249_v7 = vadd.f32 %v5248_v58, %v5160_v53  ;;  %v4597_v44 = vpop.permute.xlu1 %4596  ;;  %v4056_v2 = vld [vmem:[#allocation1] sm:$0xff]  ;;  %vm5583_vm5 = vweird.f32 %v10267_v62  ;;  %v4631_v31 = vpop.permute.xlu2 %4630 }
 0x90c   : > { %v4800_v11 = vsel %vm1755_vm12, %v4757_v18, %v4597_v44  ;;  %v4147_v56 = vshrl.u32 %v4056_v2, 16  ;;  %v4150_v49 = vshll.u32 %v4056_v2, 16  ;;  %vm5588_vm4 = vcmp.eq.f32.partialorder %v5587_v41, 8.507059e+37 }
 0x90d   : > { %v5566_v8 = vmul.f32 %v7188_v33, %v5565_v10  ;;  %v5338_v17 = vadd.f32 %v10210_v54, %v5249_v7  ;;  %5201 = vmatmul.bf16.gmra.mxu3 %v4800_v11  ;;  %v4567_v54 = vpop.permute.xlu0 %4566  ;;  %v10301_v40 = vpop.f32.mrf.mxu2  ;;  %v5165_v18 = vadd.f32 %v10204_v38, %v10272_v60 }
 0x90e   : > { %v4149_v42 = vrot.slane %v4147_v56, 7 }
 0x90f   : > { %v5567_v16 = vadd.f32 %v7188_v33, %v5566_v8  ;;  %v6881_v46 = vmul.f32 -1.442695, %v5338_v17  ;;  %v4759_v17 = vsel %vm1752_vm11, %v4727_v13, %v4567_v54 }
 0x910   : > { %v7190_v36 = vpop.eup %7189  ;;  %v4152_v1 = vor.u32 %v4150_v49, %v4149_v42  ;;  %v4218_v26 = vsel %vm7802_vm6, %v4149_v42, 0  ;;  %v4852_v42 = vsel %vm1749_vm7, %v10106_v63, %v4631_v31 }
 0x911   : > { %v7192_v34 = vpop.eup %7191  ;;  %v5571_v22 = vsel %vm5570_vm1, %v7188_v33, %v5567_v16  ;;  %v5579_v21 = vmul.f32 %v7190_v36, %v10267_v62  ;;  %7193 = vpow2.f32 %v6881_v46  ;;  %vm5584_vm3 = vweird.f32 %v7190_v36 }
 0x912   : > { %v5576_v57 = vsel %vm5573_vm14, %v5575_v29, %v5571_v22  ;;  %v10291_v61 = vadd.f32 1.0, %v7192_v34  ;;  %v10293_v28 = vpop.f32.mrf.mxu3  ;;  %v5251_v5 = vpop.f32.mrf.mxu1  ;;  %vm5585_vm8 = vmor %vm5583_vm5, %vm5584_vm3  ;;  %v10313_v62 = vsel %vm7802_vm6, 0, %v4152_v1  ;;  %v4508_v12 = vrot.slane %v4218_v26, 1 }
 0x913   : > { %6016 = vst.msk [vmem:[%s10247_s28 + $0x10] sm:$0xff] %vm6013_vm13, %v5576_v57  ;;  %v5580_v25 = vsub.f32 1.0, %v5579_v21  ;;  %v5252_v30 = vadd.f32 %v5251_v5, %v5163_v37  ;;  %v4693_v51 = vpop.permute.xlu1 %4692  ;;  %4666 = vrot.lane.b32.xlu0 %v10313_v62, %s7586_s22  ;;  %v4507_v55 = vrot.slane %v10313_v62, 1  ;;  %v4496_v48 = vshll.u32 %v10313_v62, 16 }
 0x914   : > { %7195 = vrcp.f32 %v10291_v61  ;;  %v4928_v14 = vsel %vm1755_vm12, %v4885_v52, %v4693_v51  ;;  %v5604_v60 = vand.u32 2147483648, %v10291_v61  ;;  %v4494_v46 = vshrl.u32 %v10313_v62, 16  ;;  %v4537_v51 = vpop.permute.xlu2 %4536 }
 0x915   : > { %v5581_v4 = vmul.f32 %v7190_v36, %v5580_v25  ;;  %v5341_v47 = vadd.f32 %v10220_v50, %v5252_v30  ;;  %5290 = vmatmul.bf16.gmra.mxu1 %v4928_v14  ;;  %v5590_v50 = vor.u32 1.1754944e-38, %v5589_v43  ;;  %v4663_v44 = vpop.permute.xlu0 %4662  ;;  %v4509_v11 = vsel %vm4444_vm15, %v4507_v55, %v4508_v12  ;;  %v10337_v37 = vpop.f32.mrf.mxu2 }
 0x916   : > { %4636 = vrot.lane.b32.xlu2 %v4509_v11, %s7588_s14  ;;  %6874 = vmatmul.msk.bf16.gmra.mxu2 %vm1749_vm7, %v4509_v11  ;;  %v4501_v34 = vshll.u32 %v4218_v26, 16  ;;  %v4498_v57 = vrot.slane %v4496_v48, 1  ;;  %vm5598_vm15 = vweird.f32 %v10291_v61  ;;  %v5605_v56 = vor.u32 1.1754944e-38, %v5604_v60 }
 0x917   : > { %v5582_v33 = vadd.f32 %v7190_v36, %v5581_v4  ;;  %v6882_v32 = vmul.f32 -1.442695, %v5341_v47  ;;  %v7194_v39 = vpop.eup %7193 }
 0x918   : > { %v10309_v53 = vadd.f32 1.0, %v7194_v39  ;;  %v4499_v30 = vor.u32 %v4498_v57, %v4494_v46  ;;  %v4503_v52 = vrot.slane %v4501_v34, 1  ;;  %v10782_v34 = vld [vmem:[#allocation21_spill] sm:$0xff] }
 0x919   : > { %v5586_v27 = vsel %vm5585_vm8, %v7190_v36, %v5582_v33  ;;  %7197 = vpow2.f32 %v6882_v32  ;;  %v5602_v36 = vand.u32 2147483647, %v10291_v61  ;;  %v4887_v32 = vsel %vm1752_vm11, %v4852_v42, %v4663_v44 }
 0x91a   : > { %v7196_v58 = vpop.eup %7195  ;;  %v5591_v10 = vsel %vm5588_vm4, %v5590_v50, %v5586_v27  ;;  %v10318_v7 = vpop.f32.mrf.mxu3  ;;  %7199 = vrcp.f32 %v10309_v53  ;;  %v10354_v33 = vsel %vm4219_vm0, %v4499_v30, %v4503_v52  ;;  %v5617_v63 = vand.u32 2147483647, %v10309_v53 }
 0x91b   : > { %v5253_v8 = vpop.f32.mrf.mxu1  ;;  %6017 = vst.msk [vmem:[%s10247_s28 + $0x18] sm:$0xff] %vm6013_vm13, %v5591_v10  ;;  %v5594_v59 = vmul.f32 %v7196_v58, %v10291_v61  ;;  %v4599_v29 = vpop.permute.xlu1 %4598  ;;  %vm5599_vm6 = vweird.f32 %v7196_v58  ;;  %4572 = vrot.lane.b32.xlu0 %v10097_v35, %s7586_s22  ;;  %vm5603_vm10 = vcmp.eq.f32.partialorder %v5602_v36, 8.507059e+37  ;;  %v5168_v61 = vadd.f32 %v10204_v38, %v10293_v28  ;;  %4698 = vrot.lane.b32.xlu1 %v10354_v33, %s7587_s26 }
 0x91c   : > { %v5254_v9 = vadd.f32 %v5253_v8, %v5165_v18  ;;  %v4803_v22 = vsel %vm1755_vm12, %v4759_v17, %v4599_v29  ;;  %vm5600_vm9 = vmor %vm5598_vm15, %vm5599_vm6  ;;  %v5619_v35 = vand.u32 2147483648, %v10309_v53  ;;  %vm5613_vm0 = vweird.f32 %v10309_v53 }
 0x91d   : > { %v5595_v16 = vsub.f32 1.0, %v5594_v59  ;;  %5206 = vmatmul.bf16.gmra.mxu3 %v4803_v22  ;;  %v4569_v28 = vpop.permute.xlu0 %4568  ;;  %v10366_v55 = vpop.f32.mrf.mxu2  ;;  %vm5618_vm14 = vcmp.eq.f32.partialorder %v5617_v63, 8.507059e+37  ;;  %v4729_v36 = vsel %vm1749_vm7, %v9963_v19, %v4537_v51 }
 0x91e   : > { %v5343_v23 = vadd.f32 %v10234_v6, %v5254_v9  ;;  %v5620_v12 = vor.u32 1.1754944e-38, %v5619_v35  ;;  %v4761_v60 = vsel %vm1752_vm11, %v4729_v36, %v4569_v28  ;;  %v4633_v22 = vpop.permute.xlu2 %4632 }
 0x91f   : > { %v7198_v21 = vpop.eup %7197  ;;  %v5596_v54 = vmul.f32 %v7196_v58, %v5595_v16  ;;  %v5170_v16 = vadd.f32 %v10204_v38, %v10318_v7 }
 0x920   : > { %v10340_v5 = vadd.f32 1.0, %v7198_v21  ;;  %v7200_v2 = vpop.eup %7199  ;;  %v6883_v41 = vmul.f32 -1.442695, %v5343_v23 }
 0x921   : > { %v5597_v25 = vadd.f32 %v7196_v58, %v5596_v54  ;;  %v5609_v43 = vmul.f32 %v7200_v2, %v10309_v53  ;;  %vm5614_vm2 = vweird.f32 %v7200_v2 }
 0x922   : > { %7201 = vrcp.f32 %v10340_v5  ;;  %v10347_v6 = vpop.f32.mrf.mxu3  ;;  %vm5615_vm1 = vmor %vm5613_vm0, %vm5614_vm2  ;;  %v5632_v9 = vand.u32 2147483647, %v10340_v5  ;;  %v5634_v48 = vand.u32 2147483648, %v10340_v5  ;;  %vm5628_vm5 = vweird.f32 %v10340_v5 }
 0x923   : > { %v5256_v4 = vpop.f32.mrf.mxu1  ;;  %v5601_v47 = vsel %vm5600_vm9, %v7196_v58, %v5597_v25  ;;  %7203 = vpow2.f32 %v6883_v41  ;;  %v5610_v14 = vsub.f32 1.0, %v5609_v43  ;;  %v4695_v26 = vpop.permute.xlu1 %4694  ;;  %4604 = vrot.lane.b32.xlu1 %v10313_v62, %s7587_s26 }
 0x924   : > { %v5606_v49 = vsel %vm5603_vm10, %v5605_v56, %v5601_v47  ;;  %v5257_v1 = vadd.f32 %v5256_v4, %v5168_v61  ;;  %v4931_v50 = vsel %vm1755_vm12, %v4887_v32, %v4695_v26  ;;  %v5635_v57 = vor.u32 1.1754944e-38, %v5634_v48 }
 0x925   : > { %6018 = vst.msk [vmem:[%s10247_s28 + $0x20] sm:$0xff] %vm6013_vm13, %v5606_v49  ;;  %v5611_v39 = vmul.f32 %v7200_v2, %v5610_v14  ;;  %5295 = vmatmul.bf16.gmra.mxu1 %v4931_v50  ;;  %v4665_v54 = vpop.permute.xlu0 %4664  ;;  %vm5633_vm4 = vcmp.eq.f32.partialorder %v5632_v9, 8.507059e+37  ;;  %v10394_v4 = vpop.f32.mrf.mxu2  ;;  %v4855_v47 = vsel %vm1749_vm7, %v10136_v20, %v4633_v22  ;;  %v10783_v49 = vld [vmem:[#allocation22_spill] sm:$0xff] }
 0x926   : > { %v5346_v27 = vadd.f32 %v10253_v0, %v5257_v1  ;;  %v10781_v0 = vld [vmem:[#allocation20_spill] sm:$0xff]  ;;  %6875 = vmatmul.msk.bf16.gmra.mxu2 %vm1749_vm7, %v10782_v34  ;;  %v4889_v42 = vsel %vm1752_vm11, %v4855_v47, %v4665_v54  ;;  %v4539_v26 = vpop.permute.xlu2 %4538 }
 0x927   : > { %v5612_v58 = vadd.f32 %v7200_v2, %v5611_v39  ;;  %4668 = vrot.lane.b32.xlu0 %v10781_v0, %s7586_s22 }
 0x928   : > { %v7202_v31 = vpop.eup %7201  ;;  %v6884_v13 = vmul.f32 -1.442695, %v5346_v27 }
 0x929   : > { %v7204_v10 = vpop.eup %7203  ;;  %v5624_v8 = vmul.f32 %v7202_v31, %v10340_v5  ;;  %v5616_v59 = vsel %vm5615_vm1, %v7200_v2, %v5612_v58  ;;  %vm5629_vm3 = vweird.f32 %v7202_v31 }
 0x92a   : > { %v10369_v18 = vadd.f32 1.0, %v7204_v10  ;;  %v10373_v44 = vpop.f32.mrf.mxu3  ;;  %v5621_v53 = vsel %vm5618_vm14, %v5620_v12, %v5616_v59  ;;  %7205 = vpow2.f32 %v6884_v13  ;;  %vm5630_vm8 = vmor %vm5628_vm5, %vm5629_vm3  ;;  %v4731_v59 = vsel %vm1749_vm7, %v10030_v45, %v4539_v26 }
 0x92b   : > { %v5258_v17 = vpop.f32.mrf.mxu1  ;;  %v5625_v11 = vsub.f32 1.0, %v5624_v8  ;;  %6019 = vst.msk [vmem:[%s10247_s28 + $0x28] sm:$0xff] %vm6013_vm13, %v5621_v53  ;;  %v4601_v46 = vpop.permute.xlu1 %4600  ;;  %4700 = vrot.lane.b32.xlu1 %v10783_v49, %s7587_s26  ;;  %v5175_v58 = vadd.f32 %v10204_v38, %v10373_v44 }
 0x92c   : > { %7207 = vrcp.f32 %v10369_v18  ;;  %v5259_v7 = vadd.f32 %v5258_v17, %v5170_v16  ;;  %v4806_v19 = vsel %vm1755_vm12, %v4761_v60, %v4601_v46  ;;  %v5649_v35 = vand.u32 2147483648, %v10369_v18 }
 0x92d   : > { %v5626_v29 = vmul.f32 %v7202_v31, %v5625_v11  ;;  %5211 = vmatmul.bf16.gmra.mxu3 %v4806_v19  ;;  %vm5643_vm15 = vweird.f32 %v10369_v18  ;;  %v4571_v63 = vpop.permute.xlu0 %4570  ;;  %v10417_v0 = vpop.f32.mrf.mxu2 }
 0x92e   : > { %v5348_v23 = vadd.f32 %v10274_v24, %v5259_v7  ;;  %v5173_v24 = vadd.f32 %v10204_v38, %v10347_v6  ;;  %v5647_v6 = vand.u32 2147483647, %v10369_v18  ;;  %v4763_v44 = vsel %vm1752_vm11, %v4731_v59, %v4571_v63 }
 0x92f   : > { %v5627_v21 = vadd.f32 %v7202_v31, %v5626_v29 }
 0x930   : > { %v7206_v2 = vpop.eup %7205  ;;  %v6885_v25 = vmul.f32 -1.442695, %v5348_v23  ;;  %vm5648_vm10 = vcmp.eq.f32.partialorder %v5647_v6, 8.507059e+37 }
 0x931   : > { %v5631_v62 = vsel %vm5630_vm8, %v7202_v31, %v5627_v21  ;;  %v10392_v56 = vadd.f32 1.0, %v7206_v2  ;;  %v5650_v31 = vor.u32 1.1754944e-38, %v5649_v35 }
 0x932   : > { %v7208_v41 = vpop.eup %7207  ;;  %v5636_v30 = vsel %vm5633_vm4, %v5635_v57, %v5631_v62  ;;  %v5177_v43 = vpop.f32.mrf.mxu3  ;;  %7209 = vpow2.f32 %v6885_v25 }
 0x933   : > { %v5261_v52 = vpop.f32.mrf.mxu1  ;;  %6020 = vst.msk [vmem:[%s10247_s28 + $0x30] sm:$0xff] %vm6013_vm13, %v5636_v30  ;;  %v5639_v5 = vmul.f32 %v7208_v41, %v10369_v18  ;;  %7211 = vrcp.f32 %v10392_v56  ;;  %v4697_v14 = vpop.permute.xlu1 %4696  ;;  %vm5644_vm6 = vweird.f32 %v7208_v41  ;;  %v5664_v16 = vand.u32 2147483648, %v10392_v56 }
 0x934   : > { %v5262_v51 = vadd.f32 %v5261_v52, %v5173_v24  ;;  %v4934_v32 = vsel %vm1755_vm12, %v4889_v42, %v4697_v14  ;;  %vm5645_vm9 = vmor %vm5643_vm15, %vm5644_vm6  ;;  %v5662_v48 = vand.u32 2147483647, %v10392_v56  ;;  %vm5658_vm0 = vweird.f32 %v10392_v56 }
 0x935   : > { %v5640_v61 = vsub.f32 1.0, %v5639_v5  ;;  %5300 = vmatmul.bf16.gmra.mxu1 %v4934_v32  ;;  %v5665_v34 = vor.u32 1.1754944e-38, %v5664_v16  ;;  %v5178_v19 = vadd.f32 %v10204_v38, %v5177_v43 }
 0x936   : > { %v5351_v20 = vadd.f32 %v10301_v40, %v5262_v51  ;;  %vm5663_vm14 = vcmp.eq.f32.partialorder %v5662_v48, 8.507059e+37 }
 0x937   : > { %v5641_v28 = vmul.f32 %v7208_v41, %v5640_v61 }
 0x938   : > { %v7210_v1 = vpop.eup %7209  ;;  %v6886_v50 = vmul.f32 -1.442695, %v5351_v20 }
 0x939   : > { %v5642_v39 = vadd.f32 %v7208_v41, %v5641_v28  ;;  %v7212_v27 = vpop.eup %7211  ;;  %v5510_v10 = vadd.f32 1.0, %v7210_v1 }
 0x93a   : > { %v5179_v12 = vpop.f32.mrf.mxu3  ;;  %v5654_v40 = vmul.f32 %v7212_v27, %v10392_v56  ;;  %7213 = vpow2.f32 %v6886_v50  ;;  %vm5659_vm2 = vweird.f32 %v7212_v27 }
 0x93b   : > { %v5263_v8 = vpop.f32.mrf.mxu1  ;;  %v5646_v13 = vsel %vm5645_vm9, %v7208_v41, %v5642_v39  ;;  %7215 = vrcp.f32 %v5510_v10  ;;  %v4603_v11 = vpop.permute.xlu1 %4602  ;;  %vm5660_vm1 = vmor %vm5658_vm0, %vm5659_vm2  ;;  %v5679_v25 = vand.u32 2147483648, %v5510_v10  ;;  %v5677_v56 = vand.u32 2147483647, %v5510_v10 }
 0x93c   : > { %v5651_v18 = vsel %vm5648_vm10, %v5650_v31, %v5646_v13  ;;  %v5655_v17 = vsub.f32 1.0, %v5654_v40  ;;  %v5264_v53 = vadd.f32 %v5263_v8, %v5175_v58  ;;  %v4809_v36 = vsel %vm1755_vm12, %v4763_v44, %v4603_v11  ;;  %v10430_v41 = vpop.f32.mrf.mxu2 }
 0x93d   : > { %6021 = vst.msk [vmem:[%s10247_s28 + $0x38] sm:$0xff] %vm6013_vm13, %v5651_v18  ;;  %5216 = vmatmul.bf16.gmra.mxu3 %v4809_v36  ;;  %vm5673_vm5 = vweird.f32 %v5510_v10  ;;  %v5680_v61 = vor.u32 1.1754944e-38, %v5679_v25  ;;  %v5180_v42 = vadd.f32 %v10204_v38, %v5179_v12  ;;  %vm5678_vm4 = vcmp.eq.f32.partialorder %v5677_v56, 8.507059e+37 }
 0x93e   : > { %v5656_v9 = vmul.f32 %v7212_v27, %v5655_v17  ;;  %v5353_v45 = vadd.f32 %v10337_v37, %v5264_v53 }
 0x940   : > { %v7214_v29 = vpop.eup %7213  ;;  %v5657_v60 = vadd.f32 %v7212_v27, %v5656_v9  ;;  %v6887_v7 = vmul.f32 -1.442695, %v5353_v45 }
 0x941   : > { %v7216_v46 = vpop.eup %7215  ;;  %v5511_v22 = vadd.f32 1.0, %v7214_v29 }
 0x942   : > { %v5182_v21 = vpop.f32.mrf.mxu3  ;;  %v5661_v23 = vsel %vm5660_vm1, %v7212_v27, %v5657_v60  ;;  %v5669_v57 = vmul.f32 %v7216_v46, %v5510_v10  ;;  %7217 = vpow2.f32 %v6887_v7  ;;  %vm5674_vm3 = vweird.f32 %v7216_v46 }
 0x943   : > { %v5266_v54 = vpop.f32.mrf.mxu1  ;;  %v5666_v37 = vsel %vm5663_vm14, %v5665_v34, %v5661_v23  ;;  %7219 = vrcp.f32 %v5511_v22  ;;  %vm5675_vm8 = vmor %vm5673_vm5, %vm5674_vm3  ;;  %v5694_v20 = vand.u32 2147483648, %v5511_v22  ;;  %v5692_v26 = vand.u32 2147483647, %v5511_v22 }
 0x944   : > { %6022 = vst.msk [vmem:[%s10247_s28 + $0x40] sm:$0xff] %vm6013_vm13, %v5666_v37  ;;  %v5670_v2 = vsub.f32 1.0, %v5669_v57  ;;  %v5267_v62 = vadd.f32 %v5266_v54, %v5178_v19  ;;  %v10437_v50 = vpop.f32.mrf.mxu2  ;;  %vm5688_vm15 = vweird.f32 %v5511_v22  ;;  %v5183_v12 = vadd.f32 %v10204_v38, %v5182_v21 }
 0x945   : > { %v5695_v10 = vor.u32 1.1754944e-38, %v5694_v20  ;;  %vm5693_vm10 = vcmp.eq.f32.partialorder %v5692_v26, 8.507059e+37 }
 0x946   : > { %v5671_v30 = vmul.f32 %v7216_v46, %v5670_v2  ;;  %v5356_v43 = vadd.f32 %v10366_v55, %v5267_v62 }
 0x948   : > { %v7218_v52 = vpop.eup %7217  ;;  %v5672_v5 = vadd.f32 %v7216_v46, %v5671_v30  ;;  %v6888_v24 = vmul.f32 -1.442695, %v5356_v43 }
 0x949   : > { %v7220_v47 = vpop.eup %7219  ;;  %v5512_v49 = vadd.f32 1.0, %v7218_v52 }
 0x94a   : > { %v5676_v14 = vsel %vm5675_vm8, %v7216_v46, %v5672_v5  ;;  %v5684_v35 = vmul.f32 %v7220_v47, %v5511_v22  ;;  %7221 = vpow2.f32 %v6888_v24  ;;  %v5184_v32 = vpop.f32.mrf.mxu3  ;;  %vm5689_vm6 = vweird.f32 %v7220_v47 }
 0x94b   : > { %v5268_v51 = vpop.f32.mrf.mxu1  ;;  %v5681_v28 = vsel %vm5678_vm4, %v5680_v61, %v5676_v14  ;;  %7223 = vrcp.f32 %v5512_v49  ;;  %vm5690_vm9 = vmor %vm5688_vm15, %vm5689_vm6  ;;  %v5709_v53 = vand.u32 2147483648, %v5512_v49  ;;  %v5707_v16 = vand.u32 2147483647, %v5512_v49 }
 0x94c   : > { %6023 = vst.msk [vmem:[%s10247_s28 + $0x48] sm:$0xff] %vm6013_vm13, %v5681_v28  ;;  %v5685_v55 = vsub.f32 1.0, %v5684_v35  ;;  %v5269_v6 = vadd.f32 %v5268_v51, %v5180_v42  ;;  %vm5703_vm0 = vweird.f32 %v5512_v49  ;;  %v5185_v7 = vadd.f32 %v10204_v38, %v5184_v32  ;;  %v10444_v19 = vpop.f32.mrf.mxu2 }
 0x94d   : > { %v5710_v60 = vor.u32 1.1754944e-38, %v5709_v53  ;;  %vm5708_vm14 = vcmp.eq.f32.partialorder %v5707_v16, 8.507059e+37 }
 0x94e   : > { %v5686_v1 = vmul.f32 %v7220_v47, %v5685_v55  ;;  %v5358_v39 = vadd.f32 %v10394_v4, %v5269_v6 }
 0x950   : > { %v7222_v63 = vpop.eup %7221  ;;  %v5687_v27 = vadd.f32 %v7220_v47, %v5686_v1  ;;  %v6889_v31 = vmul.f32 -1.442695, %v5358_v39 }
 0x951   : > { %v7224_v58 = vpop.eup %7223  ;;  %v5513_v8 = vadd.f32 1.0, %v7222_v63 }
 0x952   : > { %v5691_v40 = vsel %vm5690_vm9, %v7220_v47, %v5687_v27  ;;  %v5699_v59 = vmul.f32 %v7224_v58, %v5512_v49  ;;  %7225 = vpow2.f32 %v6889_v31  ;;  %v5187_v17 = vpop.f32.mrf.mxu3  ;;  %vm5704_vm2 = vweird.f32 %v7224_v58 }
 0x953   : > { %v5271_v13 = vpop.f32.mrf.mxu1  ;;  %v5696_v18 = vsel %vm5693_vm10, %v5695_v10, %v5691_v40  ;;  %7227 = vrcp.f32 %v5513_v8  ;;  %vm5705_vm1 = vmor %vm5703_vm0, %vm5704_vm2  ;;  %v5724_v57 = vand.u32 2147483648, %v5513_v8  ;;  %v5722_v2 = vand.u32 2147483647, %v5513_v8 }
 0x954   : > { %6024 = vst.msk [vmem:[%s10247_s28 + $0x50] sm:$0xff] %vm6013_vm13, %v5696_v18  ;;  %v5700_v4 = vsub.f32 1.0, %v5699_v59  ;;  %v5272_v44 = vadd.f32 %v5271_v13, %v5183_v12  ;;  %vm5718_vm5 = vweird.f32 %v5513_v8  ;;  %v5188_v24 = vadd.f32 %v10204_v38, %v5187_v17  ;;  %v5370_v14 = vpop.f32.mrf.mxu2 }
 0x955   : > { %v5725_v5 = vor.u32 1.1754944e-38, %v5724_v57  ;;  %vm5723_vm4 = vcmp.eq.f32.partialorder %v5722_v2, 8.507059e+37 }
 0x956   : > { %v5701_v11 = vmul.f32 %v7224_v58, %v5700_v4  ;;  %v5361_v36 = vadd.f32 %v10417_v0, %v5272_v44 }
 0x958   : > { %v7226_v9 = vpop.eup %7225  ;;  %v5702_v48 = vadd.f32 %v7224_v58, %v5701_v11  ;;  %v6890_v45 = vmul.f32 -1.442695, %v5361_v36 }
 0x959   : > { %v7228_v29 = vpop.eup %7227  ;;  %v5514_v46 = vadd.f32 1.0, %v7226_v9  ;;  %v10460_v9 = vld [vmem:[%s10553_s12] ss:$0 sm:$0xff] }
 0x95a   : > { %v5706_v22 = vsel %vm5705_vm1, %v7224_v58, %v5702_v48  ;;  %v5714_v21 = vmul.f32 %v7228_v29, %v5513_v8  ;;  %7229 = vpow2.f32 %v6890_v45  ;;  %vm5719_vm3 = vweird.f32 %v7228_v29  ;;  %v5189_v62 = vpop.f32.mrf.mxu3 }
 0x95b   : > { %v5273_v34 = vpop.f32.mrf.mxu1  ;;  %v5711_v54 = vsel %vm5708_vm14, %v5710_v60, %v5706_v22  ;;  %7231 = vrcp.f32 %v5514_v46  ;;  %vm5720_vm8 = vmor %vm5718_vm5, %vm5719_vm3  ;;  %v5739_v32 = vand.u32 2147483648, %v5514_v46  ;;  %v5737_v55 = vand.u32 2147483647, %v5514_v46 }
 0x95c   : > { %6025 = vst.msk [vmem:[%s10247_s28 + $0x58] sm:$0xff] %vm6013_vm13, %v5711_v54  ;;  %v5715_v0 = vsub.f32 1.0, %v5714_v21  ;;  %v5274_v23 = vadd.f32 %v5273_v34, %v5185_v7  ;;  %vm5733_vm15 = vweird.f32 %v5514_v46  ;;  %v5190_v31 = vadd.f32 %v10204_v38, %v5189_v62  ;;  %v5372_v18 = vpop.f32.mrf.mxu2 }
 0x95d   : > { %v5740_v27 = vor.u32 1.1754944e-38, %v5739_v32  ;;  %vm5738_vm10 = vcmp.eq.f32.partialorder %v5737_v55, 8.507059e+37 }
 0x95e   : > { %v5716_v37 = vmul.f32 %v7228_v29, %v5715_v0  ;;  %v5363_v25 = vadd.f32 %v10430_v41, %v5274_v23 }
 0x960   : > { %v7230_v30 = vpop.eup %7229  ;;  %v5717_v56 = vadd.f32 %v7228_v29, %v5716_v37  ;;  %v6891_v43 = vmul.f32 -1.442695, %v5363_v25 }
 0x961   : > { %v7232_v52 = vpop.eup %7231  ;;  %v5515_v47 = vadd.f32 1.0, %v7230_v30 }
 0x962   : > { %v5721_v42 = vsel %vm5720_vm8, %v7228_v29, %v5717_v56  ;;  %v5729_v49 = vmul.f32 %v7232_v52, %v5514_v46  ;;  %7233 = vpow2.f32 %v6891_v43  ;;  %vm5734_vm6 = vweird.f32 %v7232_v52  ;;  %v5192_v26 = vpop.f32.mrf.mxu3 }
 0x963   : > { %v5276_v61 = vpop.f32.mrf.mxu1  ;;  %v5726_v51 = vsel %vm5723_vm4, %v5725_v5, %v5721_v42  ;;  %7235 = vrcp.f32 %v5515_v47  ;;  %vm5735_vm9 = vmor %vm5733_vm15, %vm5734_vm6  ;;  %v5754_v59 = vand.u32 2147483648, %v5515_v47  ;;  %v5752_v17 = vand.u32 2147483647, %v5515_v47 }
 0x964   : > { %6026 = vst.msk [vmem:[%s10247_s28 + $0x60] sm:$0xff] %vm6013_vm13, %v5726_v51  ;;  %v5730_v41 = vsub.f32 1.0, %v5729_v49  ;;  %v5277_v35 = vadd.f32 %v5276_v61, %v5188_v24  ;;  %vm5748_vm0 = vweird.f32 %v5515_v47  ;;  %v5193_v48 = vadd.f32 %v10460_v9, %v5192_v26  ;;  %v5375_v37 = vpop.f32.mrf.mxu2 }
 0x965   : > { %v5755_v36 = vor.u32 1.1754944e-38, %v5754_v59  ;;  %vm5753_vm14 = vcmp.eq.f32.partialorder %v5752_v17, 8.507059e+37 }
 0x966   : > { %v5731_v28 = vmul.f32 %v7232_v52, %v5730_v41  ;;  %v5366_v6 = vadd.f32 %v10437_v50, %v5277_v35 }
 0x968   : > { %v7234_v20 = vpop.eup %7233  ;;  %v5732_v1 = vadd.f32 %v7232_v52, %v5731_v28  ;;  %v6892_v39 = vmul.f32 -1.442695, %v5366_v6 }
 0x969   : > { %v7236_v63 = vpop.eup %7235  ;;  %v5516_v58 = vadd.f32 1.0, %v7234_v20 }
 0x96a   : > { %v5736_v12 = vsel %vm5735_vm9, %v7232_v52, %v5732_v1  ;;  %v5744_v8 = vmul.f32 %v7236_v63, %v5515_v47  ;;  %7237 = vpow2.f32 %v6892_v39  ;;  %vm5749_vm2 = vweird.f32 %v7236_v63  ;;  %v5194_v46 = vpop.f32.mrf.mxu3 }
 0x96b   : > { %v5278_v10 = vpop.f32.mrf.mxu1  ;;  %v5741_v13 = vsel %vm5738_vm10, %v5740_v27, %v5736_v12  ;;  %7239 = vrcp.f32 %v5516_v58  ;;  %vm5750_vm1 = vmor %vm5748_vm0, %vm5749_vm2  ;;  %v5769_v21 = vand.u32 2147483648, %v5516_v58  ;;  %v5767_v0 = vand.u32 2147483647, %v5516_v58 }
 0x96c   : > { %6027 = vst.msk [vmem:[%s10247_s28 + $0x68] sm:$0xff] %vm6013_vm13, %v5741_v13  ;;  %v5745_v50 = vsub.f32 1.0, %v5744_v8  ;;  %v5279_v40 = vadd.f32 %v5278_v10, %v5190_v31  ;;  %vm5763_vm5 = vweird.f32 %v5516_v58  ;;  %v5195_v56 = vadd.f32 %v10460_v9, %v5194_v46 }
 0x96d   : > { %v5770_v30 = vor.u32 1.1754944e-38, %v5769_v21  ;;  %vm5768_vm4 = vcmp.eq.f32.partialorder %v5767_v0, 8.507059e+37 }
 0x96e   : > { %v5746_v4 = vmul.f32 %v7236_v63, %v5745_v50  ;;  %v5368_v44 = vadd.f32 %v10444_v19, %v5279_v40 }
 0x970   : > { %v7238_v38 = vpop.eup %7237  ;;  %v5747_v53 = vadd.f32 %v7236_v63, %v5746_v4  ;;  %v6893_v11 = vmul.f32 -1.442695, %v5368_v44 }
 0x971   : > { %v7240_v16 = vpop.eup %7239  ;;  %v5517_v45 = vadd.f32 1.0, %v7238_v38 }
 0x972   : > { %v5751_v60 = vsel %vm5750_vm1, %v7236_v63, %v5747_v53  ;;  %v5759_v7 = vmul.f32 %v7240_v16, %v5516_v58  ;;  %7241 = vpow2.f32 %v6893_v11  ;;  %vm5764_vm3 = vweird.f32 %v7240_v16  ;;  %v5197_v42 = vpop.f32.mrf.mxu3  ;;  %v5377_v63 = vpop.f32.mrf.mxu2 }
 0x973   : > { %v5281_v29 = vpop.f32.mrf.mxu1  ;;  %v5756_v34 = vsel %vm5753_vm14, %v5755_v36, %v5751_v60  ;;  %7243 = vrcp.f32 %v5517_v45  ;;  %vm5765_vm8 = vmor %vm5763_vm5, %vm5764_vm3  ;;  %v5784_v51 = vand.u32 2147483648, %v5517_v45  ;;  %v5782_v41 = vand.u32 2147483647, %v5517_v45 }
 0x974   : > { %6028 = vst.msk [vmem:[%s10247_s28 + $0x70] sm:$0xff] %vm6013_vm13, %v5756_v34  ;;  %v5760_v19 = vsub.f32 1.0, %v5759_v7  ;;  %v5282_v22 = vadd.f32 %v5281_v29, %v5193_v48  ;;  %vm5778_vm15 = vweird.f32 %v5517_v45  ;;  %v5198_v1 = vadd.f32 %v10460_v9, %v5197_v42 }
 0x975   : > { %v5785_v20 = vor.u32 1.1754944e-38, %v5784_v51  ;;  %vm5783_vm10 = vcmp.eq.f32.partialorder %v5782_v41, 8.507059e+37 }
 0x976   : > { %v5761_v54 = vmul.f32 %v7240_v16, %v5760_v19  ;;  %v5371_v23 = vadd.f32 %v5370_v14, %v5282_v22 }
 0x978   : > { %v7242_v57 = vpop.eup %7241  ;;  %v5762_v2 = vadd.f32 %v7240_v16, %v5761_v54  ;;  %v6894_v62 = vmul.f32 -1.442695, %v5371_v23  ;;  %v4635_v54 = vpop.permute.xlu2 %4634 }
 0x979   : > { %v7244_v25 = vpop.eup %7243  ;;  %v5518_v43 = vadd.f32 1.0, %v7242_v57 }
 0x97a   : > { %v5766_v5 = vsel %vm5765_vm8, %v7240_v16, %v5762_v2  ;;  %v5774_v24 = vmul.f32 %v7244_v25, %v5517_v45  ;;  %7245 = vpow2.f32 %v6894_v62  ;;  %vm5779_vm6 = vweird.f32 %v7244_v25  ;;  %v5199_v40 = vpop.f32.mrf.mxu3  ;;  %v5380_v29 = vpop.f32.mrf.mxu2 }
 0x97b   : > { %v5283_v52 = vpop.f32.mrf.mxu1  ;;  %v5771_v47 = vsel %vm5768_vm4, %v5770_v30, %v5766_v5  ;;  %7247 = vrcp.f32 %v5518_v43  ;;  %vm5780_vm9 = vmor %vm5778_vm15, %vm5779_vm6  ;;  %v5799_v8 = vand.u32 2147483648, %v5518_v43  ;;  %v5797_v50 = vand.u32 2147483647, %v5518_v43 }
 0x97c   : > { %6029 = vst.msk [vmem:[%s10247_s28 + $0x78] sm:$0xff] %vm6013_vm13, %v5771_v47  ;;  %v5775_v61 = vsub.f32 1.0, %v5774_v24  ;;  %v5284_v49 = vadd.f32 %v5283_v52, %v5195_v56  ;;  %vm5793_vm0 = vweird.f32 %v5518_v43  ;;  %v5200_v53 = vadd.f32 %v10460_v9, %v5199_v40 }
 0x97d   : > { %v5800_v38 = vor.u32 1.1754944e-38, %v5799_v8  ;;  %vm5798_vm14 = vcmp.eq.f32.partialorder %v5797_v50, 8.507059e+37  ;;  %v4858_v47 = vsel %vm1749_vm7, %v10169_v3, %v4635_v54 }
 0x97e   : > { %v5776_v14 = vmul.f32 %v7244_v25, %v5775_v61  ;;  %v5373_v35 = vadd.f32 %v5372_v18, %v5284_v49 }
 0x980   : > { %v7246_v32 = vpop.eup %7245  ;;  %v5777_v28 = vadd.f32 %v7244_v25, %v5776_v14  ;;  %v6895_v55 = vmul.f32 -1.442695, %v5373_v35  ;;  %v4541_v3 = vpop.permute.xlu2 %4540 }
 0x981   : > { %v7248_v6 = vpop.eup %7247  ;;  %v5519_v26 = vadd.f32 1.0, %v7246_v32 }
 0x982   : > { %v5781_v27 = vsel %vm5780_vm9, %v7244_v25, %v5777_v28  ;;  %v5789_v31 = vmul.f32 %v7248_v6, %v5518_v43  ;;  %7249 = vpow2.f32 %v6895_v55  ;;  %vm5794_vm2 = vweird.f32 %v7248_v6  ;;  %v5382_v49 = vpop.f32.mrf.mxu2 }
 0x983   : > { %v5286_v39 = vpop.f32.mrf.mxu1  ;;  %v5786_v58 = vsel %vm5783_vm10, %v5785_v20, %v5781_v27  ;;  %7251 = vrcp.f32 %v5519_v26  ;;  %vm5795_vm1 = vmor %vm5793_vm0, %vm5794_vm2  ;;  %v5814_v46 = vand.u32 2147483648, %v5519_v26  ;;  %v5812_v19 = vand.u32 2147483647, %v5519_v26 }
 0x984   : > { %6030 = vst.msk [vmem:[%s10247_s28 + $0x80] sm:$0xff] %vm6013_vm13, %v5786_v58  ;;  %v5790_v10 = vsub.f32 1.0, %v5789_v31  ;;  %v5287_v12 = vadd.f32 %v5286_v39, %v5198_v1  ;;  %vm5808_vm5 = vweird.f32 %v5519_v26 }
 0x985   : > { %v4667_v22 = vpop.permute.xlu0 %4666  ;;  %v5815_v2 = vor.u32 1.1754944e-38, %v5814_v46  ;;  %vm5813_vm4 = vcmp.eq.f32.partialorder %v5812_v19, 8.507059e+37 }
 0x986   : > { %v5791_v13 = vmul.f32 %v7248_v6, %v5790_v10  ;;  %v5376_v59 = vadd.f32 %v5375_v37, %v5287_v12  ;;  %v4891_v14 = vsel %vm1752_vm11, %v4858_v47, %v4667_v22 }
 0x988   : > { %v7250_v18 = vpop.eup %7249  ;;  %v5792_v4 = vadd.f32 %v7248_v6, %v5791_v13  ;;  %v6896_v17 = vmul.f32 -1.442695, %v5376_v59  ;;  %v4733_v13 = vsel %vm1749_vm7, %v10076_v15, %v4541_v3 }
 0x989   : > { %v7252_v44 = vpop.eup %7251  ;;  %v5520_v11 = vadd.f32 1.0, %v7250_v18 }
 0x98a   : > { %v5796_v36 = vsel %vm5795_vm1, %v7248_v6, %v5792_v4  ;;  %v5804_v48 = vmul.f32 %v7252_v44, %v5519_v26  ;;  %7253 = vpow2.f32 %v6896_v17  ;;  %vm5809_vm3 = vweird.f32 %v7252_v44 }
 0x98b   : > { %v5288_v16 = vpop.f32.mrf.mxu1  ;;  %v5801_v45 = vsel %vm5798_vm14, %v5800_v38, %v5796_v36  ;;  %7255 = vrcp.f32 %v5520_v11  ;;  %vm5810_vm8 = vmor %vm5808_vm5, %vm5809_vm3  ;;  %v5827_v61 = vand.u32 2147483647, %v5520_v11  ;;  %v5829_v42 = vand.u32 2147483648, %v5520_v11 }
 0x98c   : > { %6031 = vst.msk [vmem:[%s10247_s28 + $0x88] sm:$0xff] %vm6013_vm13, %v5801_v45  ;;  %v5805_v60 = vsub.f32 1.0, %v5804_v48  ;;  %v5289_v7 = vadd.f32 %v5288_v16, %v5200_v53  ;;  %vm5823_vm15 = vweird.f32 %v5520_v11  ;;  %v5385_v53 = vpop.f32.mrf.mxu2  ;;  %v4637_v16 = vpop.permute.xlu2 %4636 }
 0x98d   : > { %v4699_v41 = vpop.permute.xlu1 %4698  ;;  %v4573_v6 = vpop.permute.xlu0 %4572  ;;  %v5830_v26 = vor.u32 1.1754944e-38, %v5829_v42  ;;  %vm5828_vm10 = vcmp.eq.f32.partialorder %v5827_v61, 8.507059e+37 }
 0x98e   : > { %v5806_v34 = vmul.f32 %v7252_v44, %v5805_v60  ;;  %v5378_v21 = vadd.f32 %v5377_v63, %v5289_v7  ;;  %v4937_v32 = vsel %vm1755_vm12, %v4891_v14, %v4699_v41  ;;  %v4765_v4 = vsel %vm1752_vm11, %v4733_v13, %v4573_v6 }
 0x98f   : > { %5305 = vmatmul.bf16.gmra.mxu1 %v4937_v32 }
 0x990   : > { %v7254_v0 = vpop.eup %7253  ;;  %v5807_v23 = vadd.f32 %v7252_v44, %v5806_v34  ;;  %v6897_v57 = vmul.f32 -1.442695, %v5378_v21  ;;  %v5202_v25 = vpop.f32.mrf.mxu3 }
 0x991   : > { %v7256_v37 = vpop.eup %7255  ;;  %v10474_v62 = vadd.f32 1.0, %v7254_v0  ;;  %v5203_v24 = vadd.f32 %v10460_v9, %v5202_v25  ;;  %v4861_v0 = vsel %vm1749_vm7, %v10354_v33, %v4637_v16 }
 0x992   : > { %v5811_v30 = vsel %vm5810_vm8, %v7252_v44, %v5807_v23  ;;  %v5819_v56 = vmul.f32 %v7256_v37, %v5520_v11  ;;  %7257 = vpow2.f32 %v6897_v57  ;;  %vm5824_vm6 = vweird.f32 %v7256_v37 }
 0x993   : > { %v5816_v43 = vsel %vm5813_vm4, %v5815_v2, %v5811_v30  ;;  %7259 = vrcp.f32 %v10474_v62  ;;  %v5291_v52 = vpop.f32.mrf.mxu1  ;;  %vm5825_vm9 = vmor %vm5823_vm15, %vm5824_vm6  ;;  %v5844_v50 = vand.u32 2147483648, %v10474_v62  ;;  %v5842_v18 = vand.u32 2147483647, %v10474_v62 }
 0x994   : > { %6032 = vst.msk [vmem:[%s10247_s28 + $0x90] sm:$0xff] %vm6013_vm13, %v5816_v43  ;;  %v5820_v5 = vsub.f32 1.0, %v5819_v56  ;;  %v5292_v35 = vadd.f32 %v5291_v52, %v5203_v24  ;;  %vm5838_vm0 = vweird.f32 %v10474_v62 }
 0x995   : > { %v4605_v17 = vpop.permute.xlu1 %4604  ;;  %v5845_v36 = vor.u32 1.1754944e-38, %v5844_v50  ;;  %vm5843_vm14 = vcmp.eq.f32.partialorder %v5842_v18, 8.507059e+37 }
 0x996   : > { %v5821_v51 = vmul.f32 %v7256_v37, %v5820_v5  ;;  %v5381_v20 = vadd.f32 %v5380_v29, %v5292_v35  ;;  %v4812_v44 = vsel %vm1755_vm12, %v4765_v4, %v4605_v17 }
 0x997   : > { %5221 = vmatmul.bf16.gmra.mxu3 %v4812_v44 }
 0x998   : > { %v7258_v28 = vpop.eup %7257  ;;  %v5822_v55 = vadd.f32 %v7256_v37, %v5821_v51  ;;  %v5204_v63 = vpop.f32.mrf.mxu3  ;;  %v6898_v58 = vmul.f32 -1.442695, %v5381_v20 }
 0x999   : > { %v7260_v1 = vpop.eup %7259  ;;  %v10484_v39 = vadd.f32 1.0, %v7258_v28  ;;  %v5205_v40 = vadd.f32 %v10460_v9, %v5204_v63  ;;  %v4669_v46 = vpop.permute.xlu0 %4668 }
 0x99a   : > { %v5826_v27 = vsel %vm5825_vm9, %v7256_v37, %v5822_v55  ;;  %v5834_v31 = vmul.f32 %v7260_v1, %v10474_v62  ;;  %vm5839_vm2 = vweird.f32 %v7260_v1  ;;  %v4893_v62 = vsel %vm1752_vm11, %v4861_v0, %v4669_v46 }
 0x99b   : > { %v5831_v10 = vsel %vm5828_vm10, %v5830_v26, %v5826_v27  ;;  %7261 = vrcp.f32 %v10484_v39  ;;  %v5293_v12 = vpop.f32.mrf.mxu1  ;;  %vm5840_vm1 = vmor %vm5838_vm0, %vm5839_vm2  ;;  %v5857_v37 = vand.u32 2147483647, %v10484_v39  ;;  %v5859_v2 = vand.u32 2147483648, %v10484_v39 }
 0x99c   : > { %6033 = vst.msk [vmem:[%s10247_s28 + $0x98] sm:$0xff] %vm6013_vm13, %v5831_v10  ;;  %v5835_v8 = vsub.f32 1.0, %v5834_v31  ;;  %7263 = vpow2.f32 %v6898_v58  ;;  %v5294_v38 = vadd.f32 %v5293_v12, %v5205_v40  ;;  %vm5853_vm7 = vweird.f32 %v10484_v39 }
 0x99d   : > { %v4701_v30 = vpop.permute.xlu1 %4700  ;;  %v5860_v5 = vor.u32 1.1754944e-38, %v5859_v2  ;;  %vm5858_vm8 = vcmp.eq.f32.partialorder %v5857_v37, 8.507059e+37 }
 0x99e   : > { %v5836_v59 = vmul.f32 %v7260_v1, %v5835_v8  ;;  %v5383_v48 = vadd.f32 %v5382_v49, %v5294_v38  ;;  %v4940_v43 = vsel %vm1755_vm12, %v4893_v62, %v4701_v30  ;;  %v5387_v49 = vpop.f32.mrf.mxu2 }
 0x99f   : > { %5310 = vmatmul.bf16.gmra.mxu1 %v4940_v43 }
 0x9a0   : > { %v5837_v11 = vadd.f32 %v7260_v1, %v5836_v59  ;;  %v5207_v45 = vpop.f32.mrf.mxu3  ;;  %v6899_v21 = vmul.f32 -1.442695, %v5383_v48 }
 0x9a1   : > { %v7262_v15 = vpop.eup %7261  ;;  %v5208_v34 = vadd.f32 %v10460_v9, %v5207_v45 }
 0x9a2   : > { %v7264_v29 = vpop.eup %7263  ;;  %v5841_v60 = vsel %vm5840_vm1, %v7260_v1, %v5837_v11  ;;  %v5849_v7 = vmul.f32 %v7262_v15, %v10484_v39  ;;  %vm5854_vm3 = vweird.f32 %v7262_v15 }
 0x9a3   : > { %v5846_v19 = vsel %vm5843_vm14, %v5845_v36, %v5841_v60  ;;  %v5523_v22 = vadd.f32 1.0, %v7264_v29  ;;  %v5296_v54 = vpop.f32.mrf.mxu1  ;;  %vm5855_vm5 = vmor %vm5853_vm7, %vm5854_vm3 }
 0x9a4   : > { %6034 = vst.msk [vmem:[%s10247_s28 + $0xa0] sm:$0xff] %vm6013_vm13, %v5846_v19  ;;  %v5850_v23 = vsub.f32 1.0, %v5849_v7  ;;  %v5297_v57 = vadd.f32 %v5296_v54, %v5208_v34 }
 0x9a5   : > { %7265 = vrcp.f32 %v5523_v22  ;;  %v5874_v20 = vand.u32 2147483648, %v5523_v22  ;;  %v5872_v26 = vand.u32 2147483647, %v5523_v22  ;;  %vm5868_vm12 = vweird.f32 %v5523_v22 }
 0x9a6   : > { %v5851_v25 = vmul.f32 %v7262_v15, %v5850_v23  ;;  %7267 = vpow2.f32 %v6899_v21  ;;  %v5386_v56 = vadd.f32 %v5385_v53, %v5297_v57  ;;  %v5390_v40 = vpop.f32.mrf.mxu2 }
 0x9a7   : > { %v5875_v10 = vor.u32 1.1754944e-38, %v5874_v20  ;;  %vm5873_vm6 = vcmp.eq.f32.partialorder %v5872_v26, 8.507059e+37 }
 0x9a8   : > { %v5852_v52 = vadd.f32 %v7262_v15, %v5851_v25  ;;  %v6900_v33 = vmul.f32 -1.442695, %v5386_v56  ;;  %v5209_v24 = vpop.f32.mrf.mxu3 }
 0x9a9   : > { %v5210_v61 = vadd.f32 %v10460_v9, %v5209_v24 }
 0x9aa   : > { %v5856_v47 = vsel %vm5855_vm5, %v7262_v15, %v5852_v52  ;;  %7269 = vpow2.f32 %v6900_v33 }
 0x9ab   : > { %v7266_v42 = vpop.eup %7265  ;;  %v5861_v51 = vsel %vm5858_vm8, %v5860_v5, %v5856_v47  ;;  %v5298_v14 = vpop.f32.mrf.mxu1 }
 0x9ac   : > { %v7268_v41 = vpop.eup %7267  ;;  %6035 = vst.msk [vmem:[%s10247_s28 + $0xa8] sm:$0xff] %vm6013_vm13, %v5861_v51  ;;  %v5864_v35 = vmul.f32 %v7266_v42, %v5523_v22  ;;  %v5299_v32 = vadd.f32 %v5298_v14, %v5210_v61  ;;  %vm5869_vm11 = vweird.f32 %v7266_v42 }
 0x9ad   : > { %v5524_v28 = vadd.f32 1.0, %v7268_v41  ;;  %vm5870_vm4 = vmor %vm5868_vm12, %vm5869_vm11 }
 0x9ae   : > { %v5865_v55 = vsub.f32 1.0, %v5864_v35  ;;  %v5388_v6 = vadd.f32 %v5387_v49, %v5299_v32  ;;  %v5392_v23 = vpop.f32.mrf.mxu2 }
 0x9af   : > { %7271 = vrcp.f32 %v5524_v28  ;;  %v5887_v11 = vand.u32 2147483647, %v5524_v28  ;;  %v5889_v15 = vand.u32 2147483648, %v5524_v28  ;;  %vm5883_vm9 = vweird.f32 %v5524_v28 }
 0x9b0   : > { %v7270_v1 = vpop.eup %7269  ;;  %v5866_v3 = vmul.f32 %v7266_v42, %v5865_v55  ;;  %v6901_v39 = vmul.f32 -1.442695, %v5388_v6  ;;  %v5212_v27 = vpop.f32.mrf.mxu3 }
 0x9b1   : > { %v5525_v63 = vadd.f32 1.0, %v7270_v1  ;;  %v5213_v58 = vadd.f32 %v10460_v9, %v5212_v27  ;;  %vm5888_vm2 = vcmp.eq.f32.partialorder %v5887_v11, 8.507059e+37  ;;  %v5890_v34 = vor.u32 1.1754944e-38, %v5889_v15 }
 0x9b2   : > { %v5867_v31 = vadd.f32 %v7266_v42, %v5866_v3  ;;  %7273 = vpow2.f32 %v6901_v39 }
 0x9b3   : > { %7275 = vrcp.f32 %v5525_v63  ;;  %v5301_v12 = vpop.f32.mrf.mxu1  ;;  %v5902_v19 = vand.u32 2147483647, %v5525_v63  ;;  %v5904_v22 = vand.u32 2147483648, %v5525_v63  ;;  %vm5898_vm1 = vweird.f32 %v5525_v63 }
 0x9b4   : > { %v5871_v8 = vsel %vm5870_vm4, %v7266_v42, %v5867_v31  ;;  %v5302_v13 = vadd.f32 %v5301_v12, %v5213_v58 }
 0x9b5   : > { %v7272_v50 = vpop.eup %7271  ;;  %v5876_v59 = vsel %vm5873_vm6, %v5875_v10, %v5871_v8  ;;  %v5905_v30 = vor.u32 1.1754944e-38, %v5904_v22  ;;  %vm5903_vm3 = vcmp.eq.f32.partialorder %v5902_v19, 8.507059e+37 }
 0x9b6   : > { %6036 = vst.msk [vmem:[%s10247_s28 + $0xb0] sm:$0xff] %vm6013_vm13, %v5876_v59  ;;  %v5879_v18 = vmul.f32 %v7272_v50, %v5524_v28  ;;  %v5391_v4 = vadd.f32 %v5390_v40, %v5302_v13  ;;  %vm5884_vm15 = vweird.f32 %v7272_v50 }
 0x9b7   : > { %vm5885_vm10 = vmor %vm5883_vm9, %vm5884_vm15 }
 0x9b8   : > { %v7274_v17 = vpop.eup %7273  ;;  %v5880_v44 = vsub.f32 1.0, %v5879_v18  ;;  %v6902_v38 = vmul.f32 -1.442695, %v5391_v4  ;;  %v5214_v36 = vpop.f32.mrf.mxu3 }
 0x9b9   : > { %v7276_v53 = vpop.eup %7275  ;;  %v5526_v16 = vadd.f32 1.0, %v7274_v17  ;;  %v5215_v46 = vadd.f32 %v10460_v9, %v5214_v36  ;;  %v5395_v17 = vpop.f32.mrf.mxu2 }
 0x9ba   : > { %v5881_v48 = vmul.f32 %v7272_v50, %v5880_v44  ;;  %v5894_v45 = vmul.f32 %v7276_v53, %v5525_v63  ;;  %7277 = vpow2.f32 %v6902_v38  ;;  %vm5899_vm0 = vweird.f32 %v7276_v53 }
 0x9bb   : > { %7279 = vrcp.f32 %v5526_v16  ;;  %v5303_v29 = vpop.f32.mrf.mxu1  ;;  %vm5900_vm14 = vmor %vm5898_vm1, %vm5899_vm0  ;;  %v5919_v47 = vand.u32 2147483648, %v5526_v16  ;;  %v5917_v42 = vand.u32 2147483647, %v5526_v16  ;;  %vm5913_vm5 = vweird.f32 %v5526_v16 }
 0x9bc   : > { %v5882_v60 = vadd.f32 %v7272_v50, %v5881_v48  ;;  %v5895_v7 = vsub.f32 1.0, %v5894_v45  ;;  %v5304_v0 = vadd.f32 %v5303_v29, %v5215_v46 }
 0x9bd   : > { %v5920_v14 = vor.u32 1.1754944e-38, %v5919_v47  ;;  %vm5918_vm11 = vcmp.eq.f32.partialorder %v5917_v42, 8.507059e+37 }
 0x9be   : > { %v5886_v21 = vsel %vm5885_vm10, %v7272_v50, %v5882_v60  ;;  %v5896_v54 = vmul.f32 %v7276_v53, %v5895_v7  ;;  %v5393_v62 = vadd.f32 %v5392_v23, %v5304_v0 }
 0x9bf   : > { %v5891_v57 = vsel %vm5888_vm2, %v5890_v34, %v5886_v21 }
 0x9c0   : > { %v7278_v37 = vpop.eup %7277  ;;  %6037 = vst.msk [vmem:[%s10247_s28 + $0xb8] sm:$0xff] %vm6013_vm13, %v5891_v57  ;;  %v5897_v2 = vadd.f32 %v7276_v53, %v5896_v54  ;;  %v6903_v33 = vmul.f32 -1.442695, %v5393_v62  ;;  %v5217_v4 = vpop.f32.mrf.mxu3 }
 0x9c1   : > { %v7280_v25 = vpop.eup %7279  ;;  %v5527_v56 = vadd.f32 1.0, %v7278_v37  ;;  %v5218_v44 = vadd.f32 %v10460_v9, %v5217_v4  ;;  %v5397_v48 = vpop.f32.mrf.mxu2 }
 0x9c2   : > { %v5901_v43 = vsel %vm5900_vm14, %v7276_v53, %v5897_v2  ;;  %v5909_v52 = vmul.f32 %v7280_v25, %v5526_v16  ;;  %vm5914_vm7 = vweird.f32 %v7280_v25 }
 0x9c3   : > { %v5906_v5 = vsel %vm5903_vm3, %v5905_v30, %v5901_v43  ;;  %7281 = vrcp.f32 %v5527_v56  ;;  %vm5915_vm8 = vmor %vm5913_vm5, %vm5914_vm7  ;;  %v5934_v20 = vand.u32 2147483648, %v5527_v56  ;;  %v5932_v3 = vand.u32 2147483647, %v5527_v56 }
 0x9c4   : > { %6038 = vst.msk [vmem:[%s10247_s28 + $0xc0] sm:$0xff] %vm6013_vm13, %v5906_v5  ;;  %v5910_v24 = vsub.f32 1.0, %v5909_v52  ;;  %7283 = vpow2.f32 %v6903_v33  ;;  %vm5928_vm4 = vweird.f32 %v5527_v56 }
 0x9c5   : > { %v5935_v39 = vor.u32 1.1754944e-38, %v5934_v20  ;;  %vm5933_vm15 = vcmp.eq.f32.partialorder %v5932_v3, 8.507059e+37 }
 0x9c6   : > { %v5911_v61 = vmul.f32 %v7280_v25, %v5910_v24 }
 0x9c8   : > { %v5912_v49 = vadd.f32 %v7280_v25, %v5911_v61  ;;  %v5219_v15 = vpop.f32.mrf.mxu3 }
 0x9c9   : > { %v7282_v51 = vpop.eup %7281  ;;  %v5220_v36 = vadd.f32 %v10460_v9, %v5219_v15  ;;  %v5400_v21 = vpop.f32.mrf.mxu2 }
 0x9ca   : > { %v7284_v41 = vpop.eup %7283  ;;  %v5916_v35 = vsel %vm5915_vm8, %v7280_v25, %v5912_v49  ;;  %v5924_v32 = vmul.f32 %v7282_v51, %v5527_v56  ;;  %vm5929_vm12 = vweird.f32 %v7282_v51 }
 0x9cb   : > { %v5921_v28 = vsel %vm5918_vm11, %v5920_v14, %v5916_v35  ;;  %v5528_v55 = vadd.f32 1.0, %v7284_v41  ;;  %vm5930_vm6 = vmor %vm5928_vm4, %vm5929_vm12 }
 0x9cc   : > { %6039 = vst.msk [vmem:[%s10247_s28 + $0xc8] sm:$0xff] %vm6013_vm13, %v5921_v28  ;;  %v5925_v6 = vsub.f32 1.0, %v5924_v32 }
 0x9cd   : > { %7285 = vrcp.f32 %v5528_v55  ;;  %v5949_v12 = vand.u32 2147483648, %v5528_v55  ;;  %v5947_v13 = vand.u32 2147483647, %v5528_v55  ;;  %vm5943_vm10 = vweird.f32 %v5528_v55 }
 0x9ce   : > { %v5926_v1 = vmul.f32 %v7282_v51, %v5925_v6 }
 0x9cf   : > { %v5950_v40 = vor.u32 1.1754944e-38, %v5949_v12  ;;  %vm5948_vm0 = vcmp.eq.f32.partialorder %v5947_v13, 8.507059e+37 }
 0x9d0   : > { %v5927_v26 = vadd.f32 %v7282_v51, %v5926_v1 }
 0x9d1   : > { %v5402_v24 = vpop.f32.mrf.mxu2 }
 0x9d2   : > { %v5931_v63 = vsel %vm5930_vm6, %v7282_v51, %v5927_v26 }
 0x9d3   : > { %v7286_v27 = vpop.eup %7285  ;;  %v5936_v31 = vsel %vm5933_vm15, %v5935_v39, %v5931_v63 }
 0x9d4   : > { %6040 = vst.msk [vmem:[%s10247_s28 + $0xd0] sm:$0xff] %vm6013_vm13, %v5936_v31  ;;  %v5939_v58 = vmul.f32 %v7286_v27, %v5528_v55  ;;  %vm5944_vm9 = vweird.f32 %v7286_v27 }
 0x9d5   : > { %vm5945_vm2 = vmor %vm5943_vm10, %vm5944_vm9 }
 0x9d6   : > { %v5940_v10 = vsub.f32 1.0, %v5939_v58 }
 0x9d8   : > { %v5941_v8 = vmul.f32 %v7286_v27, %v5940_v10 }
 0x9da   : > { %v5942_v50 = vadd.f32 %v7286_v27, %v5941_v8 }
 0x9dc   : > { %v5946_v59 = vsel %vm5945_vm2, %v7286_v27, %v5942_v50 }
 0x9dd   : > { %v5951_v18 = vsel %vm5948_vm0, %v5950_v40, %v5946_v59 }
 0x9de   : > { %6041 = vst.msk [vmem:[%s10247_s28 + $0xd8] sm:$0xff] %vm6013_vm13, %v5951_v18 }
 0xa0c   : > { %v5306_v38 = vpop.f32.mrf.mxu1 }
 0xa0d   : > { %v5307_v53 = vadd.f32 %v5306_v38, %v5218_v44 }
 0xa0f   : > { %v5396_v11 = vadd.f32 %v5395_v17, %v5307_v53 }
 0xa11   : > { %v6904_v16 = vmul.f32 -1.442695, %v5396_v11 }
 0xa13   : > { %7287 = vpow2.f32 %v6904_v16 }
 0xa14   : > { %v5308_v45 = vpop.f32.mrf.mxu1 }
 0xa15   : > { %v5309_v29 = vadd.f32 %v5308_v45, %v5220_v36 }
 0xa17   : > { %v5398_v60 = vadd.f32 %v5397_v48, %v5309_v29 }
 0xa19   : > { %v7288_v7 = vpop.eup %7287  ;;  %v6905_v46 = vmul.f32 -1.442695, %v5398_v60 }
 0xa1a   : > { %v5529_v34 = vadd.f32 1.0, %v7288_v7  ;;  %v5222_v19 = vpop.f32.mrf.mxu3 }
 0xa1b   : > { %7289 = vpow2.f32 %v6905_v46  ;;  %v5223_v22 = vadd.f32 %v10460_v9, %v5222_v19 }
 0xa1c   : > { %7291 = vrcp.f32 %v5529_v34  ;;  %v5311_v54 = vpop.f32.mrf.mxu1  ;;  %v5964_v5 = vand.u32 2147483648, %v5529_v34  ;;  %v5962_v61 = vand.u32 2147483647, %v5529_v34  ;;  %vm5958_vm14 = vweird.f32 %v5529_v34 }
 0xa1d   : > { %v5312_v0 = vadd.f32 %v5311_v54, %v5223_v22 }
 0xa1e   : > { %v5965_v35 = vor.u32 1.1754944e-38, %v5964_v5  ;;  %vm5963_vm7 = vcmp.eq.f32.partialorder %v5962_v61, 8.507059e+37 }
 0xa1f   : > { %v5401_v23 = vadd.f32 %v5400_v21, %v5312_v0 }
 0xa21   : > { %v7290_v57 = vpop.eup %7289  ;;  %v6906_v37 = vmul.f32 -1.442695, %v5401_v23 }
 0xa22   : > { %v7292_v2 = vpop.eup %7291  ;;  %v5530_v62 = vadd.f32 1.0, %v7290_v57  ;;  %v5224_v25 = vpop.f32.mrf.mxu3 }
 0xa23   : > { %v5954_v30 = vmul.f32 %v7292_v2, %v5529_v34  ;;  %7293 = vpow2.f32 %v6906_v37  ;;  %v5225_v56 = vadd.f32 %v10460_v9, %v5224_v25  ;;  %vm5959_vm1 = vweird.f32 %v7292_v2 }
 0xa24   : > { %7295 = vrcp.f32 %v5530_v62  ;;  %v5313_v43 = vpop.f32.mrf.mxu1  ;;  %vm5960_vm3 = vmor %vm5958_vm14, %vm5959_vm1  ;;  %v5979_v20 = vand.u32 2147483648, %v5530_v62  ;;  %v5977_v3 = vand.u32 2147483647, %v5530_v62  ;;  %vm5973_vm8 = vweird.f32 %v5530_v62 }
 0xa25   : > { %v5955_v52 = vsub.f32 1.0, %v5954_v30  ;;  %v5314_v33 = vadd.f32 %v5313_v43, %v5225_v56 }
 0xa26   : > { %v5980_v27 = vor.u32 1.1754944e-38, %v5979_v20  ;;  %vm5978_vm12 = vcmp.eq.f32.partialorder %v5977_v3, 8.507059e+37 }
 0xa27   : > { %v5956_v47 = vmul.f32 %v7292_v2, %v5955_v52  ;;  %v5403_v42 = vadd.f32 %v5402_v24, %v5314_v33 }
 0xa29   : > { %v7294_v49 = vpop.eup %7293  ;;  %v5957_v51 = vadd.f32 %v7292_v2, %v5956_v47  ;;  %v6907_v14 = vmul.f32 -1.442695, %v5403_v42 }
 0xa2a   : > { %v7296_v41 = vpop.eup %7295  ;;  %v5531_v32 = vadd.f32 1.0, %v7294_v49 }
 0xa2b   : > { %v5961_v9 = vsel %vm5960_vm3, %v7292_v2, %v5957_v51  ;;  %v5969_v28 = vmul.f32 %v7296_v41, %v5530_v62  ;;  %7297 = vpow2.f32 %v6907_v14  ;;  %vm5974_vm5 = vweird.f32 %v7296_v41 }
 0xa2c   : > { %v5966_v55 = vsel %vm5963_vm7, %v5965_v35, %v5961_v9  ;;  %7299 = vrcp.f32 %v5531_v32  ;;  %vm5975_vm11 = vmor %vm5973_vm8, %vm5974_vm5  ;;  %v5994_v13 = vand.u32 2147483648, %v5531_v32  ;;  %v5992_v40 = vand.u32 2147483647, %v5531_v32 }
 0xa2d   : > { %6042 = vst.msk [vmem:[%s10247_s28 + $0xe0] sm:$0xff] %vm6013_vm13, %v5966_v55  ;;  %v5970_v6 = vsub.f32 1.0, %v5969_v28  ;;  %vm5988_vm6 = vweird.f32 %v5531_v32 }
 0xa2e   : > { %v5995_v4 = vor.u32 1.1754944e-38, %v5994_v13  ;;  %vm5993_vm9 = vcmp.eq.f32.partialorder %v5992_v40, 8.507059e+37 }
 0xa2f   : > { %v5971_v1 = vmul.f32 %v7296_v41, %v5970_v6 }
 0xa31   : > { %v7298_v26 = vpop.eup %7297  ;;  %v5972_v39 = vadd.f32 %v7296_v41, %v5971_v1 }
 0xa32   : > { %v7300_v63 = vpop.eup %7299  ;;  %v5532_v31 = vadd.f32 1.0, %v7298_v26 }
 0xa33   : > { %v5976_v58 = vsel %vm5975_vm11, %v7296_v41, %v5972_v39  ;;  %v5984_v10 = vmul.f32 %v7300_v63, %v5531_v32  ;;  %vm5989_vm4 = vweird.f32 %v7300_v63 }
 0xa34   : > { %v5981_v12 = vsel %vm5978_vm12, %v5980_v27, %v5976_v58  ;;  %7301 = vrcp.f32 %v5532_v31  ;;  %vm5990_vm15 = vmor %vm5988_vm6, %vm5989_vm4  ;;  %v6009_v11 = vand.u32 2147483648, %v5532_v31  ;;  %v6007_v16 = vand.u32 2147483647, %v5532_v31 }
 0xa35   : > { %6043 = vst.msk [vmem:[%s10247_s28 + $0xe8] sm:$0xff] %vm6013_vm13, %v5981_v12  ;;  %v5985_v8 = vsub.f32 1.0, %v5984_v10  ;;  %vm6003_vm2 = vweird.f32 %v5532_v31 }
 0xa36   : > { %v6010_v48 = vor.u32 1.1754944e-38, %v6009_v11  ;;  %vm6008_vm1 = vcmp.eq.f32.partialorder %v6007_v16, 8.507059e+37 }
 0xa37   : > { %v5986_v50 = vmul.f32 %v7300_v63, %v5985_v8 }
 0xa39   : > { %v5987_v59 = vadd.f32 %v7300_v63, %v5986_v50 }
 0xa3a   : > { %v7302_v18 = vpop.eup %7301 }
 0xa3b   : > { %v5991_v17 = vsel %vm5990_vm15, %v7300_v63, %v5987_v59  ;;  %v5999_v44 = vmul.f32 %v7302_v18, %v5532_v31  ;;  %vm6004_vm10 = vweird.f32 %v7302_v18 }
 0xa3c   : > { %v5996_v38 = vsel %vm5993_vm9, %v5995_v4, %v5991_v17  ;;  %vm6005_vm0 = vmor %vm6003_vm2, %vm6004_vm10 }
 0xa3d   : > { %6044 = vst.msk [vmem:[%s10247_s28 + $0xf0] sm:$0xff] %vm6013_vm13, %v5996_v38  ;;  %v6000_v53 = vsub.f32 1.0, %v5999_v44 }
 0xa3f   : > { %v6001_v15 = vmul.f32 %v7302_v18, %v6000_v53 }
 0xa41   : > { %v6002_v36 = vadd.f32 %v7302_v18, %v6001_v15 }
 0xa43   : > { %v6006_v45 = vsel %vm6005_vm0, %v7302_v18, %v6002_v36 }
 0xa44   : > { %v6011_v29 = vsel %vm6008_vm1, %v6010_v48, %v6006_v45 }
 0xa45   : > { %6045 = vst.msk [vmem:[%s10247_s28 + $0xf8] sm:$0xff] %vm6013_vm13, %v6011_v29 }
 0xa46 PF: > { %s28_s25 = sadd.s32 1, %s7570_s25  }
 0xa47   : > { %p25_p7 = scmp.ge.s32.totalorder %s28_s25, 4  }
 0xa49   :  { %27 = sbr.rel (!%p25_p7) target bundleno = 9 (0x9), region = 170 }
 0xa4e   :  { %6067 = vsyncpa [#allocation3], 1 }
 0xa4f   :  { %6069 = vsyncpa [#allocation3 + $0x1], 1 }
 0xa50   :  { %6070 = vsyncpa [#allocation5], 1 }
 0xa51   :  { %6071 = vsyncpa [#allocation8], 1 }
 0xa52   :  { %6072 = vsyncpa [#allocation11], 1 }
 0xa53   :  { %6073 = vsyncpa [#allocation14], 1 }

</bundles_post_ra>
